<compile_context>
chip_gen: v5e
topology: v5e:2x2
jax: 0.10.0
libtpu: 0.0.40
codegen_flags: <defaults>
</compile_context>

<pallas_src>
import functools

import jax
import jax.numpy as jnp
from jax.experimental import pallas as pl
from jax.experimental.pallas import tpu as pltpu


_LANE = 128
# Leave headroom below v7x's 64 MiB physical VMEM (also fine on v5e/v6e).
_VMEM_LIMIT = 48 * 1024 * 1024
_M_TILES = (512, 256, 128, 64, 32, 16, 8)


# ---------------------------------------------------------------------------
# Helpers
# ---------------------------------------------------------------------------
def _mish(y):
    """torch.nn.Mish in f32: y * tanh(softplus(y)), softplus threshold 20.

    tanh(log(1 + t)) == ((1+t)^2 - 1) / ((1+t)^2 + 1), so one EUP exp and one
    approx reciprocal replace exp + log1p + tanh.
    """
    t = jnp.exp(jnp.minimum(y, 20.0))
    u2 = (1.0 + t) * (1.0 + t)
    return y * (u2 - 1.0) * pl.reciprocal(u2 + 1.0, approx=True)


def _round_up(x, m):
    return (x + m - 1) // m * m


def _pick_m_tile(M):
    """Largest preferred M tile dividing M, preferring >=2 tiles (megacore)."""
    for t in _M_TILES:
        if M % t == 0 and M // t >= 2:
            return t
    for t in _M_TILES:
        if M % t == 0:
            return t
    return M


def _pick_row_tile(H, W):
    """Largest divisor of H with ~<=2048 output rows per step and >=2 tiles."""
    best = 1
    for th in range(1, H + 1):
        if H % th == 0 and th * W <= 2048 and (H // th >= 2 or best == 1):
            best = th
    return best


# ---------------------------------------------------------------------------
# Kernel A: head = in_conv1 + in_conv2 + rcsp.in_conv (split-K, no concat)
# ---------------------------------------------------------------------------
def _head_kernel(x1_ref, x2_ref, w1_ref, s1_ref, b1_ref, w2_ref, s2_ref,
                 b2_ref, wh2_ref, wh1_ref, si_ref, bi_ref, o_ref):
    h1 = _mish(jnp.dot(x1_ref[...], w1_ref[...],
                       preferred_element_type=jnp.float32)
               * s1_ref[...] + b1_ref[...]).astype(jnp.bfloat16)
    h2 = _mish(jnp.dot(x2_ref[...], w2_ref[...],
                       preferred_element_type=jnp.float32)
               * s2_ref[...] + b2_ref[...]).astype(jnp.bfloat16)
    # rcsp.in_conv over cat([h2, h1]) -> dual matmul over the split K halves.
    acc = jnp.dot(h2, wh2_ref[...], preferred_element_type=jnp.float32)
    acc = acc + jnp.dot(h1, wh1_ref[...], preferred_element_type=jnp.float32)
    o_ref[...] = _mish(acc * si_ref[...] + bi_ref[...]).astype(o_ref.dtype)


def _head(x1f, x2f, p):
    M, c1 = x1f.shape
    c2 = x2f.shape[1]
    P = p["in1_w"].shape[1]
    tm = _pick_m_tile(M)

    def const(arr):
        n = arr.ndim
        return pl.BlockSpec(arr.shape, lambda i: (0,) * n)

    weights = (p["in1_w"], p["in1_s"], p["in1_b"],
               p["in2_w"], p["in2_s"], p["in2_b"],
               p["rin_w_h2"], p["rin_w_h1"], p["rin_s"], p["rin_b"])
    return pl.pallas_call(
        _head_kernel,
        out_shape=jax.ShapeDtypeStruct((M, P), jnp.bfloat16),
        grid=(M // tm,),
        in_specs=[pl.BlockSpec((tm, c1), lambda i: (i, 0)),
                  pl.BlockSpec((tm, c2), lambda i: (i, 0))]
                 + [const(w) for w in weights],
        out_specs=pl.BlockSpec((tm, P), lambda i: (i, 0)),
        compiler_params=pltpu.CompilerParams(
            dimension_semantics=("parallel",),
            vmem_limit_bytes=_VMEM_LIMIT),
        cost_estimate=pl.CostEstimate(
            flops=2 * M * P * (c1 + c2 + 2 * P),
            transcendentals=3 * M * P,
            bytes_accessed=2 * M * (c1 + c2 + P)),
    )(x1f, x2f, *weights)


# ---------------------------------------------------------------------------
# Kernel B: one depth stage = 1x1 ConvBnAct (prologue) + 3x3 ConvBnAct,
#   row-tiled with a 1-row halo; last stage fuses cat-BN (main half) + Mish.
# ---------------------------------------------------------------------------
def _stage_kernel(xc_ref, xt_ref, xb_ref, w1_ref, s1_ref, b1_ref, w3_ref,
                  s3_ref, b3_ref, sc_ref, bc_ref, o_ref, win_ref, *,
                  fuse_cat):
    th, W, Cin = xc_ref.shape[1], xc_ref.shape[2], xc_ref.shape[3]
    Cmid = w1_ref.shape[1]
    Cout = w3_ref.shape[2]
    i = pl.program_id(1)
    n_row_tiles = pl.num_programs(1)

    w1 = w1_ref[...]
    s1 = s1_ref[...]
    b1 = b1_ref[...]

    def band(x_rows, gate):
        # 1x1 ConvBnAct prologue on (r, W, Cin), then assemble the
        # [x-1 | x | x+1] lane bands consumed by the 3x3 matmuls.  `gate`
        # zeroes halo rows that fall outside the image (3x3 zero padding).
        r = x_rows.shape[0]
        h = _mish(jnp.dot(x_rows.reshape(r * W, Cin), w1,
                          preferred_element_type=jnp.float32) * s1 + b1)
        h = h.reshape(r, W, Cmid)
        if gate is not None:
            h = h * gate
        z = jnp.zeros((r, 1, Cmid), jnp.float32)
        left = jnp.concatenate([z, h[:, :W - 1, :]], axis=1)   # h[:, x-1]
        right = jnp.concatenate([h[:, 1:, :], z], axis=1)      # h[:, x+1]
        return jnp.concatenate([left, h, right], axis=2).astype(win_ref.dtype)

    win_ref[pl.ds(1, th)] = band(xc_ref[0], None)
    win_ref[pl.ds(0, 1)] = band(xt_ref[0], (i > 0).astype(jnp.float32))
    win_ref[pl.ds(th + 1, 1)] = band(
        xb_ref[0], (i < n_row_tiles - 1).astype(jnp.float32))

    # 3x3 conv = 3 matmuls with K = 3*Cmid; the dy shift is a major-dim slice.
    acc = jnp.zeros((th * W, Cout), jnp.float32)
    for dy in range(3):
        a = win_ref[pl.ds(dy, th)].reshape(th * W, 3 * Cmid)
        acc = acc + jnp.dot(a, w3_ref[dy], preferred_element_type=jnp.float32)

    y = _mish(acc * s3_ref[...] + b3_ref[...])
    if fuse_cat:                       # ReversedCSP cat-BN (main half) + Mish
        y = _mish(y * sc_ref[...] + bc_ref[...])
    o_ref[0] = y.reshape(th, W, Cout).astype(o_ref.dtype)


def _stage(x_img, st, cat_s, cat_b, *, fuse_cat, th):
    B, H, W, Cin = x_img.shape
    P = st["w1"].shape[1]
    Cout = st["w3"].shape[2]
    n_rows = H // th
    kern = functools.partial(_stage_kernel, fuse_cat=fuse_cat)

    def const(arr):
        n = arr.ndim
        return pl.BlockSpec(arr.shape, lambda b, i: (0,) * n)

    return pl.pallas_call(
        kern,
        out_shape=jax.ShapeDtypeStruct((B, H, W, Cout), jnp.bfloat16),
        grid=(B, n_rows),
        in_specs=[
            # row tile + its two 1-row halos.  H block size 1 => block index
            # is the row index; clamped at image borders, gated in-kernel.
            pl.BlockSpec((1, th, W, Cin), lambda b, i: (b, i, 0, 0)),
            pl.BlockSpec((1, 1, W, Cin),
                         lambda b, i: (b, jnp.maximum(i * th - 1, 0), 0, 0)),
            pl.BlockSpec((1, 1, W, Cin),
                         lambda b, i: (b, jnp.minimum(i * th + th, H - 1),
                                       0, 0)),
            const(st["w1"]), const(st["s1"]), const(st["b1"]),
            const(st["w3"]), const(st["s3"]), const(st["b3"]),
            const(cat_s), const(cat_b),
        ],
        out_specs=pl.BlockSpec((1, th, W, Cout), lambda b, i: (b, i, 0, 0)),
        scratch_shapes=[pltpu.VMEM((th + 2, W, 3 * P), jnp.bfloat16)],
        compiler_params=pltpu.CompilerParams(
            dimension_semantics=("parallel", "parallel"),
            vmem_limit_bytes=_VMEM_LIMIT),
        cost_estimate=pl.CostEstimate(
            flops=2 * B * H * W * P * (Cin + 9 * P),
            transcendentals=2 * B * H * W * (P + Cout),
            bytes_accessed=2 * B * H * W * (Cin + Cout)),
    )(x_img, x_img, x_img, st["w1"], st["s1"], st["b1"],
      st["w3"], st["s3"], st["b3"], cat_s, cat_b)


# ---------------------------------------------------------------------------
# Kernel C: tail = bypass conv + cat-BN (bypass half) + Mish + out_conv
# ---------------------------------------------------------------------------
def _tail_kernel(h1_ref, x_ref, wb_ref, scb_ref, bcb_ref, scm_ref, bcm_ref,
                 wom_ref, wob_ref, so_ref, bo_ref, o_ref, *, apply_cat_main):
    hb = _mish(jnp.dot(x_ref[...], wb_ref[...],
                       preferred_element_type=jnp.float32)
               * scb_ref[...] + bcb_ref[...]).astype(jnp.bfloat16)
    if apply_cat_main:        # depth == 0: main branch is identity -> cat-BN
        hm = _mish(h1_ref[...].astype(jnp.float32) * scm_ref[...]
                   + bcm_ref[...]).astype(jnp.bfloat16)
    else:                     # cat-BN main half already fused into last 3x3
        hm = h1_ref[...]
    acc = jnp.dot(hm, wom_ref[...], preferred_element_type=jnp.float32)
    acc = acc + jnp.dot(hb, wob_ref[...], preferred_element_type=jnp.float32)
    o_ref[...] = _mish(acc * so_ref[...] + bo_ref[...]).astype(o_ref.dtype)


def _tail(h1m, x, p, *, apply_cat_main):
    M, P = x.shape
    tm = _pick_m_tile(M)

    def const(arr):
        n = arr.ndim
        return pl.BlockSpec(arr.shape, lambda i: (0,) * n)

    weights = (p["byp_w"], p["catb_s"], p["catb_b"], p["catm_s"], p["catm_b"],
               p["out_w_main"], p["out_w_byp"], p["out_s"], p["out_b"])
    kern = functools.partial(_tail_kernel, apply_cat_main=apply_cat_main)
    return pl.pallas_call(
        kern,
        out_shape=jax.ShapeDtypeStruct((M, P), jnp.float32),
        grid=(M // tm,),
        in_specs=[pl.BlockSpec((tm, P), lambda i: (i, 0)),
                  pl.BlockSpec((tm, P), lambda i: (i, 0))]
                 + [const(w) for w in weights],
        out_specs=pl.BlockSpec((tm, P), lambda i: (i, 0)),
        compiler_params=pltpu.CompilerParams(
            dimension_semantics=("parallel",),
            vmem_limit_bytes=_VMEM_LIMIT),
        cost_estimate=pl.CostEstimate(
            flops=6 * M * P * P, transcendentals=3 * M * P,
            bytes_accessed=8 * M * P),
    )(h1m, x, *weights)


# ---------------------------------------------------------------------------
# Deterministic synthetic parameters (shapes mirror the PyTorch module).
# BatchNorm is in inference form (running stats + conv bias folded into a
# per-channel scale/bias).  Weights bf16, scales/biases f32, channel dims
# zero-padded to a multiple of 128.
# ---------------------------------------------------------------------------
def _fold_bn(gamma, beta, mean, var, conv_bias, eps):
    scale = gamma / jnp.sqrt(var + eps)
    bias = beta + scale * (conv_bias - mean)
    return scale.astype(jnp.float32), bias.astype(jnp.float32)


def _pad2(mat, rows, cols):
    out = jnp.zeros((rows, cols), mat.dtype)
    return out.at[:mat.shape[0], :mat.shape[1]].set(mat)


def _pad_vec(v, n):
    out = jnp.zeros((1, n), v.dtype)
    return out.at[0, :v.shape[0]].set(v)


def _make_cba_raw(key, cin, cout, ksize, eps=1e-5):
    ks = jax.random.split(key, 6)
    w = 0.1 * jax.random.normal(ks[0], (cout, cin, ksize, ksize), jnp.float32)
    b = 0.1 * jax.random.normal(ks[1], (cout,), jnp.float32)
    gamma = 1.0 + 0.1 * jax.random.normal(ks[2], (cout,), jnp.float32)
    beta = 0.1 * jax.random.normal(ks[3], (cout,), jnp.float32)
    mean = 0.1 * jax.random.normal(ks[4], (cout,), jnp.float32)
    var = jnp.abs(1.0 + 0.1 * jax.random.normal(ks[5], (cout,), jnp.float32))
    scale, bias = _fold_bn(gamma, beta, mean, var, b, eps)
    return w, scale, bias


def make_params(key, in_channels, out_channels, depth):
    c1, c2 = in_channels
    co = out_channels
    P = _round_up(co, _LANE)            # lane-dense padded channel count
    keys = jax.random.split(key, 8 + 2 * depth)
    p = {"co": co, "P": P}

    def pad_1x1(w, s, b, cin):
        wm = w[:, :, 0, 0].T                                  # (cin, cout)
        return (_pad2(wm, cin, P).astype(jnp.bfloat16),
                _pad_vec(s, P), _pad_vec(b, P))

    # in_conv1 / in_conv2 (1x1 Conv+BN+Mish)
    w, s, b = _make_cba_raw(keys[0], c1, co, 1)
    p["in1_w"], p["in1_s"], p["in1_b"] = pad_1x1(w, s, b, c1)
    w, s, b = _make_cba_raw(keys[1], c2, co, 1)
    p["in2_w"], p["in2_s"], p["in2_b"] = pad_1x1(w, s, b, c2)

    # rcsp.in_conv: 1x1 over cat([h2, h1]) -> split the K dim into two halves
    w, s, b = _make_cba_raw(keys[2], 2 * co, co, 1)
    wm = w[:, :, 0, 0].T                                      # (2co, co)
    p["rin_w_h2"] = _pad2(wm[:co], P, P).astype(jnp.bfloat16)
    p["rin_w_h1"] = _pad2(wm[co:], P, P).astype(jnp.bfloat16)
    p["rin_s"], p["rin_b"] = _pad_vec(s, P), _pad_vec(b, P)

    # main stages: depth x [ConvBnAct(1x1), ConvBnAct(3x3)]
    stages = []
    for d in range(depth):
        w1, s1, b1 = _make_cba_raw(keys[3 + 2 * d], co, co, 1)
        w3, s3, b3 = _make_cba_raw(keys[4 + 2 * d], co, co, 3)
        w1m = _pad2(w1[:, :, 0, 0].T, P, P).astype(jnp.bfloat16)
        w3t = jnp.transpose(w3, (2, 3, 1, 0))                 # (3,3,cin,cout)
        bands = []
        for ky in range(3):             # per dy: [W[dy,0]; W[dy,1]; W[dy,2]]
            rows = [_pad2(w3t[ky, kx], P, P) for kx in range(3)]
            bands.append(jnp.concatenate(rows, axis=0))       # (3P, P)
        w3s = jnp.stack(bands, axis=0).astype(jnp.bfloat16)   # (3, 3P, P)
        stages.append(dict(w1=w1m, s1=_pad_vec(s1, P), b1=_pad_vec(b1, P),
                           w3=w3s, s3=_pad_vec(s3, P), b3=_pad_vec(b3, P)))
    p["main"] = stages

    kbase = 3 + 2 * depth
    # bypass_conv: Conv2d(co, co, 1, bias=False)
    wb = 0.1 * jax.random.normal(keys[kbase], (co, co, 1, 1), jnp.float32)
    p["byp_w"] = _pad2(wb[:, :, 0, 0].T, P, P).astype(jnp.bfloat16)

    # bn on cat([h1, h2]): BatchNorm2d(2*co, eps=1e-3), split per half
    ks = jax.random.split(keys[kbase + 1], 4)
    gamma = 1.0 + 0.1 * jax.random.normal(ks[0], (2 * co,), jnp.float32)
    beta = 0.1 * jax.random.normal(ks[1], (2 * co,), jnp.float32)
    mean = 0.1 * jax.random.normal(ks[2], (2 * co,), jnp.float32)
    var = jnp.abs(1.0 + 0.1 * jax.random.normal(ks[3], (2 * co,), jnp.float32))
    s_cat, b_cat = _fold_bn(gamma, beta, mean, var,
                            jnp.zeros((2 * co,), jnp.float32), 1e-3)
    p["catm_s"], p["catm_b"] = _pad_vec(s_cat[:co], P), _pad_vec(b_cat[:co], P)
    p["catb_s"], p["catb_b"] = _pad_vec(s_cat[co:], P), _pad_vec(b_cat[co:], P)

    # out_conv: ConvBnAct(2*co, co, 1) over cat([h1_main, h2_bypass])
    w, s, b = _make_cba_raw(keys[kbase + 2], 2 * co, co, 1)
    wm = w[:, :, 0, 0].T
    p["out_w_main"] = _pad2(wm[:co], P, P).astype(jnp.bfloat16)
    p["out_w_byp"] = _pad2(wm[co:], P, P).astype(jnp.bfloat16)
    p["out_s"], p["out_b"] = _pad_vec(s, P), _pad_vec(b, P)
    return p


# ---------------------------------------------------------------------------
# Forward pass: CSPPlainBlock(x1, x2)  (NCHW in / NCHW out)
# ---------------------------------------------------------------------------
def csp_plain_block(x1_nchw, x2_nchw, params):
    co, P = params["co"], params["P"]
    x1 = jnp.transpose(x1_nchw, (0, 2, 3, 1)).astype(jnp.bfloat16)   # NHWC
    x2 = jnp.transpose(x2_nchw, (0, 2, 3, 1)).astype(jnp.bfloat16)
    B, H, W, _ = x1.shape
    M = B * H * W

    x1f = x1.reshape(M, x1.shape[-1])
    x2f = x2.reshape(M, x2.shape[-1])

    # Head: in_conv1 + in_conv2 + rcsp.in_conv (no concat, no HBM round-trip)
    x = _head(x1f, x2f, params)                                 # (M, P) bf16

    # Main branch: each depth stage fuses its 1x1 into the row-tiled 3x3;
    # the last stage also applies the cat-BN main half + Mish.
    th = _pick_row_tile(H, W)
    cur = x.reshape(B, H, W, P)
    depth = len(params["main"])
    for d, st in enumerate(params["main"]):
        cur = _stage(cur, st, params["catm_s"], params["catm_b"],
                     fuse_cat=(d == depth - 1), th=th)
    h1m = cur.reshape(M, P)

    # Tail: bypass conv + cat-BN bypass half + Mish + out_conv (split-K)
    out = _tail(h1m, x, params, apply_cat_main=(depth == 0))    # (M, P) f32

    out = out[:, :co].reshape(B, H, W, co)
    return jnp.transpose(out, (0, 3, 1, 2))                     # NCHW


# ---------------------------------------------------------------------------
if __name__ == "__main__":
    key = jax.random.PRNGKey(0)
    in_channels = (4, 6)
    out_channels = 8
    depth = 2
    batch, spatial = 2, 16

    k1, k2, kp = jax.random.split(key, 3)
    x1 = jax.random.normal(k1, (batch, in_channels[0], spatial, spatial),
                           jnp.float32)
    x2 = jax.random.normal(k2, (batch, in_channels[1], spatial, spatial),
                           jnp.float32)
    params = make_params(kp, in_channels, out_channels, depth)

    fwd = jax.jit(lambda a, b: csp_plain_block(a, b, params))
    y = fwd(x1, x2)
    jax.block_until_ready(y)

    assert y.shape == (batch, out_channels, spatial, spatial)
    assert bool(jnp.all(jnp.isfinite(y)))
    print("KERNEL_OK")
</pallas_src>

<mosaic_0001>
module attributes {stable_mosaic.version = 11 : i64} {
  func.func @_head_kernel(%arg0: i32, %arg1: memref<256x4xbf16, #tpu.memory_space<vmem>>, %arg2: memref<256x6xbf16, #tpu.memory_space<vmem>>, %arg3: memref<4x128xbf16, #tpu.memory_space<vmem>>, %arg4: memref<1x128xf32, #tpu.memory_space<vmem>>, %arg5: memref<1x128xf32, #tpu.memory_space<vmem>>, %arg6: memref<6x128xbf16, #tpu.memory_space<vmem>>, %arg7: memref<1x128xf32, #tpu.memory_space<vmem>>, %arg8: memref<1x128xf32, #tpu.memory_space<vmem>>, %arg9: memref<128x128xbf16, #tpu.memory_space<vmem>>, %arg10: memref<128x128xbf16, #tpu.memory_space<vmem>>, %arg11: memref<1x128xf32, #tpu.memory_space<vmem>>, %arg12: memref<1x128xf32, #tpu.memory_space<vmem>>, %arg13: memref<256x128xbf16, #tpu.memory_space<vmem>>) attributes {dimension_semantics = [#tpu.dimension_semantics<parallel>], iteration_bounds = array<i64: 2>, scalar_prefetch = 0 : i64, scratch_operands = 0 : i64, tpu.core_type = #tpu.core_type<tc>, window_params = [{transform_indices = @transform_0, window_bounds = array<i64: 256, 4>}, {transform_indices = @transform_1, window_bounds = array<i64: 256, 6>}, {pipeline_mode = #tpu.pipeline_mode<synchronous>, transform_indices = @transform_2, window_bounds = array<i64: 4, 128>}, {pipeline_mode = #tpu.pipeline_mode<synchronous>, transform_indices = @transform_3, window_bounds = array<i64: 1, 128>}, {pipeline_mode = #tpu.pipeline_mode<synchronous>, transform_indices = @transform_4, window_bounds = array<i64: 1, 128>}, {pipeline_mode = #tpu.pipeline_mode<synchronous>, transform_indices = @transform_5, window_bounds = array<i64: 6, 128>}, {pipeline_mode = #tpu.pipeline_mode<synchronous>, transform_indices = @transform_6, window_bounds = array<i64: 1, 128>}, {pipeline_mode = #tpu.pipeline_mode<synchronous>, transform_indices = @transform_7, window_bounds = array<i64: 1, 128>}, {pipeline_mode = #tpu.pipeline_mode<synchronous>, transform_indices = @transform_8, window_bounds = array<i64: 128, 128>}, {pipeline_mode = #tpu.pipeline_mode<synchronous>, transform_indices = @transform_9, window_bounds = array<i64: 128, 128>}, {pipeline_mode = #tpu.pipeline_mode<synchronous>, transform_indices = @transform_10, window_bounds = array<i64: 1, 128>}, {pipeline_mode = #tpu.pipeline_mode<synchronous>, transform_indices = @transform_11, window_bounds = array<i64: 1, 128>}, {transform_indices = @transform_12, window_bounds = array<i64: 256, 128>}]} {
    %c0 = arith.constant 0 : index
    %c0_0 = arith.constant 0 : index
    %0 = vector.load %arg1[%c0, %c0_0] : memref<256x4xbf16, #tpu.memory_space<vmem>>, vector<256x4xbf16>
    %c0_1 = arith.constant 0 : index
    %c0_2 = arith.constant 0 : index
    %1 = vector.load %arg3[%c0_1, %c0_2] : memref<4x128xbf16, #tpu.memory_space<vmem>>, vector<4x128xbf16>
    %cst = arith.constant dense<0.000000e+00> : vector<256x128xf32>
    %2 = tpu.matmul %0, %1, %cst {dimension_numbers = #tpu.dot_dimension_numbers<[1], [0], [0], [1], [0, 0, 1, 1], [], []>} : vector<256x4xbf16>, vector<4x128xbf16>, vector<256x128xf32> -> vector<256x128xf32>
    %c0_3 = arith.constant 0 : index
    %c0_4 = arith.constant 0 : index
    %3 = vector.load %arg4[%c0_3, %c0_4] : memref<1x128xf32, #tpu.memory_space<vmem>>, vector<1x128xf32>
    %4 = vector.broadcast %3 : vector<1x128xf32> to vector<256x128xf32>
    %5 = arith.mulf %2, %4 : vector<256x128xf32>
    %c0_5 = arith.constant 0 : index
    %c0_6 = arith.constant 0 : index
    %6 = vector.load %arg5[%c0_5, %c0_6] : memref<1x128xf32, #tpu.memory_space<vmem>>, vector<1x128xf32>
    %7 = vector.broadcast %6 : vector<1x128xf32> to vector<256x128xf32>
    %8 = arith.addf %5, %7 : vector<256x128xf32>
    %cst_7 = arith.constant 2.000000e+01 : f32
    %9 = vector.broadcast %cst_7 : f32 to vector<256x128xf32>
    %10 = arith.minimumf %8, %9 : vector<256x128xf32>
    %11 = math.exp %10 : vector<256x128xf32>
    %cst_8 = arith.constant 1.000000e+00 : f32
    %12 = vector.broadcast %cst_8 : f32 to vector<256x128xf32>
    %13 = arith.addf %12, %11 : vector<256x128xf32>
    %cst_9 = arith.constant 1.000000e+00 : f32
    %14 = vector.broadcast %cst_9 : f32 to vector<256x128xf32>
    %15 = arith.addf %14, %11 : vector<256x128xf32>
    %16 = arith.mulf %13, %15 : vector<256x128xf32>
    %cst_10 = arith.constant 1.000000e+00 : f32
    %17 = vector.broadcast %cst_10 : f32 to vector<256x128xf32>
    %18 = arith.subf %16, %17 : vector<256x128xf32>
    %19 = arith.mulf %8, %18 : vector<256x128xf32>
    %cst_11 = arith.constant 1.000000e+00 : f32
    %20 = vector.broadcast %cst_11 : f32 to vector<256x128xf32>
    %21 = arith.addf %16, %20 : vector<256x128xf32>
    %22 = tpu.reciprocal %21 {approx = true} : vector<256x128xf32> -> vector<256x128xf32>
    %23 = arith.mulf %19, %22 : vector<256x128xf32>
    %24 = arith.truncf %23 : vector<256x128xf32> to vector<256x128xbf16>
    %c0_12 = arith.constant 0 : index
    %c0_13 = arith.constant 0 : index
    %25 = vector.load %arg2[%c0_12, %c0_13] : memref<256x6xbf16, #tpu.memory_space<vmem>>, vector<256x6xbf16>
    %c0_14 = arith.constant 0 : index
    %c0_15 = arith.constant 0 : index
    %26 = vector.load %arg6[%c0_14, %c0_15] : memref<6x128xbf16, #tpu.memory_space<vmem>>, vector<6x128xbf16>
    %cst_16 = arith.constant dense<0.000000e+00> : vector<256x128xf32>
    %27 = tpu.matmul %25, %26, %cst_16 {dimension_numbers = #tpu.dot_dimension_numbers<[1], [0], [0], [1], [0, 0, 1, 1], [], []>} : vector<256x6xbf16>, vector<6x128xbf16>, vector<256x128xf32> -> vector<256x128xf32>
    %c0_17 = arith.constant 0 : index
    %c0_18 = arith.constant 0 : index
    %28 = vector.load %arg7[%c0_17, %c0_18] : memref<1x128xf32, #tpu.memory_space<vmem>>, vector<1x128xf32>
    %29 = vector.broadcast %28 : vector<1x128xf32> to vector<256x128xf32>
    %30 = arith.mulf %27, %29 : vector<256x128xf32>
    %c0_19 = arith.constant 0 : index
    %c0_20 = arith.constant 0 : index
    %31 = vector.load %arg8[%c0_19, %c0_20] : memref<1x128xf32, #tpu.memory_space<vmem>>, vector<1x128xf32>
    %32 = vector.broadcast %31 : vector<1x128xf32> to vector<256x128xf32>
    %33 = arith.addf %30, %32 : vector<256x128xf32>
    %cst_21 = arith.constant 2.000000e+01 : f32
    %34 = vector.broadcast %cst_21 : f32 to vector<256x128xf32>
    %35 = arith.minimumf %33, %34 : vector<256x128xf32>
    %36 = math.exp %35 : vector<256x128xf32>
    %cst_22 = arith.constant 1.000000e+00 : f32
    %37 = vector.broadcast %cst_22 : f32 to vector<256x128xf32>
    %38 = arith.addf %37, %36 : vector<256x128xf32>
    %cst_23 = arith.constant 1.000000e+00 : f32
    %39 = vector.broadcast %cst_23 : f32 to vector<256x128xf32>
    %40 = arith.addf %39, %36 : vector<256x128xf32>
    %41 = arith.mulf %38, %40 : vector<256x128xf32>
    %cst_24 = arith.constant 1.000000e+00 : f32
    %42 = vector.broadcast %cst_24 : f32 to vector<256x128xf32>
    %43 = arith.subf %41, %42 : vector<256x128xf32>
    %44 = arith.mulf %33, %43 : vector<256x128xf32>
    %cst_25 = arith.constant 1.000000e+00 : f32
    %45 = vector.broadcast %cst_25 : f32 to vector<256x128xf32>
    %46 = arith.addf %41, %45 : vector<256x128xf32>
    %47 = tpu.reciprocal %46 {approx = true} : vector<256x128xf32> -> vector<256x128xf32>
    %48 = arith.mulf %44, %47 : vector<256x128xf32>
    %49 = arith.truncf %48 : vector<256x128xf32> to vector<256x128xbf16>
    %c0_26 = arith.constant 0 : index
    %c0_27 = arith.constant 0 : index
    %50 = vector.load %arg9[%c0_26, %c0_27] : memref<128x128xbf16, #tpu.memory_space<vmem>>, vector<128x128xbf16>
    %cst_28 = arith.constant dense<0.000000e+00> : vector<256x128xf32>
    %51 = tpu.matmul %49, %50, %cst_28 {dimension_numbers = #tpu.dot_dimension_numbers<[1], [0], [0], [1], [0, 0, 1, 1], [], []>} : vector<256x128xbf16>, vector<128x128xbf16>, vector<256x128xf32> -> vector<256x128xf32>
    %c0_29 = arith.constant 0 : index
    %c0_30 = arith.constant 0 : index
    %52 = vector.load %arg10[%c0_29, %c0_30] : memref<128x128xbf16, #tpu.memory_space<vmem>>, vector<128x128xbf16>
    %cst_31 = arith.constant dense<0.000000e+00> : vector<256x128xf32>
    %53 = tpu.matmul %24, %52, %cst_31 {dimension_numbers = #tpu.dot_dimension_numbers<[1], [0], [0], [1], [0, 0, 1, 1], [], []>} : vector<256x128xbf16>, vector<128x128xbf16>, vector<256x128xf32> -> vector<256x128xf32>
    %54 = arith.addf %51, %53 : vector<256x128xf32>
    %c0_32 = arith.constant 0 : index
    %c0_33 = arith.constant 0 : index
    %55 = vector.load %arg11[%c0_32, %c0_33] : memref<1x128xf32, #tpu.memory_space<vmem>>, vector<1x128xf32>
    %56 = vector.broadcast %55 : vector<1x128xf32> to vector<256x128xf32>
    %57 = arith.mulf %54, %56 : vector<256x128xf32>
    %c0_34 = arith.constant 0 : index
    %c0_35 = arith.constant 0 : index
    %58 = vector.load %arg12[%c0_34, %c0_35] : memref<1x128xf32, #tpu.memory_space<vmem>>, vector<1x128xf32>
    %59 = vector.broadcast %58 : vector<1x128xf32> to vector<256x128xf32>
    %60 = arith.addf %57, %59 : vector<256x128xf32>
    %cst_36 = arith.constant 2.000000e+01 : f32
    %61 = vector.broadcast %cst_36 : f32 to vector<256x128xf32>
    %62 = arith.minimumf %60, %61 : vector<256x128xf32>
    %63 = math.exp %62 : vector<256x128xf32>
    %cst_37 = arith.constant 1.000000e+00 : f32
    %64 = vector.broadcast %cst_37 : f32 to vector<256x128xf32>
    %65 = arith.addf %64, %63 : vector<256x128xf32>
    %cst_38 = arith.constant 1.000000e+00 : f32
    %66 = vector.broadcast %cst_38 : f32 to vector<256x128xf32>
    %67 = arith.addf %66, %63 : vector<256x128xf32>
    %68 = arith.mulf %65, %67 : vector<256x128xf32>
    %cst_39 = arith.constant 1.000000e+00 : f32
    %69 = vector.broadcast %cst_39 : f32 to vector<256x128xf32>
    %70 = arith.subf %68, %69 : vector<256x128xf32>
    %71 = arith.mulf %60, %70 : vector<256x128xf32>
    %cst_40 = arith.constant 1.000000e+00 : f32
    %72 = vector.broadcast %cst_40 : f32 to vector<256x128xf32>
    %73 = arith.addf %68, %72 : vector<256x128xf32>
    %74 = tpu.reciprocal %73 {approx = true} : vector<256x128xf32> -> vector<256x128xf32>
    %75 = arith.mulf %71, %74 : vector<256x128xf32>
    %76 = arith.truncf %75 : vector<256x128xf32> to vector<256x128xbf16>
    %c0_41 = arith.constant 0 : index
    %c0_42 = arith.constant 0 : index
    %77 = vector.load %arg13[%c0_41, %c0_42] : memref<256x128xbf16, #tpu.memory_space<vmem>>, vector<256x128xbf16>
    tpu.vector_store %arg13[%c0_41, %c0_42], %76 {strides = array<i32>} : memref<256x128xbf16, #tpu.memory_space<vmem>>, vector<256x128xbf16>,
    return
  }
  func.func @transform_0(%arg0: i32) -> (i32, i32) {
    %c0_i32 = arith.constant 0 : i32
    %c0_i32_0 = arith.constant 0 : i32
    return %arg0, %c0_i32 : i32, i32
  }
  func.func @transform_1(%arg0: i32) -> (i32, i32) {
    %c0_i32 = arith.constant 0 : i32
    %c0_i32_0 = arith.constant 0 : i32
    return %arg0, %c0_i32 : i32, i32
  }
  func.func @transform_2(%arg0: i32) -> (i32, i32) {
    %c0_i32 = arith.constant 0 : i32
    %c0_i32_0 = arith.constant 0 : i32
    %c0_i32_1 = arith.constant 0 : i32
    return %c0_i32, %c0_i32_0 : i32, i32
  }
  func.func @transform_3(%arg0: i32) -> (i32, i32) {
    %c0_i32 = arith.constant 0 : i32
    %c0_i32_0 = arith.constant 0 : i32
    %c0_i32_1 = arith.constant 0 : i32
    return %c0_i32, %c0_i32_0 : i32, i32
  }
  func.func @transform_4(%arg0: i32) -> (i32, i32) {
    %c0_i32 = arith.constant 0 : i32
    %c0_i32_0 = arith.constant 0 : i32
    %c0_i32_1 = arith.constant 0 : i32
    return %c0_i32, %c0_i32_0 : i32, i32
  }
  func.func @transform_5(%arg0: i32) -> (i32, i32) {
    %c0_i32 = arith.constant 0 : i32
    %c0_i32_0 = arith.constant 0 : i32
    %c0_i32_1 = arith.constant 0 : i32
    return %c0_i32, %c0_i32_0 : i32, i32
  }
  func.func @transform_6(%arg0: i32) -> (i32, i32) {
    %c0_i32 = arith.constant 0 : i32
    %c0_i32_0 = arith.constant 0 : i32
    %c0_i32_1 = arith.constant 0 : i32
    return %c0_i32, %c0_i32_0 : i32, i32
  }
  func.func @transform_7(%arg0: i32) -> (i32, i32) {
    %c0_i32 = arith.constant 0 : i32
    %c0_i32_0 = arith.constant 0 : i32
    %c0_i32_1 = arith.constant 0 : i32
    return %c0_i32, %c0_i32_0 : i32, i32
  }
  func.func @transform_8(%arg0: i32) -> (i32, i32) {
    %c0_i32 = arith.constant 0 : i32
    %c0_i32_0 = arith.constant 0 : i32
    %c0_i32_1 = arith.constant 0 : i32
    return %c0_i32, %c0_i32_0 : i32, i32
  }
  func.func @transform_9(%arg0: i32) -> (i32, i32) {
    %c0_i32 = arith.constant 0 : i32
    %c0_i32_0 = arith.constant 0 : i32
    %c0_i32_1 = arith.constant 0 : i32
    return %c0_i32, %c0_i32_0 : i32, i32
  }
  func.func @transform_10(%arg0: i32) -> (i32, i32) {
    %c0_i32 = arith.constant 0 : i32
    %c0_i32_0 = arith.constant 0 : i32
    %c0_i32_1 = arith.constant 0 : i32
    return %c0_i32, %c0_i32_0 : i32, i32
  }
  func.func @transform_11(%arg0: i32) -> (i32, i32) {
    %c0_i32 = arith.constant 0 : i32
    %c0_i32_0 = arith.constant 0 : i32
    %c0_i32_1 = arith.constant 0 : i32
    return %c0_i32, %c0_i32_0 : i32, i32
  }
  func.func @transform_12(%arg0: i32) -> (i32, i32) {
    %c0_i32 = arith.constant 0 : i32
    %c0_i32_0 = arith.constant 0 : i32
    return %arg0, %c0_i32 : i32, i32
  }
}

module attributes {stable_mosaic.version = 11 : i64} {
  func.func @_stage_kernel(%arg0: i32, %arg1: i32, %arg2: memref<1x8x16x128xbf16, #tpu.memory_space<vmem>>, %arg3: memref<1x1x16x128xbf16, #tpu.memory_space<vmem>>, %arg4: memref<1x1x16x128xbf16, #tpu.memory_space<vmem>>, %arg5: memref<128x128xbf16, #tpu.memory_space<vmem>>, %arg6: memref<1x128xf32, #tpu.memory_space<vmem>>, %arg7: memref<1x128xf32, #tpu.memory_space<vmem>>, %arg8: memref<3x384x128xbf16, #tpu.memory_space<vmem>>, %arg9: memref<1x128xf32, #tpu.memory_space<vmem>>, %arg10: memref<1x128xf32, #tpu.memory_space<vmem>>, %arg11: memref<1x128xf32, #tpu.memory_space<vmem>>, %arg12: memref<1x128xf32, #tpu.memory_space<vmem>>, %arg13: memref<1x8x16x128xbf16, #tpu.memory_space<vmem>>, %arg14: memref<10x16x384xbf16, #tpu.memory_space<vmem>>) attributes {dimension_semantics = [#tpu.dimension_semantics<parallel>, #tpu.dimension_semantics<parallel>], iteration_bounds = array<i64: 2, 2>, scalar_prefetch = 0 : i64, scratch_operands = 1 : i64, tpu.core_type = #tpu.core_type<tc>, window_params = [{transform_indices = @transform_0, window_bounds = array<i64: 1, 8, 16, 128>}, {transform_indices = @transform_1, window_bounds = array<i64: 1, 1, 16, 128>}, {transform_indices = @transform_2, window_bounds = array<i64: 1, 1, 16, 128>}, {pipeline_mode = #tpu.pipeline_mode<synchronous>, transform_indices = @transform_3, window_bounds = array<i64: 128, 128>}, {pipeline_mode = #tpu.pipeline_mode<synchronous>, transform_indices = @transform_4, window_bounds = array<i64: 1, 128>}, {pipeline_mode = #tpu.pipeline_mode<synchronous>, transform_indices = @transform_5, window_bounds = array<i64: 1, 128>}, {pipeline_mode = #tpu.pipeline_mode<synchronous>, transform_indices = @transform_6, window_bounds = array<i64: 3, 384, 128>}, {pipeline_mode = #tpu.pipeline_mode<synchronous>, transform_indices = @transform_7, window_bounds = array<i64: 1, 128>}, {pipeline_mode = #tpu.pipeline_mode<synchronous>, transform_indices = @transform_8, window_bounds = array<i64: 1, 128>}, {pipeline_mode = #tpu.pipeline_mode<synchronous>, transform_indices = @transform_9, window_bounds = array<i64: 1, 128>}, {pipeline_mode = #tpu.pipeline_mode<synchronous>, transform_indices = @transform_10, window_bounds = array<i64: 1, 128>}, {transform_indices = @transform_11, window_bounds = array<i64: 1, 8, 16, 128>}]} {
    %c0 = arith.constant 0 : index
    %c0_0 = arith.constant 0 : index
    %0 = vector.load %arg5[%c0, %c0_0] : memref<128x128xbf16, #tpu.memory_space<vmem>>, vector<128x128xbf16>
    %c0_1 = arith.constant 0 : index
    %c0_2 = arith.constant 0 : index
    %1 = vector.load %arg6[%c0_1, %c0_2] : memref<1x128xf32, #tpu.memory_space<vmem>>, vector<1x128xf32>
    %c0_3 = arith.constant 0 : index
    %c0_4 = arith.constant 0 : index
    %2 = vector.load %arg7[%c0_3, %c0_4] : memref<1x128xf32, #tpu.memory_space<vmem>>, vector<1x128xf32>
    %c0_5 = arith.constant 0 : index
    %c0_6 = arith.constant 0 : index
    %c0_7 = arith.constant 0 : index
    %c0_8 = arith.constant 0 : index
    %3 = vector.load %arg2[%c0_5, %c0_6, %c0_7, %c0_8] : memref<1x8x16x128xbf16, #tpu.memory_space<vmem>>, vector<1x8x16x128xbf16>
    %4 = vector.shape_cast %3 : vector<1x8x16x128xbf16> to vector<8x16x128xbf16>
    %5 = vector.shape_cast %4 : vector<8x16x128xbf16> to vector<128x128xbf16>
    %cst = arith.constant dense<0.000000e+00> : vector<128x128xf32>
    %6 = tpu.matmul %5, %0, %cst {dimension_numbers = #tpu.dot_dimension_numbers<[1], [0], [0], [1], [0, 0, 1, 1], [], []>} : vector<128x128xbf16>, vector<128x128xbf16>, vector<128x128xf32> -> vector<128x128xf32>
    %7 = vector.broadcast %1 : vector<1x128xf32> to vector<128x128xf32>
    %8 = arith.mulf %6, %7 : vector<128x128xf32>
    %9 = vector.broadcast %2 : vector<1x128xf32> to vector<128x128xf32>
    %10 = arith.addf %8, %9 : vector<128x128xf32>
    %cst_9 = arith.constant 2.000000e+01 : f32
    %11 = vector.broadcast %cst_9 : f32 to vector<128x128xf32>
    %12 = arith.minimumf %10, %11 : vector<128x128xf32>
    %13 = math.exp %12 : vector<128x128xf32>
    %cst_10 = arith.constant 1.000000e+00 : f32
    %14 = vector.broadcast %cst_10 : f32 to vector<128x128xf32>
    %15 = arith.addf %14, %13 : vector<128x128xf32>
    %cst_11 = arith.constant 1.000000e+00 : f32
    %16 = vector.broadcast %cst_11 : f32 to vector<128x128xf32>
    %17 = arith.addf %16, %13 : vector<128x128xf32>
    %18 = arith.mulf %15, %17 : vector<128x128xf32>
    %cst_12 = arith.constant 1.000000e+00 : f32
    %19 = vector.broadcast %cst_12 : f32 to vector<128x128xf32>
    %20 = arith.subf %18, %19 : vector<128x128xf32>
    %21 = arith.mulf %10, %20 : vector<128x128xf32>
    %cst_13 = arith.constant 1.000000e+00 : f32
    %22 = vector.broadcast %cst_13 : f32 to vector<128x128xf32>
    %23 = arith.addf %18, %22 : vector<128x128xf32>
    %24 = tpu.reciprocal %23 {approx = true} : vector<128x128xf32> -> vector<128x128xf32>
    %25 = arith.mulf %21, %24 : vector<128x128xf32>
    %26 = vector.shape_cast %25 : vector<128x128xf32> to vector<8x16x128xf32>
    %cst_14 = arith.constant 0.000000e+00 : f32
    %27 = vector.broadcast %cst_14 : f32 to vector<8x1x128xf32>
    %28 = vector.extract_strided_slice %26 {offsets = [0, 0, 0], sizes = [8, 15, 128], strides = [1, 1, 1]} : vector<8x16x128xf32> to vector<8x15x128xf32>
    %29 = tpu.concatenate %27, %28 in 1 : vector<8x1x128xf32>, vector<8x15x128xf32> -> vector<8x16x128xf32>
    %30 = vector.extract_strided_slice %26 {offsets = [0, 1, 0], sizes = [8, 15, 128], strides = [1, 1, 1]} : vector<8x16x128xf32> to vector<8x15x128xf32>
    %31 = tpu.concatenate %30, %27 in 1 : vector<8x15x128xf32>, vector<8x1x128xf32> -> vector<8x16x128xf32>
    %32 = tpu.concatenate %29, %26, %31 in 2 : vector<8x16x128xf32>, vector<8x16x128xf32>, vector<8x16x128xf32> -> vector<8x16x384xf32>
    %33 = arith.truncf %32 : vector<8x16x384xf32> to vector<8x16x384xbf16>
    %c1 = arith.constant 1 : index
    %c0_15 = arith.constant 0 : index
    %c0_16 = arith.constant 0 : index
    %34 = vector.load %arg14[%c1, %c0_15, %c0_16] : memref<10x16x384xbf16, #tpu.memory_space<vmem>>, vector<8x16x384xbf16>
    tpu.vector_store %arg14[%c1, %c0_15, %c0_16], %33 {strides = array<i32>} : memref<10x16x384xbf16, #tpu.memory_space<vmem>>, vector<8x16x384xbf16>,
    %c0_17 = arith.constant 0 : index
    %c0_18 = arith.constant 0 : index
    %c0_19 = arith.constant 0 : index
    %c0_20 = arith.constant 0 : index
    %35 = vector.load %arg3[%c0_17, %c0_18, %c0_19, %c0_20] : memref<1x1x16x128xbf16, #tpu.memory_space<vmem>>, vector<1x1x16x128xbf16>
    %36 = vector.shape_cast %35 : vector<1x1x16x128xbf16> to vector<1x16x128xbf16>
    %c0_i32 = arith.constant 0 : i32
    %37 = arith.cmpi sgt, %arg1, %c0_i32 : i32
    %38 = arith.extui %37 : i1 to i32
    %39 = arith.sitofp %38 : i32 to f32
    %40 = vector.shape_cast %36 : vector<1x16x128xbf16> to vector<16x128xbf16>
    %cst_21 = arith.constant dense<0.000000e+00> : vector<16x128xf32>
    %41 = tpu.matmul %40, %0, %cst_21 {dimension_numbers = #tpu.dot_dimension_numbers<[1], [0], [0], [1], [0, 0, 1, 1], [], []>} : vector<16x128xbf16>, vector<128x128xbf16>, vector<16x128xf32> -> vector<16x128xf32>
    %42 = vector.broadcast %1 : vector<1x128xf32> to vector<16x128xf32>
    %43 = arith.mulf %41, %42 : vector<16x128xf32>
    %44 = vector.broadcast %2 : vector<1x128xf32> to vector<16x128xf32>
    %45 = arith.addf %43, %44 : vector<16x128xf32>
    %cst_22 = arith.constant 2.000000e+01 : f32
    %46 = vector.broadcast %cst_22 : f32 to vector<16x128xf32>
    %47 = arith.minimumf %45, %46 : vector<16x128xf32>
    %48 = math.exp %47 : vector<16x128xf32>
    %cst_23 = arith.constant 1.000000e+00 : f32
    %49 = vector.broadcast %cst_23 : f32 to vector<16x128xf32>
    %50 = arith.addf %49, %48 : vector<16x128xf32>
    %cst_24 = arith.constant 1.000000e+00 : f32
    %51 = vector.broadcast %cst_24 : f32 to vector<16x128xf32>
    %52 = arith.addf %51, %48 : vector<16x128xf32>
    %53 = arith.mulf %50, %52 : vector<16x128xf32>
    %cst_25 = arith.constant 1.000000e+00 : f32
    %54 = vector.broadcast %cst_25 : f32 to vector<16x128xf32>
    %55 = arith.subf %53, %54 : vector<16x128xf32>
    %56 = arith.mulf %45, %55 : vector<16x128xf32>
    %cst_26 = arith.constant 1.000000e+00 : f32
    %57 = vector.broadcast %cst_26 : f32 to vector<16x128xf32>
    %58 = arith.addf %53, %57 : vector<16x128xf32>
    %59 = tpu.reciprocal %58 {approx = true} : vector<16x128xf32> -> vector<16x128xf32>
    %60 = arith.mulf %56, %59 : vector<16x128xf32>
    %61 = vector.shape_cast %60 : vector<16x128xf32> to vector<1x16x128xf32>
    %62 = vector.broadcast %39 : f32 to vector<1x16x128xf32>
    %63 = arith.mulf %61, %62 : vector<1x16x128xf32>
    %cst_27 = arith.constant 0.000000e+00 : f32
    %64 = vector.broadcast %cst_27 : f32 to vector<1x1x128xf32>
    %65 = vector.extract_strided_slice %63 {offsets = [0, 0, 0], sizes = [1, 15, 128], strides = [1, 1, 1]} : vector<1x16x128xf32> to vector<1x15x128xf32>
    %66 = tpu.concatenate %64, %65 in 1 : vector<1x1x128xf32>, vector<1x15x128xf32> -> vector<1x16x128xf32>
    %67 = vector.extract_strided_slice %63 {offsets = [0, 1, 0], sizes = [1, 15, 128], strides = [1, 1, 1]} : vector<1x16x128xf32> to vector<1x15x128xf32>
    %68 = tpu.concatenate %67, %64 in 1 : vector<1x15x128xf32>, vector<1x1x128xf32> -> vector<1x16x128xf32>
    %69 = tpu.concatenate %66, %63, %68 in 2 : vector<1x16x128xf32>, vector<1x16x128xf32>, vector<1x16x128xf32> -> vector<1x16x384xf32>
    %70 = arith.truncf %69 : vector<1x16x384xf32> to vector<1x16x384xbf16>
    %c0_28 = arith.constant 0 : index
    %c0_29 = arith.constant 0 : index
    %c0_30 = arith.constant 0 : index
    %71 = vector.load %arg14[%c0_28, %c0_29, %c0_30] : memref<10x16x384xbf16, #tpu.memory_space<vmem>>, vector<1x16x384xbf16>
    tpu.vector_store %arg14[%c0_28, %c0_29, %c0_30], %70 {strides = array<i32>} : memref<10x16x384xbf16, #tpu.memory_space<vmem>>, vector<1x16x384xbf16>,
    %c0_31 = arith.constant 0 : index
    %c0_32 = arith.constant 0 : index
    %c0_33 = arith.constant 0 : index
    %c0_34 = arith.constant 0 : index
    %72 = vector.load %arg4[%c0_31, %c0_32, %c0_33, %c0_34] : memref<1x1x16x128xbf16, #tpu.memory_space<vmem>>, vector<1x1x16x128xbf16>
    %73 = vector.shape_cast %72 : vector<1x1x16x128xbf16> to vector<1x16x128xbf16>
    %c1_i32 = arith.constant 1 : i32
    %74 = arith.cmpi slt, %arg1, %c1_i32 : i32
    %75 = arith.extui %74 : i1 to i32
    %76 = arith.sitofp %75 : i32 to f32
    %77 = vector.shape_cast %73 : vector<1x16x128xbf16> to vector<16x128xbf16>
    %cst_35 = arith.constant dense<0.000000e+00> : vector<16x128xf32>
    %78 = tpu.matmul %77, %0, %cst_35 {dimension_numbers = #tpu.dot_dimension_numbers<[1], [0], [0], [1], [0, 0, 1, 1], [], []>} : vector<16x128xbf16>, vector<128x128xbf16>, vector<16x128xf32> -> vector<16x128xf32>
    %79 = vector.broadcast %1 : vector<1x128xf32> to vector<16x128xf32>
    %80 = arith.mulf %78, %79 : vector<16x128xf32>
    %81 = vector.broadcast %2 : vector<1x128xf32> to vector<16x128xf32>
    %82 = arith.addf %80, %81 : vector<16x128xf32>
    %cst_36 = arith.constant 2.000000e+01 : f32
    %83 = vector.broadcast %cst_36 : f32 to vector<16x128xf32>
    %84 = arith.minimumf %82, %83 : vector<16x128xf32>
    %85 = math.exp %84 : vector<16x128xf32>
    %cst_37 = arith.constant 1.000000e+00 : f32
    %86 = vector.broadcast %cst_37 : f32 to vector<16x128xf32>
    %87 = arith.addf %86, %85 : vector<16x128xf32>
    %cst_38 = arith.constant 1.000000e+00 : f32
    %88 = vector.broadcast %cst_38 : f32 to vector<16x128xf32>
    %89 = arith.addf %88, %85 : vector<16x128xf32>
    %90 = arith.mulf %87, %89 : vector<16x128xf32>
    %cst_39 = arith.constant 1.000000e+00 : f32
    %91 = vector.broadcast %cst_39 : f32 to vector<16x128xf32>
    %92 = arith.subf %90, %91 : vector<16x128xf32>
    %93 = arith.mulf %82, %92 : vector<16x128xf32>
    %cst_40 = arith.constant 1.000000e+00 : f32
    %94 = vector.broadcast %cst_40 : f32 to vector<16x128xf32>
    %95 = arith.addf %90, %94 : vector<16x128xf32>
    %96 = tpu.reciprocal %95 {approx = true} : vector<16x128xf32> -> vector<16x128xf32>
    %97 = arith.mulf %93, %96 : vector<16x128xf32>
    %98 = vector.shape_cast %97 : vector<16x128xf32> to vector<1x16x128xf32>
    %99 = vector.broadcast %76 : f32 to vector<1x16x128xf32>
    %100 = arith.mulf %98, %99 : vector<1x16x128xf32>
    %cst_41 = arith.constant 0.000000e+00 : f32
    %101 = vector.broadcast %cst_41 : f32 to vector<1x1x128xf32>
    %102 = vector.extract_strided_slice %100 {offsets = [0, 0, 0], sizes = [1, 15, 128], strides = [1, 1, 1]} : vector<1x16x128xf32> to vector<1x15x128xf32>
    %103 = tpu.concatenate %101, %102 in 1 : vector<1x1x128xf32>, vector<1x15x128xf32> -> vector<1x16x128xf32>
    %104 = vector.extract_strided_slice %100 {offsets = [0, 1, 0], sizes = [1, 15, 128], strides = [1, 1, 1]} : vector<1x16x128xf32> to vector<1x15x128xf32>
    %105 = tpu.concatenate %104, %101 in 1 : vector<1x15x128xf32>, vector<1x1x128xf32> -> vector<1x16x128xf32>
    %106 = tpu.concatenate %103, %100, %105 in 2 : vector<1x16x128xf32>, vector<1x16x128xf32>, vector<1x16x128xf32> -> vector<1x16x384xf32>
    %107 = arith.truncf %106 : vector<1x16x384xf32> to vector<1x16x384xbf16>
    %c9 = arith.constant 9 : index
    %c0_42 = arith.constant 0 : index
    %c0_43 = arith.constant 0 : index
    %108 = vector.load %arg14[%c9, %c0_42, %c0_43] : memref<10x16x384xbf16, #tpu.memory_space<vmem>>, vector<1x16x384xbf16>
    tpu.vector_store %arg14[%c9, %c0_42, %c0_43], %107 {strides = array<i32>} : memref<10x16x384xbf16, #tpu.memory_space<vmem>>, vector<1x16x384xbf16>,
    %cst_44 = arith.constant 0.000000e+00 : f32
    %109 = vector.broadcast %cst_44 : f32 to vector<128x128xf32>
    %c0_45 = arith.constant 0 : index
    %c0_46 = arith.constant 0 : index
    %c0_47 = arith.constant 0 : index
    %110 = vector.load %arg14[%c0_45, %c0_46, %c0_47] : memref<10x16x384xbf16, #tpu.memory_space<vmem>>, vector<8x16x384xbf16>
    %111 = vector.shape_cast %110 : vector<8x16x384xbf16> to vector<128x384xbf16>
    %c0_48 = arith.constant 0 : index
    %c0_49 = arith.constant 0 : index
    %c0_50 = arith.constant 0 : index
    %112 = vector.load %arg8[%c0_48, %c0_49, %c0_50] : memref<3x384x128xbf16, #tpu.memory_space<vmem>>, vector<1x384x128xbf16>
    %113 = vector.shape_cast %112 : vector<1x384x128xbf16> to vector<384x128xbf16>
    %cst_51 = arith.constant dense<0.000000e+00> : vector<128x128xf32>
    %114 = tpu.matmul %111, %113, %cst_51 {dimension_numbers = #tpu.dot_dimension_numbers<[1], [0], [0], [1], [0, 0, 1, 1], [], []>} : vector<128x384xbf16>, vector<384x128xbf16>, vector<128x128xf32> -> vector<128x128xf32>
    %115 = arith.addf %109, %114 : vector<128x128xf32>
    %c1_52 = arith.constant 1 : index
    %c0_53 = arith.constant 0 : index
    %c0_54 = arith.constant 0 : index
    %116 = vector.load %arg14[%c1_52, %c0_53, %c0_54] : memref<10x16x384xbf16, #tpu.memory_space<vmem>>, vector<8x16x384xbf16>
    %117 = vector.shape_cast %116 : vector<8x16x384xbf16> to vector<128x384xbf16>
    %c1_55 = arith.constant 1 : index
    %c0_56 = arith.constant 0 : index
    %c0_57 = arith.constant 0 : index
    %118 = vector.load %arg8[%c1_55, %c0_56, %c0_57] : memref<3x384x128xbf16, #tpu.memory_space<vmem>>, vector<1x384x128xbf16>
    %119 = vector.shape_cast %118 : vector<1x384x128xbf16> to vector<384x128xbf16>
    %cst_58 = arith.constant dense<0.000000e+00> : vector<128x128xf32>
    %120 = tpu.matmul %117, %119, %cst_58 {dimension_numbers = #tpu.dot_dimension_numbers<[1], [0], [0], [1], [0, 0, 1, 1], [], []>} : vector<128x384xbf16>, vector<384x128xbf16>, vector<128x128xf32> -> vector<128x128xf32>
    %121 = arith.addf %115, %120 : vector<128x128xf32>
    %c2 = arith.constant 2 : index
    %c0_59 = arith.constant 0 : index
    %c0_60 = arith.constant 0 : index
    %122 = vector.load %arg14[%c2, %c0_59, %c0_60] : memref<10x16x384xbf16, #tpu.memory_space<vmem>>, vector<8x16x384xbf16>
    %123 = vector.shape_cast %122 : vector<8x16x384xbf16> to vector<128x384xbf16>
    %c2_61 = arith.constant 2 : index
    %c0_62 = arith.constant 0 : index
    %c0_63 = arith.constant 0 : index
    %124 = vector.load %arg8[%c2_61, %c0_62, %c0_63] : memref<3x384x128xbf16, #tpu.memory_space<vmem>>, vector<1x384x128xbf16>
    %125 = vector.shape_cast %124 : vector<1x384x128xbf16> to vector<384x128xbf16>
    %cst_64 = arith.constant dense<0.000000e+00> : vector<128x128xf32>
    %126 = tpu.matmul %123, %125, %cst_64 {dimension_numbers = #tpu.dot_dimension_numbers<[1], [0], [0], [1], [0, 0, 1, 1], [], []>} : vector<128x384xbf16>, vector<384x128xbf16>, vector<128x128xf32> -> vector<128x128xf32>
    %127 = arith.addf %121, %126 : vector<128x128xf32>
    %c0_65 = arith.constant 0 : index
    %c0_66 = arith.constant 0 : index
    %128 = vector.load %arg9[%c0_65, %c0_66] : memref<1x128xf32, #tpu.memory_space<vmem>>, vector<1x128xf32>
    %129 = vector.broadcast %128 : vector<1x128xf32> to vector<128x128xf32>
    %130 = arith.mulf %127, %129 : vector<128x128xf32>
    %c0_67 = arith.constant 0 : index
    %c0_68 = arith.constant 0 : index
    %131 = vector.load %arg10[%c0_67, %c0_68] : memref<1x128xf32, #tpu.memory_space<vmem>>, vector<1x128xf32>
    %132 = vector.broadcast %131 : vector<1x128xf32> to vector<128x128xf32>
    %133 = arith.addf %130, %132 : vector<128x128xf32>
    %cst_69 = arith.constant 2.000000e+01 : f32
    %134 = vector.broadcast %cst_69 : f32 to vector<128x128xf32>
    %135 = arith.minimumf %133, %134 : vector<128x128xf32>
    %136 = math.exp %135 : vector<128x128xf32>
    %cst_70 = arith.constant 1.000000e+00 : f32
    %137 = vector.broadcast %cst_70 : f32 to vector<128x128xf32>
    %138 = arith.addf %137, %136 : vector<128x128xf32>
    %cst_71 = arith.constant 1.000000e+00 : f32
    %139 = vector.broadcast %cst_71 : f32 to vector<128x128xf32>
    %140 = arith.addf %139, %136 : vector<128x128xf32>
    %141 = arith.mulf %138, %140 : vector<128x128xf32>
    %cst_72 = arith.constant 1.000000e+00 : f32
    %142 = vector.broadcast %cst_72 : f32 to vector<128x128xf32>
    %143 = arith.subf %141, %142 : vector<128x128xf32>
    %144 = arith.mulf %133, %143 : vector<128x128xf32>
    %cst_73 = arith.constant 1.000000e+00 : f32
    %145 = vector.broadcast %cst_73 : f32 to vector<128x128xf32>
    %146 = arith.addf %141, %145 : vector<128x128xf32>
    %147 = tpu.reciprocal %146 {approx = true} : vector<128x128xf32> -> vector<128x128xf32>
    %148 = arith.mulf %144, %147 : vector<128x128xf32>
    %c0_74 = arith.constant 0 : index
    %c0_75 = arith.constant 0 : index
    %149 = vector.load %arg11[%c0_74, %c0_75] : memref<1x128xf32, #tpu.memory_space<vmem>>, vector<1x128xf32>
    %150 = vector.broadcast %149 : vector<1x128xf32> to vector<128x128xf32>
    %151 = arith.mulf %148, %150 : vector<128x128xf32>
    %c0_76 = arith.constant 0 : index
    %c0_77 = arith.constant 0 : index
    %152 = vector.load %arg12[%c0_76, %c0_77] : memref<1x128xf32, #tpu.memory_space<vmem>>, vector<1x128xf32>
    %153 = vector.broadcast %152 : vector<1x128xf32> to vector<128x128xf32>
    %154 = arith.addf %151, %153 : vector<128x128xf32>
    %cst_78 = arith.constant 2.000000e+01 : f32
    %155 = vector.broadcast %cst_78 : f32 to vector<128x128xf32>
    %156 = arith.minimumf %154, %155 : vector<128x128xf32>
    %157 = math.exp %156 : vector<128x128xf32>
    %cst_79 = arith.constant 1.000000e+00 : f32
    %158 = vector.broadcast %cst_79 : f32 to vector<128x128xf32>
    %159 = arith.addf %158, %157 : vector<128x128xf32>
    %cst_80 = arith.constant 1.000000e+00 : f32
    %160 = vector.broadcast %cst_80 : f32 to vector<128x128xf32>
    %161 = arith.addf %160, %157 : vector<128x128xf32>
    %162 = arith.mulf %159, %161 : vector<128x128xf32>
    %cst_81 = arith.constant 1.000000e+00 : f32
    %163 = vector.broadcast %cst_81 : f32 to vector<128x128xf32>
    %164 = arith.subf %162, %163 : vector<128x128xf32>
    %165 = arith.mulf %154, %164 : vector<128x128xf32>
    %cst_82 = arith.constant 1.000000e+00 : f32
    %166 = vector.broadcast %cst_82 : f32 to vector<128x128xf32>
    %167 = arith.addf %162, %166 : vector<128x128xf32>
    %168 = tpu.reciprocal %167 {approx = true} : vector<128x128xf32> -> vector<128x128xf32>
    %169 = arith.mulf %165, %168 : vector<128x128xf32>
    %170 = vector.shape_cast %169 : vector<128x128xf32> to vector<8x16x128xf32>
    %171 = arith.truncf %170 : vector<8x16x128xf32> to vector<8x16x128xbf16>
    %c0_83 = arith.constant 0 : index
    %c0_84 = arith.constant 0 : index
    %c0_85 = arith.constant 0 : index
    %c0_86 = arith.constant 0 : index
    %172 = vector.load %arg13[%c0_83, %c0_84, %c0_85, %c0_86] : memref<1x8x16x128xbf16, #tpu.memory_space<vmem>>, vector<1x8x16x128xbf16>
    %173 = vector.shape_cast %172 : vector<1x8x16x128xbf16> to vector<8x16x128xbf16>
    %174 = vector.shape_cast %171 : vector<8x16x128xbf16> to vector<1x8x16x128xbf16>
    tpu.vector_store %arg13[%c0_83, %c0_84, %c0_85, %c0_86], %174 {strides = array<i32>} : memref<1x8x16x128xbf16, #tpu.memory_space<vmem>>, vector<1x8x16x128xbf16>,
    return
  }
  func.func @transform_0(%arg0: i32, %arg1: i32) -> (i32, i32, i32, i32) {
    %c0_i32 = arith.constant 0 : i32
    %c0_i32_0 = arith.constant 0 : i32
    %c0_i32_1 = arith.constant 0 : i32
    return %arg0, %arg1, %c0_i32, %c0_i32_0 : i32, i32, i32, i32
  }
  func.func @transform_1(%arg0: i32, %arg1: i32) -> (i32, i32, i32, i32) {
    %c8_i32 = arith.constant 8 : i32
    %0 = arith.muli %arg1, %c8_i32 : i32
    %c1_i32 = arith.constant 1 : i32
    %1 = arith.subi %0, %c1_i32 : i32
    %c0_i32 = arith.constant 0 : i32
    %2 = arith.maxsi %1, %c0_i32 : i32
    %c0_i32_0 = arith.constant 0 : i32
    %c0_i32_1 = arith.constant 0 : i32
    %c0_i32_2 = arith.constant 0 : i32
    return %arg0, %2, %c0_i32_0, %c0_i32_1 : i32, i32, i32, i32
  }
  func.func @transform_2(%arg0: i32, %arg1: i32) -> (i32, i32, i32, i32) {
    %c8_i32 = arith.constant 8 : i32
    %0 = arith.muli %arg1, %c8_i32 : i32
    %c8_i32_0 = arith.constant 8 : i32
    %1 = arith.addi %0, %c8_i32_0 : i32
    %c15_i32 = arith.constant 15 : i32
    %2 = arith.minsi %1, %c15_i32 : i32
    %c0_i32 = arith.constant 0 : i32
    %c0_i32_1 = arith.constant 0 : i32
    %c0_i32_2 = arith.constant 0 : i32
    return %arg0, %2, %c0_i32, %c0_i32_1 : i32, i32, i32, i32
  }
  func.func @transform_3(%arg0: i32, %arg1: i32) -> (i32, i32) {
    %c0_i32 = arith.constant 0 : i32
    %c0_i32_0 = arith.constant 0 : i32
    %c0_i32_1 = arith.constant 0 : i32
    return %c0_i32, %c0_i32_0 : i32, i32
  }
  func.func @transform_4(%arg0: i32, %arg1: i32) -> (i32, i32) {
    %c0_i32 = arith.constant 0 : i32
    %c0_i32_0 = arith.constant 0 : i32
    %c0_i32_1 = arith.constant 0 : i32
    return %c0_i32, %c0_i32_0 : i32, i32
  }
  func.func @transform_5(%arg0: i32, %arg1: i32) -> (i32, i32) {
    %c0_i32 = arith.constant 0 : i32
    %c0_i32_0 = arith.constant 0 : i32
    %c0_i32_1 = arith.constant 0 : i32
    return %c0_i32, %c0_i32_0 : i32, i32
  }
  func.func @transform_6(%arg0: i32, %arg1: i32) -> (i32, i32, i32) {
    %c0_i32 = arith.constant 0 : i32
    %c0_i32_0 = arith.constant 0 : i32
    %c0_i32_1 = arith.constant 0 : i32
    %c0_i32_2 = arith.constant 0 : i32
    return %c0_i32, %c0_i32_0, %c0_i32_1 : i32, i32, i32
  }
  func.func @transform_7(%arg0: i32, %arg1: i32) -> (i32, i32) {
    %c0_i32 = arith.constant 0 : i32
    %c0_i32_0 = arith.constant 0 : i32
    %c0_i32_1 = arith.constant 0 : i32
    return %c0_i32, %c0_i32_0 : i32, i32
  }
  func.func @transform_8(%arg0: i32, %arg1: i32) -> (i32, i32) {
    %c0_i32 = arith.constant 0 : i32
    %c0_i32_0 = arith.constant 0 : i32
    %c0_i32_1 = arith.constant 0 : i32
    return %c0_i32, %c0_i32_0 : i32, i32
  }
  func.func @transform_9(%arg0: i32, %arg1: i32) -> (i32, i32) {
    %c0_i32 = arith.constant 0 : i32
    %c0_i32_0 = arith.constant 0 : i32
    %c0_i32_1 = arith.constant 0 : i32
    return %c0_i32, %c0_i32_0 : i32, i32
  }
  func.func @transform_10(%arg0: i32, %arg1: i32) -> (i32, i32) {
    %c0_i32 = arith.constant 0 : i32
    %c0_i32_0 = arith.constant 0 : i32
    %c0_i32_1 = arith.constant 0 : i32
    return %c0_i32, %c0_i32_0 : i32, i32
  }
  func.func @transform_11(%arg0: i32, %arg1: i32) -> (i32, i32, i32, i32) {
    %c0_i32 = arith.constant 0 : i32
    %c0_i32_0 = arith.constant 0 : i32
    %c0_i32_1 = arith.constant 0 : i32
    return %arg0, %arg1, %c0_i32, %c0_i32_0 : i32, i32, i32, i32
  }
}

module attributes {stable_mosaic.version = 11 : i64} {
  func.func @_stage_kernel(%arg0: i32, %arg1: i32, %arg2: memref<1x8x16x128xbf16, #tpu.memory_space<vmem>>, %arg3: memref<1x1x16x128xbf16, #tpu.memory_space<vmem>>, %arg4: memref<1x1x16x128xbf16, #tpu.memory_space<vmem>>, %arg5: memref<128x128xbf16, #tpu.memory_space<vmem>>, %arg6: memref<1x128xf32, #tpu.memory_space<vmem>>, %arg7: memref<1x128xf32, #tpu.memory_space<vmem>>, %arg8: memref<3x384x128xbf16, #tpu.memory_space<vmem>>, %arg9: memref<1x128xf32, #tpu.memory_space<vmem>>, %arg10: memref<1x128xf32, #tpu.memory_space<vmem>>, %arg11: memref<1x128xf32, #tpu.memory_space<vmem>>, %arg12: memref<1x128xf32, #tpu.memory_space<vmem>>, %arg13: memref<1x8x16x128xbf16, #tpu.memory_space<vmem>>, %arg14: memref<10x16x384xbf16, #tpu.memory_space<vmem>>) attributes {dimension_semantics = [#tpu.dimension_semantics<parallel>, #tpu.dimension_semantics<parallel>], iteration_bounds = array<i64: 2, 2>, scalar_prefetch = 0 : i64, scratch_operands = 1 : i64, tpu.core_type = #tpu.core_type<tc>, window_params = [{transform_indices = @transform_0, window_bounds = array<i64: 1, 8, 16, 128>}, {transform_indices = @transform_1, window_bounds = array<i64: 1, 1, 16, 128>}, {transform_indices = @transform_2, window_bounds = array<i64: 1, 1, 16, 128>}, {pipeline_mode = #tpu.pipeline_mode<synchronous>, transform_indices = @transform_3, window_bounds = array<i64: 128, 128>}, {pipeline_mode = #tpu.pipeline_mode<synchronous>, transform_indices = @transform_4, window_bounds = array<i64: 1, 128>}, {pipeline_mode = #tpu.pipeline_mode<synchronous>, transform_indices = @transform_5, window_bounds = array<i64: 1, 128>}, {pipeline_mode = #tpu.pipeline_mode<synchronous>, transform_indices = @transform_6, window_bounds = array<i64: 3, 384, 128>}, {pipeline_mode = #tpu.pipeline_mode<synchronous>, transform_indices = @transform_7, window_bounds = array<i64: 1, 128>}, {pipeline_mode = #tpu.pipeline_mode<synchronous>, transform_indices = @transform_8, window_bounds = array<i64: 1, 128>}, {pipeline_mode = #tpu.pipeline_mode<synchronous>, transform_indices = @transform_9, window_bounds = array<i64: 1, 128>}, {pipeline_mode = #tpu.pipeline_mode<synchronous>, transform_indices = @transform_10, window_bounds = array<i64: 1, 128>}, {transform_indices = @transform_11, window_bounds = array<i64: 1, 8, 16, 128>}]} {
    %c0 = arith.constant 0 : index
    %c0_0 = arith.constant 0 : index
    %0 = vector.load %arg5[%c0, %c0_0] : memref<128x128xbf16, #tpu.memory_space<vmem>>, vector<128x128xbf16>
    %c0_1 = arith.constant 0 : index
    %c0_2 = arith.constant 0 : index
    %1 = vector.load %arg6[%c0_1, %c0_2] : memref<1x128xf32, #tpu.memory_space<vmem>>, vector<1x128xf32>
    %c0_3 = arith.constant 0 : index
    %c0_4 = arith.constant 0 : index
    %2 = vector.load %arg7[%c0_3, %c0_4] : memref<1x128xf32, #tpu.memory_space<vmem>>, vector<1x128xf32>
    %c0_5 = arith.constant 0 : index
    %c0_6 = arith.constant 0 : index
    %c0_7 = arith.constant 0 : index
    %c0_8 = arith.constant 0 : index
    %3 = vector.load %arg2[%c0_5, %c0_6, %c0_7, %c0_8] : memref<1x8x16x128xbf16, #tpu.memory_space<vmem>>, vector<1x8x16x128xbf16>
    %4 = vector.shape_cast %3 : vector<1x8x16x128xbf16> to vector<8x16x128xbf16>
    %5 = vector.shape_cast %4 : vector<8x16x128xbf16> to vector<128x128xbf16>
    %cst = arith.constant dense<0.000000e+00> : vector<128x128xf32>
    %6 = tpu.matmul %5, %0, %cst {dimension_numbers = #tpu.dot_dimension_numbers<[1], [0], [0], [1], [0, 0, 1, 1], [], []>} : vector<128x128xbf16>, vector<128x128xbf16>, vector<128x128xf32> -> vector<128x128xf32>
    %7 = vector.broadcast %1 : vector<1x128xf32> to vector<128x128xf32>
    %8 = arith.mulf %6, %7 : vector<128x128xf32>
    %9 = vector.broadcast %2 : vector<1x128xf32> to vector<128x128xf32>
    %10 = arith.addf %8, %9 : vector<128x128xf32>
    %cst_9 = arith.constant 2.000000e+01 : f32
    %11 = vector.broadcast %cst_9 : f32 to vector<128x128xf32>
    %12 = arith.minimumf %10, %11 : vector<128x128xf32>
    %13 = math.exp %12 : vector<128x128xf32>
    %cst_10 = arith.constant 1.000000e+00 : f32
    %14 = vector.broadcast %cst_10 : f32 to vector<128x128xf32>
    %15 = arith.addf %14, %13 : vector<128x128xf32>
    %cst_11 = arith.constant 1.000000e+00 : f32
    %16 = vector.broadcast %cst_11 : f32 to vector<128x128xf32>
    %17 = arith.addf %16, %13 : vector<128x128xf32>
    %18 = arith.mulf %15, %17 : vector<128x128xf32>
    %cst_12 = arith.constant 1.000000e+00 : f32
    %19 = vector.broadcast %cst_12 : f32 to vector<128x128xf32>
    %20 = arith.subf %18, %19 : vector<128x128xf32>
    %21 = arith.mulf %10, %20 : vector<128x128xf32>
    %cst_13 = arith.constant 1.000000e+00 : f32
    %22 = vector.broadcast %cst_13 : f32 to vector<128x128xf32>
    %23 = arith.addf %18, %22 : vector<128x128xf32>
    %24 = tpu.reciprocal %23 {approx = true} : vector<128x128xf32> -> vector<128x128xf32>
    %25 = arith.mulf %21, %24 : vector<128x128xf32>
    %26 = vector.shape_cast %25 : vector<128x128xf32> to vector<8x16x128xf32>
    %cst_14 = arith.constant 0.000000e+00 : f32
    %27 = vector.broadcast %cst_14 : f32 to vector<8x1x128xf32>
    %28 = vector.extract_strided_slice %26 {offsets = [0, 0, 0], sizes = [8, 15, 128], strides = [1, 1, 1]} : vector<8x16x128xf32> to vector<8x15x128xf32>
    %29 = tpu.concatenate %27, %28 in 1 : vector<8x1x128xf32>, vector<8x15x128xf32> -> vector<8x16x128xf32>
    %30 = vector.extract_strided_slice %26 {offsets = [0, 1, 0], sizes = [8, 15, 128], strides = [1, 1, 1]} : vector<8x16x128xf32> to vector<8x15x128xf32>
    %31 = tpu.concatenate %30, %27 in 1 : vector<8x15x128xf32>, vector<8x1x128xf32> -> vector<8x16x128xf32>
    %32 = tpu.concatenate %29, %26, %31 in 2 : vector<8x16x128xf32>, vector<8x16x128xf32>, vector<8x16x128xf32> -> vector<8x16x384xf32>
    %33 = arith.truncf %32 : vector<8x16x384xf32> to vector<8x16x384xbf16>
    %c1 = arith.constant 1 : index
    %c0_15 = arith.constant 0 : index
    %c0_16 = arith.constant 0 : index
    %34 = vector.load %arg14[%c1, %c0_15, %c0_16] : memref<10x16x384xbf16, #tpu.memory_space<vmem>>, vector<8x16x384xbf16>
    tpu.vector_store %arg14[%c1, %c0_15, %c0_16], %33 {strides = array<i32>} : memref<10x16x384xbf16, #tpu.memory_space<vmem>>, vector<8x16x384xbf16>,
    %c0_17 = arith.constant 0 : index
    %c0_18 = arith.constant 0 : index
    %c0_19 = arith.constant 0 : index
    %c0_20 = arith.constant 0 : index
    %35 = vector.load %arg3[%c0_17, %c0_18, %c0_19, %c0_20] : memref<1x1x16x128xbf16, #tpu.memory_space<vmem>>, vector<1x1x16x128xbf16>
    %36 = vector.shape_cast %35 : vector<1x1x16x128xbf16> to vector<1x16x128xbf16>
    %c0_i32 = arith.constant 0 : i32
    %37 = arith.cmpi sgt, %arg1, %c0_i32 : i32
    %38 = arith.extui %37 : i1 to i32
    %39 = arith.sitofp %38 : i32 to f32
    %40 = vector.shape_cast %36 : vector<1x16x128xbf16> to vector<16x128xbf16>
    %cst_21 = arith.constant dense<0.000000e+00> : vector<16x128xf32>
    %41 = tpu.matmul %40, %0, %cst_21 {dimension_numbers = #tpu.dot_dimension_numbers<[1], [0], [0], [1], [0, 0, 1, 1], [], []>} : vector<16x128xbf16>, vector<128x128xbf16>, vector<16x128xf32> -> vector<16x128xf32>
    %42 = vector.broadcast %1 : vector<1x128xf32> to vector<16x128xf32>
    %43 = arith.mulf %41, %42 : vector<16x128xf32>
    %44 = vector.broadcast %2 : vector<1x128xf32> to vector<16x128xf32>
    %45 = arith.addf %43, %44 : vector<16x128xf32>
    %cst_22 = arith.constant 2.000000e+01 : f32
    %46 = vector.broadcast %cst_22 : f32 to vector<16x128xf32>
    %47 = arith.minimumf %45, %46 : vector<16x128xf32>
    %48 = math.exp %47 : vector<16x128xf32>
    %cst_23 = arith.constant 1.000000e+00 : f32
    %49 = vector.broadcast %cst_23 : f32 to vector<16x128xf32>
    %50 = arith.addf %49, %48 : vector<16x128xf32>
    %cst_24 = arith.constant 1.000000e+00 : f32
    %51 = vector.broadcast %cst_24 : f32 to vector<16x128xf32>
    %52 = arith.addf %51, %48 : vector<16x128xf32>
    %53 = arith.mulf %50, %52 : vector<16x128xf32>
    %cst_25 = arith.constant 1.000000e+00 : f32
    %54 = vector.broadcast %cst_25 : f32 to vector<16x128xf32>
    %55 = arith.subf %53, %54 : vector<16x128xf32>
    %56 = arith.mulf %45, %55 : vector<16x128xf32>
    %cst_26 = arith.constant 1.000000e+00 : f32
    %57 = vector.broadcast %cst_26 : f32 to vector<16x128xf32>
    %58 = arith.addf %53, %57 : vector<16x128xf32>
    %59 = tpu.reciprocal %58 {approx = true} : vector<16x128xf32> -> vector<16x128xf32>
    %60 = arith.mulf %56, %59 : vector<16x128xf32>
    %61 = vector.shape_cast %60 : vector<16x128xf32> to vector<1x16x128xf32>
    %62 = vector.broadcast %39 : f32 to vector<1x16x128xf32>
    %63 = arith.mulf %61, %62 : vector<1x16x128xf32>
    %cst_27 = arith.constant 0.000000e+00 : f32
    %64 = vector.broadcast %cst_27 : f32 to vector<1x1x128xf32>
    %65 = vector.extract_strided_slice %63 {offsets = [0, 0, 0], sizes = [1, 15, 128], strides = [1, 1, 1]} : vector<1x16x128xf32> to vector<1x15x128xf32>
    %66 = tpu.concatenate %64, %65 in 1 : vector<1x1x128xf32>, vector<1x15x128xf32> -> vector<1x16x128xf32>
    %67 = vector.extract_strided_slice %63 {offsets = [0, 1, 0], sizes = [1, 15, 128], strides = [1, 1, 1]} : vector<1x16x128xf32> to vector<1x15x128xf32>
    %68 = tpu.concatenate %67, %64 in 1 : vector<1x15x128xf32>, vector<1x1x128xf32> -> vector<1x16x128xf32>
    %69 = tpu.concatenate %66, %63, %68 in 2 : vector<1x16x128xf32>, vector<1x16x128xf32>, vector<1x16x128xf32> -> vector<1x16x384xf32>
    %70 = arith.truncf %69 : vector<1x16x384xf32> to vector<1x16x384xbf16>
    %c0_28 = arith.constant 0 : index
    %c0_29 = arith.constant 0 : index
    %c0_30 = arith.constant 0 : index
    %71 = vector.load %arg14[%c0_28, %c0_29, %c0_30] : memref<10x16x384xbf16, #tpu.memory_space<vmem>>, vector<1x16x384xbf16>
    tpu.vector_store %arg14[%c0_28, %c0_29, %c0_30], %70 {strides = array<i32>} : memref<10x16x384xbf16, #tpu.memory_space<vmem>>, vector<1x16x384xbf16>,
    %c0_31 = arith.constant 0 : index
    %c0_32 = arith.constant 0 : index
    %c0_33 = arith.constant 0 : index
    %c0_34 = arith.constant 0 : index
    %72 = vector.load %arg4[%c0_31, %c0_32, %c0_33, %c0_34] : memref<1x1x16x128xbf16, #tpu.memory_space<vmem>>, vector<1x1x16x128xbf16>
    %73 = vector.shape_cast %72 : vector<1x1x16x128xbf16> to vector<1x16x128xbf16>
    %c1_i32 = arith.constant 1 : i32
    %74 = arith.cmpi slt, %arg1, %c1_i32 : i32
    %75 = arith.extui %74 : i1 to i32
    %76 = arith.sitofp %75 : i32 to f32
    %77 = vector.shape_cast %73 : vector<1x16x128xbf16> to vector<16x128xbf16>
    %cst_35 = arith.constant dense<0.000000e+00> : vector<16x128xf32>
    %78 = tpu.matmul %77, %0, %cst_35 {dimension_numbers = #tpu.dot_dimension_numbers<[1], [0], [0], [1], [0, 0, 1, 1], [], []>} : vector<16x128xbf16>, vector<128x128xbf16>, vector<16x128xf32> -> vector<16x128xf32>
    %79 = vector.broadcast %1 : vector<1x128xf32> to vector<16x128xf32>
    %80 = arith.mulf %78, %79 : vector<16x128xf32>
    %81 = vector.broadcast %2 : vector<1x128xf32> to vector<16x128xf32>
    %82 = arith.addf %80, %81 : vector<16x128xf32>
    %cst_36 = arith.constant 2.000000e+01 : f32
    %83 = vector.broadcast %cst_36 : f32 to vector<16x128xf32>
    %84 = arith.minimumf %82, %83 : vector<16x128xf32>
    %85 = math.exp %84 : vector<16x128xf32>
    %cst_37 = arith.constant 1.000000e+00 : f32
    %86 = vector.broadcast %cst_37 : f32 to vector<16x128xf32>
    %87 = arith.addf %86, %85 : vector<16x128xf32>
    %cst_38 = arith.constant 1.000000e+00 : f32
    %88 = vector.broadcast %cst_38 : f32 to vector<16x128xf32>
    %89 = arith.addf %88, %85 : vector<16x128xf32>
    %90 = arith.mulf %87, %89 : vector<16x128xf32>
    %cst_39 = arith.constant 1.000000e+00 : f32
    %91 = vector.broadcast %cst_39 : f32 to vector<16x128xf32>
    %92 = arith.subf %90, %91 : vector<16x128xf32>
    %93 = arith.mulf %82, %92 : vector<16x128xf32>
    %cst_40 = arith.constant 1.000000e+00 : f32
    %94 = vector.broadcast %cst_40 : f32 to vector<16x128xf32>
    %95 = arith.addf %90, %94 : vector<16x128xf32>
    %96 = tpu.reciprocal %95 {approx = true} : vector<16x128xf32> -> vector<16x128xf32>
    %97 = arith.mulf %93, %96 : vector<16x128xf32>
    %98 = vector.shape_cast %97 : vector<16x128xf32> to vector<1x16x128xf32>
    %99 = vector.broadcast %76 : f32 to vector<1x16x128xf32>
    %100 = arith.mulf %98, %99 : vector<1x16x128xf32>
    %cst_41 = arith.constant 0.000000e+00 : f32
    %101 = vector.broadcast %cst_41 : f32 to vector<1x1x128xf32>
    %102 = vector.extract_strided_slice %100 {offsets = [0, 0, 0], sizes = [1, 15, 128], strides = [1, 1, 1]} : vector<1x16x128xf32> to vector<1x15x128xf32>
    %103 = tpu.concatenate %101, %102 in 1 : vector<1x1x128xf32>, vector<1x15x128xf32> -> vector<1x16x128xf32>
    %104 = vector.extract_strided_slice %100 {offsets = [0, 1, 0], sizes = [1, 15, 128], strides = [1, 1, 1]} : vector<1x16x128xf32> to vector<1x15x128xf32>
    %105 = tpu.concatenate %104, %101 in 1 : vector<1x15x128xf32>, vector<1x1x128xf32> -> vector<1x16x128xf32>
    %106 = tpu.concatenate %103, %100, %105 in 2 : vector<1x16x128xf32>, vector<1x16x128xf32>, vector<1x16x128xf32> -> vector<1x16x384xf32>
    %107 = arith.truncf %106 : vector<1x16x384xf32> to vector<1x16x384xbf16>
    %c9 = arith.constant 9 : index
    %c0_42 = arith.constant 0 : index
    %c0_43 = arith.constant 0 : index
    %108 = vector.load %arg14[%c9, %c0_42, %c0_43] : memref<10x16x384xbf16, #tpu.memory_space<vmem>>, vector<1x16x384xbf16>
    tpu.vector_store %arg14[%c9, %c0_42, %c0_43], %107 {strides = array<i32>} : memref<10x16x384xbf16, #tpu.memory_space<vmem>>, vector<1x16x384xbf16>,
    %cst_44 = arith.constant 0.000000e+00 : f32
    %109 = vector.broadcast %cst_44 : f32 to vector<128x128xf32>
    %c0_45 = arith.constant 0 : index
    %c0_46 = arith.constant 0 : index
    %c0_47 = arith.constant 0 : index
    %110 = vector.load %arg14[%c0_45, %c0_46, %c0_47] : memref<10x16x384xbf16, #tpu.memory_space<vmem>>, vector<8x16x384xbf16>
    %111 = vector.shape_cast %110 : vector<8x16x384xbf16> to vector<128x384xbf16>
    %c0_48 = arith.constant 0 : index
    %c0_49 = arith.constant 0 : index
    %c0_50 = arith.constant 0 : index
    %112 = vector.load %arg8[%c0_48, %c0_49, %c0_50] : memref<3x384x128xbf16, #tpu.memory_space<vmem>>, vector<1x384x128xbf16>
    %113 = vector.shape_cast %112 : vector<1x384x128xbf16> to vector<384x128xbf16>
    %cst_51 = arith.constant dense<0.000000e+00> : vector<128x128xf32>
    %114 = tpu.matmul %111, %113, %cst_51 {dimension_numbers = #tpu.dot_dimension_numbers<[1], [0], [0], [1], [0, 0, 1, 1], [], []>} : vector<128x384xbf16>, vector<384x128xbf16>, vector<128x128xf32> -> vector<128x128xf32>
    %115 = arith.addf %109, %114 : vector<128x128xf32>
    %c1_52 = arith.constant 1 : index
    %c0_53 = arith.constant 0 : index
    %c0_54 = arith.constant 0 : index
    %116 = vector.load %arg14[%c1_52, %c0_53, %c0_54] : memref<10x16x384xbf16, #tpu.memory_space<vmem>>, vector<8x16x384xbf16>
    %117 = vector.shape_cast %116 : vector<8x16x384xbf16> to vector<128x384xbf16>
    %c1_55 = arith.constant 1 : index
    %c0_56 = arith.constant 0 : index
    %c0_57 = arith.constant 0 : index
    %118 = vector.load %arg8[%c1_55, %c0_56, %c0_57] : memref<3x384x128xbf16, #tpu.memory_space<vmem>>, vector<1x384x128xbf16>
    %119 = vector.shape_cast %118 : vector<1x384x128xbf16> to vector<384x128xbf16>
    %cst_58 = arith.constant dense<0.000000e+00> : vector<128x128xf32>
    %120 = tpu.matmul %117, %119, %cst_58 {dimension_numbers = #tpu.dot_dimension_numbers<[1], [0], [0], [1], [0, 0, 1, 1], [], []>} : vector<128x384xbf16>, vector<384x128xbf16>, vector<128x128xf32> -> vector<128x128xf32>
    %121 = arith.addf %115, %120 : vector<128x128xf32>
    %c2 = arith.constant 2 : index
    %c0_59 = arith.constant 0 : index
    %c0_60 = arith.constant 0 : index
    %122 = vector.load %arg14[%c2, %c0_59, %c0_60] : memref<10x16x384xbf16, #tpu.memory_space<vmem>>, vector<8x16x384xbf16>
    %123 = vector.shape_cast %122 : vector<8x16x384xbf16> to vector<128x384xbf16>
    %c2_61 = arith.constant 2 : index
    %c0_62 = arith.constant 0 : index
    %c0_63 = arith.constant 0 : index
    %124 = vector.load %arg8[%c2_61, %c0_62, %c0_63] : memref<3x384x128xbf16, #tpu.memory_space<vmem>>, vector<1x384x128xbf16>
    %125 = vector.shape_cast %124 : vector<1x384x128xbf16> to vector<384x128xbf16>
    %cst_64 = arith.constant dense<0.000000e+00> : vector<128x128xf32>
    %126 = tpu.matmul %123, %125, %cst_64 {dimension_numbers = #tpu.dot_dimension_numbers<[1], [0], [0], [1], [0, 0, 1, 1], [], []>} : vector<128x384xbf16>, vector<384x128xbf16>, vector<128x128xf32> -> vector<128x128xf32>
    %127 = arith.addf %121, %126 : vector<128x128xf32>
    %c0_65 = arith.constant 0 : index
    %c0_66 = arith.constant 0 : index
    %128 = vector.load %arg9[%c0_65, %c0_66] : memref<1x128xf32, #tpu.memory_space<vmem>>, vector<1x128xf32>
    %129 = vector.broadcast %128 : vector<1x128xf32> to vector<128x128xf32>
    %130 = arith.mulf %127, %129 : vector<128x128xf32>
    %c0_67 = arith.constant 0 : index
    %c0_68 = arith.constant 0 : index
    %131 = vector.load %arg10[%c0_67, %c0_68] : memref<1x128xf32, #tpu.memory_space<vmem>>, vector<1x128xf32>
    %132 = vector.broadcast %131 : vector<1x128xf32> to vector<128x128xf32>
    %133 = arith.addf %130, %132 : vector<128x128xf32>
    %cst_69 = arith.constant 2.000000e+01 : f32
    %134 = vector.broadcast %cst_69 : f32 to vector<128x128xf32>
    %135 = arith.minimumf %133, %134 : vector<128x128xf32>
    %136 = math.exp %135 : vector<128x128xf32>
    %cst_70 = arith.constant 1.000000e+00 : f32
    %137 = vector.broadcast %cst_70 : f32 to vector<128x128xf32>
    %138 = arith.addf %137, %136 : vector<128x128xf32>
    %cst_71 = arith.constant 1.000000e+00 : f32
    %139 = vector.broadcast %cst_71 : f32 to vector<128x128xf32>
    %140 = arith.addf %139, %136 : vector<128x128xf32>
    %141 = arith.mulf %138, %140 : vector<128x128xf32>
    %cst_72 = arith.constant 1.000000e+00 : f32
    %142 = vector.broadcast %cst_72 : f32 to vector<128x128xf32>
    %143 = arith.subf %141, %142 : vector<128x128xf32>
    %144 = arith.mulf %133, %143 : vector<128x128xf32>
    %cst_73 = arith.constant 1.000000e+00 : f32
    %145 = vector.broadcast %cst_73 : f32 to vector<128x128xf32>
    %146 = arith.addf %141, %145 : vector<128x128xf32>
    %147 = tpu.reciprocal %146 {approx = true} : vector<128x128xf32> -> vector<128x128xf32>
    %148 = arith.mulf %144, %147 : vector<128x128xf32>
    %149 = vector.shape_cast %148 : vector<128x128xf32> to vector<8x16x128xf32>
    %150 = arith.truncf %149 : vector<8x16x128xf32> to vector<8x16x128xbf16>
    %c0_74 = arith.constant 0 : index
    %c0_75 = arith.constant 0 : index
    %c0_76 = arith.constant 0 : index
    %c0_77 = arith.constant 0 : index
    %151 = vector.load %arg13[%c0_74, %c0_75, %c0_76, %c0_77] : memref<1x8x16x128xbf16, #tpu.memory_space<vmem>>, vector<1x8x16x128xbf16>
    %152 = vector.shape_cast %151 : vector<1x8x16x128xbf16> to vector<8x16x128xbf16>
    %153 = vector.shape_cast %150 : vector<8x16x128xbf16> to vector<1x8x16x128xbf16>
    tpu.vector_store %arg13[%c0_74, %c0_75, %c0_76, %c0_77], %153 {strides = array<i32>} : memref<1x8x16x128xbf16, #tpu.memory_space<vmem>>, vector<1x8x16x128xbf16>,
    return
  }
  func.func @transform_0(%arg0: i32, %arg1: i32) -> (i32, i32, i32, i32) {
    %c0_i32 = arith.constant 0 : i32
    %c0_i32_0 = arith.constant 0 : i32
    %c0_i32_1 = arith.constant 0 : i32
    return %arg0, %arg1, %c0_i32, %c0_i32_0 : i32, i32, i32, i32
  }
  func.func @transform_1(%arg0: i32, %arg1: i32) -> (i32, i32, i32, i32) {
    %c8_i32 = arith.constant 8 : i32
    %0 = arith.muli %arg1, %c8_i32 : i32
    %c1_i32 = arith.constant 1 : i32
    %1 = arith.subi %0, %c1_i32 : i32
    %c0_i32 = arith.constant 0 : i32
    %2 = arith.maxsi %1, %c0_i32 : i32
    %c0_i32_0 = arith.constant 0 : i32
    %c0_i32_1 = arith.constant 0 : i32
    %c0_i32_2 = arith.constant 0 : i32
    return %arg0, %2, %c0_i32_0, %c0_i32_1 : i32, i32, i32, i32
  }
  func.func @transform_2(%arg0: i32, %arg1: i32) -> (i32, i32, i32, i32) {
    %c8_i32 = arith.constant 8 : i32
    %0 = arith.muli %arg1, %c8_i32 : i32
    %c8_i32_0 = arith.constant 8 : i32
    %1 = arith.addi %0, %c8_i32_0 : i32
    %c15_i32 = arith.constant 15 : i32
    %2 = arith.minsi %1, %c15_i32 : i32
    %c0_i32 = arith.constant 0 : i32
    %c0_i32_1 = arith.constant 0 : i32
    %c0_i32_2 = arith.constant 0 : i32
    return %arg0, %2, %c0_i32, %c0_i32_1 : i32, i32, i32, i32
  }
  func.func @transform_3(%arg0: i32, %arg1: i32) -> (i32, i32) {
    %c0_i32 = arith.constant 0 : i32
    %c0_i32_0 = arith.constant 0 : i32
    %c0_i32_1 = arith.constant 0 : i32
    return %c0_i32, %c0_i32_0 : i32, i32
  }
  func.func @transform_4(%arg0: i32, %arg1: i32) -> (i32, i32) {
    %c0_i32 = arith.constant 0 : i32
    %c0_i32_0 = arith.constant 0 : i32
    %c0_i32_1 = arith.constant 0 : i32
    return %c0_i32, %c0_i32_0 : i32, i32
  }
  func.func @transform_5(%arg0: i32, %arg1: i32) -> (i32, i32) {
    %c0_i32 = arith.constant 0 : i32
    %c0_i32_0 = arith.constant 0 : i32
    %c0_i32_1 = arith.constant 0 : i32
    return %c0_i32, %c0_i32_0 : i32, i32
  }
  func.func @transform_6(%arg0: i32, %arg1: i32) -> (i32, i32, i32) {
    %c0_i32 = arith.constant 0 : i32
    %c0_i32_0 = arith.constant 0 : i32
    %c0_i32_1 = arith.constant 0 : i32
    %c0_i32_2 = arith.constant 0 : i32
    return %c0_i32, %c0_i32_0, %c0_i32_1 : i32, i32, i32
  }
  func.func @transform_7(%arg0: i32, %arg1: i32) -> (i32, i32) {
    %c0_i32 = arith.constant 0 : i32
    %c0_i32_0 = arith.constant 0 : i32
    %c0_i32_1 = arith.constant 0 : i32
    return %c0_i32, %c0_i32_0 : i32, i32
  }
  func.func @transform_8(%arg0: i32, %arg1: i32) -> (i32, i32) {
    %c0_i32 = arith.constant 0 : i32
    %c0_i32_0 = arith.constant 0 : i32
    %c0_i32_1 = arith.constant 0 : i32
    return %c0_i32, %c0_i32_0 : i32, i32
  }
  func.func @transform_9(%arg0: i32, %arg1: i32) -> (i32, i32) {
    %c0_i32 = arith.constant 0 : i32
    %c0_i32_0 = arith.constant 0 : i32
    %c0_i32_1 = arith.constant 0 : i32
    return %c0_i32, %c0_i32_0 : i32, i32
  }
  func.func @transform_10(%arg0: i32, %arg1: i32) -> (i32, i32) {
    %c0_i32 = arith.constant 0 : i32
    %c0_i32_0 = arith.constant 0 : i32
    %c0_i32_1 = arith.constant 0 : i32
    return %c0_i32, %c0_i32_0 : i32, i32
  }
  func.func @transform_11(%arg0: i32, %arg1: i32) -> (i32, i32, i32, i32) {
    %c0_i32 = arith.constant 0 : i32
    %c0_i32_0 = arith.constant 0 : i32
    %c0_i32_1 = arith.constant 0 : i32
    return %arg0, %arg1, %c0_i32, %c0_i32_0 : i32, i32, i32, i32
  }
}

module attributes {stable_mosaic.version = 11 : i64} {
  func.func @_tail_kernel(%arg0: i32, %arg1: memref<256x128xbf16, #tpu.memory_space<vmem>>, %arg2: memref<256x128xbf16, #tpu.memory_space<vmem>>, %arg3: memref<128x128xbf16, #tpu.memory_space<vmem>>, %arg4: memref<1x128xf32, #tpu.memory_space<vmem>>, %arg5: memref<1x128xf32, #tpu.memory_space<vmem>>, %arg6: memref<1x128xf32, #tpu.memory_space<vmem>>, %arg7: memref<1x128xf32, #tpu.memory_space<vmem>>, %arg8: memref<128x128xbf16, #tpu.memory_space<vmem>>, %arg9: memref<128x128xbf16, #tpu.memory_space<vmem>>, %arg10: memref<1x128xf32, #tpu.memory_space<vmem>>, %arg11: memref<1x128xf32, #tpu.memory_space<vmem>>, %arg12: memref<256x128xf32, #tpu.memory_space<vmem>>) attributes {dimension_semantics = [#tpu.dimension_semantics<parallel>], iteration_bounds = array<i64: 2>, scalar_prefetch = 0 : i64, scratch_operands = 0 : i64, tpu.core_type = #tpu.core_type<tc>, window_params = [{transform_indices = @transform_0, window_bounds = array<i64: 256, 128>}, {transform_indices = @transform_1, window_bounds = array<i64: 256, 128>}, {pipeline_mode = #tpu.pipeline_mode<synchronous>, transform_indices = @transform_2, window_bounds = array<i64: 128, 128>}, {pipeline_mode = #tpu.pipeline_mode<synchronous>, transform_indices = @transform_3, window_bounds = array<i64: 1, 128>}, {pipeline_mode = #tpu.pipeline_mode<synchronous>, transform_indices = @transform_4, window_bounds = array<i64: 1, 128>}, {pipeline_mode = #tpu.pipeline_mode<synchronous>, transform_indices = @transform_5, window_bounds = array<i64: 1, 128>}, {pipeline_mode = #tpu.pipeline_mode<synchronous>, transform_indices = @transform_6, window_bounds = array<i64: 1, 128>}, {pipeline_mode = #tpu.pipeline_mode<synchronous>, transform_indices = @transform_7, window_bounds = array<i64: 128, 128>}, {pipeline_mode = #tpu.pipeline_mode<synchronous>, transform_indices = @transform_8, window_bounds = array<i64: 128, 128>}, {pipeline_mode = #tpu.pipeline_mode<synchronous>, transform_indices = @transform_9, window_bounds = array<i64: 1, 128>}, {pipeline_mode = #tpu.pipeline_mode<synchronous>, transform_indices = @transform_10, window_bounds = array<i64: 1, 128>}, {transform_indices = @transform_11, window_bounds = array<i64: 256, 128>}]} {
    %c0 = arith.constant 0 : index
    %c0_0 = arith.constant 0 : index
    %0 = vector.load %arg2[%c0, %c0_0] : memref<256x128xbf16, #tpu.memory_space<vmem>>, vector<256x128xbf16>
    %c0_1 = arith.constant 0 : index
    %c0_2 = arith.constant 0 : index
    %1 = vector.load %arg3[%c0_1, %c0_2] : memref<128x128xbf16, #tpu.memory_space<vmem>>, vector<128x128xbf16>
    %cst = arith.constant dense<0.000000e+00> : vector<256x128xf32>
    %2 = tpu.matmul %0, %1, %cst {dimension_numbers = #tpu.dot_dimension_numbers<[1], [0], [0], [1], [0, 0, 1, 1], [], []>} : vector<256x128xbf16>, vector<128x128xbf16>, vector<256x128xf32> -> vector<256x128xf32>
    %c0_3 = arith.constant 0 : index
    %c0_4 = arith.constant 0 : index
    %3 = vector.load %arg4[%c0_3, %c0_4] : memref<1x128xf32, #tpu.memory_space<vmem>>, vector<1x128xf32>
    %4 = vector.broadcast %3 : vector<1x128xf32> to vector<256x128xf32>
    %5 = arith.mulf %2, %4 : vector<256x128xf32>
    %c0_5 = arith.constant 0 : index
    %c0_6 = arith.constant 0 : index
    %6 = vector.load %arg5[%c0_5, %c0_6] : memref<1x128xf32, #tpu.memory_space<vmem>>, vector<1x128xf32>
    %7 = vector.broadcast %6 : vector<1x128xf32> to vector<256x128xf32>
    %8 = arith.addf %5, %7 : vector<256x128xf32>
    %cst_7 = arith.constant 2.000000e+01 : f32
    %9 = vector.broadcast %cst_7 : f32 to vector<256x128xf32>
    %10 = arith.minimumf %8, %9 : vector<256x128xf32>
    %11 = math.exp %10 : vector<256x128xf32>
    %cst_8 = arith.constant 1.000000e+00 : f32
    %12 = vector.broadcast %cst_8 : f32 to vector<256x128xf32>
    %13 = arith.addf %12, %11 : vector<256x128xf32>
    %cst_9 = arith.constant 1.000000e+00 : f32
    %14 = vector.broadcast %cst_9 : f32 to vector<256x128xf32>
    %15 = arith.addf %14, %11 : vector<256x128xf32>
    %16 = arith.mulf %13, %15 : vector<256x128xf32>
    %cst_10 = arith.constant 1.000000e+00 : f32
    %17 = vector.broadcast %cst_10 : f32 to vector<256x128xf32>
    %18 = arith.subf %16, %17 : vector<256x128xf32>
    %19 = arith.mulf %8, %18 : vector<256x128xf32>
    %cst_11 = arith.constant 1.000000e+00 : f32
    %20 = vector.broadcast %cst_11 : f32 to vector<256x128xf32>
    %21 = arith.addf %16, %20 : vector<256x128xf32>
    %22 = tpu.reciprocal %21 {approx = true} : vector<256x128xf32> -> vector<256x128xf32>
    %23 = arith.mulf %19, %22 : vector<256x128xf32>
    %24 = arith.truncf %23 : vector<256x128xf32> to vector<256x128xbf16>
    %c0_12 = arith.constant 0 : index
    %c0_13 = arith.constant 0 : index
    %25 = vector.load %arg1[%c0_12, %c0_13] : memref<256x128xbf16, #tpu.memory_space<vmem>>, vector<256x128xbf16>
    %c0_14 = arith.constant 0 : index
    %c0_15 = arith.constant 0 : index
    %26 = vector.load %arg8[%c0_14, %c0_15] : memref<128x128xbf16, #tpu.memory_space<vmem>>, vector<128x128xbf16>
    %cst_16 = arith.constant dense<0.000000e+00> : vector<256x128xf32>
    %27 = tpu.matmul %25, %26, %cst_16 {dimension_numbers = #tpu.dot_dimension_numbers<[1], [0], [0], [1], [0, 0, 1, 1], [], []>} : vector<256x128xbf16>, vector<128x128xbf16>, vector<256x128xf32> -> vector<256x128xf32>
    %c0_17 = arith.constant 0 : index
    %c0_18 = arith.constant 0 : index
    %28 = vector.load %arg9[%c0_17, %c0_18] : memref<128x128xbf16, #tpu.memory_space<vmem>>, vector<128x128xbf16>
    %cst_19 = arith.constant dense<0.000000e+00> : vector<256x128xf32>
    %29 = tpu.matmul %24, %28, %cst_19 {dimension_numbers = #tpu.dot_dimension_numbers<[1], [0], [0], [1], [0, 0, 1, 1], [], []>} : vector<256x128xbf16>, vector<128x128xbf16>, vector<256x128xf32> -> vector<256x128xf32>
    %30 = arith.addf %27, %29 : vector<256x128xf32>
    %c0_20 = arith.constant 0 : index
    %c0_21 = arith.constant 0 : index
    %31 = vector.load %arg10[%c0_20, %c0_21] : memref<1x128xf32, #tpu.memory_space<vmem>>, vector<1x128xf32>
    %32 = vector.broadcast %31 : vector<1x128xf32> to vector<256x128xf32>
    %33 = arith.mulf %30, %32 : vector<256x128xf32>
    %c0_22 = arith.constant 0 : index
    %c0_23 = arith.constant 0 : index
    %34 = vector.load %arg11[%c0_22, %c0_23] : memref<1x128xf32, #tpu.memory_space<vmem>>, vector<1x128xf32>
    %35 = vector.broadcast %34 : vector<1x128xf32> to vector<256x128xf32>
    %36 = arith.addf %33, %35 : vector<256x128xf32>
    %cst_24 = arith.constant 2.000000e+01 : f32
    %37 = vector.broadcast %cst_24 : f32 to vector<256x128xf32>
    %38 = arith.minimumf %36, %37 : vector<256x128xf32>
    %39 = math.exp %38 : vector<256x128xf32>
    %cst_25 = arith.constant 1.000000e+00 : f32
    %40 = vector.broadcast %cst_25 : f32 to vector<256x128xf32>
    %41 = arith.addf %40, %39 : vector<256x128xf32>
    %cst_26 = arith.constant 1.000000e+00 : f32
    %42 = vector.broadcast %cst_26 : f32 to vector<256x128xf32>
    %43 = arith.addf %42, %39 : vector<256x128xf32>
    %44 = arith.mulf %41, %43 : vector<256x128xf32>
    %cst_27 = arith.constant 1.000000e+00 : f32
    %45 = vector.broadcast %cst_27 : f32 to vector<256x128xf32>
    %46 = arith.subf %44, %45 : vector<256x128xf32>
    %47 = arith.mulf %36, %46 : vector<256x128xf32>
    %cst_28 = arith.constant 1.000000e+00 : f32
    %48 = vector.broadcast %cst_28 : f32 to vector<256x128xf32>
    %49 = arith.addf %44, %48 : vector<256x128xf32>
    %50 = tpu.reciprocal %49 {approx = true} : vector<256x128xf32> -> vector<256x128xf32>
    %51 = arith.mulf %47, %50 : vector<256x128xf32>
    %c0_29 = arith.constant 0 : index
    %c0_30 = arith.constant 0 : index
    %52 = vector.load %arg12[%c0_29, %c0_30] : memref<256x128xf32, #tpu.memory_space<vmem>>, vector<256x128xf32>
    tpu.vector_store %arg12[%c0_29, %c0_30], %51 {strides = array<i32>} : memref<256x128xf32, #tpu.memory_space<vmem>>, vector<256x128xf32>,
    return
  }
  func.func @transform_0(%arg0: i32) -> (i32, i32) {
    %c0_i32 = arith.constant 0 : i32
    %c0_i32_0 = arith.constant 0 : i32
    return %arg0, %c0_i32 : i32, i32
  }
  func.func @transform_1(%arg0: i32) -> (i32, i32) {
    %c0_i32 = arith.constant 0 : i32
    %c0_i32_0 = arith.constant 0 : i32
    return %arg0, %c0_i32 : i32, i32
  }
  func.func @transform_2(%arg0: i32) -> (i32, i32) {
    %c0_i32 = arith.constant 0 : i32
    %c0_i32_0 = arith.constant 0 : i32
    %c0_i32_1 = arith.constant 0 : i32
    return %c0_i32, %c0_i32_0 : i32, i32
  }
  func.func @transform_3(%arg0: i32) -> (i32, i32) {
    %c0_i32 = arith.constant 0 : i32
    %c0_i32_0 = arith.constant 0 : i32
    %c0_i32_1 = arith.constant 0 : i32
    return %c0_i32, %c0_i32_0 : i32, i32
  }
  func.func @transform_4(%arg0: i32) -> (i32, i32) {
    %c0_i32 = arith.constant 0 : i32
    %c0_i32_0 = arith.constant 0 : i32
    %c0_i32_1 = arith.constant 0 : i32
    return %c0_i32, %c0_i32_0 : i32, i32
  }
  func.func @transform_5(%arg0: i32) -> (i32, i32) {
    %c0_i32 = arith.constant 0 : i32
    %c0_i32_0 = arith.constant 0 : i32
    %c0_i32_1 = arith.constant 0 : i32
    return %c0_i32, %c0_i32_0 : i32, i32
  }
  func.func @transform_6(%arg0: i32) -> (i32, i32) {
    %c0_i32 = arith.constant 0 : i32
    %c0_i32_0 = arith.constant 0 : i32
    %c0_i32_1 = arith.constant 0 : i32
    return %c0_i32, %c0_i32_0 : i32, i32
  }
  func.func @transform_7(%arg0: i32) -> (i32, i32) {
    %c0_i32 = arith.constant 0 : i32
    %c0_i32_0 = arith.constant 0 : i32
    %c0_i32_1 = arith.constant 0 : i32
    return %c0_i32, %c0_i32_0 : i32, i32
  }
  func.func @transform_8(%arg0: i32) -> (i32, i32) {
    %c0_i32 = arith.constant 0 : i32
    %c0_i32_0 = arith.constant 0 : i32
    %c0_i32_1 = arith.constant 0 : i32
    return %c0_i32, %c0_i32_0 : i32, i32
  }
  func.func @transform_9(%arg0: i32) -> (i32, i32) {
    %c0_i32 = arith.constant 0 : i32
    %c0_i32_0 = arith.constant 0 : i32
    %c0_i32_1 = arith.constant 0 : i32
    return %c0_i32, %c0_i32_0 : i32, i32
  }
  func.func @transform_10(%arg0: i32) -> (i32, i32) {
    %c0_i32 = arith.constant 0 : i32
    %c0_i32_0 = arith.constant 0 : i32
    %c0_i32_1 = arith.constant 0 : i32
    return %c0_i32, %c0_i32_0 : i32, i32
  }
  func.func @transform_11(%arg0: i32) -> (i32, i32) {
    %c0_i32 = arith.constant 0 : i32
    %c0_i32_0 = arith.constant 0 : i32
    return %arg0, %c0_i32 : i32, i32
  }
}

</mosaic_0001>

<bundles_post_ra>
// kernel: _lambda_.7
= control target key start
LH: loop header
LB: loop body
LE: loop exit
PB: predicated region body
PF: predicated region fallthrough
CT: control target
= control target key end

     0   :  { %s2748_s17 = smov 0   ;;  %s3390_s0 = inlined_call_operand.vmem [shape: bf16[512,128], index: 0, kind: input, shape index: {}]   ;;  %s3391_s1 = inlined_call_operand.vmem [shape: bf16[512,128], index: 1, kind: input, shape index: {}]   ;;  %s3392_s2 = inlined_call_operand.vmem [shape: bf16[128,128], index: 2, kind: input, shape index: {}]   ;;  %s3393_s3 = inlined_call_operand.vmem [shape: f32[1,128], index: 3, kind: input, shape index: {}]   ;;  %s3394_s4 = inlined_call_operand.vmem [shape: f32[1,128], index: 4, kind: input, shape index: {}]   ;;  %s3395_s5 = inlined_call_operand.vmem [shape: f32[1,128], index: 5, kind: input, shape index: {}]   ;;  %s3396_s6 = inlined_call_operand.vmem [shape: f32[1,128], index: 6, kind: input, shape index: {}]   ;;  %s3397_s7 = inlined_call_operand.vmem [shape: bf16[128,128], index: 7, kind: input, shape index: {}]   ;;  %s3398_s8 = inlined_call_operand.vmem [shape: bf16[128,128], index: 8, kind: input, shape index: {}]   ;;  %s3399_s9 = inlined_call_operand.vmem [shape: f32[1,128], index: 9, kind: input, shape index: {}]   ;;  %s3400_s10 = inlined_call_operand.vmem [shape: f32[1,128], index: 10, kind: input, shape index: {}]   ;;  %s3401_s11 = inlined_call_operand.vmem [shape: f32[512,128], index: 11, kind: output, shape index: {}]  }
   0x1 LB: > { %s2027_s5 = sadd.s32 4294967295, %s2686_s17   ;;  %p2031_p0 = scmp.ge.s32.totalorder %s2686_s17, 1  ;;  %s2686_s17 = sphi %s2748_s17, %s21_s17  }
   0x2   : > { %p349_p1 = scmp.lt.s32.totalorder %s2686_s17, 3 }
   0x4   : > { %p350_p2 = pnand %p2031_p0, %p349_p1 }
   0x5   : > { %s2032_s25 = sshll.u32 (!%p350_p2), %s2027_s5, 5 }
   0x6   : > { %353 = sbr.rel (%p350_p2) target bundleno = 553 (0x229), region = 64  ;;  %p395_p3 = scmp.lt.s32.totalorder (!%p350_p2), %s2032_s25, 63 }
   0xb   : > { %v2351_v0 = vld [vmem:[%s3392_s2 + $0x38] sm:$0xff]  ;;  %v2350_v1 = vld [vmem:[%s3392_s2 + $0x30] sm:$0xff]  ;;  %v2349_v2 = vld [vmem:[%s3392_s2 + $0x28] sm:$0xff]  ;;  %s3403_s25 = smov (!%p395_p3, %s2032_s25), 63 }
   0xc   : > { %604 = vmatpush.bf16.msra.mxu0 %v2351_v0  ;;  %2384 = vmatpush.bf16.msra.mxu3 %v2351_v0  ;;  %v2348_v3 = vld [vmem:[%s3392_s2 + $0x20] sm:$0xff]  ;;  %v2347_v4 = vld [vmem:[%s3392_s2 + $0x18] sm:$0xff]  ;;  %v2346_v5 = vld [vmem:[%s3392_s2 + $0x10] sm:$0xff]  ;;  %s2033_s13 = sshll.u32 %s3403_s25, 2  ;;  %s2037_s30 = sshll.u32 %s3403_s25, 3 }
   0xd   : > { %v2345_v6 = vld [vmem:[%s3392_s2 + $0x8] sm:$0xff]  ;;  %v2344_v7 = vld [vmem:[%s3392_s2] sm:$0xff]  ;;  %s2788_s6 = scalar_lea.vmem %s3391_s1, %s2033_s13  ;;  %v2375_v18 = vld [vmem:[%s3397_s7 + $0x38] sm:$0xff]  ;;  %s2863_s28 = scalar_lea.vmem %s3390_s0, %s2033_s13 }
   0xe   : > { %v2328_v8 = vld [vmem:[%s2788_s6] sm:$0xff]  ;;  %v2329_v10 = vld [vmem:[%s2788_s6 + $0x8] sm:$0xff]  ;;  %v2330_v12 = vld [vmem:[%s2788_s6 + $0x10] sm:$0xff]  ;;  %1446 = vmatpush.bf16.msra.mxu2 %v2375_v18  ;;  %s3146_s15 = scalar_lea.vmem %s3401_s11, %s2037_s30 }
   0xf   : > { %v2340_v9 = vld [vmem:[%s2788_s6 + $0x60] sm:$0xff]  ;;  %v2341_v11 = vld [vmem:[%s2788_s6 + $0x68] sm:$0xff]  ;;  %v2342_v13 = vld [vmem:[%s2788_s6 + $0x70] sm:$0xff] }
  0x10   : > { %605 = vmatpush.bf16.msra.mxu0 %v2350_v1  ;;  %2385 = vmatpush.bf16.msra.mxu3 %v2350_v1  ;;  %v2331_v14 = vld [vmem:[%s2788_s6 + $0x18] sm:$0xff]  ;;  %v2332_v16 = vld [vmem:[%s2788_s6 + $0x20] sm:$0xff]  ;;  %v2333_v17 = vld [vmem:[%s2788_s6 + $0x28] sm:$0xff] }
  0x11   : > { %v2343_v15 = vld [vmem:[%s2788_s6 + $0x78] sm:$0xff]  ;;  %v2806_v19 = vld [vmem:[%s3397_s7 + $0x30] sm:$0xff]  ;;  %v2813_v21 = vld [vmem:[%s3397_s7 + $0x28] sm:$0xff] }
  0x12   : > { %v2334_v20 = vld [vmem:[%s2788_s6 + $0x30] sm:$0xff]  ;;  %1447 = vmatpush.bf16.msra.mxu2 %v2806_v19  ;;  %v2819_v22 = vld [vmem:[%s3397_s7 + $0x20] sm:$0xff]  ;;  %v2383_v23 = vld [vmem:[%s3398_s8 + $0x38] sm:$0xff] }
  0x13   : > { %1213 = vmatpush.bf16.msra.mxu1 %v2383_v23  ;;  %v2828_v24 = vld [vmem:[%s3397_s7 + $0x18] sm:$0xff]  ;;  %v2382_v25 = vld [vmem:[%s3398_s8 + $0x30] sm:$0xff]  ;;  %v2381_v28 = vld [vmem:[%s3398_s8 + $0x28] sm:$0xff] }
  0x14   : > { %606 = vmatpush.bf16.msra.mxu0 %v2349_v2  ;;  %2386 = vmatpush.bf16.msra.mxu3 %v2349_v2  ;;  %v2837_v26 = vld [vmem:[%s3397_s7 + $0x10] sm:$0xff]  ;;  %v2335_v27 = vld [vmem:[%s2788_s6 + $0x38] sm:$0xff]  ;;  %v2847_v29 = vld [vmem:[%s3397_s7 + $0x8] sm:$0xff] }
  0x15   : > { %v2380_v30 = vld [vmem:[%s3398_s8 + $0x20] sm:$0xff]  ;;  %v2379_v32 = vld [vmem:[%s3398_s8 + $0x18] sm:$0xff]  ;;  %v2378_v34 = vld [vmem:[%s3398_s8 + $0x10] sm:$0xff] }
  0x16   : > { %1448 = vmatpush.bf16.msra.mxu2 %v2813_v21  ;;  %v2856_v31 = vld [vmem:[%s3397_s7] sm:$0xff]  ;;  %v2377_v39 = vld [vmem:[%s3398_s8 + $0x8] sm:$0xff] }
  0x17   : > { %1214 = vmatpush.bf16.msra.mxu1 %v2382_v25  ;;  %v2352_v33 = vld [vmem:[%s2863_s28] sm:$0xff]  ;;  %v2353_v50 = vld [vmem:[%s2863_s28 + $0x8] sm:$0xff] }
  0x18   : > { %607 = vmatpush.bf16.msra.mxu0 %v2348_v3  ;;  %2387 = vmatpush.bf16.msra.mxu3 %v2348_v3  ;;  %v2876_v35 = vld [vmem:[%s3393_s3] ss:$0 sm:$0xff]  ;;  %v2337_v59 = vld [vmem:[%s2788_s6 + $0x48] sm:$0xff] }
  0x19   : > { %v2881_v36 = vld [vmem:[%s3394_s4] ss:$0 sm:$0xff] }
  0x1a   : > { %1449 = vmatpush.bf16.msra.mxu2 %v2819_v22  ;;  %v2336_v37 = vld [vmem:[%s2788_s6 + $0x40] sm:$0xff] }
  0x1b   : > { %1215 = vmatpush.bf16.msra.mxu1 %v2381_v28  ;;  %v2376_v42 = vld [vmem:[%s3398_s8] sm:$0xff] }
  0x1c   : > { %608 = vmatpush.bf16.msra.mxu0 %v2347_v4  ;;  %2388 = vmatpush.bf16.msra.mxu3 %v2347_v4 }
  0x1e   : > { %1450 = vmatpush.bf16.msra.mxu2 %v2828_v24 }
  0x1f   : > { %1216 = vmatpush.bf16.msra.mxu1 %v2380_v30 }
  0x20   : > { %609 = vmatpush.bf16.msra.mxu0 %v2346_v5  ;;  %2389 = vmatpush.bf16.msra.mxu3 %v2346_v5 }
  0x22   : > { %1451 = vmatpush.bf16.msra.mxu2 %v2837_v26 }
  0x23   : > { %1217 = vmatpush.bf16.msra.mxu1 %v2379_v32 }
  0x24   : > { %610 = vmatpush.bf16.msra.mxu0 %v2345_v6  ;;  %2390 = vmatpush.bf16.msra.mxu3 %v2345_v6 }
  0x26   : > { %1452 = vmatpush.bf16.msra.mxu2 %v2847_v29 }
  0x27   : > { %1218 = vmatpush.bf16.msra.mxu1 %v2378_v34 }
  0x28   : > { %611 = vmatpush.bf16.msra.mxu0 %v2344_v7  ;;  %2391 = vmatpush.bf16.msra.mxu3 %v2344_v7 }
  0x2a   : > { %1453 = vmatpush.bf16.msra.mxu2 %v2856_v31 }
  0x2b   : > { %612 = vmatmul.bf16.vlgmr.msra.gmra.mxu0 %v2328_v8  ;;  %672 = vmatmul.bf16.vlgmr.msra.gmra.mxu3 %v2340_v9 }
  0x2c   : > { %2392 = vmatpush.bf16.msrb.mxu3 %v2383_v23  ;;  %1219 = vmatpush.bf16.msra.mxu1 %v2377_v39 }
  0x2d   : > { %1454 = vmatmul.bf16.vlgmr.msra.gmra.mxu2 %v2352_v33 }
  0x30   : > { %2393 = vmatpush.bf16.msrb.mxu3 %v2382_v25  ;;  %1220 = vmatpush.bf16.msra.mxu1 %v2376_v42 }
  0x34   : > { %2394 = vmatpush.bf16.msrb.mxu3 %v2381_v28 }
  0x38   : > { %2395 = vmatpush.bf16.msrb.mxu3 %v2380_v30 }
  0x3b   : > { %617 = vmatmul.bf16.gmra.mxu0 %v2329_v10  ;;  %677 = vmatmul.bf16.gmra.mxu3 %v2341_v11 }
  0x3c   : > { %2396 = vmatpush.bf16.msrb.mxu3 %v2379_v32 }
  0x3d   : > { %1459 = vmatmul.bf16.gmra.mxu2 %v2353_v50 }
  0x40   : > { %2397 = vmatpush.bf16.msrb.mxu3 %v2378_v34 }
  0x44   : > { %2398 = vmatpush.bf16.msrb.mxu3 %v2377_v39 }
  0x48   : > { %2399 = vmatpush.bf16.msrb.mxu3 %v2376_v42 }
  0x4b   : > { %622 = vmatmul.bf16.gmra.mxu0 %v2330_v12  ;;  %682 = vmatmul.bf16.gmra.mxu3 %v2342_v13 }
  0x4c   : > { %2400 = vmatpush.bf16.msra.mxu3 %v2375_v18 }
  0x50   : > { %2401 = vmatpush.bf16.msra.mxu3 %v2806_v19 }
  0x54   : > { %2402 = vmatpush.bf16.msra.mxu3 %v2813_v21 }
  0x58   : > { %2403 = vmatpush.bf16.msra.mxu3 %v2819_v22 }
  0x5b   : > { %627 = vmatmul.bf16.gmra.mxu0 %v2331_v14  ;;  %687 = vmatmul.bf16.gmra.mxu3 %v2343_v15 }
  0x5c   : > { %2404 = vmatpush.bf16.msra.mxu3 %v2828_v24 }
  0x60   : > { %2405 = vmatpush.bf16.msra.mxu3 %v2837_v26 }
  0x64   : > { %2406 = vmatpush.bf16.msra.mxu3 %v2847_v29 }
  0x68   : > { %2407 = vmatpush.bf16.msra.mxu3 %v2856_v31 }
  0x6b   : > { %632 = vmatmul.bf16.gmra.mxu0 %v2332_v16 }
  0x7b   : > { %637 = vmatmul.bf16.gmra.mxu0 %v2333_v17  ;;  %v2354_v17 = vld [vmem:[%s2863_s28 + $0x10] sm:$0xff] }
  0x7c   : > { %1464 = vmatmul.bf16.gmra.mxu2 %v2354_v17 }
  0x8b   : > { %642 = vmatmul.bf16.gmra.mxu0 %v2334_v20 }
  0x9b   : > { %647 = vmatmul.bf16.gmra.mxu0 %v2335_v27 }
  0xa8   : > { %v613_v38 = vpop.f32.mrf.mxu0 }
  0xa9   : > { %v697_v40 = vmul.f32 %v2876_v35, %v613_v38  ;;  %v2338_v38 = vld [vmem:[%s2788_s6 + $0x50] sm:$0xff] }
  0xab   : > { %v2889_v41 = vadd.f32 %v2881_v36, %v697_v40  ;;  %652 = vmatmul.bf16.gmra.mxu0 %v2336_v37 }
  0xad   : > { %v765_v43 = vmin.f32 %v2889_v41, 20.0 }
  0xae   : > { %v673_v44 = vpop.f32.mrf.mxu3 }
  0xaf   : > { %v797_v45 = vmul.f32 1.442695, %v765_v43  ;;  %v721_v46 = vmul.f32 %v2876_v35, %v673_v44 }
  0xb0   : > { %v615_v47 = vpop.f32.mrf.mxu0 }
  0xb1   : > { %2420 = vpow2.f32 %v797_v45  ;;  %v2897_v48 = vadd.f32 %v2881_v36, %v721_v46  ;;  %v698_v49 = vmul.f32 %v2876_v35, %v615_v47 }
  0xb3   : > { %v789_v51 = vmin.f32 %v2897_v48, 20.0  ;;  %v2903_v52 = vadd.f32 %v2881_v36, %v698_v49 }
  0xb5   : > { %v845_v53 = vmul.f32 1.442695, %v789_v51  ;;  %v766_v54 = vmin.f32 %v2903_v52, 20.0 }
  0xb6   : > { %v675_v55 = vpop.f32.mrf.mxu3 }
  0xb7   : > { %v2421_v56 = vpop.eup %2420  ;;  %2422 = vpow2.f32 %v845_v53  ;;  %v799_v57 = vmul.f32 1.442695, %v766_v54  ;;  %v722_v58 = vmul.f32 %v2876_v35, %v675_v55 }
  0xb8   : > { %v861_v60 = vadd.f32 1.0, %v2421_v56  ;;  %v618_v61 = vpop.f32.mrf.mxu0 }
  0xb9   : > { %2424 = vpow2.f32 %v799_v57  ;;  %v2911_v62 = vadd.f32 %v2881_v36, %v722_v58  ;;  %v699_v63 = vmul.f32 %v2876_v35, %v618_v61 }
  0xba   : > { %v893_v2 = vmul.f32 %v861_v60, %v861_v60 }
  0xbb   : > { %v790_v0 = vmin.f32 %v2911_v62, 20.0  ;;  %v2916_v1 = vadd.f32 %v2881_v36, %v699_v63  ;;  %657 = vmatmul.bf16.gmra.mxu0 %v2337_v59 }
  0xbc   : > { %v989_v11 = vadd.f32 1.0, %v893_v2  ;;  %v2134_v27 = vadd.f32 -1.0, %v893_v2 }
  0xbd   : > { %v2423_v3 = vpop.eup %2422  ;;  %v847_v4 = vmul.f32 1.442695, %v790_v0  ;;  %v767_v5 = vmin.f32 %v2916_v1, 20.0 }
  0xbe   : > { %v885_v6 = vadd.f32 1.0, %v2423_v3  ;;  %v678_v7 = vpop.f32.mrf.mxu3  ;;  %v957_v49 = vmul.f32 %v2134_v27, %v2889_v41 }
  0xbf   : > { %v2425_v8 = vpop.eup %2424  ;;  %2426 = vpow2.f32 %v847_v4  ;;  %v801_v9 = vmul.f32 1.442695, %v767_v5  ;;  %v723_v10 = vmul.f32 %v2876_v35, %v678_v7 }
  0xc0   : > { %v917_v12 = vmul.f32 %v885_v6, %v885_v6  ;;  %v862_v13 = vadd.f32 1.0, %v2425_v8  ;;  %v620_v14 = vpop.f32.mrf.mxu0 }
  0xc1   : > { %2428 = vpow2.f32 %v801_v9  ;;  %v2923_v15 = vadd.f32 %v2881_v36, %v723_v10  ;;  %v700_v16 = vmul.f32 %v2876_v35, %v620_v14  ;;  %v2355_v9 = vld [vmem:[%s2863_s28 + $0x18] sm:$0xff] }
  0xc2   : > { %v894_v18 = vmul.f32 %v862_v13, %v862_v13  ;;  %2430 = vrcp.f32 %v989_v11  ;;  %v1013_v21 = vadd.f32 1.0, %v917_v12  ;;  %v2158_v26 = vadd.f32 -1.0, %v917_v12  ;;  %1469 = vmatmul.bf16.gmra.mxu2 %v2355_v9 }
  0xc3   : > { %v791_v19 = vmin.f32 %v2923_v15, 20.0  ;;  %v2929_v20 = vadd.f32 %v2881_v36, %v700_v16 }
  0xc4   : > { %v990_v22 = vadd.f32 1.0, %v894_v18  ;;  %v2135_v33 = vadd.f32 -1.0, %v894_v18  ;;  %v981_v54 = vmul.f32 %v2158_v26, %v2897_v48 }
  0xc5   : > { %v2427_v23 = vpop.eup %2426  ;;  %v849_v24 = vmul.f32 1.442695, %v791_v19  ;;  %v768_v25 = vmin.f32 %v2929_v20, 20.0 }
  0xc6   : > { %2432 = vrcp.f32 %v990_v22  ;;  %v886_v28 = vadd.f32 1.0, %v2427_v23  ;;  %v680_v30 = vpop.f32.mrf.mxu3  ;;  %v958_v50 = vmul.f32 %v2135_v33, %v2903_v52  ;;  %v2339_v33 = vld [vmem:[%s2788_s6 + $0x58] sm:$0xff] }
  0xc7   : > { %v2429_v32 = vpop.eup %2428  ;;  %2434 = vpow2.f32 %v849_v24  ;;  %v803_v34 = vmul.f32 1.442695, %v768_v25  ;;  %v724_v37 = vmul.f32 %v2876_v35, %v680_v30 }
  0xc8   : > { %2436 = vrcp.f32 %v1013_v21  ;;  %v918_v39 = vmul.f32 %v886_v28, %v886_v28  ;;  %v863_v40 = vadd.f32 1.0, %v2429_v32  ;;  %v623_v42 = vpop.f32.mrf.mxu0  ;;  %v2431_v45 = vpop.eup %2430 }
  0xc9   : > { %2438 = vpow2.f32 %v803_v34  ;;  %v2937_v43 = vadd.f32 %v2881_v36, %v724_v37  ;;  %v701_v44 = vmul.f32 %v2876_v35, %v623_v42  ;;  %v1053_v41 = vmul.f32 %v2431_v45, %v957_v49 }
  0xca   : > { %v2159_v46 = vadd.f32 -1.0, %v918_v39  ;;  %v1014_v47 = vadd.f32 1.0, %v918_v39  ;;  %v895_v55 = vmul.f32 %v863_v40, %v863_v40 }
  0xcb   : > { %v792_v29 = vmin.f32 %v2937_v43, 20.0  ;;  %v2944_v51 = vadd.f32 %v2881_v36, %v701_v44  ;;  %662 = vmatmul.bf16.gmra.mxu0 %v2338_v38 }
  0xcc   : > { %v2433_v53 = vpop.eup %2432  ;;  %2440 = vrcp.f32 %v1014_v47  ;;  %v982_v60 = vmul.f32 %v2159_v46, %v2911_v62  ;;  %v991_v3 = vadd.f32 1.0, %v895_v55  ;;  %v2136_v23 = vadd.f32 -1.0, %v895_v55 }
  0xcd   : > { %v2435_v56 = vpop.eup %2434  ;;  %v851_v57 = vmul.f32 1.442695, %v792_v29  ;;  %v769_v58 = vmin.f32 %v2944_v51, 20.0  ;;  %v1054_v59 = vmul.f32 %v2433_v53, %v958_v50 }
  0xce   : > { %v2437_v52 = vpop.eup %2436  ;;  %v887_v61 = vadd.f32 1.0, %v2435_v56  ;;  %v683_v63 = vpop.f32.mrf.mxu3  ;;  %v959_v46 = vmul.f32 %v2136_v23, %v2916_v1 }
  0xcf   : > { %v2439_v0 = vpop.eup %2438  ;;  %2442 = vpow2.f32 %v851_v57  ;;  %v805_v31 = vmul.f32 1.442695, %v769_v58  ;;  %v725_v2 = vmul.f32 %v2876_v35, %v683_v63  ;;  %v1085_v48 = vpack.c.bf16 %v1054_v59, %v1053_v41 }
  0xd0   : > { %v919_v4 = vmul.f32 %v887_v61, %v887_v61  ;;  %v864_v5 = vadd.f32 1.0, %v2439_v0  ;;  %v625_v6 = vpop.f32.mrf.mxu0  ;;  %v1077_v62 = vmul.f32 %v2437_v52, %v981_v54 }
  0xd1   : > { %2444 = vpow2.f32 %v805_v31  ;;  %v2952_v7 = vadd.f32 %v2881_v36, %v725_v2  ;;  %v702_v8 = vmul.f32 %v2876_v35, %v625_v6  ;;  %1221 = vmatmul.bf16.vlgmr.msra.gmra.mxu1 %v1085_v48 }
  0xd2   : > { %v2441_v10 = vpop.eup %2440  ;;  %v896_v11 = vmul.f32 %v864_v5, %v864_v5  ;;  %2446 = vrcp.f32 %v991_v3  ;;  %v1015_v16 = vadd.f32 1.0, %v919_v4  ;;  %v2160_v34 = vadd.f32 -1.0, %v919_v4  ;;  %v2356_v5 = vld [vmem:[%s2863_s28 + $0x20] sm:$0xff] }
  0xd3   : > { %v793_v12 = vmin.f32 %v2952_v7, 20.0  ;;  %v2958_v13 = vadd.f32 %v2881_v36, %v702_v8  ;;  %v1078_v14 = vmul.f32 %v2441_v10, %v982_v60  ;;  %1474 = vmatmul.bf16.gmra.mxu2 %v2356_v5 }
  0xd4   : > { %v992_v17 = vadd.f32 1.0, %v896_v11  ;;  %v2137_v28 = vadd.f32 -1.0, %v896_v11  ;;  %v983_v53 = vmul.f32 %v2160_v34, %v2923_v15 }
  0xd5   : > { %v2443_v18 = vpop.eup %2442  ;;  %v853_v19 = vmul.f32 1.442695, %v793_v12  ;;  %v770_v21 = vmin.f32 %v2958_v13, 20.0  ;;  %v1097_v22 = vpack.c.bf16 %v1078_v14, %v1077_v62 }
  0xd6   : > { %2448 = vrcp.f32 %v992_v17  ;;  %v888_v24 = vadd.f32 1.0, %v2443_v18  ;;  %v685_v25 = vpop.f32.mrf.mxu3  ;;  %v960_v47 = vmul.f32 %v2137_v28, %v2929_v20 }
  0xd7   : > { %v2445_v27 = vpop.eup %2444  ;;  %2450 = vpow2.f32 %v853_v19  ;;  %v807_v30 = vmul.f32 1.442695, %v770_v21  ;;  %v726_v32 = vmul.f32 %v2876_v35, %v685_v25  ;;  %1281 = vmatmul.bf16.vlgmr.msrb.gmra.mxu3 %v1097_v22 }
  0xd8   : > { %2452 = vrcp.f32 %v1015_v16  ;;  %v920_v37 = vmul.f32 %v888_v24, %v888_v24  ;;  %v865_v38 = vadd.f32 1.0, %v2445_v27  ;;  %v628_v26 = vpop.f32.mrf.mxu0  ;;  %v2447_v42 = vpop.eup %2446 }
  0xd9   : > { %2454 = vpow2.f32 %v807_v30  ;;  %v2964_v39 = vadd.f32 %v2881_v36, %v726_v32  ;;  %v703_v40 = vmul.f32 %v2876_v35, %v628_v26  ;;  %v1055_v58 = vmul.f32 %v2447_v42, %v959_v46 }
  0xda   : > { %v2161_v44 = vadd.f32 -1.0, %v920_v37  ;;  %v1016_v45 = vadd.f32 1.0, %v920_v37  ;;  %v897_v54 = vmul.f32 %v865_v38, %v865_v38 }
  0xdb   : > { %v794_v49 = vmin.f32 %v2964_v39, 20.0  ;;  %v2971_v50 = vadd.f32 %v2881_v36, %v703_v40  ;;  %667 = vmatmul.bf16.gmra.mxu0 %v2339_v33 }
  0xdc   : > { %v2449_v29 = vpop.eup %2448  ;;  %2456 = vrcp.f32 %v1016_v45  ;;  %v984_v20 = vmul.f32 %v2161_v44, %v2937_v43  ;;  %v993_v0 = vadd.f32 1.0, %v897_v54  ;;  %v2138_v19 = vadd.f32 -1.0, %v897_v54 }
  0xdd   : > { %v2451_v55 = vpop.eup %2450  ;;  %v855_v56 = vmul.f32 1.442695, %v794_v49  ;;  %v771_v57 = vmin.f32 %v2971_v50, 20.0  ;;  %v1056_v41 = vmul.f32 %v2449_v29, %v960_v47 }
  0xde   : > { %v2453_v1 = vpop.eup %2452  ;;  %v889_v59 = vadd.f32 1.0, %v2451_v55  ;;  %v688_v52 = vpop.f32.mrf.mxu3  ;;  %v961_v26 = vmul.f32 %v2138_v19, %v2944_v51 }
  0xdf   : > { %v2455_v60 = vpop.eup %2454  ;;  %2458 = vpow2.f32 %v855_v56  ;;  %v809_v61 = vmul.f32 1.442695, %v771_v57  ;;  %v727_v63 = vmul.f32 %v2876_v35, %v688_v52  ;;  %v1086_v15 = vpack.c.bf16 %v1056_v41, %v1055_v58 }
  0xe0   : > { %v921_v31 = vmul.f32 %v889_v59, %v889_v59  ;;  %v866_v2 = vadd.f32 1.0, %v2455_v60  ;;  %v630_v48 = vpop.f32.mrf.mxu0  ;;  %v1079_v43 = vmul.f32 %v2453_v1, %v983_v53 }
  0xe1   : > { %2460 = vpow2.f32 %v809_v61  ;;  %v2978_v3 = vadd.f32 %v2881_v36, %v727_v63  ;;  %v704_v4 = vmul.f32 %v2876_v35, %v630_v48  ;;  %1226 = vmatmul.bf16.gmra.mxu1 %v1086_v15  ;;  %v2357_v15 = vld [vmem:[%s2863_s28 + $0x28] sm:$0xff] }
  0xe2   : > { %v2457_v6 = vpop.eup %2456  ;;  %v898_v8 = vmul.f32 %v866_v2, %v866_v2  ;;  %2462 = vrcp.f32 %v993_v0  ;;  %v1017_v11 = vadd.f32 1.0, %v921_v31  ;;  %v2162_v28 = vadd.f32 -1.0, %v921_v31 }
  0xe3   : > { %v795_v62 = vmin.f32 %v2978_v3, 20.0  ;;  %v2984_v9 = vadd.f32 %v2881_v36, %v704_v4  ;;  %v1080_v10 = vmul.f32 %v2457_v6, %v984_v20  ;;  %1479 = vmatmul.bf16.gmra.mxu2 %v2357_v15 }
  0xe4   : > { %v994_v12 = vadd.f32 1.0, %v898_v8  ;;  %v2139_v24 = vadd.f32 -1.0, %v898_v8  ;;  %v985_v49 = vmul.f32 %v2162_v28, %v2952_v7 }
  0xe5   : > { %v2459_v14 = vpop.eup %2458  ;;  %v857_v16 = vmul.f32 1.442695, %v795_v62  ;;  %v772_v17 = vmin.f32 %v2984_v9, 20.0  ;;  %v1098_v18 = vpack.c.bf16 %v1080_v10, %v1079_v43 }
  0xe6   : > { %2464 = vrcp.f32 %v994_v12  ;;  %v890_v21 = vadd.f32 1.0, %v2459_v14  ;;  %v690_v22 = vpop.f32.mrf.mxu3  ;;  %v962_v42 = vmul.f32 %v2139_v24, %v2958_v13 }
  0xe7   : > { %v2461_v23 = vpop.eup %2460  ;;  %2466 = vpow2.f32 %v857_v16  ;;  %v811_v25 = vmul.f32 1.442695, %v772_v17  ;;  %v728_v27 = vmul.f32 %v2876_v35, %v690_v22  ;;  %1286 = vmatmul.bf16.gmra.mxu3 %v1098_v18 }
  0xe8   : > { %2468 = vrcp.f32 %v1017_v11  ;;  %v922_v30 = vmul.f32 %v890_v21, %v890_v21  ;;  %v867_v32 = vadd.f32 1.0, %v2461_v23  ;;  %v633_v33 = vpop.f32.mrf.mxu0  ;;  %v2463_v38 = vpop.eup %2462 }
  0xe9   : > { %2470 = vpow2.f32 %v811_v25  ;;  %v2989_v34 = vadd.f32 %v2881_v36, %v728_v27  ;;  %v705_v37 = vmul.f32 %v2876_v35, %v633_v33  ;;  %v1057_v56 = vmul.f32 %v2463_v38, %v961_v26 }
  0xea   : > { %v1018_v40 = vadd.f32 1.0, %v922_v30  ;;  %v2163_v44 = vadd.f32 -1.0, %v922_v30  ;;  %v899_v29 = vmul.f32 %v867_v32, %v867_v32 }
  0xeb   : > { %v796_v45 = vmin.f32 %v2989_v34, 20.0  ;;  %v2996_v46 = vadd.f32 %v2881_v36, %v705_v37 }
  0xec   : > { %v2465_v47 = vpop.eup %2464  ;;  %2472 = vrcp.f32 %v1018_v40  ;;  %v986_v41 = vmul.f32 %v2163_v44, %v2964_v39  ;;  %v995_v59 = vadd.f32 1.0, %v899_v29  ;;  %v2140_v10 = vadd.f32 -1.0, %v899_v29 }
  0xed   : > { %v2467_v53 = vpop.eup %2466  ;;  %v859_v54 = vmul.f32 1.442695, %v796_v45  ;;  %v773_v55 = vmin.f32 %v2996_v46, 20.0  ;;  %v1058_v51 = vmul.f32 %v2465_v47, %v962_v42 }
  0xee   : > { %v2469_v57 = vpop.eup %2468  ;;  %v891_v13 = vadd.f32 1.0, %v2467_v53  ;;  %v963_v23 = vmul.f32 %v2140_v10, %v2971_v50 }
  0xef   : > { %v2471_v58 = vpop.eup %2470  ;;  %2474 = vpow2.f32 %v859_v54  ;;  %v813_v1 = vmul.f32 1.442695, %v773_v55  ;;  %v1087_v20 = vpack.c.bf16 %v1058_v51, %v1057_v56  ;;  %v1081_v63 = vmul.f32 %v2469_v57, %v985_v49 }
  0xf0   : > { %v923_v52 = vmul.f32 %v891_v13, %v891_v13  ;;  %v868_v7 = vadd.f32 1.0, %v2471_v58  ;;  %v635_v60 = vpop.f32.mrf.mxu0 }
  0xf1   : > { %2476 = vpow2.f32 %v813_v1  ;;  %v706_v61 = vmul.f32 %v2876_v35, %v635_v60  ;;  %1231 = vmatmul.bf16.gmra.mxu1 %v1087_v20 }
  0xf2   : > { %v2473_v0 = vpop.eup %2472  ;;  %v900_v31 = vmul.f32 %v868_v7, %v868_v7  ;;  %2478 = vrcp.f32 %v995_v59  ;;  %v1019_v39 = vadd.f32 1.0, %v923_v52  ;;  %v2164_v18 = vadd.f32 -1.0, %v923_v52 }
  0xf3   : > { %v3004_v2 = vadd.f32 %v2881_v36, %v706_v61  ;;  %v1082_v48 = vmul.f32 %v2473_v0, %v986_v41 }
  0xf4   : > { %v996_v4 = vadd.f32 1.0, %v900_v31  ;;  %v2141_v11 = vadd.f32 -1.0, %v900_v31  ;;  %v987_v32 = vmul.f32 %v2164_v18, %v2978_v3  ;;  %v2358_v3 = vld [vmem:[%s2863_s28 + $0x30] sm:$0xff] }
  0xf5   : > { %v2475_v43 = vpop.eup %2474  ;;  %v774_v5 = vmin.f32 %v3004_v2, 20.0  ;;  %v1099_v6 = vpack.c.bf16 %v1082_v48, %v1081_v63  ;;  %1484 = vmatmul.bf16.gmra.mxu2 %v2358_v3 }
  0xf6   : > { %2480 = vrcp.f32 %v996_v4  ;;  %v892_v8 = vadd.f32 1.0, %v2475_v43  ;;  %v964_v24 = vmul.f32 %v2141_v11, %v2984_v9 }
  0xf7   : > { %v2477_v62 = vpop.eup %2476  ;;  %v815_v12 = vmul.f32 1.442695, %v774_v5  ;;  %1291 = vmatmul.bf16.gmra.mxu3 %v1099_v6  ;;  %2482 = vrcp.f32 %v1019_v39 }
  0xf8   : > { %v924_v14 = vmul.f32 %v892_v8, %v892_v8  ;;  %v869_v16 = vadd.f32 1.0, %v2477_v62  ;;  %v638_v17 = vpop.f32.mrf.mxu0  ;;  %v2479_v21 = vpop.eup %2478 }
  0xf9   : > { %2484 = vpow2.f32 %v815_v12  ;;  %v707_v19 = vmul.f32 %v2876_v35, %v638_v17  ;;  %v1059_v37 = vmul.f32 %v2479_v21, %v963_v23  ;;  %v2364_v12 = vld [vmem:[%s2863_s28 + $0x60] sm:$0xff] }
  0xfa   : > { %v1020_v22 = vadd.f32 1.0, %v924_v14  ;;  %v2165_v25 = vadd.f32 -1.0, %v924_v14  ;;  %v901_v30 = vmul.f32 %v869_v16, %v869_v16 }
  0xfb   : > { %v3011_v27 = vadd.f32 %v2881_v36, %v707_v19 }
  0xfc   : > { %v2481_v28 = vpop.eup %2480  ;;  %2486 = vrcp.f32 %v1020_v22  ;;  %v988_v50 = vmul.f32 %v2165_v25, %v2989_v34  ;;  %v997_v44 = vadd.f32 1.0, %v901_v30  ;;  %v2142_v58 = vadd.f32 -1.0, %v901_v30 }
  0xfd   : > { %v775_v33 = vmin.f32 %v3011_v27, 20.0  ;;  %v1060_v38 = vmul.f32 %v2481_v28, %v964_v24  ;;  %v2483_v26 = vpop.eup %2482 }
  0xfe   : > { %v1083_v29 = vmul.f32 %v2483_v26, %v987_v32  ;;  %v965_v60 = vmul.f32 %v2142_v58, %v2996_v46 }
  0xff   : > { %v2485_v40 = vpop.eup %2484  ;;  %v817_v42 = vmul.f32 1.442695, %v775_v33  ;;  %v1088_v9 = vpack.c.bf16 %v1060_v38, %v1059_v37 }
 0x100   : > { %v870_v45 = vadd.f32 1.0, %v2485_v40  ;;  %v640_v47 = vpop.f32.mrf.mxu0 }
 0x101   : > { %2488 = vpow2.f32 %v817_v42  ;;  %v708_v49 = vmul.f32 %v2876_v35, %v640_v47  ;;  %1236 = vmatmul.bf16.gmra.mxu1 %v1088_v9 }
 0x102   : > { %v2487_v53 = vpop.eup %2486  ;;  %v902_v54 = vmul.f32 %v870_v45, %v870_v45  ;;  %2490 = vrcp.f32 %v997_v44 }
 0x103   : > { %v744_v55 = vadd.f32 %v2881_v36, %v708_v49  ;;  %v1084_v56 = vmul.f32 %v2487_v53, %v988_v50  ;;  %v2360_v49 = vld [vmem:[%s2863_s28 + $0x40] sm:$0xff]  ;;  %v2365_v53 = vld [vmem:[%s2863_s28 + $0x68] sm:$0xff] }
 0x104   : > { %v998_v51 = vadd.f32 1.0, %v902_v54  ;;  %v2143_v41 = vadd.f32 -1.0, %v902_v54 }
 0x105   : > { %v776_v34 = vmin.f32 %v744_v55, 20.0  ;;  %v1100_v57 = vpack.c.bf16 %v1084_v56, %v1083_v29  ;;  %v3040_v56 = vpop.f32.mrf.mxu2 }
 0x106   : > { %2492 = vrcp.f32 %v998_v51  ;;  %v966_v61 = vmul.f32 %v2143_v41, %v3004_v2  ;;  %v2359_v2 = vld [vmem:[%s2863_s28 + $0x38] sm:$0xff] }
 0x107   : > { %v2489_v13 = vpop.eup %2488  ;;  %v819_v1 = vmul.f32 1.442695, %v776_v34  ;;  %1296 = vmatmul.bf16.gmra.mxu3 %v1100_v57  ;;  %1489 = vmatmul.bf16.gmra.mxu2 %v2359_v2 }
 0x108   : > { %v871_v20 = vadd.f32 1.0, %v2489_v13  ;;  %v643_v59 = vpop.f32.mrf.mxu0  ;;  %v2491_v7 = vpop.eup %2490 }
 0x109   : > { %2494 = vpow2.f32 %v819_v1  ;;  %v709_v52 = vmul.f32 %v2876_v35, %v643_v59  ;;  %v1061_v48 = vmul.f32 %v2491_v7, %v965_v60 }
 0x10a   : > { %v903_v0 = vmul.f32 %v871_v20, %v871_v20 }
 0x10b   : > { %v3023_v63 = vadd.f32 %v2881_v36, %v709_v52 }
 0x10c   : > { %v2493_v15 = vpop.eup %2492  ;;  %v999_v6 = vadd.f32 1.0, %v903_v0  ;;  %v2144_v18 = vadd.f32 -1.0, %v903_v0 }
 0x10d   : > { %v777_v31 = vmin.f32 %v3023_v63, 20.0  ;;  %v1062_v39 = vmul.f32 %v2493_v15, %v966_v61 }
 0x10e   : > { %v967_v28 = vmul.f32 %v2144_v18, %v3011_v27 }
 0x10f   : > { %v2495_v4 = vpop.eup %2494  ;;  %v821_v43 = vmul.f32 1.442695, %v777_v31  ;;  %v1089_v5 = vpack.c.bf16 %v1062_v39, %v1061_v48  ;;  %v3048_v48 = vpop.f32.mrf.mxu2 }
 0x110   : > { %v872_v8 = vadd.f32 1.0, %v2495_v4  ;;  %v645_v62 = vpop.f32.mrf.mxu0 }
 0x111   : > { %2496 = vpow2.f32 %v821_v43  ;;  %v710_v46 = vmul.f32 %v2876_v35, %v645_v62  ;;  %1241 = vmatmul.bf16.gmra.mxu1 %v1089_v5 }
 0x112   : > { %v904_v10 = vmul.f32 %v872_v8, %v872_v8  ;;  %2498 = vrcp.f32 %v999_v6 }
 0x113   : > { %v746_v11 = vadd.f32 %v2881_v36, %v710_v46  ;;  %v2361_v46 = vld [vmem:[%s2863_s28 + $0x48] sm:$0xff] }
 0x114   : > { %v1000_v14 = vadd.f32 1.0, %v904_v10  ;;  %v2145_v19 = vadd.f32 -1.0, %v904_v10  ;;  %v2366_v10 = vld [vmem:[%s2863_s28 + $0x70] sm:$0xff] }
 0x115   : > { %v778_v16 = vmin.f32 %v746_v11, 20.0 }
 0x116   : > { %2500 = vrcp.f32 %v1000_v14  ;;  %v968_v30 = vmul.f32 %v2145_v19, %v744_v55 }
 0x117   : > { %v2497_v17 = vpop.eup %2496  ;;  %v823_v21 = vmul.f32 1.442695, %v778_v16  ;;  %1514 = vmatmul.bf16.vlgmr.msra.gmra.mxu3 %v2364_v12  ;;  %1494 = vmatmul.bf16.gmra.mxu2 %v2360_v49  ;;  %v3054_v19 = vpop.f32.mrf.mxu2 }
 0x118   : > { %v873_v22 = vadd.f32 1.0, %v2497_v17  ;;  %v648_v23 = vpop.f32.mrf.mxu0  ;;  %v2499_v25 = vpop.eup %2498 }
 0x119   : > { %2502 = vpow2.f32 %v823_v21  ;;  %v711_v24 = vmul.f32 %v2876_v35, %v648_v23  ;;  %v1063_v26 = vmul.f32 %v2499_v25, %v967_v28 }
 0x11a   : > { %v905_v37 = vmul.f32 %v873_v22, %v873_v22 }
 0x11b   : > { %v3033_v32 = vadd.f32 %v2881_v36, %v711_v24 }
 0x11c   : > { %v2501_v33 = vpop.eup %2500  ;;  %v1001_v44 = vadd.f32 1.0, %v905_v37  ;;  %v2146_v34 = vadd.f32 -1.0, %v905_v37 }
 0x11d   : > { %v779_v38 = vmin.f32 %v3033_v32, 20.0  ;;  %v1064_v40 = vmul.f32 %v2501_v33, %v968_v30 }
 0x11e   : > { %v969_v59 = vmul.f32 %v2146_v34, %v3023_v63 }
 0x11f   : > { %v2503_v50 = vpop.eup %2502  ;;  %v825_v42 = vmul.f32 1.442695, %v779_v38  ;;  %v1090_v9 = vpack.c.bf16 %v1064_v40, %v1063_v26 }
 0x120   : > { %v874_v45 = vadd.f32 1.0, %v2503_v50  ;;  %v650_v47 = vpop.f32.mrf.mxu0 }
 0x121   : > { %2504 = vpow2.f32 %v825_v42  ;;  %v712_v27 = vmul.f32 %v2876_v35, %v650_v47  ;;  %1246 = vmatmul.bf16.gmra.mxu1 %v1090_v9 }
 0x122   : > { %v906_v29 = vmul.f32 %v874_v45, %v874_v45  ;;  %2506 = vrcp.f32 %v1001_v44  ;;  %v3062_v44 = vpop.f32.mrf.mxu2 }
 0x123   : > { %v748_v3 = vadd.f32 %v2881_v36, %v712_v27 }
 0x124   : > { %v1002_v54 = vadd.f32 1.0, %v906_v29  ;;  %v2147_v57 = vadd.f32 -1.0, %v906_v29  ;;  %v2362_v29 = vld [vmem:[%s2863_s28 + $0x50] sm:$0xff] }
 0x125   : > { %v780_v55 = vmin.f32 %v748_v3, 20.0 }
 0x126   : > { %2508 = vrcp.f32 %v1002_v54  ;;  %v970_v52 = vmul.f32 %v2147_v57, %v746_v11 }
 0x127   : > { %v2505_v51 = vpop.eup %2504  ;;  %v827_v13 = vmul.f32 1.442695, %v780_v55  ;;  %1519 = vmatmul.bf16.gmra.mxu3 %v2365_v53  ;;  %1499 = vmatmul.bf16.gmra.mxu2 %v2361_v46  ;;  %v2367_v53 = vld [vmem:[%s2863_s28 + $0x78] sm:$0xff] }
 0x128   : > { %v875_v58 = vadd.f32 1.0, %v2505_v51  ;;  %v653_v41 = vpop.f32.mrf.mxu0  ;;  %v2507_v20 = vpop.eup %2506 }
 0x129   : > { %2510 = vpow2.f32 %v827_v13  ;;  %v713_v1 = vmul.f32 %v2876_v35, %v653_v41  ;;  %v1065_v0 = vmul.f32 %v2507_v20, %v969_v59 }
 0x12a   : > { %v907_v61 = vmul.f32 %v875_v58, %v875_v58  ;;  %v3072_v20 = vpop.f32.mrf.mxu2 }
 0x12b   : > { %v3045_v7 = vadd.f32 %v2881_v36, %v713_v1 }
 0x12c   : > { %v2509_v60 = vpop.eup %2508  ;;  %v1003_v5 = vadd.f32 1.0, %v907_v61  ;;  %v2148_v16 = vadd.f32 -1.0, %v907_v61 }
 0x12d   : > { %v781_v15 = vmin.f32 %v3045_v7, 20.0  ;;  %v1066_v31 = vmul.f32 %v2509_v60, %v970_v52 }
 0x12e   : > { %v971_v25 = vmul.f32 %v2148_v16, %v3033_v32  ;;  %v2363_v16 = vld [vmem:[%s2863_s28 + $0x58] sm:$0xff] }
 0x12f   : > { %v2511_v39 = vpop.eup %2510  ;;  %v829_v4 = vmul.f32 1.442695, %v781_v15  ;;  %v1091_v43 = vpack.c.bf16 %v1066_v31, %v1065_v0 }
 0x130   : > { %v876_v6 = vadd.f32 1.0, %v2511_v39  ;;  %v655_v63 = vpop.f32.mrf.mxu0  ;;  %v3082_v39 = vld [vmem:[%s3399_s9] ss:$0 sm:$0xff] }
 0x131   : > { %2512 = vpow2.f32 %v829_v4  ;;  %v714_v8 = vmul.f32 %v2876_v35, %v655_v63  ;;  %1251 = vmatmul.bf16.gmra.mxu1 %v1091_v43 }
 0x132   : > { %v908_v62 = vmul.f32 %v876_v6, %v876_v6  ;;  %2514 = vrcp.f32 %v1003_v5 }
 0x133   : > { %v750_v2 = vadd.f32 %v2881_v36, %v714_v8  ;;  %v3088_v8 = vld [vmem:[%s3400_s10] ss:$0 sm:$0xff] }
 0x134   : > { %v1004_v11 = vadd.f32 1.0, %v908_v62  ;;  %v2149_v17 = vadd.f32 -1.0, %v908_v62 }
 0x135   : > { %v782_v12 = vmin.f32 %v750_v2, 20.0 }
 0x136   : > { %2516 = vrcp.f32 %v1004_v11  ;;  %v972_v28 = vmul.f32 %v2149_v17, %v748_v3 }
 0x137   : > { %v2513_v14 = vpop.eup %2512  ;;  %v831_v18 = vmul.f32 1.442695, %v782_v12  ;;  %1524 = vmatmul.bf16.gmra.mxu3 %v2366_v10  ;;  %1504 = vmatmul.bf16.gmra.mxu2 %v2362_v29 }
 0x138   : > { %v877_v21 = vadd.f32 1.0, %v2513_v14  ;;  %v658_v22 = vpop.f32.mrf.mxu0  ;;  %v2515_v24 = vpop.eup %2514 }
 0x139   : > { %2518 = vpow2.f32 %v831_v18  ;;  %v715_v23 = vmul.f32 %v2876_v35, %v658_v22  ;;  %v1067_v26 = vmul.f32 %v2515_v24, %v971_v25  ;;  %v3099_v18 = vpop.f32.mrf.mxu2 }
 0x13a   : > { %v909_v37 = vmul.f32 %v877_v21, %v877_v21 }
 0x13b   : > { %v3059_v30 = vadd.f32 %v2881_v36, %v715_v23 }
 0x13c   : > { %v2517_v33 = vpop.eup %2516  ;;  %v1005_v45 = vadd.f32 1.0, %v909_v37  ;;  %v2150_v34 = vadd.f32 -1.0, %v909_v37 }
 0x13d   : > { %v783_v38 = vmin.f32 %v3059_v30, 20.0  ;;  %v1068_v40 = vmul.f32 %v2517_v33, %v972_v28 }
 0x13e   : > { %v973_v52 = vmul.f32 %v2150_v34, %v3045_v7 }
 0x13f   : > { %v2519_v50 = vpop.eup %2518  ;;  %v833_v42 = vmul.f32 1.442695, %v783_v38  ;;  %v1092_v9 = vpack.c.bf16 %v1068_v40, %v1067_v26 }
 0x140   : > { %v878_v47 = vadd.f32 1.0, %v2519_v50  ;;  %v660_v32 = vpop.f32.mrf.mxu0  ;;  %v2676_v50 = vld [vmem:[%s3393_s3] ss:$0 sm:$0xff] }
 0x141   : > { %2520 = vpow2.f32 %v833_v42  ;;  %v716_v27 = vmul.f32 %v2876_v35, %v660_v32  ;;  %1256 = vmatmul.bf16.gmra.mxu1 %v1092_v9 }
 0x142   : > { %v910_v49 = vmul.f32 %v878_v47, %v878_v47  ;;  %2522 = vrcp.f32 %v1005_v45 }
 0x143   : > { %v3067_v3 = vadd.f32 %v2881_v36, %v716_v27  ;;  %v2677_v27 = vld [vmem:[%s3394_s4] ss:$0 sm:$0xff] }
 0x144   : > { %v1006_v54 = vadd.f32 1.0, %v910_v49  ;;  %v2151_v57 = vadd.f32 -1.0, %v910_v49 }
 0x145   : > { %v784_v55 = vmin.f32 %v3067_v3, 20.0 }
 0x146   : > { %2524 = vrcp.f32 %v1006_v54  ;;  %v974_v60 = vmul.f32 %v2151_v57, %v750_v2 }
 0x147   : > { %v2521_v51 = vpop.eup %2520  ;;  %v835_v13 = vmul.f32 1.442695, %v784_v55  ;;  %1529 = vmatmul.bf16.gmra.mxu3 %v2367_v53  ;;  %1509 = vmatmul.bf16.gmra.mxu2 %v2363_v16 }
 0x148   : > { %v879_v58 = vadd.f32 1.0, %v2521_v51  ;;  %v663_v41 = vpop.f32.mrf.mxu0  ;;  %v2523_v59 = vpop.eup %2522 }
 0x149   : > { %2526 = vpow2.f32 %v835_v13  ;;  %v717_v1 = vmul.f32 %v2876_v35, %v663_v41  ;;  %v1069_v4 = vmul.f32 %v2523_v59, %v973_v52 }
 0x14a   : > { %v911_v0 = vmul.f32 %v879_v58, %v879_v58 }
 0x14b   : > { %v3076_v61 = vadd.f32 %v2881_v36, %v717_v1 }
 0x14c   : > { %v2525_v15 = vpop.eup %2524  ;;  %v1007_v46 = vadd.f32 1.0, %v911_v0  ;;  %v2152_v24 = vadd.f32 -1.0, %v911_v0 }
 0x14d   : > { %v785_v31 = vmin.f32 %v3076_v61, 20.0  ;;  %v1070_v43 = vmul.f32 %v2525_v15, %v974_v60 }
 0x14e   : > { %v1222_v5 = vpop.f32.mrf.mxu1  ;;  %v975_v47 = vmul.f32 %v2152_v24, %v3059_v30  ;;  %v3122_v30 = vpop.f32.mrf.mxu2 }
 0x14f   : > { %v2527_v6 = vpop.eup %2526  ;;  %v837_v63 = vmul.f32 1.442695, %v785_v31  ;;  %v1456_v7 = vadd.f32 %v3040_v56, %v1222_v5  ;;  %v1093_v62 = vpack.c.bf16 %v1070_v43, %v1069_v4 }
 0x150   : > { %v880_v2 = vadd.f32 1.0, %v2527_v6  ;;  %v665_v10 = vpop.f32.mrf.mxu0 }
 0x151   : > { %2528 = vpow2.f32 %v837_v63  ;;  %v1539_v11 = vmul.f32 %v3082_v39, %v1456_v7  ;;  %v718_v12 = vmul.f32 %v2876_v35, %v665_v10  ;;  %1261 = vmatmul.bf16.gmra.mxu1 %v1093_v62 }
 0x152   : > { %v912_v14 = vmul.f32 %v880_v2, %v880_v2  ;;  %2530 = vrcp.f32 %v1007_v46 }
 0x153   : > { %v3094_v17 = vadd.f32 %v3088_v8, %v1539_v11  ;;  %v3097_v56 = vadd.f32 %v2881_v36, %v718_v12 }
 0x154   : > { %v1008_v21 = vadd.f32 1.0, %v912_v14  ;;  %v2153_v28 = vadd.f32 -1.0, %v912_v14 }
 0x155   : > { %v1607_v22 = vmin.f32 %v3094_v17, 20.0  ;;  %v786_v23 = vmin.f32 %v3097_v56, 20.0 }
 0x156   : > { %2532 = vrcp.f32 %v1008_v21  ;;  %v1224_v35 = vpop.f32.mrf.mxu1  ;;  %v976_v32 = vmul.f32 %v2153_v28, %v3067_v3  ;;  %v3135_v21 = vpop.f32.mrf.mxu2 }
 0x157   : > { %v2529_v25 = vpop.eup %2528  ;;  %v1639_v33 = vmul.f32 1.442695, %v1607_v22  ;;  %v839_v37 = vmul.f32 1.442695, %v786_v23  ;;  %v1458_v38 = vadd.f32 %v3048_v48, %v1224_v35 }
 0x158   : > { %v881_v36 = vadd.f32 1.0, %v2529_v25  ;;  %v668_v26 = vpop.f32.mrf.mxu0  ;;  %v2531_v9 = vpop.eup %2530 }
 0x159   : > { %2534 = vpow2.f32 %v1639_v33  ;;  %v1540_v40 = vmul.f32 %v3082_v39, %v1458_v38  ;;  %v719_v42 = vmul.f32 %v2676_v50, %v668_v26  ;;  %v1071_v51 = vmul.f32 %v2531_v9, %v975_v47 }
 0x15a   : > { %2536 = vpow2.f32 %v839_v37  ;;  %v3108_v45 = vpop.f32.mrf.mxu3  ;;  %v913_v53 = vmul.f32 %v881_v36, %v881_v36 }
 0x15b   : > { %v3113_v48 = vadd.f32 %v3088_v8, %v1540_v40  ;;  %v3118_v49 = vadd.f32 %v2677_v27, %v719_v42 }
 0x15c   : > { %v2533_v29 = vpop.eup %2532  ;;  %v1009_v52 = vadd.f32 1.0, %v913_v53  ;;  %v2154_v23 = vadd.f32 -1.0, %v913_v53 }
 0x15d   : > { %v1608_v54 = vmin.f32 %v3113_v48, 20.0  ;;  %v787_v55 = vmin.f32 %v3118_v49, 20.0  ;;  %v1072_v34 = vmul.f32 %v2533_v29, %v976_v32 }
 0x15e   : > { %v1227_v3 = vpop.f32.mrf.mxu1 }
 0x15f   : > { %v2535_v57 = vpop.eup %2534  ;;  %v1641_v13 = vmul.f32 1.442695, %v1608_v54  ;;  %v841_v58 = vmul.f32 1.442695, %v787_v55  ;;  %v1461_v41 = vadd.f32 %v3054_v19, %v1227_v3  ;;  %v1094_v1 = vpack.c.bf16 %v1072_v34, %v1071_v51 }
 0x160   : > { %v2537_v59 = vpop.eup %2536  ;;  %v1703_v60 = vadd.f32 1.0, %v2535_v57  ;;  %v670_v15 = vpop.f32.mrf.mxu0 }
 0x161   : > { %v882_v0 = vadd.f32 1.0, %v2537_v59  ;;  %2538 = vpow2.f32 %v1641_v13  ;;  %v1541_v31 = vmul.f32 %v3082_v39, %v1461_v41  ;;  %v720_v4 = vmul.f32 %v2676_v50, %v670_v15  ;;  %1266 = vmatmul.bf16.gmra.mxu1 %v1094_v1  ;;  %v3157_v1 = vpop.f32.mrf.mxu2 }
 0x162   : > { %v1735_v43 = vmul.f32 %v1703_v60, %v1703_v60  ;;  %2540 = vpow2.f32 %v841_v58  ;;  %v3126_v5 = vpop.f32.mrf.mxu3 }
 0x163   : > { %v914_v6 = vmul.f32 %v882_v0, %v882_v0  ;;  %v3129_v63 = vadd.f32 %v3088_v8, %v1541_v31  ;;  %v3131_v19 = vadd.f32 %v2677_v27, %v720_v4  ;;  %2542 = vrcp.f32 %v1009_v52 }
 0x164   : > { %v1831_v7 = vadd.f32 1.0, %v1735_v43  ;;  %v2294_v12 = vadd.f32 -1.0, %v1735_v43 }
 0x165   : > { %v1010_v62 = vadd.f32 1.0, %v914_v6  ;;  %v1609_v46 = vmin.f32 %v3129_v63, 20.0  ;;  %v788_v2 = vmin.f32 %v3131_v19, 20.0  ;;  %v2155_v24 = vadd.f32 -1.0, %v914_v6 }
 0x166   : > { %2544 = vrcp.f32 %v1831_v7  ;;  %v1229_v10 = vpop.f32.mrf.mxu1  ;;  %v1799_v26 = vmul.f32 %v2294_v12, %v3094_v17 }
 0x167   : > { %v2539_v11 = vpop.eup %2538  ;;  %2546 = vrcp.f32 %v1010_v62  ;;  %v1643_v14 = vmul.f32 1.442695, %v1609_v46  ;;  %v843_v16 = vmul.f32 1.442695, %v788_v2  ;;  %v1463_v25 = vadd.f32 %v3062_v44, %v1229_v10 }
 0x168   : > { %v2541_v22 = vpop.eup %2540  ;;  %v1704_v35 = vadd.f32 1.0, %v2539_v11  ;;  %v977_v44 = vmul.f32 %v2154_v23, %v3076_v61  ;;  %v978_v50 = vmul.f32 %v2155_v24, %v3097_v56 }
 0x169   : > { %v883_v28 = vadd.f32 1.0, %v2541_v22  ;;  %2548 = vpow2.f32 %v1643_v14  ;;  %v1542_v37 = vmul.f32 %v3082_v39, %v1463_v25  ;;  %v2543_v36 = vpop.eup %2542  ;;  %v3175_v25 = vpop.f32.mrf.mxu2 }
 0x16a   : > { %v1736_v33 = vmul.f32 %v1704_v35, %v1704_v35  ;;  %2550 = vpow2.f32 %v843_v16  ;;  %v3140_v38 = vpop.f32.mrf.mxu3  ;;  %v1073_v53 = vmul.f32 %v2543_v36, %v977_v44 }
 0x16b   : > { %v3151_v9 = vadd.f32 %v3088_v8, %v1542_v37  ;;  %v915_v27 = vmul.f32 %v883_v28, %v883_v28 }
 0x16c   : > { %v2545_v40 = vpop.eup %2544  ;;  %v1832_v42 = vadd.f32 1.0, %v1736_v33  ;;  %v2295_v51 = vadd.f32 -1.0, %v1736_v33 }
 0x16d   : > { %v2547_v47 = vpop.eup %2546  ;;  %v1895_v32 = vmul.f32 %v2545_v40, %v1799_v26  ;;  %v1610_v17 = vmin.f32 %v3151_v9, 20.0  ;;  %v1011_v13 = vadd.f32 1.0, %v915_v27  ;;  %v2156_v10 = vadd.f32 -1.0, %v915_v27 }
 0x16e   : > { %2552 = vrcp.f32 %v1832_v42  ;;  %v1232_v29 = vpop.f32.mrf.mxu1  ;;  %v1074_v54 = vmul.f32 %v2547_v47, %v978_v50  ;;  %v1800_v60 = vmul.f32 %v2295_v51, %v3113_v48 }
 0x16f   : > { %v2549_v55 = vpop.eup %2548  ;;  %1927 = vst [vmem:[%s3146_s15] sm:$0xff] %v1895_v32  ;;  %v1466_v61 = vadd.f32 %v3072_v20, %v1232_v29  ;;  %v1645_v3 = vmul.f32 1.442695, %v1610_v17  ;;  %v979_v28 = vmul.f32 %v2156_v10, %v3118_v49 }
 0x170   : > { %v2551_v34 = vpop.eup %2550  ;;  %v1705_v56 = vadd.f32 1.0, %v2549_v55  ;;  %v1095_v57 = vpack.c.bf16 %v1074_v54, %v1073_v53 }
 0x171   : > { %v884_v58 = vadd.f32 1.0, %v2551_v34  ;;  %v1543_v41 = vmul.f32 %v3082_v39, %v1466_v61  ;;  %2554 = vpow2.f32 %v1645_v3 }
 0x172   : > { %v1737_v59 = vmul.f32 %v1705_v56, %v1705_v56  ;;  %1271 = vmatmul.bf16.gmra.mxu1 %v1095_v57  ;;  %v3159_v52 = vpop.f32.mrf.mxu3  ;;  %2556 = vrcp.f32 %v1011_v13  ;;  %v3187_v56 = vpop.f32.mrf.mxu2 }
 0x173   : > { %v916_v15 = vmul.f32 %v884_v58, %v884_v58  ;;  %v3163_v20 = vadd.f32 %v3088_v8, %v1543_v41 }
 0x174   : > { %v2553_v0 = vpop.eup %2552  ;;  %v1833_v31 = vadd.f32 1.0, %v1737_v59  ;;  %v2296_v62 = vadd.f32 -1.0, %v1737_v59 }
 0x175   : > { %v1896_v4 = vmul.f32 %v2553_v0, %v1800_v60  ;;  %v1012_v43 = vadd.f32 1.0, %v916_v15  ;;  %v1611_v6 = vmin.f32 %v3163_v20, 20.0  ;;  %v2157_v11 = vadd.f32 -1.0, %v916_v15 }
 0x176   : > { %2558 = vrcp.f32 %v1833_v31  ;;  %v1234_v7 = vpop.f32.mrf.mxu1  ;;  %v1801_v23 = vmul.f32 %v2296_v62, %v3129_v63 }
 0x177   : > { %1928 = vst [vmem:[%s3146_s15 + $0x8] sm:$0xff] %v1896_v4  ;;  %2560 = vrcp.f32 %v1012_v43  ;;  %v1647_v46 = vmul.f32 1.442695, %v1611_v6  ;;  %v1468_v2 = vadd.f32 %v3099_v18, %v1234_v7  ;;  %v2555_v48 = vpop.eup %2554  ;;  %v980_v33 = vmul.f32 %v2157_v11, %v3131_v19 }
 0x178   : > { %v1706_v12 = vadd.f32 1.0, %v2555_v48  ;;  %v2557_v22 = vpop.eup %2556 }
 0x179   : > { %2562 = vpow2.f32 %v1647_v46  ;;  %v1544_v14 = vmul.f32 %v3082_v39, %v1468_v2  ;;  %v1075_v50 = vmul.f32 %v2557_v22, %v979_v28 }
 0x17a   : > { %v3169_v16 = vpop.f32.mrf.mxu3  ;;  %v1738_v24 = vmul.f32 %v1706_v12, %v1706_v12  ;;  %v3198_v10 = vpop.f32.mrf.mxu2 }
 0x17b   : > { %v3173_v35 = vadd.f32 %v3088_v8, %v1544_v14 }
 0x17c   : > { %v2559_v18 = vpop.eup %2558  ;;  %v1834_v26 = vadd.f32 1.0, %v1738_v24  ;;  %v2297_v27 = vadd.f32 -1.0, %v1738_v24 }
 0x17d   : > { %v2561_v37 = vpop.eup %2560  ;;  %v1897_v36 = vmul.f32 %v2559_v18, %v1801_v23  ;;  %v1612_v40 = vmin.f32 %v3173_v35, 20.0 }
 0x17e   : > { %v1237_v44 = vpop.f32.mrf.mxu1  ;;  %v1076_v42 = vmul.f32 %v2561_v37, %v980_v33  ;;  %2564 = vrcp.f32 %v1834_v26  ;;  %v1802_v55 = vmul.f32 %v2297_v27, %v3151_v9 }
 0x17f   : > { %v2563_v63 = vpop.eup %2562  ;;  %1929 = vst [vmem:[%s3146_s15 + $0x10] sm:$0xff] %v1897_v36  ;;  %v1649_v47 = vmul.f32 1.442695, %v1612_v40  ;;  %v1471_v32 = vadd.f32 %v3122_v30, %v1237_v44 }
 0x180   : > { %v1707_v17 = vadd.f32 1.0, %v2563_v63  ;;  %v1096_v29 = vpack.c.bf16 %v1076_v42, %v1075_v50 }
 0x181   : > { %2566 = vpow2.f32 %v1649_v47  ;;  %v1545_v49 = vmul.f32 %v3082_v39, %v1471_v32 }
 0x182   : > { %v1739_v19 = vmul.f32 %v1707_v17, %v1707_v17  ;;  %1276 = vmatmul.bf16.gmra.mxu1 %v1096_v29  ;;  %v3183_v53 = vpop.f32.mrf.mxu3  ;;  %v3211_v50 = vpop.f32.mrf.mxu2 }
 0x183   : > { %v1581_v54 = vadd.f32 %v3088_v8, %v1545_v49 }
 0x184   : > { %v1835_v51 = vadd.f32 1.0, %v1739_v19  ;;  %v2565_v61 = vpop.eup %2564  ;;  %v2298_v13 = vadd.f32 -1.0, %v1739_v19 }
 0x185   : > { %v1613_v34 = vmin.f32 %v1581_v54, 20.0  ;;  %v1898_v30 = vmul.f32 %v2565_v61, %v1802_v55 }
 0x186   : > { %2568 = vrcp.f32 %v1835_v51  ;;  %v1239_v3 = vpop.f32.mrf.mxu1  ;;  %v1803_v0 = vmul.f32 %v2298_v13, %v3163_v20 }
 0x187   : > { %v2567_v57 = vpop.eup %2566  ;;  %v1651_v58 = vmul.f32 1.442695, %v1613_v34  ;;  %v1473_v41 = vadd.f32 %v3135_v21, %v1239_v3  ;;  %1930 = vst [vmem:[%s3146_s15 + $0x18] sm:$0xff] %v1898_v30 }
 0x188   : > { %v1708_v59 = vadd.f32 1.0, %v2567_v57 }
 0x189   : > { %2570 = vpow2.f32 %v1651_v58  ;;  %v1546_v60 = vmul.f32 %v3082_v39, %v1473_v41 }
 0x18a   : > { %v1740_v9 = vmul.f32 %v1708_v59, %v1708_v59  ;;  %v3192_v15 = vpop.f32.mrf.mxu3 }
 0x18b   : > { %v1582_v31 = vadd.f32 %v3088_v8, %v1546_v60 }
 0x18c   : > { %v2569_v4 = vpop.eup %2568  ;;  %v1836_v43 = vadd.f32 1.0, %v1740_v9  ;;  %v2299_v46 = vadd.f32 -1.0, %v1740_v9 }
 0x18d   : > { %v1899_v6 = vmul.f32 %v2569_v4, %v1803_v0  ;;  %v1614_v7 = vmin.f32 %v1582_v31, 20.0  ;;  %v3230_v0 = vpop.f32.mrf.mxu2 }
 0x18e   : > { %2572 = vrcp.f32 %v1836_v43  ;;  %v1242_v62 = vpop.f32.mrf.mxu1  ;;  %v1804_v22 = vmul.f32 %v2299_v46, %v3173_v35 }
 0x18f   : > { %v2571_v21 = vpop.eup %2570  ;;  %1931 = vst [vmem:[%s3146_s15 + $0x20] sm:$0xff] %v1899_v6  ;;  %v1653_v2 = vmul.f32 1.442695, %v1614_v7  ;;  %v1476_v48 = vadd.f32 %v3157_v1, %v1242_v62 }
 0x190   : > { %v1709_v11 = vadd.f32 1.0, %v2571_v21 }
 0x191   : > { %2574 = vpow2.f32 %v1653_v2  ;;  %v1547_v20 = vmul.f32 %v3082_v39, %v1476_v48 }
 0x192   : > { %v1741_v12 = vmul.f32 %v1709_v11, %v1709_v11  ;;  %v3201_v14 = vpop.f32.mrf.mxu3 }
 0x193   : > { %v3205_v23 = vadd.f32 %v3088_v8, %v1547_v20 }
 0x194   : > { %v2573_v24 = vpop.eup %2572  ;;  %v1837_v18 = vadd.f32 1.0, %v1741_v12  ;;  %v2300_v36 = vadd.f32 -1.0, %v1741_v12 }
 0x195   : > { %v1900_v28 = vmul.f32 %v2573_v24, %v1804_v22  ;;  %v1615_v1 = vmin.f32 %v3205_v23, 20.0 }
 0x196   : > { %2576 = vrcp.f32 %v1837_v18  ;;  %v1244_v33 = vpop.f32.mrf.mxu1  ;;  %v1805_v47 = vmul.f32 %v2300_v36, %v1581_v54 }
 0x197   : > { %v2575_v37 = vpop.eup %2574  ;;  %1932 = vst [vmem:[%s3146_s15 + $0x28] sm:$0xff] %v1900_v28  ;;  %v1655_v26 = vmul.f32 1.442695, %v1615_v1  ;;  %v1478_v40 = vadd.f32 %v3175_v25, %v1244_v33 }
 0x198   : > { %v1710_v44 = vadd.f32 1.0, %v2575_v37 }
 0x199   : > { %2578 = vpow2.f32 %v1655_v26  ;;  %v1548_v35 = vmul.f32 %v3082_v39, %v1478_v40 }
 0x19a   : > { %v1742_v42 = vmul.f32 %v1710_v44, %v1710_v44  ;;  %v1515_v63 = vpop.f32.mrf.mxu3 }
 0x19b   : > { %v3214_v32 = vadd.f32 %v3088_v8, %v1548_v35  ;;  %v1516_v27 = vadd.f32 %v1515_v63, %v3108_v45  ;;  %v3248_v35 = vpop.f32.mrf.mxu2 }
 0x19c   : > { %v2577_v17 = vpop.eup %2576  ;;  %v1838_v29 = vadd.f32 1.0, %v1742_v42  ;;  %v2301_v61 = vadd.f32 -1.0, %v1742_v42 }
 0x19d   : > { %v1901_v49 = vmul.f32 %v2577_v17, %v1805_v47  ;;  %v1616_v25 = vmin.f32 %v3214_v32, 20.0  ;;  %v1563_v19 = vmul.f32 %v3082_v39, %v1516_v27 }
 0x19e   : > { %2580 = vrcp.f32 %v1838_v29  ;;  %v1247_v55 = vpop.f32.mrf.mxu1  ;;  %v1806_v41 = vmul.f32 %v2301_v61, %v1582_v31 }
 0x19f   : > { %v2579_v51 = vpop.eup %2578  ;;  %1933 = vst [vmem:[%s3146_s15 + $0x30] sm:$0xff] %v1901_v49  ;;  %v1657_v34 = vmul.f32 1.442695, %v1616_v25  ;;  %v3221_v54 = vadd.f32 %v3088_v8, %v1563_v19  ;;  %v1481_v30 = vadd.f32 %v3187_v56, %v1247_v55 }
 0x1a0   : > { %v1711_v3 = vadd.f32 1.0, %v2579_v51 }
 0x1a1   : > { %2582 = vpow2.f32 %v1657_v34  ;;  %v1631_v45 = vmin.f32 %v3221_v54, 20.0  ;;  %v1549_v57 = vmul.f32 %v3082_v39, %v1481_v30 }
 0x1a2   : > { %v1743_v13 = vmul.f32 %v1711_v3, %v1711_v3  ;;  %v1517_v58 = vpop.f32.mrf.mxu3 }
 0x1a3   : > { %v1687_v59 = vmul.f32 1.442695, %v1631_v45  ;;  %v3227_v60 = vadd.f32 %v3088_v8, %v1549_v57  ;;  %v1518_v9 = vadd.f32 %v1517_v58, %v3126_v5 }
 0x1a4   : > { %v2581_v4 = vpop.eup %2580  ;;  %v1839_v56 = vadd.f32 1.0, %v1743_v13  ;;  %v2302_v31 = vadd.f32 -1.0, %v1743_v13 }
 0x1a5   : > { %v1902_v43 = vmul.f32 %v2581_v4, %v1806_v41  ;;  %2584 = vpow2.f32 %v1687_v59  ;;  %v1617_v6 = vmin.f32 %v3227_v60, 20.0  ;;  %v1564_v7 = vmul.f32 %v3082_v39, %v1518_v9 }
 0x1a6   : > { %2586 = vrcp.f32 %v1839_v56  ;;  %v1249_v62 = vpop.f32.mrf.mxu1  ;;  %v1807_v18 = vmul.f32 %v2302_v31, %v3205_v23 }
 0x1a7   : > { %v2583_v21 = vpop.eup %2582  ;;  %1934 = vst [vmem:[%s3146_s15 + $0x38] sm:$0xff] %v1902_v43  ;;  %v1659_v46 = vmul.f32 1.442695, %v1617_v6  ;;  %v3236_v2 = vadd.f32 %v3088_v8, %v1564_v7  ;;  %v1483_v5 = vadd.f32 %v3198_v10, %v1249_v62 }
 0x1a8   : > { %v1712_v48 = vadd.f32 1.0, %v2583_v21  ;;  %v3270_v21 = vpop.f32.mrf.mxu2 }
 0x1a9   : > { %2588 = vpow2.f32 %v1659_v46  ;;  %v1632_v11 = vmin.f32 %v3236_v2, 20.0  ;;  %v1550_v20 = vmul.f32 %v3082_v39, %v1483_v5 }
 0x1aa   : > { %v1744_v12 = vmul.f32 %v1712_v48, %v1712_v48  ;;  %v1520_v22 = vpop.f32.mrf.mxu3 }
 0x1ab   : > { %v2585_v24 = vpop.eup %2584  ;;  %v1689_v28 = vmul.f32 1.442695, %v1632_v11  ;;  %v3243_v1 = vadd.f32 %v3088_v8, %v1550_v20  ;;  %v1521_v33 = vadd.f32 %v1520_v22, %v3140_v38 }
 0x1ac   : > { %v2587_v37 = vpop.eup %2586  ;;  %v1840_v10 = vadd.f32 1.0, %v1744_v12  ;;  %v1727_v36 = vadd.f32 1.0, %v2585_v24  ;;  %v2303_v47 = vadd.f32 -1.0, %v1744_v12 }
 0x1ad   : > { %v1903_v26 = vmul.f32 %v2587_v37, %v1807_v18  ;;  %2590 = vpow2.f32 %v1689_v28  ;;  %v1618_v40 = vmin.f32 %v3243_v1, 20.0  ;;  %v1565_v44 = vmul.f32 %v3082_v39, %v1521_v33 }
 0x1ae   : > { %2592 = vrcp.f32 %v1840_v10  ;;  %v1759_v23 = vmul.f32 %v1727_v36, %v1727_v36  ;;  %v1252_v42 = vpop.f32.mrf.mxu1  ;;  %v1808_v30 = vmul.f32 %v2303_v47, %v3214_v32 }
 0x1af   : > { %v2589_v63 = vpop.eup %2588  ;;  %1935 = vst [vmem:[%s3146_s15 + $0x40] sm:$0xff] %v1903_v26  ;;  %v1661_v27 = vmul.f32 1.442695, %v1618_v40  ;;  %v3252_v38 = vadd.f32 %v3088_v8, %v1565_v44  ;;  %v1486_v17 = vadd.f32 %v3211_v50, %v1252_v42 }
 0x1b0   : > { %v1855_v29 = vadd.f32 1.0, %v1759_v23  ;;  %v1713_v49 = vadd.f32 1.0, %v2589_v63  ;;  %v2318_v55 = vadd.f32 -1.0, %v1759_v23 }
 0x1b1   : > { %2594 = vpow2.f32 %v1661_v27  ;;  %v1633_v25 = vmin.f32 %v3252_v38, 20.0  ;;  %v1551_v19 = vmul.f32 %v3082_v39, %v1486_v17 }
 0x1b2   : > { %2596 = vrcp.f32 %v1855_v29  ;;  %v1745_v51 = vmul.f32 %v1713_v49, %v1713_v49  ;;  %v1522_v61 = vpop.f32.mrf.mxu3  ;;  %v1823_v4 = vmul.f32 %v2318_v55, %v3221_v54 }
 0x1b3   : > { %v2591_v34 = vpop.eup %2590  ;;  %v1691_v3 = vmul.f32 1.442695, %v1633_v25  ;;  %v3259_v45 = vadd.f32 %v3088_v8, %v1551_v19  ;;  %v1523_v50 = vadd.f32 %v1522_v61, %v3159_v52 }
 0x1b4   : > { %v2593_v57 = vpop.eup %2592  ;;  %v1841_v13 = vadd.f32 1.0, %v1745_v51  ;;  %v1728_v58 = vadd.f32 1.0, %v2591_v34  ;;  %v2304_v6 = vadd.f32 -1.0, %v1745_v51  ;;  %v1495_v51 = vpop.f32.mrf.mxu2 }
 0x1b5   : > { %v1904_v41 = vmul.f32 %v2593_v57, %v1808_v30  ;;  %2598 = vpow2.f32 %v1691_v3  ;;  %v1619_v59 = vmin.f32 %v3259_v45, 20.0  ;;  %v1566_v9 = vmul.f32 %v3082_v39, %v1523_v50 }
 0x1b6   : > { %2600 = vrcp.f32 %v1841_v13  ;;  %v1760_v32 = vmul.f32 %v1728_v58, %v1728_v58  ;;  %v1254_v56 = vpop.f32.mrf.mxu1  ;;  %v1809_v18 = vmul.f32 %v2304_v6, %v3227_v60 }
 0x1b7   : > { %v2595_v43 = vpop.eup %2594  ;;  %1936 = vst [vmem:[%s3146_s15 + $0x48] sm:$0xff] %v1904_v41  ;;  %v1663_v7 = vmul.f32 1.442695, %v1619_v59  ;;  %v3267_v52 = vadd.f32 %v3088_v8, %v1566_v9  ;;  %v1488_v62 = vadd.f32 %v3230_v0, %v1254_v56 }
 0x1b8   : > { %v2597_v31 = vpop.eup %2596  ;;  %v1856_v46 = vadd.f32 1.0, %v1760_v32  ;;  %v1714_v5 = vadd.f32 1.0, %v2595_v43  ;;  %v2319_v20 = vadd.f32 -1.0, %v1760_v32 }
 0x1b9   : > { %v1919_v48 = vmul.f32 %v2597_v31, %v1823_v4  ;;  %2602 = vpow2.f32 %v1663_v7  ;;  %v1634_v54 = vmin.f32 %v3267_v52, 20.0  ;;  %v1552_v11 = vmul.f32 %v3082_v39, %v1488_v62 }
 0x1ba   : > { %2604 = vrcp.f32 %v1856_v46  ;;  %v1746_v12 = vmul.f32 %v1714_v5, %v1714_v5  ;;  %v1525_v22 = vpop.f32.mrf.mxu3  ;;  %v1824_v23 = vmul.f32 %v2319_v20, %v3236_v2 }
 0x1bb   : > { %v2599_v24 = vpop.eup %2598  ;;  %1951 = vst [vmem:[%s3146_s15 + $0xc0] sm:$0xff] %v1919_v48  ;;  %v1693_v0 = vmul.f32 1.442695, %v1634_v54  ;;  %v3277_v28 = vadd.f32 %v3088_v8, %v1552_v11  ;;  %v1526_v33 = vadd.f32 %v1525_v22, %v3169_v16 }
 0x1bc   : > { %v2601_v37 = vpop.eup %2600  ;;  %v1842_v10 = vadd.f32 1.0, %v1746_v12  ;;  %v1729_v36 = vadd.f32 1.0, %v2599_v24  ;;  %v2305_v47 = vadd.f32 -1.0, %v1746_v12 }
 0x1bd   : > { %v1905_v26 = vmul.f32 %v2601_v37, %v1809_v18  ;;  %2606 = vpow2.f32 %v1693_v0  ;;  %v1620_v40 = vmin.f32 %v3277_v28, 20.0  ;;  %v1567_v44 = vmul.f32 %v3082_v39, %v1526_v33  ;;  %v1497_v37 = vpop.f32.mrf.mxu2 }
 0x1be   : > { %2608 = vrcp.f32 %v1842_v10  ;;  %v1761_v60 = vmul.f32 %v1729_v36, %v1729_v36  ;;  %v1257_v42 = vpop.f32.mrf.mxu1  ;;  %v1810_v50 = vmul.f32 %v2305_v47, %v3243_v1 }
 0x1bf   : > { %v2603_v63 = vpop.eup %2602  ;;  %1937 = vst [vmem:[%s3146_s15 + $0x50] sm:$0xff] %v1905_v26  ;;  %v1665_v27 = vmul.f32 1.442695, %v1620_v40  ;;  %v3285_v16 = vadd.f32 %v3088_v8, %v1567_v44  ;;  %v1491_v17 = vadd.f32 %v3248_v35, %v1257_v42 }
 0x1c0   : > { %v2605_v29 = vpop.eup %2604  ;;  %v1857_v49 = vadd.f32 1.0, %v1761_v60  ;;  %v1715_v25 = vadd.f32 1.0, %v2603_v63  ;;  %v2320_v61 = vadd.f32 -1.0, %v1761_v60 }
 0x1c1   : > { %v1920_v19 = vmul.f32 %v2605_v29, %v1824_v23  ;;  %2610 = vpow2.f32 %v1665_v27  ;;  %v1635_v2 = vmin.f32 %v3285_v16, 20.0  ;;  %v1553_v55 = vmul.f32 %v3082_v39, %v1491_v17 }
 0x1c2   : > { %2612 = vrcp.f32 %v1857_v49  ;;  %v1747_v34 = vmul.f32 %v1715_v25, %v1715_v25  ;;  %v1527_v30 = vpop.f32.mrf.mxu3  ;;  %v1825_v56 = vmul.f32 %v2320_v61, %v3252_v38 }
 0x1c3   : > { %v2607_v3 = vpop.eup %2606  ;;  %1952 = vst [vmem:[%s3146_s15 + $0xc8] sm:$0xff] %v1920_v19  ;;  %v1695_v35 = vmul.f32 1.442695, %v1635_v2  ;;  %v3293_v57 = vadd.f32 %v3088_v8, %v1553_v55  ;;  %v1528_v13 = vadd.f32 %v1527_v30, %v3183_v53 }
 0x1c4   : > { %v2609_v58 = vpop.eup %2608  ;;  %v1843_v41 = vadd.f32 1.0, %v1747_v34  ;;  %v1730_v59 = vadd.f32 1.0, %v2607_v3  ;;  %v2306_v7 = vadd.f32 -1.0, %v1747_v34 }
 0x1c5   : > { %v1906_v9 = vmul.f32 %v2609_v58, %v1810_v50  ;;  %2614 = vpow2.f32 %v1695_v35  ;;  %v1621_v4 = vmin.f32 %v3293_v57, 20.0  ;;  %v1568_v32 = vmul.f32 %v3082_v39, %v1528_v13 }
 0x1c6   : > { %2616 = vrcp.f32 %v1843_v41  ;;  %v1762_v1 = vmul.f32 %v1730_v59, %v1730_v59  ;;  %v1259_v43 = vpop.f32.mrf.mxu1  ;;  %v1811_v18 = vmul.f32 %v2306_v7, %v3259_v45 }
 0x1c7   : > { %v2611_v6 = vpop.eup %2610  ;;  %1938 = vst [vmem:[%s3146_s15 + $0x58] sm:$0xff] %v1906_v9  ;;  %v1667_v62 = vmul.f32 1.442695, %v1621_v4  ;;  %v3301_v53 = vadd.f32 %v3088_v8, %v1568_v32  ;;  %v1493_v31 = vadd.f32 %v3270_v21, %v1259_v43  ;;  %v1500_v32 = vpop.f32.mrf.mxu2 }
 0x1c8   : > { %v2613_v46 = vpop.eup %2612  ;;  %v1858_v5 = vadd.f32 1.0, %v1762_v1  ;;  %v1716_v48 = vadd.f32 1.0, %v2611_v6  ;;  %v2321_v20 = vadd.f32 -1.0, %v1762_v1 }
 0x1c9   : > { %v1921_v54 = vmul.f32 %v2613_v46, %v1825_v56  ;;  %2618 = vpow2.f32 %v1667_v62  ;;  %v1636_v38 = vmin.f32 %v3301_v53, 20.0  ;;  %v1554_v11 = vmul.f32 %v3082_v39, %v1493_v31 }
 0x1ca   : > { %2620 = vrcp.f32 %v1858_v5  ;;  %v1748_v12 = vmul.f32 %v1716_v48, %v1716_v48  ;;  %v1530_v22 = vpop.f32.mrf.mxu3  ;;  %v1826_v60 = vmul.f32 %v2321_v20, %v3267_v52 }
 0x1cb   : > { %v2615_v24 = vpop.eup %2614  ;;  %1953 = vst [vmem:[%s3146_s15 + $0xd0] sm:$0xff] %v1921_v54  ;;  %v1697_v0 = vmul.f32 1.442695, %v1636_v38  ;;  %v3309_v21 = vadd.f32 %v3088_v8, %v1554_v11  ;;  %v1531_v33 = vadd.f32 %v1530_v22, %v3192_v15 }
 0x1cc   : > { %v2617_v10 = vpop.eup %2616  ;;  %v1844_v36 = vadd.f32 1.0, %v1748_v12  ;;  %v1731_v26 = vadd.f32 1.0, %v2615_v24  ;;  %v2307_v47 = vadd.f32 -1.0, %v1748_v12 }
 0x1cd   : > { %v1907_v40 = vmul.f32 %v2617_v10, %v1811_v18  ;;  %2622 = vpow2.f32 %v1697_v0  ;;  %v1622_v44 = vmin.f32 %v3309_v21, 20.0  ;;  %v1569_v23 = vmul.f32 %v3082_v39, %v1531_v33 }
 0x1ce   : > { %2624 = vrcp.f32 %v1844_v36  ;;  %v1763_v45 = vmul.f32 %v1731_v26, %v1731_v26  ;;  %v1262_v42 = vpop.f32.mrf.mxu1  ;;  %v1812_v3 = vmul.f32 %v2307_v47, %v3277_v28  ;;  %v3347_v47 = vld [vmem:[%s3399_s9] ss:$0 sm:$0xff] }
 0x1cf   : > { %v2619_v63 = vpop.eup %2618  ;;  %1939 = vst [vmem:[%s3146_s15 + $0x60] sm:$0xff] %v1907_v40  ;;  %v1669_v15 = vmul.f32 1.442695, %v1622_v44  ;;  %v3317_v27 = vadd.f32 %v3088_v8, %v1569_v23  ;;  %v1496_v17 = vadd.f32 %v1495_v51, %v1262_v42 }
 0x1d0   : > { %v2621_v29 = vpop.eup %2620  ;;  %v1859_v49 = vadd.f32 1.0, %v1763_v45  ;;  %v1717_v25 = vadd.f32 1.0, %v2619_v63  ;;  %v2322_v55 = vadd.f32 -1.0, %v1763_v45 }
 0x1d1   : > { %v1922_v19 = vmul.f32 %v2621_v29, %v1826_v60  ;;  %2626 = vpow2.f32 %v1669_v15  ;;  %v1637_v2 = vmin.f32 %v3317_v27, 20.0  ;;  %v1555_v52 = vmul.f32 %v3082_v39, %v1496_v17 }
 0x1d2   : > { %2628 = vrcp.f32 %v1859_v49  ;;  %v1749_v61 = vmul.f32 %v1717_v25, %v1717_v25  ;;  %v1532_v34 = vpop.f32.mrf.mxu3  ;;  %v1827_v56 = vmul.f32 %v2322_v55, %v3285_v16  ;;  %v3355_v25 = vld [vmem:[%s3400_s10] ss:$0 sm:$0xff] }
 0x1d3   : > { %v2623_v30 = vpop.eup %2622  ;;  %1954 = vst [vmem:[%s3146_s15 + $0xd8] sm:$0xff] %v1922_v19  ;;  %v1699_v50 = vmul.f32 1.442695, %v1637_v2  ;;  %v3324_v51 = vadd.f32 %v3088_v8, %v1555_v52  ;;  %v1533_v35 = vadd.f32 %v1532_v34, %v3201_v14 }
 0x1d4   : > { %v2625_v13 = vpop.eup %2624  ;;  %v1845_v58 = vadd.f32 1.0, %v1749_v61  ;;  %v1732_v41 = vadd.f32 1.0, %v2623_v30  ;;  %v2308_v6 = vadd.f32 -1.0, %v1749_v61 }
 0x1d5   : > { %v1908_v59 = vmul.f32 %v2625_v13, %v1812_v3  ;;  %2630 = vpow2.f32 %v1699_v50  ;;  %v1623_v9 = vmin.f32 %v3324_v51, 20.0  ;;  %v1570_v4 = vmul.f32 %v3082_v39, %v1533_v35 }
 0x1d6   : > { %2632 = vrcp.f32 %v1845_v58  ;;  %v1764_v28 = vmul.f32 %v1732_v41, %v1732_v41  ;;  %v1264_v1 = vpop.f32.mrf.mxu1  ;;  %v1813_v20 = vmul.f32 %v2308_v6, %v3293_v57 }
 0x1d7   : > { %v2627_v43 = vpop.eup %2626  ;;  %1940 = vst [vmem:[%s3146_s15 + $0x68] sm:$0xff] %v1908_v59  ;;  %v1671_v14 = vmul.f32 1.442695, %v1623_v9  ;;  %v3332_v7 = vadd.f32 %v3088_v8, %v1570_v4  ;;  %v1498_v62 = vadd.f32 %v1497_v37, %v1264_v1 }
 0x1d8   : > { %v2629_v31 = vpop.eup %2628  ;;  %v1860_v46 = vadd.f32 1.0, %v1764_v28  ;;  %v1718_v5 = vadd.f32 1.0, %v2627_v43  ;;  %v2323_v12 = vadd.f32 -1.0, %v1764_v28 }
 0x1d9   : > { %v1923_v48 = vmul.f32 %v2629_v31, %v1827_v56  ;;  %2634 = vpow2.f32 %v1671_v14  ;;  %v1638_v54 = vmin.f32 %v3332_v7, 20.0  ;;  %v1556_v16 = vmul.f32 %v3082_v39, %v1498_v62 }
 0x1da   : > { %2636 = vrcp.f32 %v1860_v46  ;;  %v1750_v38 = vmul.f32 %v1718_v5, %v1718_v5  ;;  %v1828_v57 = vmul.f32 %v2323_v12, %v3301_v53 }
 0x1db   : > { %v2631_v11 = vpop.eup %2630  ;;  %1955 = vst [vmem:[%s3146_s15 + $0xe0] sm:$0xff] %v1923_v48  ;;  %v1701_v22 = vmul.f32 1.442695, %v1638_v54  ;;  %v3339_v24 = vadd.f32 %v3088_v8, %v1556_v16  ;;  %v1502_v8 = vpop.f32.mrf.mxu2 }
 0x1dc   : > { %v2633_v18 = vpop.eup %2632  ;;  %v1846_v0 = vadd.f32 1.0, %v1750_v38  ;;  %v1733_v33 = vadd.f32 1.0, %v2631_v11  ;;  %v2309_v40 = vadd.f32 -1.0, %v1750_v38 }
 0x1dd   : > { %v1909_v37 = vmul.f32 %v2633_v18, %v1813_v20  ;;  %2638 = vpow2.f32 %v1701_v22  ;;  %v1624_v10 = vmin.f32 %v3339_v24, 20.0 }
 0x1de   : > { %2640 = vrcp.f32 %v1846_v0  ;;  %v1765_v39 = vmul.f32 %v1733_v33, %v1733_v33  ;;  %v1267_v36 = vpop.f32.mrf.mxu1  ;;  %v1814_v29 = vmul.f32 %v2309_v40, %v3309_v21 }
 0x1df   : > { %v2635_v26 = vpop.eup %2634  ;;  %1941 = vst [vmem:[%s3146_s15 + $0x70] sm:$0xff] %v1909_v37  ;;  %v1673_v44 = vmul.f32 1.442695, %v1624_v10  ;;  %v1501_v23 = vadd.f32 %v1500_v32, %v1267_v36 }
 0x1e0   : > { %v2637_v60 = vpop.eup %2636  ;;  %v1861_v45 = vadd.f32 1.0, %v1765_v39  ;;  %v1719_v42 = vadd.f32 1.0, %v2635_v26  ;;  %v2324_v49 = vadd.f32 -1.0, %v1765_v39 }
 0x1e1   : > { %v1924_v63 = vmul.f32 %v2637_v60, %v1828_v57  ;;  %2642 = vpow2.f32 %v1673_v44  ;;  %v1557_v15 = vmul.f32 %v3347_v47, %v1501_v23 }
 0x1e2   : > { %2644 = vrcp.f32 %v1861_v45  ;;  %v1751_v17 = vmul.f32 %v1719_v42, %v1719_v42  ;;  %v1829_v50 = vmul.f32 %v2324_v49, %v3317_v27 }
 0x1e3   : > { %v2639_v53 = vpop.eup %2638  ;;  %1956 = vst [vmem:[%s3146_s15 + $0xe8] sm:$0xff] %v1924_v63  ;;  %v3358_v19 = vadd.f32 %v3355_v25, %v1557_v15  ;;  %v1505_v56 = vpop.f32.mrf.mxu2 }
 0x1e4   : > { %v2641_v2 = vpop.eup %2640  ;;  %v1847_v52 = vadd.f32 1.0, %v1751_v17  ;;  %v1734_v55 = vadd.f32 1.0, %v2639_v53  ;;  %v2310_v35 = vadd.f32 -1.0, %v1751_v17 }
 0x1e5   : > { %v1910_v61 = vmul.f32 %v2641_v2, %v1814_v29  ;;  %v1625_v34 = vmin.f32 %v3358_v19, 20.0 }
 0x1e6   : > { %2646 = vrcp.f32 %v1847_v52  ;;  %v1766_v30 = vmul.f32 %v1734_v55, %v1734_v55  ;;  %v1269_v3 = vpop.f32.mrf.mxu1  ;;  %v1815_v1 = vmul.f32 %v2310_v35, %v3324_v51 }
 0x1e7   : > { %v2643_v21 = vpop.eup %2642  ;;  %1942 = vst [vmem:[%s3146_s15 + $0x78] sm:$0xff] %v1910_v61  ;;  %v1675_v13 = vmul.f32 1.442695, %v1625_v34  ;;  %v1503_v58 = vadd.f32 %v1502_v8, %v1269_v3 }
 0x1e8   : > { %v2645_v41 = vpop.eup %2644  ;;  %v1862_v59 = vadd.f32 1.0, %v1766_v30  ;;  %v1720_v9 = vadd.f32 1.0, %v2643_v21  ;;  %v2325_v43 = vadd.f32 -1.0, %v1766_v30 }
 0x1e9   : > { %v1925_v4 = vmul.f32 %v2645_v41, %v1829_v50  ;;  %2648 = vpow2.f32 %v1675_v13  ;;  %v1558_v32 = vmul.f32 %v3347_v47, %v1503_v58 }
 0x1ea   : > { %2650 = vrcp.f32 %v1862_v59  ;;  %v1752_v28 = vmul.f32 %v1720_v9, %v1720_v9  ;;  %v1830_v5 = vmul.f32 %v2325_v43, %v3332_v7 }
 0x1eb   : > { %1957 = vst [vmem:[%s3146_s15 + $0xf0] sm:$0xff] %v1925_v4  ;;  %v1594_v27 = vadd.f32 %v3355_v25, %v1558_v32  ;;  %v1507_v0 = vpop.f32.mrf.mxu2 }
 0x1ec   : > { %v2647_v6 = vpop.eup %2646  ;;  %v1848_v14 = vadd.f32 1.0, %v1752_v28  ;;  %v2311_v48 = vadd.f32 -1.0, %v1752_v28 }
 0x1ed   : > { %v1911_v62 = vmul.f32 %v2647_v6, %v1815_v1  ;;  %v1626_v31 = vmin.f32 %v1594_v27, 20.0 }
 0x1ee   : > { %2652 = vrcp.f32 %v1848_v14  ;;  %v1816_v18 = vmul.f32 %v2311_v48, %v3339_v24 }
 0x1ef   : > { %v2649_v46 = vpop.eup %2648  ;;  %1943 = vst [vmem:[%s3146_s15 + $0x80] sm:$0xff] %v1911_v62  ;;  %v1677_v54 = vmul.f32 1.442695, %v1626_v31  ;;  %v1272_v16 = vpop.f32.mrf.mxu1 }
 0x1f0   : > { %v2651_v38 = vpop.eup %2650  ;;  %v1721_v11 = vadd.f32 1.0, %v2649_v46  ;;  %v1506_v51 = vadd.f32 %v1505_v56, %v1272_v16 }
 0x1f1   : > { %v1926_v20 = vmul.f32 %v2651_v38, %v1830_v5  ;;  %2654 = vpow2.f32 %v1677_v54 }
 0x1f2   : > { %v1753_v12 = vmul.f32 %v1721_v11, %v1721_v11  ;;  %v1559_v22 = vmul.f32 %v3347_v47, %v1506_v51 }
 0x1f3   : > { %1958 = vst [vmem:[%s3146_s15 + $0xf8] sm:$0xff] %v1926_v20  ;;  %v1510_v17 = vpop.f32.mrf.mxu2 }
 0x1f4   : > { %v2653_v33 = vpop.eup %2652  ;;  %v1849_v37 = vadd.f32 1.0, %v1753_v12  ;;  %v1595_v7 = vadd.f32 %v3355_v25, %v1559_v22  ;;  %v2312_v26 = vadd.f32 -1.0, %v1753_v12 }
 0x1f5   : > { %v1912_v10 = vmul.f32 %v2653_v33, %v1816_v18 }
 0x1f6   : > { %2656 = vrcp.f32 %v1849_v37  ;;  %v1627_v39 = vmin.f32 %v1595_v7, 20.0  ;;  %v1817_v60 = vmul.f32 %v2312_v26, %v3358_v19 }
 0x1f7   : > { %v2655_v36 = vpop.eup %2654  ;;  %1944 = vst [vmem:[%s3146_s15 + $0x88] sm:$0xff] %v1912_v10  ;;  %v1274_v57 = vpop.f32.mrf.mxu1 }
 0x1f8   : > { %v1722_v40 = vadd.f32 1.0, %v2655_v36  ;;  %v1679_v44 = vmul.f32 1.442695, %v1627_v39  ;;  %v1508_v23 = vadd.f32 %v1507_v0, %v1274_v57 }
 0x1fa   : > { %v1754_v8 = vmul.f32 %v1722_v40, %v1722_v40  ;;  %2658 = vpow2.f32 %v1679_v44  ;;  %v1560_v24 = vmul.f32 %v3347_v47, %v1508_v23 }
 0x1fb   : > { %v1512_v58 = vpop.f32.mrf.mxu2 }
 0x1fc   : > { %v2657_v45 = vpop.eup %2656  ;;  %v1850_v42 = vadd.f32 1.0, %v1754_v8  ;;  %v1596_v63 = vadd.f32 %v3355_v25, %v1560_v24  ;;  %v2313_v29 = vadd.f32 -1.0, %v1754_v8 }
 0x1fd   : > { %v1913_v15 = vmul.f32 %v2657_v45, %v1817_v60 }
 0x1fe   : > { %2660 = vrcp.f32 %v1850_v42  ;;  %v1628_v53 = vmin.f32 %v1596_v63, 20.0  ;;  %v1818_v19 = vmul.f32 %v2313_v29, %v1594_v27 }
 0x1ff   : > { %1945 = vst [vmem:[%s3146_s15 + $0x90] sm:$0xff] %v1913_v15  ;;  %v1277_v49 = vpop.f32.mrf.mxu1 }
 0x200   : > { %v2659_v2 = vpop.eup %2658  ;;  %v1681_v52 = vmul.f32 1.442695, %v1628_v53  ;;  %v1511_v55 = vadd.f32 %v1510_v17, %v1277_v49 }
 0x201   : > { %v1723_v61 = vadd.f32 1.0, %v2659_v2 }
 0x202   : > { %2662 = vpow2.f32 %v1681_v52  ;;  %v1561_v34 = vmul.f32 %v3347_v47, %v1511_v55 }
 0x203   : > { %v1755_v30 = vmul.f32 %v1723_v61, %v1723_v61 }
 0x204   : > { %v2661_v3 = vpop.eup %2660  ;;  %v1597_v21 = vadd.f32 %v3355_v25, %v1561_v34 }
 0x205   : > { %v1914_v50 = vmul.f32 %v2661_v3, %v1818_v19  ;;  %v1851_v35 = vadd.f32 1.0, %v1755_v30  ;;  %v2314_v9 = vadd.f32 -1.0, %v1755_v30 }
 0x206   : > { %v1629_v13 = vmin.f32 %v1597_v21, 20.0 }
 0x207   : > { %1946 = vst [vmem:[%s3146_s15 + $0x98] sm:$0xff] %v1914_v50  ;;  %2664 = vrcp.f32 %v1851_v35  ;;  %v1279_v41 = vpop.f32.mrf.mxu1  ;;  %v1819_v43 = vmul.f32 %v2314_v9, %v1595_v7 }
 0x208   : > { %v2663_v59 = vpop.eup %2662  ;;  %v1683_v4 = vmul.f32 1.442695, %v1629_v13  ;;  %v1513_v32 = vadd.f32 %v1512_v58, %v1279_v41 }
 0x209   : > { %v1724_v56 = vadd.f32 1.0, %v2663_v59 }
 0x20a   : > { %2666 = vpow2.f32 %v1683_v4  ;;  %v1562_v28 = vmul.f32 %v3347_v47, %v1513_v32 }
 0x20b   : > { %v1756_v1 = vmul.f32 %v1724_v56, %v1724_v56 }
 0x20c   : > { %v1598_v27 = vadd.f32 %v3355_v25, %v1562_v28 }
 0x20d   : > { %v2665_v6 = vpop.eup %2664  ;;  %v1852_v14 = vadd.f32 1.0, %v1756_v1  ;;  %v2315_v5 = vadd.f32 -1.0, %v1756_v1 }
 0x20e   : > { %v1915_v62 = vmul.f32 %v2665_v6, %v1819_v43  ;;  %v1630_v31 = vmin.f32 %v1598_v27, 20.0 }
 0x20f   : > { %2668 = vrcp.f32 %v1852_v14  ;;  %v1820_v38 = vmul.f32 %v2315_v5, %v1596_v63 }
 0x210   : > { %v2667_v46 = vpop.eup %2666  ;;  %1947 = vst [vmem:[%s3146_s15 + $0xa0] sm:$0xff] %v1915_v62  ;;  %v1685_v48 = vmul.f32 1.442695, %v1630_v31 }
 0x211   : > { %v1725_v54 = vadd.f32 1.0, %v2667_v46 }
 0x212   : > { %2670 = vpow2.f32 %v1685_v48 }
 0x213   : > { %v1757_v16 = vmul.f32 %v1725_v54, %v1725_v54 }
 0x215   : > { %v2669_v47 = vpop.eup %2668  ;;  %v1853_v11 = vadd.f32 1.0, %v1757_v16  ;;  %v2316_v20 = vadd.f32 -1.0, %v1757_v16 }
 0x216   : > { %v1916_v51 = vmul.f32 %v2669_v47, %v1820_v38 }
 0x217   : > { %2672 = vrcp.f32 %v1853_v11  ;;  %v1821_v18 = vmul.f32 %v2316_v20, %v1597_v21 }
 0x218   : > { %v2671_v25 = vpop.eup %2670  ;;  %1948 = vst [vmem:[%s3146_s15 + $0xa8] sm:$0xff] %v1916_v51 }
 0x219   : > { %v1726_v12 = vadd.f32 1.0, %v2671_v25 }
 0x21b   : > { %v1758_v22 = vmul.f32 %v1726_v12, %v1726_v12 }
 0x21d   : > { %v2673_v0 = vpop.eup %2672  ;;  %v1854_v33 = vadd.f32 1.0, %v1758_v22  ;;  %v2317_v7 = vadd.f32 -1.0, %v1758_v22 }
 0x21e   : > { %v1917_v37 = vmul.f32 %v2673_v0, %v1821_v18 }
 0x21f   : > { %2674 = vrcp.f32 %v1854_v33  ;;  %v1822_v10 = vmul.f32 %v2317_v7, %v1598_v27 }
 0x220   : > { %1949 = vst [vmem:[%s3146_s15 + $0xb0] sm:$0xff] %v1917_v37 }
 0x225   : > { %v2675_v39 = vpop.eup %2674 }
 0x226   : > { %v1918_v36 = vmul.f32 %v2675_v39, %v1822_v10 }
 0x228   : > { %1950 = vst [vmem:[%s3146_s15 + $0xb8] sm:$0xff] %v1918_v36 }
 0x229 PF: > { %s21_s17 = sadd.s32 1, %s2686_s17  }
 0x22a   : > { %p18_p4 = scmp.ge.s32.totalorder %s21_s17, 4  }
 0x22c   :  { %20 = sbr.rel (!%p18_p4) target bundleno = 1 (0x1), region = 97 }

// kernel: _lambda_.4
= control target key start
LH: loop header
LB: loop body
LE: loop exit
PB: predicated region body
PF: predicated region fallthrough
CT: control target
= control target key end

     0   :  { %s3553_s21 = smov 0   ;;  %s4379_s0 = inlined_call_operand.vmem [shape: bf16[512,4], index: 0, kind: input, shape index: {}]   ;;  %s4380_s1 = inlined_call_operand.vmem [shape: bf16[512,6], index: 1, kind: input, shape index: {}]   ;;  %s4381_s2 = inlined_call_operand.vmem [shape: bf16[4,128], index: 2, kind: input, shape index: {}]   ;;  %s4382_s3 = inlined_call_operand.vmem [shape: f32[1,128], index: 3, kind: input, shape index: {}]   ;;  %s4383_s4 = inlined_call_operand.vmem [shape: f32[1,128], index: 4, kind: input, shape index: {}]   ;;  %s4384_s5 = inlined_call_operand.vmem [shape: bf16[6,128], index: 5, kind: input, shape index: {}]   ;;  %s4385_s6 = inlined_call_operand.vmem [shape: f32[1,128], index: 6, kind: input, shape index: {}]   ;;  %s4386_s7 = inlined_call_operand.vmem [shape: f32[1,128], index: 7, kind: input, shape index: {}]   ;;  %s4387_s8 = inlined_call_operand.vmem [shape: bf16[128,128], index: 8, kind: input, shape index: {}]   ;;  %s4388_s9 = inlined_call_operand.vmem [shape: bf16[128,128], index: 9, kind: input, shape index: {}]   ;;  %s4389_s10 = inlined_call_operand.vmem [shape: f32[1,128], index: 10, kind: input, shape index: {}]   ;;  %s4390_s11 = inlined_call_operand.vmem [shape: f32[1,128], index: 11, kind: input, shape index: {}]   ;;  %s4391_s12 = inlined_call_operand.vmem [shape: bf16[512,128], index: 12, kind: output, shape index: {}]  }
   0x1 LB: > { %s2596_s22 = sadd.s32 4294967295, %s3486_s21   ;;  %p2600_p0 = scmp.ge.s32.totalorder %s3486_s21, 1  ;;  %s3486_s21 = sphi %s3553_s21, %s22_s21  }
   0x2   : > { %p374_p1 = scmp.lt.s32.totalorder %s3486_s21, 3 }
   0x4   : > { %p375_p2 = pnand %p2600_p0, %p374_p1 }
   0x5   : > { %s2601_s27 = sshll.u32 (!%p375_p2), %s2596_s22, 5 }
   0x6   : > { %378 = sbr.rel (%p375_p2) target bundleno = 619 (0x26b), region = 68  ;;  %p422_p3 = scmp.lt.s32.totalorder (!%p375_p2), %s2601_s27, 63 }
   0xb   : > { %v472_v0 = vld [vmem:[%s4381_s2] sm:$0x3]  ;;  %vm602_vm0 = vcmask 1041408   ;;  %vm1265_vm1 = vcmask 1042432   ;;  %s4393_s27 = smov (!%p422_p3, %s2601_s27), 63  ;;  %vm553_vm2 = vcmask 31744  }
   0xc   : > { %v1135_v1 = vld [vmem:[%s4384_s5] sm:$0x7]  ;;  %v604_v2 = vsel %vm602_vm0, %v472_v0, 0  ;;  %s3567_s28 = sshll.u32 %s4393_s27, 2  ;;  %vm1216_vm3 = vcmask 48128   ;;  %v2976_v18 = vld [vmem:[%s4388_s9 + $0x38] sm:$0xff] }
   0xd   : > { %v1267_v3 = vsel %vm1265_vm1, %v1135_v1, 0  ;;  %613 = vmatpush.bf16.msra.mxu0 %v604_v2  ;;  %s3573_s13 = scalar_lea.vmem %s4379_s0, %s3567_s28  ;;  %s3579_s16 = scalar_lea.vmem %s4380_s1, %s3567_s28  ;;  %v2968_v19 = vld [vmem:[%s4387_s8 + $0x38] sm:$0xff]  ;;  %1846 = vmatpush.bf16.msra.mxu2 %v2976_v18  ;;  %v2975_v20 = vld [vmem:[%s4388_s9 + $0x30] sm:$0xff]  ;;  %v2974_v24 = vld [vmem:[%s4388_s9 + $0x28] sm:$0xff] }
   0xe   : > { %1276 = vmatpush.bf16.msra.mxu1 %v1267_v3  ;;  %v2929_v4 = vld [vmem:[%s3573_s13] sm:$0xff]  ;;  %v2930_v6 = vld [vmem:[%s3573_s13 + $0x8] sm:$0xff]  ;;  %v2931_v8 = vld [vmem:[%s3573_s13 + $0x10] sm:$0xff]  ;;  %1983 = vmatpush.bf16.msra.mxu3 %v2968_v19  ;;  %s4092_s29 = scalar_lea.vmem %s4391_s12, %s3567_s28 }
   0xf   : > { %v2945_v5 = vld [vmem:[%s3579_s16] sm:$0xff]  ;;  %v2946_v7 = vld [vmem:[%s3579_s16 + $0x8] sm:$0xff]  ;;  %v2947_v9 = vld [vmem:[%s3579_s16 + $0x10] sm:$0xff] }
  0x10   : > { %2671 = vmatmul.msk.bf16.vlgmr.msra.gmra.mxu0 %vm553_vm2, %v2929_v4  ;;  %v2932_v10 = vld [vmem:[%s3573_s13 + $0x18] sm:$0xff]  ;;  %v2933_v12 = vld [vmem:[%s3573_s13 + $0x20] sm:$0xff]  ;;  %v2934_v14 = vld [vmem:[%s3573_s13 + $0x28] sm:$0xff] }
  0x11   : > { %2783 = vmatmul.msk.bf16.vlgmr.msra.gmra.mxu1 %vm1216_vm3, %v2945_v5  ;;  %v2948_v11 = vld [vmem:[%s3579_s16 + $0x18] sm:$0xff]  ;;  %v2949_v13 = vld [vmem:[%s3579_s16 + $0x20] sm:$0xff]  ;;  %v2950_v15 = vld [vmem:[%s3579_s16 + $0x28] sm:$0xff]  ;;  %1847 = vmatpush.bf16.msra.mxu2 %v2975_v20 }
  0x12   : > { %v2935_v16 = vld [vmem:[%s3573_s13 + $0x30] sm:$0xff]  ;;  %v2936_v22 = vld [vmem:[%s3573_s13 + $0x38] sm:$0xff]  ;;  %v2966_v25 = vld [vmem:[%s4387_s8 + $0x28] sm:$0xff] }
  0x13   : > { %v2951_v17 = vld [vmem:[%s3579_s16 + $0x30] sm:$0xff]  ;;  %v2952_v23 = vld [vmem:[%s3579_s16 + $0x38] sm:$0xff]  ;;  %v2973_v26 = vld [vmem:[%s4388_s9 + $0x20] sm:$0xff] }
  0x14   : > { %v2967_v21 = vld [vmem:[%s4387_s8 + $0x30] sm:$0xff]  ;;  %v2965_v27 = vld [vmem:[%s4387_s8 + $0x20] sm:$0xff]  ;;  %v2972_v28 = vld [vmem:[%s4388_s9 + $0x18] sm:$0xff] }
  0x15   : > { %1984 = vmatpush.bf16.msra.mxu3 %v2967_v21  ;;  %1848 = vmatpush.bf16.msra.mxu2 %v2974_v24  ;;  %v2964_v29 = vld [vmem:[%s4387_s8 + $0x18] sm:$0xff]  ;;  %v3646_v30 = vld [vmem:[%s4382_s3] ss:$0 sm:$0xff]  ;;  %v2971_v32 = vld [vmem:[%s4388_s9 + $0x10] sm:$0xff] }
  0x16   : > { %v3651_v31 = vld [vmem:[%s4385_s6] ss:$0 sm:$0xff]  ;;  %v2963_v33 = vld [vmem:[%s4387_s8 + $0x10] sm:$0xff]  ;;  %v2970_v42 = vld [vmem:[%s4388_s9 + $0x8] sm:$0xff] }
  0x17   : > { %v3662_v34 = vld [vmem:[%s4383_s4] ss:$0 sm:$0xff]  ;;  %v2962_v43 = vld [vmem:[%s4387_s8 + $0x8] sm:$0xff] }
  0x18   : > { %v3667_v35 = vld [vmem:[%s4386_s7] ss:$0 sm:$0xff]  ;;  %v2938_v63 = vld [vmem:[%s3573_s13 + $0x48] sm:$0xff] }
  0x19   : > { %1985 = vmatpush.bf16.msra.mxu3 %v2966_v25  ;;  %1849 = vmatpush.bf16.msra.mxu2 %v2973_v26  ;;  %v2937_v36 = vld [vmem:[%s3573_s13 + $0x40] sm:$0xff]  ;;  %v2954_v0 = vld [vmem:[%s3579_s16 + $0x48] sm:$0xff] }
  0x1a   : > { %v2953_v37 = vld [vmem:[%s3579_s16 + $0x40] sm:$0xff] }
  0x1b   : > { %v2969_v48 = vld [vmem:[%s4388_s9] sm:$0xff] }
  0x1c   : > { %v2961_v49 = vld [vmem:[%s4387_s8] sm:$0xff] }
  0x1d   : > { %1986 = vmatpush.bf16.msra.mxu3 %v2965_v27  ;;  %1850 = vmatpush.bf16.msra.mxu2 %v2972_v28 }
  0x20   : > { %2672 = vmatmul.msk.bf16.gmra.mxu0 %vm553_vm2, %v2930_v6 }
  0x21   : > { %2784 = vmatmul.msk.bf16.gmra.mxu1 %vm1216_vm3, %v2946_v7  ;;  %1987 = vmatpush.bf16.msra.mxu3 %v2964_v29 }
  0x22   : > { %1851 = vmatpush.bf16.msra.mxu2 %v2971_v32 }
  0x25   : > { %1988 = vmatpush.bf16.msra.mxu3 %v2963_v33 }
  0x26   : > { %1852 = vmatpush.bf16.msra.mxu2 %v2970_v42 }
  0x29   : > { %1989 = vmatpush.bf16.msra.mxu3 %v2962_v43  ;;  %v2955_v43 = vld [vmem:[%s3579_s16 + $0x50] sm:$0xff] }
  0x2a   : > { %1853 = vmatpush.bf16.msra.mxu2 %v2969_v48 }
  0x2d   : > { %1990 = vmatpush.bf16.msra.mxu3 %v2961_v49 }
  0x30   : > { %2673 = vmatmul.msk.bf16.gmra.mxu0 %vm553_vm2, %v2931_v8 }
  0x31   : > { %2785 = vmatmul.msk.bf16.gmra.mxu1 %vm1216_vm3, %v2947_v9 }
  0x40   : > { %2674 = vmatmul.msk.bf16.gmra.mxu0 %vm553_vm2, %v2932_v10 }
  0x41   : > { %2786 = vmatmul.msk.bf16.gmra.mxu1 %vm1216_vm3, %v2948_v11 }
  0x50   : > { %2675 = vmatmul.msk.bf16.gmra.mxu0 %vm553_vm2, %v2933_v12 }
  0x51   : > { %2787 = vmatmul.msk.bf16.gmra.mxu1 %vm1216_vm3, %v2949_v13 }
  0x60   : > { %2676 = vmatmul.msk.bf16.gmra.mxu0 %vm553_vm2, %v2934_v14 }
  0x61   : > { %2788 = vmatmul.msk.bf16.gmra.mxu1 %vm1216_vm3, %v2950_v15 }
  0x70   : > { %2677 = vmatmul.msk.bf16.gmra.mxu0 %vm553_vm2, %v2935_v16 }
  0x71   : > { %2789 = vmatmul.msk.bf16.gmra.mxu1 %vm1216_vm3, %v2951_v17 }
  0x80   : > { %2678 = vmatmul.msk.bf16.gmra.mxu0 %vm553_vm2, %v2936_v22 }
  0x81   : > { %2790 = vmatmul.msk.bf16.gmra.mxu1 %vm1216_vm3, %v2952_v23 }
  0x8d   : > { %v615_v38 = vpop.f32.mrf.mxu0 }
  0x8e   : > { %v1278_v39 = vpop.f32.mrf.mxu1  ;;  %v699_v40 = vmul.f32 %v3646_v30, %v615_v38 }
  0x8f   : > { %v1362_v41 = vmul.f32 %v3651_v31, %v1278_v39 }
  0x90   : > { %v3680_v44 = vadd.f32 %v3662_v34, %v699_v40  ;;  %2679 = vmatmul.msk.bf16.gmra.mxu0 %vm553_vm2, %v2937_v36 }
  0x91   : > { %v3683_v45 = vadd.f32 %v3667_v35, %v1362_v41  ;;  %2791 = vmatmul.msk.bf16.gmra.mxu1 %vm1216_vm3, %v2953_v37  ;;  %v2939_v37 = vld [vmem:[%s3573_s13 + $0x50] sm:$0xff] }
  0x92   : > { %v767_v46 = vmin.f32 %v3680_v44, 20.0 }
  0x93   : > { %v1430_v47 = vmin.f32 %v3683_v45, 20.0 }
  0x94   : > { %v799_v50 = vmul.f32 1.442695, %v767_v46 }
  0x95   : > { %v1462_v51 = vmul.f32 1.442695, %v1430_v47  ;;  %v617_v52 = vpop.f32.mrf.mxu0 }
  0x96   : > { %v1280_v53 = vpop.f32.mrf.mxu1  ;;  %3086 = vpow2.f32 %v799_v50  ;;  %v700_v54 = vmul.f32 %v3646_v30, %v617_v52 }
  0x97   : > { %v1363_v55 = vmul.f32 %v3651_v31, %v1280_v53  ;;  %3088 = vpow2.f32 %v1462_v51 }
  0x98   : > { %v3698_v56 = vadd.f32 %v3662_v34, %v700_v54 }
  0x99   : > { %v3701_v57 = vadd.f32 %v3667_v35, %v1363_v55 }
  0x9a   : > { %v768_v58 = vmin.f32 %v3698_v56, 20.0 }
  0x9b   : > { %v1431_v59 = vmin.f32 %v3701_v57, 20.0 }
  0x9c   : > { %v3087_v60 = vpop.eup %3086  ;;  %v801_v61 = vmul.f32 1.442695, %v768_v58 }
  0x9d   : > { %v1464_v62 = vmul.f32 1.442695, %v1431_v59  ;;  %v3089_v1 = vpop.eup %3088  ;;  %v863_v2 = vadd.f32 1.0, %v3087_v60  ;;  %v620_v3 = vpop.f32.mrf.mxu0 }
  0x9e   : > { %v1283_v4 = vpop.f32.mrf.mxu1  ;;  %v1526_v5 = vadd.f32 1.0, %v3089_v1  ;;  %3090 = vpow2.f32 %v801_v61  ;;  %v701_v6 = vmul.f32 %v3646_v30, %v620_v3 }
  0x9f   : > { %v1364_v7 = vmul.f32 %v3651_v31, %v1283_v4  ;;  %3092 = vpow2.f32 %v1464_v62  ;;  %v895_v10 = vmul.f32 %v863_v2, %v863_v2 }
  0xa0   : > { %v3710_v8 = vadd.f32 %v3662_v34, %v701_v6  ;;  %2680 = vmatmul.msk.bf16.gmra.mxu0 %vm553_vm2, %v2938_v63  ;;  %v1558_v11 = vmul.f32 %v1526_v5, %v1526_v5 }
  0xa1   : > { %v3713_v9 = vadd.f32 %v3667_v35, %v1364_v7  ;;  %2792 = vmatmul.msk.bf16.gmra.mxu1 %vm1216_vm3, %v2954_v0  ;;  %v991_v18 = vadd.f32 1.0, %v895_v10  ;;  %v2687_v40 = vadd.f32 -1.0, %v895_v10 }
  0xa2   : > { %v769_v12 = vmin.f32 %v3710_v8, 20.0  ;;  %v1654_v19 = vadd.f32 1.0, %v1558_v11  ;;  %v2799_v47 = vadd.f32 -1.0, %v1558_v11 }
  0xa3   : > { %v1432_v13 = vmin.f32 %v3713_v9, 20.0  ;;  %v959_v0 = vmul.f32 %v2687_v40, %v3680_v44 }
  0xa4   : > { %v3091_v14 = vpop.eup %3090  ;;  %v803_v15 = vmul.f32 1.442695, %v769_v12  ;;  %v1622_v3 = vmul.f32 %v2799_v47, %v3683_v45 }
  0xa5   : > { %v1466_v16 = vmul.f32 1.442695, %v1432_v13  ;;  %v3093_v17 = vpop.eup %3092  ;;  %v864_v20 = vadd.f32 1.0, %v3091_v14  ;;  %v622_v21 = vpop.f32.mrf.mxu0 }
  0xa6   : > { %v1285_v22 = vpop.f32.mrf.mxu1  ;;  %v1527_v23 = vadd.f32 1.0, %v3093_v17  ;;  %3094 = vpow2.f32 %v803_v15  ;;  %v702_v24 = vmul.f32 %v3646_v30, %v622_v21 }
  0xa7   : > { %v1365_v25 = vmul.f32 %v3651_v31, %v1285_v22  ;;  %v896_v26 = vmul.f32 %v864_v20, %v864_v20  ;;  %3096 = vpow2.f32 %v1466_v16 }
  0xa8   : > { %v1559_v27 = vmul.f32 %v1527_v23, %v1527_v23  ;;  %v3722_v28 = vadd.f32 %v3662_v34, %v702_v24  ;;  %3098 = vrcp.f32 %v991_v18 }
  0xa9   : > { %v3725_v29 = vadd.f32 %v3667_v35, %v1365_v25  ;;  %v992_v32 = vadd.f32 1.0, %v896_v26  ;;  %3100 = vrcp.f32 %v1654_v19  ;;  %v2688_v51 = vadd.f32 -1.0, %v896_v26 }
  0xaa   : > { %v770_v33 = vmin.f32 %v3722_v28, 20.0  ;;  %v1655_v38 = vadd.f32 1.0, %v1559_v27  ;;  %v2800_v58 = vadd.f32 -1.0, %v1559_v27 }
  0xab   : > { %v1433_v36 = vmin.f32 %v3725_v29, 20.0  ;;  %3102 = vrcp.f32 %v992_v32  ;;  %v960_v2 = vmul.f32 %v2688_v51, %v3698_v56 }
  0xac   : > { %v3095_v39 = vpop.eup %3094  ;;  %v805_v41 = vmul.f32 1.442695, %v770_v33  ;;  %3104 = vrcp.f32 %v1655_v38  ;;  %v1623_v11 = vmul.f32 %v2800_v58, %v3701_v57 }
  0xad   : > { %v1468_v42 = vmul.f32 1.442695, %v1433_v36  ;;  %v3097_v46 = vpop.eup %3096  ;;  %v865_v48 = vadd.f32 1.0, %v3095_v39  ;;  %v625_v49 = vpop.f32.mrf.mxu0 }
  0xae   : > { %v1288_v50 = vpop.f32.mrf.mxu1  ;;  %v1528_v52 = vadd.f32 1.0, %v3097_v46  ;;  %3106 = vpow2.f32 %v805_v41  ;;  %v703_v53 = vmul.f32 %v3646_v30, %v625_v49  ;;  %v3099_v55 = vpop.eup %3098 }
  0xaf   : > { %v1366_v54 = vmul.f32 %v3651_v31, %v1288_v50  ;;  %3108 = vpow2.f32 %v1468_v42  ;;  %v3101_v59 = vpop.eup %3100  ;;  %v897_v60 = vmul.f32 %v865_v48, %v865_v48  ;;  %v1055_v7 = vmul.f32 %v3099_v55, %v959_v0 }
  0xb0   : > { %v3734_v61 = vadd.f32 %v3662_v34, %v703_v53  ;;  %2681 = vmatmul.msk.bf16.gmra.mxu0 %vm553_vm2, %v2939_v37  ;;  %v1560_v1 = vmul.f32 %v1528_v52, %v1528_v52  ;;  %v1718_v16 = vmul.f32 %v3101_v59, %v1622_v3  ;;  %v2940_v37 = vld [vmem:[%s3573_s13 + $0x58] sm:$0xff] }
  0xb1   : > { %v3737_v62 = vadd.f32 %v3667_v35, %v1366_v54  ;;  %2793 = vmatmul.msk.bf16.gmra.mxu1 %vm1216_vm3, %v2955_v43  ;;  %v3103_v63 = vpop.eup %3102  ;;  %v993_v13 = vadd.f32 1.0, %v897_v60  ;;  %v2689_v40 = vadd.f32 -1.0, %v897_v60  ;;  %v2956_v43 = vld [vmem:[%s3579_s16 + $0x58] sm:$0xff] }
  0xb2   : > { %v771_v4 = vmin.f32 %v3734_v61, 20.0  ;;  %v3105_v6 = vpop.eup %3104  ;;  %v1056_v10 = vmul.f32 %v3103_v63, %v960_v2  ;;  %v1656_v17 = vadd.f32 1.0, %v1560_v1  ;;  %v2801_v47 = vadd.f32 -1.0, %v1560_v1 }
  0xb3   : > { %v1434_v5 = vmin.f32 %v3737_v62, 20.0  ;;  %v1719_v20 = vmul.f32 %v3105_v6, %v1623_v11  ;;  %v961_v2 = vmul.f32 %v2689_v40, %v3710_v8 }
  0xb4   : > { %v3107_v12 = vpop.eup %3106  ;;  %v807_v14 = vmul.f32 1.442695, %v771_v4  ;;  %v1087_v45 = vpack.c.bf16 %v1056_v10, %v1055_v7 }
  0xb5   : > { %v1470_v15 = vmul.f32 1.442695, %v1434_v5  ;;  %v3109_v44 = vpop.eup %3108  ;;  %v866_v18 = vadd.f32 1.0, %v3107_v12  ;;  %v627_v56 = vpop.f32.mrf.mxu0  ;;  %v1750_v24 = vpack.c.bf16 %v1719_v20, %v1718_v16  ;;  %v1624_v5 = vmul.f32 %v2801_v47, %v3713_v9 }
  0xb6   : > { %v1290_v19 = vpop.f32.mrf.mxu1  ;;  %v1529_v21 = vadd.f32 1.0, %v3109_v44  ;;  %3110 = vpow2.f32 %v807_v14  ;;  %v704_v22 = vmul.f32 %v3646_v30, %v627_v56  ;;  %1854 = vmatmul.bf16.vlgmr.msra.gmra.mxu2 %v1087_v45 }
  0xb7   : > { %v1367_v23 = vmul.f32 %v3651_v31, %v1290_v19  ;;  %v898_v57 = vmul.f32 %v866_v18, %v866_v18  ;;  %3112 = vpow2.f32 %v1470_v15  ;;  %1991 = vmatmul.bf16.vlgmr.msra.gmra.mxu3 %v1750_v24 }
  0xb8   : > { %v1561_v25 = vmul.f32 %v1529_v21, %v1529_v21  ;;  %v3750_v26 = vadd.f32 %v3662_v34, %v704_v22  ;;  %3114 = vrcp.f32 %v993_v13 }
  0xb9   : > { %v3753_v27 = vadd.f32 %v3667_v35, %v1367_v23  ;;  %v994_v32 = vadd.f32 1.0, %v898_v57  ;;  %3116 = vrcp.f32 %v1656_v17  ;;  %v2690_v51 = vadd.f32 -1.0, %v898_v57 }
  0xba   : > { %v772_v33 = vmin.f32 %v3750_v26, 20.0  ;;  %v1657_v38 = vadd.f32 1.0, %v1561_v25  ;;  %v2802_v58 = vadd.f32 -1.0, %v1561_v25 }
  0xbb   : > { %v1435_v36 = vmin.f32 %v3753_v27, 20.0  ;;  %3118 = vrcp.f32 %v994_v32  ;;  %v962_v4 = vmul.f32 %v2690_v51, %v3722_v28 }
  0xbc   : > { %v3111_v39 = vpop.eup %3110  ;;  %v809_v41 = vmul.f32 1.442695, %v772_v33  ;;  %3120 = vrcp.f32 %v1657_v38  ;;  %v1625_v13 = vmul.f32 %v2802_v58, %v3725_v29 }
  0xbd   : > { %v1472_v42 = vmul.f32 1.442695, %v1435_v36  ;;  %v3113_v46 = vpop.eup %3112  ;;  %v867_v48 = vadd.f32 1.0, %v3111_v39  ;;  %v630_v49 = vpop.f32.mrf.mxu0 }
  0xbe   : > { %v1293_v50 = vpop.f32.mrf.mxu1  ;;  %v1530_v52 = vadd.f32 1.0, %v3113_v46  ;;  %3122 = vpow2.f32 %v809_v41  ;;  %v705_v53 = vmul.f32 %v3646_v30, %v630_v49  ;;  %v3115_v55 = vpop.eup %3114 }
  0xbf   : > { %v1368_v54 = vmul.f32 %v3651_v31, %v1293_v50  ;;  %3124 = vpow2.f32 %v1472_v42  ;;  %v3117_v59 = vpop.eup %3116  ;;  %v899_v60 = vmul.f32 %v867_v48, %v867_v48  ;;  %v1057_v11 = vmul.f32 %v3115_v55, %v961_v2 }
  0xc0   : > { %v3762_v63 = vadd.f32 %v3662_v34, %v705_v53  ;;  %2682 = vmatmul.msk.bf16.gmra.mxu0 %vm553_vm2, %v2940_v37  ;;  %v1562_v3 = vmul.f32 %v1530_v52, %v1530_v52  ;;  %v1720_v17 = vmul.f32 %v3117_v59, %v1624_v5  ;;  %v2941_v37 = vld [vmem:[%s3573_s13 + $0x60] sm:$0xff] }
  0xc1   : > { %v3765_v0 = vadd.f32 %v3667_v35, %v1368_v54  ;;  %2794 = vmatmul.msk.bf16.gmra.mxu1 %vm1216_vm3, %v2956_v43  ;;  %v3119_v1 = vpop.eup %3118  ;;  %v995_v15 = vadd.f32 1.0, %v899_v60  ;;  %v2691_v40 = vadd.f32 -1.0, %v899_v60  ;;  %v2957_v43 = vld [vmem:[%s3579_s16 + $0x60] sm:$0xff] }
  0xc2   : > { %v773_v6 = vmin.f32 %v3762_v63, 20.0  ;;  %v3121_v10 = vpop.eup %3120  ;;  %v1058_v12 = vmul.f32 %v3119_v1, %v962_v4  ;;  %v1658_v18 = vadd.f32 1.0, %v1562_v3  ;;  %v2803_v47 = vadd.f32 -1.0, %v1562_v3 }
  0xc3   : > { %v1436_v7 = vmin.f32 %v3765_v0, 20.0  ;;  %v1721_v45 = vmul.f32 %v3121_v10, %v1625_v13  ;;  %v963_v4 = vmul.f32 %v2691_v40, %v3734_v61 }
  0xc4   : > { %v3123_v14 = vpop.eup %3122  ;;  %v811_v16 = vmul.f32 1.442695, %v773_v6  ;;  %v1088_v9 = vpack.c.bf16 %v1058_v12, %v1057_v11 }
  0xc5   : > { %v1474_v44 = vmul.f32 1.442695, %v1436_v7  ;;  %v3125_v8 = vpop.eup %3124  ;;  %v868_v56 = vadd.f32 1.0, %v3123_v14  ;;  %v632_v28 = vpop.f32.mrf.mxu0  ;;  %v1751_v23 = vpack.c.bf16 %v1721_v45, %v1720_v17  ;;  %v1626_v7 = vmul.f32 %v2803_v47, %v3737_v62 }
  0xc6   : > { %v1295_v19 = vpop.f32.mrf.mxu1  ;;  %v1531_v20 = vadd.f32 1.0, %v3125_v8  ;;  %3126 = vpow2.f32 %v811_v16  ;;  %v706_v21 = vmul.f32 %v3646_v30, %v632_v28  ;;  %1859 = vmatmul.bf16.gmra.mxu2 %v1088_v9 }
  0xc7   : > { %v1369_v22 = vmul.f32 %v3651_v31, %v1295_v19  ;;  %v900_v29 = vmul.f32 %v868_v56, %v868_v56  ;;  %3128 = vpow2.f32 %v1474_v44  ;;  %1996 = vmatmul.bf16.gmra.mxu3 %v1751_v23 }
  0xc8   : > { %v1563_v57 = vmul.f32 %v1531_v20, %v1531_v20  ;;  %v3778_v24 = vadd.f32 %v3662_v34, %v706_v21  ;;  %3130 = vrcp.f32 %v995_v15 }
  0xc9   : > { %v3781_v25 = vadd.f32 %v3667_v35, %v1369_v22  ;;  %v996_v32 = vadd.f32 1.0, %v900_v29  ;;  %3132 = vrcp.f32 %v1658_v18  ;;  %v2692_v51 = vadd.f32 -1.0, %v900_v29 }
  0xca   : > { %v774_v33 = vmin.f32 %v3778_v24, 20.0  ;;  %v1659_v38 = vadd.f32 1.0, %v1563_v57  ;;  %v2804_v58 = vadd.f32 -1.0, %v1563_v57 }
  0xcb   : > { %v1437_v36 = vmin.f32 %v3781_v25, 20.0  ;;  %3134 = vrcp.f32 %v996_v32  ;;  %v964_v6 = vmul.f32 %v2692_v51, %v3750_v26 }
  0xcc   : > { %v3127_v39 = vpop.eup %3126  ;;  %v813_v41 = vmul.f32 1.442695, %v774_v33  ;;  %3136 = vrcp.f32 %v1659_v38  ;;  %v1627_v15 = vmul.f32 %v2804_v58, %v3753_v27 }
  0xcd   : > { %v1476_v42 = vmul.f32 1.442695, %v1437_v36  ;;  %v3129_v46 = vpop.eup %3128  ;;  %v869_v48 = vadd.f32 1.0, %v3127_v39  ;;  %v635_v49 = vpop.f32.mrf.mxu0 }
  0xce   : > { %v1298_v50 = vpop.f32.mrf.mxu1  ;;  %v1532_v52 = vadd.f32 1.0, %v3129_v46  ;;  %3138 = vpow2.f32 %v813_v41  ;;  %v707_v53 = vmul.f32 %v3646_v30, %v635_v49  ;;  %v3131_v55 = vpop.eup %3130 }
  0xcf   : > { %v1370_v54 = vmul.f32 %v3651_v31, %v1298_v50  ;;  %3140 = vpow2.f32 %v1476_v42  ;;  %v3133_v59 = vpop.eup %3132  ;;  %v901_v60 = vmul.f32 %v869_v48, %v869_v48  ;;  %v1059_v13 = vmul.f32 %v3131_v55, %v963_v4 }
  0xd0   : > { %v3790_v1 = vadd.f32 %v3662_v34, %v707_v53  ;;  %2683 = vmatmul.msk.bf16.gmra.mxu0 %vm553_vm2, %v2941_v37  ;;  %v1564_v5 = vmul.f32 %v1532_v52, %v1532_v52  ;;  %v1722_v18 = vmul.f32 %v3133_v59, %v1626_v7  ;;  %v2942_v37 = vld [vmem:[%s3573_s13 + $0x68] sm:$0xff] }
  0xd1   : > { %v3793_v2 = vadd.f32 %v3667_v35, %v1370_v54  ;;  %2795 = vmatmul.msk.bf16.gmra.mxu1 %vm1216_vm3, %v2957_v43  ;;  %v3135_v3 = vpop.eup %3134  ;;  %v997_v44 = vadd.f32 1.0, %v901_v60  ;;  %v2693_v40 = vadd.f32 -1.0, %v901_v60  ;;  %v2958_v43 = vld [vmem:[%s3579_s16 + $0x68] sm:$0xff] }
  0xd2   : > { %v775_v10 = vmin.f32 %v3790_v1, 20.0  ;;  %v3137_v12 = vpop.eup %3136  ;;  %v1060_v14 = vmul.f32 %v3135_v3, %v964_v6  ;;  %v1660_v56 = vadd.f32 1.0, %v1564_v5  ;;  %v2805_v47 = vadd.f32 -1.0, %v1564_v5 }
  0xd3   : > { %v1438_v11 = vmin.f32 %v3793_v2, 20.0  ;;  %v1723_v9 = vmul.f32 %v3137_v12, %v1627_v15  ;;  %v965_v6 = vmul.f32 %v2693_v40, %v3762_v63 }
  0xd4   : > { %v3139_v16 = vpop.eup %3138  ;;  %v815_v17 = vmul.f32 1.442695, %v775_v10  ;;  %v1089_v62 = vpack.c.bf16 %v1060_v14, %v1059_v13 }
  0xd5   : > { %v1478_v8 = vmul.f32 1.442695, %v1438_v11  ;;  %v3141_v61 = vpop.eup %3140  ;;  %v870_v28 = vadd.f32 1.0, %v3139_v16  ;;  %v637_v26 = vpop.f32.mrf.mxu0  ;;  %v1752_v22 = vpack.c.bf16 %v1723_v9, %v1722_v18  ;;  %v1628_v11 = vmul.f32 %v2805_v47, %v3765_v0 }
  0xd6   : > { %v1300_v19 = vpop.f32.mrf.mxu1  ;;  %v1533_v45 = vadd.f32 1.0, %v3141_v61  ;;  %3142 = vpow2.f32 %v815_v17  ;;  %v708_v20 = vmul.f32 %v3646_v30, %v637_v26  ;;  %1864 = vmatmul.bf16.gmra.mxu2 %v1089_v62 }
  0xd7   : > { %v1371_v21 = vmul.f32 %v3651_v31, %v1300_v19  ;;  %v902_v27 = vmul.f32 %v870_v28, %v870_v28  ;;  %3144 = vpow2.f32 %v1478_v8  ;;  %2001 = vmatmul.bf16.gmra.mxu3 %v1752_v22 }
  0xd8   : > { %v1565_v29 = vmul.f32 %v1533_v45, %v1533_v45  ;;  %v3806_v23 = vadd.f32 %v3662_v34, %v708_v20  ;;  %3146 = vrcp.f32 %v997_v44 }
  0xd9   : > { %v3809_v57 = vadd.f32 %v3667_v35, %v1371_v21  ;;  %v998_v32 = vadd.f32 1.0, %v902_v27  ;;  %3148 = vrcp.f32 %v1660_v56  ;;  %v2694_v51 = vadd.f32 -1.0, %v902_v27 }
  0xda   : > { %v776_v33 = vmin.f32 %v3806_v23, 20.0  ;;  %v1661_v38 = vadd.f32 1.0, %v1565_v29  ;;  %v2806_v58 = vadd.f32 -1.0, %v1565_v29 }
  0xdb   : > { %v1439_v36 = vmin.f32 %v3809_v57, 20.0  ;;  %3150 = vrcp.f32 %v998_v32  ;;  %v966_v10 = vmul.f32 %v2694_v51, %v3778_v24 }
  0xdc   : > { %v3143_v39 = vpop.eup %3142  ;;  %v817_v41 = vmul.f32 1.442695, %v776_v33  ;;  %3152 = vrcp.f32 %v1661_v38  ;;  %v1629_v44 = vmul.f32 %v2806_v58, %v3781_v25 }
  0xdd   : > { %v1480_v42 = vmul.f32 1.442695, %v1439_v36  ;;  %v3145_v46 = vpop.eup %3144  ;;  %v871_v48 = vadd.f32 1.0, %v3143_v39  ;;  %v640_v49 = vpop.f32.mrf.mxu0 }
  0xde   : > { %v1303_v50 = vpop.f32.mrf.mxu1  ;;  %v1534_v52 = vadd.f32 1.0, %v3145_v46  ;;  %3154 = vpow2.f32 %v817_v41  ;;  %v709_v53 = vmul.f32 %v3646_v30, %v640_v49  ;;  %v3147_v55 = vpop.eup %3146 }
  0xdf   : > { %v1372_v54 = vmul.f32 %v3651_v31, %v1303_v50  ;;  %3156 = vpow2.f32 %v1480_v42  ;;  %v3149_v59 = vpop.eup %3148  ;;  %v903_v60 = vmul.f32 %v871_v48, %v871_v48  ;;  %v1061_v15 = vmul.f32 %v3147_v55, %v965_v6  ;;  %v2943_v42 = vld [vmem:[%s3573_s13 + $0x70] sm:$0xff] }
  0xe0   : > { %v3818_v3 = vadd.f32 %v3662_v34, %v709_v53  ;;  %2684 = vmatmul.msk.bf16.gmra.mxu0 %vm553_vm2, %v2942_v37  ;;  %v1566_v7 = vmul.f32 %v1534_v52, %v1534_v52  ;;  %v1724_v56 = vmul.f32 %v3149_v59, %v1628_v11 }
  0xe1   : > { %v3821_v4 = vadd.f32 %v3667_v35, %v1372_v54  ;;  %2796 = vmatmul.msk.bf16.gmra.mxu1 %vm1216_vm3, %v2958_v43  ;;  %v3151_v5 = vpop.eup %3150  ;;  %v999_v8 = vadd.f32 1.0, %v903_v60  ;;  %v2695_v38 = vadd.f32 -1.0, %v903_v60  ;;  %v2959_v43 = vld [vmem:[%s3579_s16 + $0x70] sm:$0xff] }
  0xe2   : > { %v777_v12 = vmin.f32 %v3818_v3, 20.0  ;;  %v3153_v14 = vpop.eup %3152  ;;  %v1062_v16 = vmul.f32 %v3151_v5, %v966_v10  ;;  %v1662_v28 = vadd.f32 1.0, %v1566_v7  ;;  %v2807_v47 = vadd.f32 -1.0, %v1566_v7 }
  0xe3   : > { %v1440_v13 = vmin.f32 %v3821_v4, 20.0  ;;  %v1725_v62 = vmul.f32 %v3153_v14, %v1629_v44  ;;  %v967_v59 = vmul.f32 %v2695_v38, %v3790_v1 }
  0xe4   : > { %v3155_v17 = vpop.eup %3154  ;;  %v819_v18 = vmul.f32 1.442695, %v777_v12  ;;  %v1090_v0 = vpack.c.bf16 %v1062_v16, %v1061_v15  ;;  %v1630_v11 = vmul.f32 %v2807_v47, %v3793_v2 }
  0xe5   : > { %v1482_v61 = vmul.f32 1.442695, %v1440_v13  ;;  %v3157_v63 = vpop.eup %3156  ;;  %v872_v26 = vadd.f32 1.0, %v3155_v17  ;;  %v642_v24 = vpop.f32.mrf.mxu0  ;;  %v1753_v25 = vpack.c.bf16 %v1725_v62, %v1724_v56 }
  0xe6   : > { %v1305_v19 = vpop.f32.mrf.mxu1  ;;  %v1535_v9 = vadd.f32 1.0, %v3157_v63  ;;  %3158 = vpow2.f32 %v819_v18  ;;  %v710_v45 = vmul.f32 %v3646_v30, %v642_v24  ;;  %1869 = vmatmul.bf16.gmra.mxu2 %v1090_v0 }
  0xe7   : > { %v1373_v20 = vmul.f32 %v3651_v31, %v1305_v19  ;;  %v904_v21 = vmul.f32 %v872_v26, %v872_v26  ;;  %3160 = vpow2.f32 %v1482_v61  ;;  %2006 = vmatmul.bf16.gmra.mxu3 %v1753_v25 }
  0xe8   : > { %v1567_v27 = vmul.f32 %v1535_v9, %v1535_v9  ;;  %v3834_v22 = vadd.f32 %v3662_v34, %v710_v45  ;;  %3162 = vrcp.f32 %v999_v8 }
  0xe9   : > { %v3837_v29 = vadd.f32 %v3667_v35, %v1373_v20  ;;  %v1000_v32 = vadd.f32 1.0, %v904_v21  ;;  %3164 = vrcp.f32 %v1662_v28  ;;  %v2696_v48 = vadd.f32 -1.0, %v904_v21 }
  0xea   : > { %v1663_v33 = vadd.f32 1.0, %v1567_v27  ;;  %v778_v36 = vmin.f32 %v3834_v22, 20.0  ;;  %v2808_v49 = vadd.f32 -1.0, %v1567_v27 }
  0xeb   : > { %v1441_v37 = vmin.f32 %v3837_v29, 20.0  ;;  %3166 = vrcp.f32 %v1000_v32  ;;  %v968_v12 = vmul.f32 %v2696_v48, %v3806_v23 }
  0xec   : > { %v3159_v39 = vpop.eup %3158  ;;  %3168 = vrcp.f32 %v1663_v33  ;;  %v821_v40 = vmul.f32 1.442695, %v778_v36  ;;  %v1631_v1 = vmul.f32 %v2808_v49, %v3809_v57 }
  0xed   : > { %v1484_v41 = vmul.f32 1.442695, %v1441_v37  ;;  %v3161_v46 = vpop.eup %3160  ;;  %v873_v50 = vadd.f32 1.0, %v3159_v39  ;;  %v645_v51 = vpop.f32.mrf.mxu0 }
  0xee   : > { %v1308_v52 = vpop.f32.mrf.mxu1  ;;  %v1536_v53 = vadd.f32 1.0, %v3161_v46  ;;  %3170 = vpow2.f32 %v821_v40  ;;  %v711_v54 = vmul.f32 %v3646_v30, %v645_v51  ;;  %v3163_v58 = vpop.eup %3162 }
  0xef   : > { %v1374_v55 = vmul.f32 %v3651_v31, %v1308_v52  ;;  %3172 = vpow2.f32 %v1484_v41  ;;  %v3165_v60 = vpop.eup %3164  ;;  %v905_v5 = vmul.f32 %v873_v50, %v873_v50  ;;  %v1063_v44 = vmul.f32 %v3163_v58, %v967_v59 }
  0xf0   : > { %v3847_v6 = vadd.f32 %v3662_v34, %v711_v54  ;;  %2685 = vmatmul.msk.bf16.gmra.mxu0 %vm553_vm2, %v2943_v42  ;;  %v1568_v13 = vmul.f32 %v1536_v53, %v1536_v53  ;;  %v1726_v8 = vmul.f32 %v3165_v60, %v1630_v11  ;;  %v2944_v42 = vld [vmem:[%s3573_s13 + $0x78] sm:$0xff] }
  0xf1   : > { %v3850_v7 = vadd.f32 %v3667_v35, %v1374_v55  ;;  %2797 = vmatmul.msk.bf16.gmra.mxu1 %vm1216_vm3, %v2959_v43  ;;  %v3167_v10 = vpop.eup %3166  ;;  %v1001_v56 = vadd.f32 1.0, %v905_v5  ;;  %v2697_v38 = vadd.f32 -1.0, %v905_v5  ;;  %v2960_v43 = vld [vmem:[%s3579_s16 + $0x78] sm:$0xff] }
  0xf2   : > { %v3169_v14 = vpop.eup %3168  ;;  %v779_v15 = vmin.f32 %v3847_v6, 20.0  ;;  %v1064_v17 = vmul.f32 %v3167_v10, %v968_v12  ;;  %v1664_v2 = vadd.f32 1.0, %v1568_v13  ;;  %v2809_v47 = vadd.f32 -1.0, %v1568_v13 }
  0xf3   : > { %v1442_v16 = vmin.f32 %v3850_v7, 20.0  ;;  %v1727_v18 = vmul.f32 %v3169_v14, %v1631_v1  ;;  %v969_v59 = vmul.f32 %v2697_v38, %v3818_v3 }
  0xf4   : > { %v3171_v61 = vpop.eup %3170  ;;  %v823_v63 = vmul.f32 1.442695, %v779_v15  ;;  %v1091_v57 = vpack.c.bf16 %v1064_v17, %v1063_v44  ;;  %v1632_v1 = vmul.f32 %v2809_v47, %v3821_v4 }
  0xf5   : > { %v1486_v28 = vmul.f32 1.442695, %v1442_v16  ;;  %v3173_v26 = vpop.eup %3172  ;;  %v874_v24 = vadd.f32 1.0, %v3171_v61  ;;  %v647_v23 = vpop.f32.mrf.mxu0  ;;  %v1754_v0 = vpack.c.bf16 %v1727_v18, %v1726_v8 }
  0xf6   : > { %v1310_v19 = vpop.f32.mrf.mxu1  ;;  %v1537_v62 = vadd.f32 1.0, %v3173_v26  ;;  %3174 = vpow2.f32 %v823_v63  ;;  %v712_v9 = vmul.f32 %v3646_v30, %v647_v23  ;;  %1874 = vmatmul.bf16.gmra.mxu2 %v1091_v57 }
  0xf7   : > { %v1375_v45 = vmul.f32 %v3651_v31, %v1310_v19  ;;  %v906_v20 = vmul.f32 %v874_v24, %v874_v24  ;;  %3176 = vpow2.f32 %v1486_v28  ;;  %2011 = vmatmul.bf16.gmra.mxu3 %v1754_v0 }
  0xf8   : > { %v1569_v21 = vmul.f32 %v1537_v62, %v1537_v62  ;;  %v3862_v25 = vadd.f32 %v3662_v34, %v712_v9  ;;  %3178 = vrcp.f32 %v1001_v56 }
  0xf9   : > { %v3865_v27 = vadd.f32 %v3667_v35, %v1375_v45  ;;  %v1002_v32 = vadd.f32 1.0, %v906_v20  ;;  %3180 = vrcp.f32 %v1664_v2  ;;  %v2698_v48 = vadd.f32 -1.0, %v906_v20 }
  0xfa   : > { %v1665_v33 = vadd.f32 1.0, %v1569_v21  ;;  %v780_v36 = vmin.f32 %v3862_v25, 20.0  ;;  %v2810_v49 = vadd.f32 -1.0, %v1569_v21 }
  0xfb   : > { %v1443_v37 = vmin.f32 %v3865_v27, 20.0  ;;  %3182 = vrcp.f32 %v1002_v32  ;;  %v970_v13 = vmul.f32 %v2698_v48, %v3834_v22 }
  0xfc   : > { %v3175_v39 = vpop.eup %3174  ;;  %3184 = vrcp.f32 %v1665_v33  ;;  %v825_v40 = vmul.f32 1.442695, %v780_v36  ;;  %v1633_v3 = vmul.f32 %v2810_v49, %v3837_v29 }
  0xfd   : > { %v1488_v41 = vmul.f32 1.442695, %v1443_v37  ;;  %v3177_v46 = vpop.eup %3176  ;;  %v875_v50 = vadd.f32 1.0, %v3175_v39  ;;  %v650_v51 = vpop.f32.mrf.mxu0 }
  0xfe   : > { %v1313_v52 = vpop.f32.mrf.mxu1  ;;  %v1538_v53 = vadd.f32 1.0, %v3177_v46  ;;  %3186 = vpow2.f32 %v825_v40  ;;  %v713_v54 = vmul.f32 %v3646_v30, %v650_v51  ;;  %v3179_v58 = vpop.eup %3178 }
  0xff   : > { %v1376_v55 = vmul.f32 %v3651_v31, %v1313_v52  ;;  %3188 = vpow2.f32 %v1488_v41  ;;  %v3181_v60 = vpop.eup %3180  ;;  %v907_v5 = vmul.f32 %v875_v50, %v875_v50  ;;  %v1065_v17 = vmul.f32 %v3179_v58, %v969_v59  ;;  %v3903_v58 = vld [vmem:[%s4383_s4] ss:$0 sm:$0xff] }
 0x100   : > { %v3875_v10 = vadd.f32 %v3662_v34, %v713_v54  ;;  %2686 = vmatmul.msk.bf16.gmra.mxu0 %vm553_vm2, %v2944_v42  ;;  %v1570_v14 = vmul.f32 %v1538_v53, %v1538_v53  ;;  %v1728_v18 = vmul.f32 %v3181_v60, %v1632_v1 }
 0x101   : > { %v3878_v11 = vadd.f32 %v3667_v35, %v1376_v55  ;;  %2798 = vmatmul.msk.bf16.gmra.mxu1 %vm1216_vm3, %v2960_v43  ;;  %v3183_v12 = vpop.eup %3182  ;;  %v1003_v63 = vadd.f32 1.0, %v907_v5  ;;  %v2699_v39 = vadd.f32 -1.0, %v907_v5 }
 0x102   : > { %v3185_v15 = vpop.eup %3184  ;;  %v781_v16 = vmin.f32 %v3875_v10, 20.0  ;;  %v1066_v8 = vmul.f32 %v3183_v12, %v970_v13  ;;  %v1666_v4 = vadd.f32 1.0, %v1570_v14  ;;  %v2811_v42 = vadd.f32 -1.0, %v1570_v14 }
 0x103   : > { %v1444_v44 = vmin.f32 %v3878_v11, 20.0  ;;  %v1729_v61 = vmul.f32 %v3185_v15, %v1633_v3  ;;  %v971_v54 = vmul.f32 %v2699_v39, %v3847_v6 }
 0x104   : > { %v3187_v56 = vpop.eup %3186  ;;  %v827_v28 = vmul.f32 1.442695, %v781_v16  ;;  %v1092_v29 = vpack.c.bf16 %v1066_v8, %v1065_v17  ;;  %v1634_v6 = vmul.f32 %v2811_v42, %v3850_v7 }
 0x105   : > { %v1490_v26 = vmul.f32 1.442695, %v1444_v44  ;;  %v3189_v2 = vpop.eup %3188  ;;  %v876_v24 = vadd.f32 1.0, %v3187_v56  ;;  %v652_v22 = vpop.f32.mrf.mxu0  ;;  %v1755_v19 = vpack.c.bf16 %v1729_v61, %v1728_v18 }
 0x106   : > { %v1315_v23 = vpop.f32.mrf.mxu1  ;;  %v1539_v57 = vadd.f32 1.0, %v3189_v2  ;;  %3190 = vpow2.f32 %v827_v28  ;;  %v714_v0 = vmul.f32 %v3646_v30, %v652_v22  ;;  %1879 = vmatmul.bf16.gmra.mxu2 %v1092_v29 }
 0x107   : > { %v1377_v62 = vmul.f32 %v3651_v31, %v1315_v23  ;;  %v908_v9 = vmul.f32 %v876_v24, %v876_v24  ;;  %3192 = vpow2.f32 %v1490_v26  ;;  %2016 = vmatmul.bf16.gmra.mxu3 %v1755_v19  ;;  %v3924_v24 = vld [vmem:[%s4382_s3] ss:$0 sm:$0xff] }
 0x108   : > { %v1571_v45 = vmul.f32 %v1539_v57, %v1539_v57  ;;  %v3890_v20 = vadd.f32 %v3662_v34, %v714_v0  ;;  %3194 = vrcp.f32 %v1003_v63  ;;  %v3930_v23 = vld [vmem:[%s4385_s6] ss:$0 sm:$0xff] }
 0x109   : > { %v3893_v21 = vadd.f32 %v3667_v35, %v1377_v62  ;;  %v1004_v32 = vadd.f32 1.0, %v908_v9  ;;  %3196 = vrcp.f32 %v1666_v4  ;;  %v2700_v43 = vadd.f32 -1.0, %v908_v9 }
 0x10a   : > { %v1667_v33 = vadd.f32 1.0, %v1571_v45  ;;  %v782_v36 = vmin.f32 %v3890_v20, 20.0  ;;  %v2812_v35 = vadd.f32 -1.0, %v1571_v45 }
 0x10b   : > { %v1445_v37 = vmin.f32 %v3893_v21, 20.0  ;;  %3198 = vrcp.f32 %v1004_v32  ;;  %v972_v5 = vmul.f32 %v2700_v43, %v3862_v25 }
 0x10c   : > { %v3191_v38 = vpop.eup %3190  ;;  %3200 = vrcp.f32 %v1667_v33  ;;  %v829_v40 = vmul.f32 1.442695, %v782_v36  ;;  %v1635_v12 = vmul.f32 %v2812_v35, %v3865_v27 }
 0x10d   : > { %v1492_v41 = vmul.f32 1.442695, %v1445_v37  ;;  %v3193_v34 = vpop.eup %3192  ;;  %v877_v46 = vadd.f32 1.0, %v3191_v38  ;;  %v655_v47 = vpop.f32.mrf.mxu0 }
 0x10e   : > { %v1318_v48 = vpop.f32.mrf.mxu1  ;;  %v1540_v49 = vadd.f32 1.0, %v3193_v34  ;;  %3202 = vpow2.f32 %v829_v40  ;;  %v715_v50 = vmul.f32 %v3646_v30, %v655_v47  ;;  %v3195_v52 = vpop.eup %3194  ;;  %v3911_v30 = vld [vmem:[%s4386_s7] ss:$0 sm:$0xff] }
 0x10f   : > { %v1378_v51 = vmul.f32 %v3651_v31, %v1318_v48  ;;  %3204 = vpow2.f32 %v1492_v41  ;;  %v3197_v53 = vpop.eup %3196  ;;  %v909_v55 = vmul.f32 %v877_v46, %v877_v46  ;;  %v1067_v15 = vmul.f32 %v3195_v52, %v971_v54 }
 0x110   : > { %v3906_v59 = vadd.f32 %v3903_v58, %v715_v50  ;;  %v1572_v1 = vmul.f32 %v1540_v49, %v1540_v49  ;;  %v1730_v44 = vmul.f32 %v3197_v53, %v1634_v6 }
 0x111   : > { %v3914_v31 = vadd.f32 %v3911_v30, %v1378_v51  ;;  %v3199_v60 = vpop.eup %3198  ;;  %v1005_v18 = vadd.f32 1.0, %v909_v55  ;;  %v2701_v37 = vadd.f32 -1.0, %v909_v55 }
 0x112   : > { %v3201_v13 = vpop.eup %3200  ;;  %v783_v3 = vmin.f32 %v3906_v59, 20.0  ;;  %v1068_v16 = vmul.f32 %v3199_v60, %v972_v5  ;;  %v1668_v7 = vadd.f32 1.0, %v1572_v1  ;;  %v2813_v41 = vadd.f32 -1.0, %v1572_v1 }
 0x113   : > { %v1446_v14 = vmin.f32 %v3914_v31, 20.0  ;;  %v1731_v17 = vmul.f32 %v3201_v13, %v1635_v12  ;;  %v973_v52 = vmul.f32 %v2701_v37, %v3875_v10 }
 0x114   : > { %v3203_v8 = vpop.eup %3202  ;;  %v831_v61 = vmul.f32 1.442695, %v783_v3  ;;  %v1093_v27 = vpack.c.bf16 %v1068_v16, %v1067_v15  ;;  %v1636_v6 = vmul.f32 %v2813_v41, %v3878_v11 }
 0x115   : > { %v1494_v56 = vmul.f32 1.442695, %v1446_v14  ;;  %v3205_v63 = vpop.eup %3204  ;;  %v878_v28 = vadd.f32 1.0, %v3203_v8  ;;  %v657_v25 = vpop.f32.mrf.mxu0  ;;  %v1756_v2 = vpack.c.bf16 %v1731_v17, %v1730_v44 }
 0x116   : > { %v1320_v26 = vpop.f32.mrf.mxu1  ;;  %v1541_v4 = vadd.f32 1.0, %v3205_v63  ;;  %3206 = vpow2.f32 %v831_v61  ;;  %v716_v22 = vmul.f32 %v3924_v24, %v657_v25  ;;  %1884 = vmatmul.bf16.gmra.mxu2 %v1093_v27 }
 0x117   : > { %v1379_v29 = vmul.f32 %v3930_v23, %v1320_v26  ;;  %v910_v19 = vmul.f32 %v878_v28, %v878_v28  ;;  %3208 = vpow2.f32 %v1494_v56  ;;  %2021 = vmatmul.bf16.gmra.mxu3 %v1756_v2 }
 0x118   : > { %v1573_v57 = vmul.f32 %v1541_v4, %v1541_v4  ;;  %v3934_v0 = vadd.f32 %v3903_v58, %v716_v22  ;;  %3210 = vrcp.f32 %v1005_v18 }
 0x119   : > { %v3937_v62 = vadd.f32 %v3911_v30, %v1379_v29  ;;  %v1006_v9 = vadd.f32 1.0, %v910_v19  ;;  %3212 = vrcp.f32 %v1668_v7  ;;  %v2702_v34 = vadd.f32 -1.0, %v910_v19 }
 0x11a   : > { %v1669_v45 = vadd.f32 1.0, %v1573_v57  ;;  %v784_v32 = vmin.f32 %v3934_v0, 20.0  ;;  %v2814_v42 = vadd.f32 -1.0, %v1573_v57 }
 0x11b   : > { %v1447_v33 = vmin.f32 %v3937_v62, 20.0  ;;  %3214 = vrcp.f32 %v1006_v9  ;;  %v974_v5 = vmul.f32 %v2702_v34, %v3890_v20 }
 0x11c   : > { %v3207_v36 = vpop.eup %3206  ;;  %3216 = vrcp.f32 %v1669_v45  ;;  %v833_v38 = vmul.f32 1.442695, %v784_v32  ;;  %v1637_v12 = vmul.f32 %v2814_v42, %v3893_v21 }
 0x11d   : > { %v1496_v39 = vmul.f32 1.442695, %v1447_v33  ;;  %v3209_v40 = vpop.eup %3208  ;;  %v879_v43 = vadd.f32 1.0, %v3207_v36  ;;  %v660_v35 = vpop.f32.mrf.mxu0 }
 0x11e   : > { %v1323_v46 = vpop.f32.mrf.mxu1  ;;  %v1542_v47 = vadd.f32 1.0, %v3209_v40  ;;  %3218 = vpow2.f32 %v833_v38  ;;  %v717_v48 = vmul.f32 %v3924_v24, %v660_v35  ;;  %v3211_v50 = vpop.eup %3210 }
 0x11f   : > { %v1380_v49 = vmul.f32 %v3930_v23, %v1323_v46  ;;  %3220 = vpow2.f32 %v1496_v39  ;;  %v3213_v51 = vpop.eup %3212  ;;  %v911_v53 = vmul.f32 %v879_v43, %v879_v43  ;;  %v1069_v14 = vmul.f32 %v3211_v50, %v973_v52 }
 0x120   : > { %v3945_v54 = vadd.f32 %v3903_v58, %v717_v48  ;;  %v1574_v1 = vmul.f32 %v1542_v47, %v1542_v47  ;;  %v1732_v16 = vmul.f32 %v3213_v51, %v1636_v6 }
 0x121   : > { %v3948_v55 = vadd.f32 %v3911_v30, %v1380_v49  ;;  %v3215_v60 = vpop.eup %3214  ;;  %v1007_v8 = vadd.f32 1.0, %v911_v53  ;;  %v2703_v33 = vadd.f32 -1.0, %v911_v53 }
 0x122   : > { %v3217_v13 = vpop.eup %3216  ;;  %v785_v3 = vmin.f32 %v3945_v54, 20.0  ;;  %v1070_v15 = vmul.f32 %v3215_v60, %v974_v5  ;;  %v1670_v11 = vadd.f32 1.0, %v1574_v1  ;;  %v2815_v39 = vadd.f32 -1.0, %v1574_v1 }
 0x123   : > { %v1448_v10 = vmin.f32 %v3948_v55, 20.0  ;;  %v1733_v44 = vmul.f32 %v3217_v13, %v1637_v12  ;;  %v975_v50 = vmul.f32 %v2703_v33, %v3906_v59 }
 0x124   : > { %v3219_v17 = vpop.eup %3218  ;;  %v835_v18 = vmul.f32 1.442695, %v785_v3  ;;  %v1094_v21 = vpack.c.bf16 %v1070_v15, %v1069_v14  ;;  %v1638_v6 = vmul.f32 %v2815_v39, %v3914_v31 }
 0x125   : > { %v1498_v61 = vmul.f32 1.442695, %v1448_v10  ;;  %v3221_v56 = vpop.eup %3220  ;;  %v880_v63 = vadd.f32 1.0, %v3219_v17  ;;  %v662_v20 = vpop.f32.mrf.mxu0  ;;  %v1757_v28 = vpack.c.bf16 %v1733_v44, %v1732_v16 }
 0x126   : > { %v1325_v7 = vpop.f32.mrf.mxu1  ;;  %v1543_v25 = vadd.f32 1.0, %v3221_v56  ;;  %3222 = vpow2.f32 %v835_v18  ;;  %v718_v26 = vmul.f32 %v3924_v24, %v662_v20  ;;  %1889 = vmatmul.bf16.gmra.mxu2 %v1094_v21 }
 0x127   : > { %v1381_v27 = vmul.f32 %v3930_v23, %v1325_v7  ;;  %v912_v2 = vmul.f32 %v880_v63, %v880_v63  ;;  %3224 = vpow2.f32 %v1498_v61  ;;  %2026 = vmatmul.bf16.gmra.mxu3 %v1757_v28 }
 0x128   : > { %v1575_v4 = vmul.f32 %v1543_v25, %v1543_v25  ;;  %v3958_v22 = vadd.f32 %v3903_v58, %v718_v26  ;;  %3226 = vrcp.f32 %v1007_v8 }
 0x129   : > { %v3961_v29 = vadd.f32 %v3911_v30, %v1381_v27  ;;  %v1008_v19 = vadd.f32 1.0, %v912_v2  ;;  %3228 = vrcp.f32 %v1670_v11  ;;  %v2704_v40 = vadd.f32 -1.0, %v912_v2 }
 0x12a   : > { %v1671_v57 = vadd.f32 1.0, %v1575_v4  ;;  %v786_v9 = vmin.f32 %v3958_v22, 20.0  ;;  %v2816_v41 = vadd.f32 -1.0, %v1575_v4 }
 0x12b   : > { %v1449_v45 = vmin.f32 %v3961_v29, 20.0  ;;  %3230 = vrcp.f32 %v1008_v19  ;;  %v976_v5 = vmul.f32 %v2704_v40, %v3934_v0 }
 0x12c   : > { %v3223_v32 = vpop.eup %3222  ;;  %3232 = vrcp.f32 %v1671_v57  ;;  %v837_v36 = vmul.f32 1.442695, %v786_v9  ;;  %v1639_v12 = vmul.f32 %v2816_v41, %v3937_v62 }
 0x12d   : > { %v1500_v37 = vmul.f32 1.442695, %v1449_v45  ;;  %v3225_v38 = vpop.eup %3224  ;;  %v881_v34 = vadd.f32 1.0, %v3223_v32  ;;  %v665_v42 = vpop.f32.mrf.mxu0  ;;  %v3992_v32 = vld [vmem:[%s4389_s10] ss:$0 sm:$0xff] }
 0x12e   : > { %v1328_v43 = vpop.f32.mrf.mxu1  ;;  %v1544_v35 = vadd.f32 1.0, %v3225_v38  ;;  %3234 = vpow2.f32 %v837_v36  ;;  %v719_v46 = vmul.f32 %v3924_v24, %v665_v42  ;;  %v3227_v48 = vpop.eup %3226 }
 0x12f   : > { %v1382_v47 = vmul.f32 %v3930_v23, %v1328_v43  ;;  %3236 = vpow2.f32 %v1500_v37  ;;  %v3229_v49 = vpop.eup %3228  ;;  %v913_v51 = vmul.f32 %v881_v34, %v881_v34  ;;  %v1071_v10 = vmul.f32 %v3227_v48, %v975_v50  ;;  %v3997_v43 = vld [vmem:[%s4390_s11] ss:$0 sm:$0xff] }
 0x130   : > { %v3969_v52 = vadd.f32 %v3903_v58, %v719_v46  ;;  %v1576_v1 = vmul.f32 %v1544_v35, %v1544_v35  ;;  %v1734_v15 = vmul.f32 %v3229_v49, %v1638_v6 }
 0x131   : > { %v3972_v53 = vadd.f32 %v3911_v30, %v1382_v47  ;;  %v3231_v60 = vpop.eup %3230  ;;  %v1009_v17 = vadd.f32 1.0, %v913_v51  ;;  %v2705_v45 = vadd.f32 -1.0, %v913_v51 }
 0x132   : > { %v3233_v13 = vpop.eup %3232  ;;  %v787_v3 = vmin.f32 %v3969_v52, 20.0  ;;  %v1072_v14 = vmul.f32 %v3231_v60, %v976_v5  ;;  %v1672_v31 = vadd.f32 1.0, %v1576_v1  ;;  %v2817_v36 = vadd.f32 -1.0, %v1576_v1 }
 0x133   : > { %v1450_v59 = vmin.f32 %v3972_v53, 20.0  ;;  %v1735_v16 = vmul.f32 %v3233_v13, %v1639_v12  ;;  %v977_v50 = vmul.f32 %v2705_v45, %v3945_v54 }
 0x134   : > { %v3235_v44 = vpop.eup %3234  ;;  %v839_v8 = vmul.f32 1.442695, %v787_v3  ;;  %v1095_v62 = vpack.c.bf16 %v1072_v14, %v1071_v10 }
 0x135   : > { %v1502_v18 = vmul.f32 1.442695, %v1450_v59  ;;  %v3237_v61 = vpop.eup %3236  ;;  %v882_v56 = vadd.f32 1.0, %v3235_v44  ;;  %v667_v0 = vpop.f32.mrf.mxu0  ;;  %v1758_v63 = vpack.c.bf16 %v1735_v16, %v1734_v15  ;;  %v1640_v59 = vmul.f32 %v2817_v36, %v3948_v55 }
 0x136   : > { %v1330_v11 = vpop.f32.mrf.mxu1  ;;  %v1545_v20 = vadd.f32 1.0, %v3237_v61  ;;  %3238 = vpow2.f32 %v839_v8  ;;  %v720_v7 = vmul.f32 %v3924_v24, %v667_v0  ;;  %1894 = vmatmul.bf16.gmra.mxu2 %v1095_v62 }
 0x137   : > { %v1383_v21 = vmul.f32 %v3930_v23, %v1330_v11  ;;  %v914_v28 = vmul.f32 %v882_v56, %v882_v56  ;;  %3240 = vpow2.f32 %v1502_v18  ;;  %2031 = vmatmul.bf16.gmra.mxu3 %v1758_v63 }
 0x138   : > { %v1577_v25 = vmul.f32 %v1545_v20, %v1545_v20  ;;  %v3982_v26 = vadd.f32 %v3903_v58, %v720_v7  ;;  %3242 = vrcp.f32 %v1009_v17 }
 0x139   : > { %v3985_v27 = vadd.f32 %v3911_v30, %v1383_v21  ;;  %v1010_v2 = vadd.f32 1.0, %v914_v28  ;;  %3244 = vrcp.f32 %v1672_v31  ;;  %v1855_v9 = vpop.f32.mrf.mxu2  ;;  %v2706_v41 = vadd.f32 -1.0, %v914_v28 }
 0x13a   : > { %v1673_v4 = vadd.f32 1.0, %v1577_v25  ;;  %v788_v19 = vmin.f32 %v3982_v26, 20.0  ;;  %v1992_v39 = vpop.f32.mrf.mxu3  ;;  %v2818_v51 = vadd.f32 -1.0, %v1577_v25 }
 0x13b   : > { %v1451_v57 = vmin.f32 %v3985_v27, 20.0  ;;  %3246 = vrcp.f32 %v1010_v2  ;;  %v1993_v42 = vadd.f32 %v1992_v39, %v1855_v9  ;;  %v978_v10 = vmul.f32 %v2706_v41, %v3958_v22 }
 0x13c   : > { %v3239_v33 = vpop.eup %3238  ;;  %v841_v37 = vmul.f32 1.442695, %v788_v19  ;;  %3248 = vrcp.f32 %v1673_v4  ;;  %v1641_v8 = vmul.f32 %v2818_v51, %v3961_v29 }
 0x13d   : > { %v1504_v38 = vmul.f32 1.442695, %v1451_v57  ;;  %v3241_v40 = vpop.eup %3240  ;;  %v883_v34 = vadd.f32 1.0, %v3239_v33  ;;  %v670_v35 = vpop.f32.mrf.mxu0  ;;  %v2076_v60 = vmul.f32 %v3992_v32, %v1993_v42 }
 0x13e   : > { %v1333_v46 = vpop.f32.mrf.mxu1  ;;  %3250 = vpow2.f32 %v841_v37  ;;  %v721_v47 = vmul.f32 %v3924_v24, %v670_v35  ;;  %v3243_v49 = vpop.eup %3242  ;;  %v1546_v12 = vadd.f32 1.0, %v3241_v40 }
 0x13f   : > { %v1384_v48 = vmul.f32 %v3930_v23, %v1333_v46  ;;  %3252 = vpow2.f32 %v1504_v38  ;;  %v3245_v6 = vpop.eup %3244  ;;  %v915_v5 = vmul.f32 %v883_v34, %v883_v34  ;;  %v4012_v54 = vadd.f32 %v3997_v43, %v2076_v60 }
 0x140   : > { %v4004_v1 = vadd.f32 %v3903_v58, %v721_v47  ;;  %v1073_v44 = vmul.f32 %v3243_v49, %v977_v50  ;;  %v1736_v31 = vmul.f32 %v3245_v6, %v1640_v59  ;;  %v1578_v0 = vmul.f32 %v1546_v12, %v1546_v12 }
 0x141   : > { %v4007_v13 = vadd.f32 %v3911_v30, %v1384_v48  ;;  %v3247_v3 = vpop.eup %3246  ;;  %v1857_v16 = vpop.f32.mrf.mxu2  ;;  %v2144_v18 = vmin.f32 %v4012_v54, 20.0  ;;  %v2707_v55 = vadd.f32 -1.0, %v915_v5  ;;  %v1011_v4 = vadd.f32 1.0, %v915_v5 }
 0x142   : > { %v789_v14 = vmin.f32 %v4004_v1, 20.0  ;;  %v3249_v17 = vpop.eup %3248  ;;  %v1074_v61 = vmul.f32 %v3247_v3, %v978_v10  ;;  %v1994_v62 = vpop.f32.mrf.mxu3  ;;  %v2819_v42 = vadd.f32 -1.0, %v1578_v0  ;;  %v1674_v35 = vadd.f32 1.0, %v1578_v0 }
 0x143   : > { %v1452_v15 = vmin.f32 %v4007_v13, 20.0  ;;  %v2176_v7 = vmul.f32 1.442695, %v2144_v18  ;;  %v1995_v21 = vadd.f32 %v1994_v62, %v1857_v16  ;;  %v1737_v45 = vmul.f32 %v3249_v17, %v1641_v8 }
 0x144   : > { %v3251_v56 = vpop.eup %3250  ;;  %v843_v22 = vmul.f32 1.442695, %v789_v14  ;;  %v1096_v2 = vpack.c.bf16 %v1074_v61, %v1073_v44  ;;  %v979_v49 = vmul.f32 %v2707_v55, %v3969_v52 }
 0x145   : > { %v1506_v11 = vmul.f32 1.442695, %v1452_v15  ;;  %v3253_v63 = vpop.eup %3252  ;;  %v884_v20 = vadd.f32 1.0, %v3251_v56  ;;  %v672_v28 = vpop.f32.mrf.mxu0  ;;  %v2077_v9 = vmul.f32 %v3992_v32, %v1995_v21  ;;  %v1759_v39 = vpack.c.bf16 %v1737_v45, %v1736_v31 }
 0x146   : > { %v1335_v25 = vpop.f32.mrf.mxu1  ;;  %3254 = vpow2.f32 %v843_v22  ;;  %v722_v29 = vmul.f32 %v3924_v24, %v672_v28  ;;  %v1547_v57 = vadd.f32 1.0, %v3253_v63  ;;  %1899 = vmatmul.bf16.gmra.mxu2 %v1096_v2  ;;  %v1642_v22 = vmul.f32 %v2819_v42, %v3972_v53 }
 0x147   : > { %v1385_v19 = vmul.f32 %v3930_v23, %v1335_v25  ;;  %3256 = vpow2.f32 %v2176_v7  ;;  %v916_v33 = vmul.f32 %v884_v20, %v884_v20  ;;  %v4028_v38 = vadd.f32 %v3997_v43, %v2077_v9  ;;  %2036 = vmatmul.bf16.gmra.mxu3 %v1759_v39 }
 0x148   : > { %3258 = vpow2.f32 %v1506_v11  ;;  %v4022_v36 = vadd.f32 %v3903_v58, %v722_v29  ;;  %v1579_v46 = vmul.f32 %v1547_v57, %v1547_v57 }
 0x149   : > { %v4025_v37 = vadd.f32 %v3911_v30, %v1385_v19  ;;  %3260 = vrcp.f32 %v1011_v4  ;;  %v1860_v34 = vpop.f32.mrf.mxu2  ;;  %v2145_v47 = vmin.f32 %v4028_v38, 20.0  ;;  %v2708_v50 = vadd.f32 -1.0, %v916_v33 }
 0x14a   : > { %v790_v40 = vmin.f32 %v4022_v36, 20.0  ;;  %v1997_v6 = vpop.f32.mrf.mxu3  ;;  %v1012_v12 = vadd.f32 1.0, %v916_v33  ;;  %v1675_v18 = vadd.f32 1.0, %v1579_v46  ;;  %v2820_v63 = vadd.f32 -1.0, %v1579_v46 }
 0x14b   : > { %v1453_v41 = vmin.f32 %v4025_v37, 20.0  ;;  %v2178_v59 = vmul.f32 1.442695, %v2145_v47  ;;  %v1998_v10 = vadd.f32 %v1997_v6, %v1860_v34  ;;  %v4050_v28 = vmul.f32 %v2708_v50, %v3982_v26 }
 0x14c   : > { %v3255_v48 = vpop.eup %3254  ;;  %v845_v51 = vmul.f32 1.442695, %v790_v40 }
 0x14d   : > { %v1508_v60 = vmul.f32 1.442695, %v1453_v41  ;;  %v3257_v5 = vpop.eup %3256  ;;  %v885_v3 = vadd.f32 1.0, %v3255_v48  ;;  %v675_v14 = vpop.f32.mrf.mxu0  ;;  %v2078_v61 = vmul.f32 %v3992_v32, %v1998_v10 }
 0x14e   : > { %v1338_v15 = vpop.f32.mrf.mxu1  ;;  %v3259_v16 = vpop.eup %3258  ;;  %v2240_v44 = vadd.f32 1.0, %v3257_v5  ;;  %3262 = vpow2.f32 %v845_v51  ;;  %v723_v17 = vmul.f32 %v3924_v24, %v675_v14 }
 0x14f   : > { %v1386_v8 = vmul.f32 %v3930_v23, %v1338_v15  ;;  %v1548_v52 = vadd.f32 1.0, %v3259_v16  ;;  %3264 = vpow2.f32 %v2178_v59  ;;  %v3261_v31 = vpop.eup %3260  ;;  %v917_v56 = vmul.f32 %v885_v3, %v885_v3 }
 0x150   : > { %3266 = vpow2.f32 %v1508_v60  ;;  %v4038_v55 = vadd.f32 %v3903_v58, %v723_v17  ;;  %v2272_v11 = vmul.f32 %v2240_v44, %v2240_v44  ;;  %v4045_v62 = vadd.f32 %v3997_v43, %v2078_v61 }
 0x151   : > { %v4041_v0 = vadd.f32 %v3911_v30, %v1386_v8  ;;  %3268 = vrcp.f32 %v1674_v35  ;;  %v1862_v21 = vpop.f32.mrf.mxu2  ;;  %v1580_v25 = vmul.f32 %v1548_v52, %v1548_v52  ;;  %v4052_v2 = vmul.f32 %v3261_v31, %v979_v49 }
 0x152   : > { %3270 = vrcp.f32 %v1012_v12  ;;  %v791_v20 = vmin.f32 %v4038_v55, 20.0  ;;  %v2709_v4 = vadd.f32 -1.0, %v917_v56  ;;  %v1013_v29 = vadd.f32 1.0, %v917_v56  ;;  %v1999_v9 = vpop.f32.mrf.mxu3 }
 0x153   : > { %v1454_v7 = vmin.f32 %v4041_v0, 20.0  ;;  %3272 = vrcp.f32 %v1675_v18  ;;  %v2146_v19 = vmin.f32 %v4045_v62, 20.0  ;;  %v2895_v33 = vadd.f32 -1.0, %v2272_v11 }
 0x154   : > { %v3263_v53 = vpop.eup %3262  ;;  %v847_v57 = vmul.f32 1.442695, %v791_v20  ;;  %v2368_v39 = vadd.f32 1.0, %v2272_v11  ;;  %v2000_v47 = vadd.f32 %v1999_v9, %v1862_v21  ;;  %v1676_v49 = vadd.f32 1.0, %v1580_v25 }
 0x155   : > { %v3265_v45 = vpop.eup %3264  ;;  %v886_v40 = vadd.f32 1.0, %v3263_v53  ;;  %v1510_v41 = vmul.f32 1.442695, %v1454_v7  ;;  %v677_v34 = vpop.f32.mrf.mxu0  ;;  %v2180_v46 = vmul.f32 1.442695, %v2146_v19  ;;  %v1643_v59 = vmul.f32 %v2820_v63, %v3985_v27 }
 0x156   : > { %v1340_v42 = vpop.f32.mrf.mxu1  ;;  %v3267_v26 = vpop.eup %3266  ;;  %v2241_v35 = vadd.f32 1.0, %v3265_v45  ;;  %3274 = vpow2.f32 %v847_v57  ;;  %v724_v51 = vmul.f32 %v3924_v24, %v677_v34  ;;  %v2079_v5 = vmul.f32 %v3992_v32, %v2000_v47 }
 0x157   : > { %v3269_v48 = vpop.eup %3268  ;;  %v1549_v50 = vadd.f32 1.0, %v3267_v26  ;;  %3276 = vpow2.f32 %v1510_v41  ;;  %v1387_v12 = vmul.f32 %v3930_v23, %v1340_v42  ;;  %v918_v10 = vmul.f32 %v886_v40, %v886_v40 }
 0x158   : > { %v3271_v60 = vpop.eup %3270  ;;  %v2273_v6 = vmul.f32 %v2241_v35, %v2241_v35  ;;  %3278 = vpow2.f32 %v2180_v46  ;;  %v4060_v14 = vadd.f32 %v3903_v58, %v724_v51  ;;  %v4063_v16 = vadd.f32 %v3997_v43, %v2079_v5 }
 0x159   : > { %v3273_v3 = vpop.eup %3272  ;;  %3280 = vrcp.f32 %v1013_v29  ;;  %v4066_v44 = vadd.f32 %v3911_v30, %v1387_v12  ;;  %v1865_v17 = vpop.f32.mrf.mxu2  ;;  %v4069_v8 = vmul.f32 %v2709_v4, %v4004_v1  ;;  %v1581_v18 = vmul.f32 %v1549_v50, %v1549_v50 }
 0x15a   : > { %3282 = vrcp.f32 %v2368_v39  ;;  %v2369_v15 = vadd.f32 1.0, %v2273_v6  ;;  %v1738_v27 = vmul.f32 %v3269_v48, %v1642_v22  ;;  %v2336_v61 = vmul.f32 %v2895_v33, %v4012_v54  ;;  %v2002_v11 = vpop.f32.mrf.mxu3 }
 0x15b   : > { %3284 = vrcp.f32 %v1676_v49  ;;  %v2821_v31 = vadd.f32 -1.0, %v1580_v25  ;;  %v2147_v56 = vmin.f32 %v4063_v16, 20.0  ;;  %v2896_v20 = vadd.f32 -1.0, %v2273_v6 }
 0x15c   : > { %v3275_v52 = vpop.eup %3274  ;;  %3286 = vrcp.f32 %v2369_v15  ;;  %v2710_v7 = vadd.f32 -1.0, %v918_v10  ;;  %v792_v21 = vmin.f32 %v4060_v14, 20.0  ;;  %v1455_v53 = vmin.f32 %v4066_v44, 20.0 }
 0x15d   : > { %v3277_v63 = vpop.eup %3276  ;;  %v680_v1 = vpop.f32.mrf.mxu0  ;;  %v1014_v19 = vadd.f32 1.0, %v918_v10  ;;  %v887_v22 = vadd.f32 1.0, %v3275_v52  ;;  %v2182_v57 = vmul.f32 1.442695, %v2147_v56  ;;  %v1076_v54 = vmul.f32 %v3271_v60, %v4050_v28 }
 0x15e   : > { %v1343_v4 = vpop.f32.mrf.mxu1  ;;  %v3279_v29 = vpop.eup %3278  ;;  %v2822_v9 = vadd.f32 -1.0, %v1581_v18  ;;  %v849_v33 = vmul.f32 1.442695, %v792_v21  ;;  %v1512_v39 = vmul.f32 1.442695, %v1455_v53  ;;  %v1550_v41 = vadd.f32 1.0, %v3277_v63 }
 0x15f   : > { %v4076_v25 = vpop.eup %3280  ;;  %v2242_v45 = vadd.f32 1.0, %v3279_v29  ;;  %3288 = vpow2.f32 %v2182_v57  ;;  %v1097_v34 = vpack.c.bf16 %v1076_v54, %v4052_v2  ;;  %v1739_v42 = vmul.f32 %v3273_v3, %v1643_v59 }
 0x160   : > { %v3283_v40 = vpop.eup %3282  ;;  %v2337_v35 = vmul.f32 %v2896_v20, %v4028_v38  ;;  %v1677_v46 = vadd.f32 1.0, %v1581_v18  ;;  %3290 = vpow2.f32 %v849_v33  ;;  %v4083_v48 = vmul.f32 %v2821_v31, %v4007_v13 }
 0x161   : > { %v4079_v26 = vpop.eup %3284  ;;  %v2274_v47 = vmul.f32 %v2242_v45, %v2242_v45  ;;  %v919_v49 = vmul.f32 %v887_v22, %v887_v22  ;;  %3292 = vpow2.f32 %v1512_v39  ;;  %1904 = vmatmul.bf16.gmra.mxu2 %v1097_v34  ;;  %v1760_v50 = vpack.c.bf16 %v1739_v42, %v1738_v27  ;;  %v1867_v51 = vpop.f32.mrf.mxu2 }
 0x162   : > { %v3287_v28 = vpop.eup %3286  ;;  %v2432_v60 = vmul.f32 %v3283_v40, %v2336_v61  ;;  %v4086_v6 = vmul.f32 %v2710_v7, %v4022_v36  ;;  %3294 = vrcp.f32 %v1014_v19  ;;  %v4095_v38 = vmul.f32 %v2822_v9, %v4025_v37  ;;  %v2004_v3 = vpop.f32.mrf.mxu3 }
 0x163   : > { %v2433_v2 = vmul.f32 %v3287_v28, %v2337_v35  ;;  %v1582_v13 = vmul.f32 %v1550_v41, %v1550_v41  ;;  %2041 = vmatmul.bf16.gmra.mxu3 %v1760_v50  ;;  %v2003_v5 = vadd.f32 %v2002_v11, %v1865_v17  ;;  %v725_v12 = vmul.f32 %v3924_v24, %v680_v1 }
 0x164   : > { %3296 = vrcp.f32 %v1677_v46  ;;  %v2370_v36 = vadd.f32 1.0, %v2274_v47  ;;  %v1388_v10 = vmul.f32 %v3930_v23, %v1343_v4  ;;  %v2711_v52 = vadd.f32 -1.0, %v919_v49 }
 0x165   : > { %v2980_v59 = vpack.c.bf16 %v2433_v2, %v2432_v60  ;;  %v682_v15 = vpop.f32.mrf.mxu0  ;;  %v3289_v27 = vpop.eup %3288  ;;  %v2080_v61 = vmul.f32 %v3992_v32, %v2003_v5  ;;  %v4101_v37 = vadd.f32 %v3903_v58, %v725_v12  ;;  %v2005_v31 = vadd.f32 %v2004_v3, %v1867_v51 }
 0x166   : > { %v1345_v18 = vpop.f32.mrf.mxu1  ;;  %v3291_v56 = vpop.eup %3290  ;;  %v1015_v17 = vadd.f32 1.0, %v919_v49  ;;  %v2243_v11 = vadd.f32 1.0, %v3289_v27  ;;  %v4105_v63 = vadd.f32 %v3911_v30, %v1388_v10  ;;  %v726_v20 = vmul.f32 %v3924_v24, %v682_v15 }
 0x167   : > { %2981 = vst [vmem:[%s4092_s29] sm:$0xff] %v2980_v59   ;;  %v3293_v7 = vpop.eup %3292  ;;  %v2897_v21 = vadd.f32 -1.0, %v2274_v47  ;;  %v2823_v53 = vadd.f32 -1.0, %v1582_v13  ;;  %v4109_v1 = vadd.f32 %v3997_v43, %v2080_v61  ;;  %v2081_v4 = vmul.f32 %v3992_v32, %v2005_v31 }
 0x168   : > { %v3295_v29 = vpop.eup %3294  ;;  %3298 = vrcp.f32 %v2370_v36  ;;  %v2275_v19 = vmul.f32 %v2243_v11, %v2243_v11  ;;  %v888_v22 = vadd.f32 1.0, %v3291_v56  ;;  %v793_v57 = vmin.f32 %v4101_v37, 20.0 }
 0x169   : > { %v2148_v54 = vmin.f32 %v4109_v1, 20.0  ;;  %v1456_v9 = vmin.f32 %v4105_v63, 20.0  ;;  %v4116_v45 = vadd.f32 %v3997_v43, %v2081_v4  ;;  %v4119_v33 = vadd.f32 %v3903_v58, %v726_v20  ;;  %v1870_v39 = vpop.f32.mrf.mxu2 }
 0x16a   : > { %v3297_v40 = vpop.eup %3296  ;;  %v2898_v41 = vadd.f32 -1.0, %v2275_v19  ;;  %v2371_v34 = vadd.f32 1.0, %v2275_v19  ;;  %v1551_v42 = vadd.f32 1.0, %v3293_v7  ;;  %v1389_v35 = vmul.f32 %v3930_v23, %v1345_v18  ;;  %v2007_v49 = vpop.f32.mrf.mxu3 }
 0x16b   : > { %v4123_v46 = vmul.f32 %v2711_v52, %v4038_v55  ;;  %3300 = vrcp.f32 %v1015_v17  ;;  %v1678_v47 = vadd.f32 1.0, %v1582_v13  ;;  %v2184_v28 = vmul.f32 1.442695, %v2148_v54 }
 0x16c   : > { %v2338_v50 = vmul.f32 %v2897_v21, %v4045_v62  ;;  %v4127_v51 = vmul.f32 %v2823_v53, %v4041_v0  ;;  %3302 = vrcp.f32 %v2371_v34  ;;  %v851_v60 = vmul.f32 1.442695, %v793_v57 }
 0x16d   : > { %v685_v2 = vpop.f32.mrf.mxu0  ;;  %v920_v5 = vmul.f32 %v888_v22, %v888_v22  ;;  %v1514_v12 = vmul.f32 1.442695, %v1456_v9  ;;  %v2149_v3 = vmin.f32 %v4116_v45, 20.0  ;;  %v794_v59 = vmin.f32 %v4119_v33, 20.0 }
 0x16e   : > { %v1348_v55 = vpop.f32.mrf.mxu1  ;;  %v3299_v36 = vpop.eup %3298  ;;  %v2339_v13 = vmul.f32 %v2898_v41, %v4063_v16  ;;  %v1583_v10 = vmul.f32 %v1551_v42, %v1551_v42  ;;  %v4133_v15 = vadd.f32 %v3911_v30, %v1389_v35  ;;  %v1077_v0 = vmul.f32 %v4076_v25, %v4069_v8 }
 0x16f   : > { %3304 = vpow2.f32 %v2184_v28  ;;  %v2186_v62 = vmul.f32 1.442695, %v2149_v3  ;;  %v853_v18 = vmul.f32 1.442695, %v794_v59  ;;  %v1078_v27 = vmul.f32 %v3295_v29, %v4086_v6 }
 0x170   : > { %3306 = vpow2.f32 %v851_v60  ;;  %v1457_v52 = vmin.f32 %v4133_v15, 20.0  ;;  %v1740_v61 = vmul.f32 %v4079_v26, %v4083_v48  ;;  %v1741_v16 = vmul.f32 %v3297_v40, %v4095_v38 }
 0x171   : > { %v4142_v31 = vpop.eup %3300  ;;  %3308 = vpow2.f32 %v1514_v12  ;;  %v1098_v56 = vpack.c.bf16 %v1078_v27, %v1077_v0  ;;  %v2008_v17 = vadd.f32 %v2007_v49, %v1870_v39  ;;  %v727_v8 = vmul.f32 %v3924_v24, %v685_v2  ;;  %v1872_v25 = vpop.f32.mrf.mxu2 }
 0x172   : > { %v3303_v11 = vpop.eup %3302  ;;  %v2434_v20 = vmul.f32 %v3299_v36, %v2338_v50  ;;  %3310 = vpow2.f32 %v2186_v62  ;;  %v1516_v6 = vmul.f32 1.442695, %v1457_v52  ;;  %v1761_v7 = vpack.c.bf16 %v1741_v16, %v1740_v61  ;;  %v2009_v38 = vpop.f32.mrf.mxu3 }
 0x173   : > { %v2435_v21 = vmul.f32 %v3303_v11, %v2339_v13  ;;  %v2712_v53 = vadd.f32 -1.0, %v920_v5  ;;  %1909 = vmatmul.bf16.gmra.mxu2 %v1098_v56  ;;  %v2082_v26 = vmul.f32 %v3992_v32, %v2008_v17  ;;  %v4147_v48 = vadd.f32 %v3903_v58, %v727_v8 }
 0x174   : > { %v1016_v4 = vadd.f32 1.0, %v920_v5  ;;  %3312 = vpow2.f32 %v853_v18  ;;  %2046 = vmatmul.bf16.gmra.mxu3 %v1761_v7  ;;  %v1390_v29 = vmul.f32 %v3930_v23, %v1348_v55  ;;  %v2010_v19 = vadd.f32 %v2009_v38, %v1872_v25 }
 0x175   : > { %v687_v22 = vpop.f32.mrf.mxu0  ;;  %v3305_v57 = vpop.eup %3304  ;;  %v2985_v54 = vpack.c.bf16 %v2435_v21, %v2434_v20  ;;  %3314 = vpow2.f32 %v1516_v6  ;;  %v4151_v9 = vadd.f32 %v3997_v43, %v2082_v26  ;;  %v795_v39 = vmin.f32 %v4147_v48, 20.0 }
 0x176   : > { %v3307_v40 = vpop.eup %3306  ;;  %3316 = vrcp.f32 %v1678_v47  ;;  %v2824_v41 = vadd.f32 -1.0, %v1583_v10  ;;  %v1679_v34 = vadd.f32 1.0, %v1583_v10  ;;  %v2244_v42 = vadd.f32 1.0, %v3305_v57  ;;  %v1350_v2 = vpop.f32.mrf.mxu1 }
 0x177   : > { %v3309_v35 = vpop.eup %3308  ;;  %3057 = vst [vmem:[%s4092_s29 + $0x8] sm:$0xff] %v2985_v54   ;;  %v889_v28 = vadd.f32 1.0, %v3307_v40  ;;  %v855_v49 = vmul.f32 1.442695, %v795_v39  ;;  %v2083_v50 = vmul.f32 %v3992_v32, %v2010_v19  ;;  %v728_v60 = vmul.f32 %v3924_v24, %v687_v22 }
 0x178   : > { %v3311_v5 = vpop.eup %3310  ;;  %v984_v12 = vmul.f32 %v2712_v53, %v4060_v14  ;;  %v2276_v3 = vmul.f32 %v2244_v42, %v2244_v42  ;;  %v1552_v59 = vadd.f32 1.0, %v3309_v35  ;;  %v4159_v55 = vadd.f32 %v3911_v30, %v1390_v29 }
 0x179   : > { %3318 = vrcp.f32 %v1016_v4  ;;  %v921_v47 = vmul.f32 %v889_v28, %v889_v28  ;;  %v2245_v36 = vadd.f32 1.0, %v3311_v5  ;;  %v2150_v13 = vmin.f32 %v4151_v9, 20.0  ;;  %v4162_v10 = vpop.f32.mrf.mxu2 }
 0x17a   : > { %v3313_v0 = vpop.eup %3312  ;;  %v1647_v62 = vmul.f32 %v2824_v41, %v4066_v44  ;;  %v2372_v24 = vadd.f32 1.0, %v2276_v3  ;;  %v1584_v18 = vmul.f32 %v1552_v59, %v1552_v59  ;;  %3320 = vpow2.f32 %v855_v49  ;;  %v2012_v61 = vpop.f32.mrf.mxu3 }
 0x17b   : > { %v3315_v27 = vpop.eup %3314  ;;  %3322 = vrcp.f32 %v1679_v34  ;;  %v2277_v14 = vmul.f32 %v2245_v36, %v2245_v36  ;;  %v4166_v52 = vadd.f32 %v3997_v43, %v2083_v50  ;;  %v4169_v30 = vadd.f32 %v3903_v58, %v728_v60 }
 0x17c   : > { %v3317_v16 = vpop.eup %3316  ;;  %v2899_v56 = vadd.f32 -1.0, %v2276_v3  ;;  %3324 = vrcp.f32 %v2372_v24  ;;  %v1017_v17 = vadd.f32 1.0, %v921_v47  ;;  %v1458_v8 = vmin.f32 %v4159_v55, 20.0 }
 0x17d   : > { %v2713_v44 = vadd.f32 -1.0, %v921_v47  ;;  %v2373_v25 = vadd.f32 1.0, %v2277_v14  ;;  %v890_v11 = vadd.f32 1.0, %v3313_v0  ;;  %v2188_v20 = vmul.f32 1.442695, %v2150_v13  ;;  %v690_v54 = vpop.f32.mrf.mxu0 }
 0x17e   : > { %v2825_v6 = vadd.f32 -1.0, %v1584_v18  ;;  %v1680_v7 = vadd.f32 1.0, %v1584_v18  ;;  %v1553_v21 = vadd.f32 1.0, %v3315_v27  ;;  %v1391_v53 = vmul.f32 %v3930_v23, %v1350_v2  ;;  %v1353_v34 = vpop.f32.mrf.mxu1 }
 0x17f   : > { %v3319_v26 = vpop.eup %3318  ;;  %v2900_v38 = vadd.f32 -1.0, %v2277_v14  ;;  %3326 = vrcp.f32 %v2373_v25  ;;  %v2151_v58 = vmin.f32 %v4166_v52, 20.0  ;;  %v796_v4 = vmin.f32 %v4169_v30, 20.0 }
 0x180   : > { %v3321_v29 = vpop.eup %3320  ;;  %v2340_v19 = vmul.f32 %v2899_v56, %v4109_v1  ;;  %3328 = vrcp.f32 %v1017_v17  ;;  %v1518_v22 = vmul.f32 1.442695, %v1458_v8  ;;  %v1079_v57 = vmul.f32 %v4142_v31, %v4123_v46  ;;  %v4187_v46 = vld [vmem:[%s4386_s7] ss:$0 sm:$0xff] }
 0x181   : > { %v3323_v39 = vpop.eup %3322  ;;  %v4179_v40 = vmul.f32 %v2713_v44, %v4101_v37  ;;  %v922_v23 = vmul.f32 %v890_v11, %v890_v11  ;;  %3330 = vpow2.f32 %v2188_v20  ;;  %v2190_v41 = vmul.f32 1.442695, %v2151_v58  ;;  %v1877_v42 = vpop.f32.mrf.mxu2  ;;  %v3476_v44 = vld [vmem:[%s4385_s6] ss:$0 sm:$0xff] }
 0x182   : > { %v3325_v35 = vpop.eup %3324  ;;  %v4182_v28 = vmul.f32 %v2825_v6, %v4105_v63  ;;  %3332 = vrcp.f32 %v1680_v7  ;;  %v857_v1 = vmul.f32 1.442695, %v796_v4  ;;  %v4190_v31 = vadd.f32 %v4187_v46, %v1391_v53  ;;  %v2014_v2 = vpop.f32.mrf.mxu3 }
 0x183   : > { %v2341_v37 = vmul.f32 %v2900_v38, %v4116_v45  ;;  %v1585_v49 = vmul.f32 %v1553_v21, %v1553_v21  ;;  %v891_v50 = vadd.f32 1.0, %v3321_v29  ;;  %v1080_v60 = vmul.f32 %v3319_v26, %v984_v12 }
 0x184   : > { %3334 = vpow2.f32 %v1518_v22  ;;  %v1459_v63 = vmin.f32 %v4190_v31, 20.0  ;;  %v1742_v5 = vmul.f32 %v3317_v16, %v4127_v51  ;;  %v1743_v3 = vmul.f32 %v3323_v39, %v1647_v62  ;;  %v3475_v51 = vld [vmem:[%s4382_s3] ss:$0 sm:$0xff] }
 0x185   : > { %v3327_v59 = vpop.eup %3326  ;;  %v2436_v47 = vmul.f32 %v3325_v35, %v2340_v19  ;;  %v1018_v36 = vadd.f32 1.0, %v922_v23  ;;  %3336 = vpow2.f32 %v2190_v41  ;;  %v1099_v13 = vpack.c.bf16 %v1080_v60, %v1079_v57  ;;  %v692_v58 = vpop.f32.mrf.mxu0 }
 0x186   : > { %v4195_v0 = vpop.eup %3328  ;;  %v2437_v24 = vmul.f32 %v3327_v59, %v2341_v37  ;;  %3338 = vpow2.f32 %v857_v1  ;;  %v1520_v45 = vmul.f32 1.442695, %v1459_v63  ;;  %v1762_v18 = vpack.c.bf16 %v1743_v3, %v1742_v5  ;;  %v1355_v57 = vpop.f32.mrf.mxu1 }
 0x187   : > { %v3331_v27 = vpop.eup %3330  ;;  %v1681_v12 = vadd.f32 1.0, %v1585_v49  ;;  %v4197_v14 = vmul.f32 %v891_v50, %v891_v50  ;;  %1914 = vmatmul.bf16.gmra.mxu2 %v1099_v13  ;;  %v2013_v56 = vadd.f32 %v2012_v61, %v4162_v10  ;;  %v729_v62 = vmul.f32 %v3475_v51, %v690_v54  ;;  %v3477_v61 = vld [vmem:[%s4383_s4] ss:$0 sm:$0xff] }
 0x188   : > { %v4203_v16 = vpop.eup %3332  ;;  %v2990_v17 = vpack.c.bf16 %v2437_v24, %v2436_v47  ;;  %v2246_v8 = vadd.f32 1.0, %v3331_v27  ;;  %3340 = vpow2.f32 %v1520_v45  ;;  %2051 = vmatmul.bf16.gmra.mxu3 %v1762_v18  ;;  %v1392_v25 = vmul.f32 %v3476_v44, %v1353_v34 }
 0x189   : > { %v2714_v11 = vadd.f32 -1.0, %v922_v23  ;;  %v2826_v20 = vadd.f32 -1.0, %v1585_v49  ;;  %v2084_v10 = vmul.f32 %v3992_v32, %v2013_v56  ;;  %v4212_v6 = vadd.f32 %v3477_v61, %v729_v62  ;;  %v4214_v7 = vpop.f32.mrf.mxu2 }
 0x18a   : > { %v3335_v21 = vpop.eup %3334  ;;  %3058 = vst [vmem:[%s4092_s29 + $0x10] sm:$0xff] %v2990_v17   ;;  %3342 = vrcp.f32 %v1018_v36  ;;  %v2278_v53 = vmul.f32 %v2246_v8, %v2246_v8  ;;  %v4218_v26 = vadd.f32 %v4187_v46, %v1392_v25  ;;  %v2015_v38 = vadd.f32 %v2014_v2, %v1877_v42  ;;  %v2017_v54 = vpop.f32.mrf.mxu3 }
 0x18b   : > { %v3337_v4 = vpop.eup %3336  ;;  %3344 = vrcp.f32 %v1681_v12  ;;  %v1554_v29 = vadd.f32 1.0, %v3335_v21  ;;  %v4221_v19 = vadd.f32 %v3997_v43, %v2084_v10  ;;  %v797_v22 = vmin.f32 %v4212_v6, 20.0 }
 0x18c   : > { %v3339_v39 = vpop.eup %3338  ;;  %v2374_v23 = vadd.f32 1.0, %v2278_v53  ;;  %v1019_v41 = vadd.f32 1.0, %v4197_v14  ;;  %v2247_v34 = vadd.f32 1.0, %v3337_v4  ;;  %v1460_v35 = vmin.f32 %v4218_v26, 20.0 }
 0x18d   : > { %v4226_v1 = vmul.f32 %v1554_v29, %v1554_v29  ;;  %v892_v42 = vadd.f32 1.0, %v3339_v39  ;;  %v2152_v37 = vmin.f32 %v4221_v19, 20.0  ;;  %v859_v49 = vmul.f32 1.442695, %v797_v22 }
 0x18e   : > { %v3341_v50 = vpop.eup %3340  ;;  %v2279_v60 = vmul.f32 %v2247_v34, %v2247_v34  ;;  %v2085_v2 = vmul.f32 %v3992_v32, %v2015_v38  ;;  %v730_v63 = vmul.f32 %v3475_v51, %v692_v58  ;;  %v1393_v5 = vmul.f32 %v3476_v44, %v1355_v57 }
 0x18f   : > { %3346 = vrcp.f32 %v2374_v23  ;;  %v1682_v3 = vadd.f32 1.0, %v4226_v1  ;;  %v924_v59 = vmul.f32 %v892_v42, %v892_v42  ;;  %v1555_v47 = vadd.f32 1.0, %v3341_v50 }
 0x190   : > { %v3343_v36 = vpop.eup %3342  ;;  %v2901_v13 = vadd.f32 -1.0, %v2278_v53  ;;  %v2375_v24 = vadd.f32 1.0, %v2279_v60  ;;  %v2192_v45 = vmul.f32 1.442695, %v2152_v37  ;;  %3348 = vpow2.f32 %v859_v49 }
 0x191   : > { %v3345_v18 = vpop.eup %3344  ;;  %v986_v27 = vmul.f32 %v2714_v11, %v4119_v33  ;;  %3350 = vrcp.f32 %v1019_v41  ;;  %v2902_v12 = vadd.f32 -1.0, %v2279_v60  ;;  %v1522_v56 = vmul.f32 1.442695, %v1460_v35  ;;  %v1882_v62 = vpop.f32.mrf.mxu2 }
 0x192   : > { %3352 = vrcp.f32 %v2375_v24  ;;  %v1020_v51 = vadd.f32 1.0, %v924_v59  ;;  %v1587_v17 = vmul.f32 %v1555_v47, %v1555_v47  ;;  %v4233_v8 = vadd.f32 %v3997_v43, %v2085_v2  ;;  %v2019_v21 = vpop.f32.mrf.mxu3 }
 0x193   : > { %v1649_v44 = vmul.f32 %v2826_v20, %v4133_v15  ;;  %3354 = vrcp.f32 %v1682_v3  ;;  %v4236_v25 = vadd.f32 %v3477_v61, %v730_v63  ;;  %v4239_v10 = vadd.f32 %v4187_v46, %v1393_v5 }
 0x194   : > { %v2342_v33 = vmul.f32 %v2901_v13, %v4151_v9  ;;  %3356 = vpow2.f32 %v2192_v45  ;;  %v2153_v11 = vmin.f32 %v4233_v8, 20.0  ;;  %v1081_v53 = vmul.f32 %v4195_v0, %v4179_v40 }
 0x195   : > { %v3347_v38 = vpop.eup %3346  ;;  %v2343_v58 = vmul.f32 %v2902_v12, %v4166_v52  ;;  %3358 = vpow2.f32 %v1522_v56  ;;  %v798_v15 = vmin.f32 %v4236_v25, 20.0  ;;  %v1461_v20 = vmin.f32 %v4239_v10, 20.0 }
 0x196   : > { %v3349_v61 = vpop.eup %3348  ;;  %3360 = vrcp.f32 %v1020_v51  ;;  %v1683_v46 = vadd.f32 1.0, %v1587_v17  ;;  %v2194_v4 = vmul.f32 1.442695, %v2153_v11  ;;  %v1082_v29 = vmul.f32 %v3343_v36, %v986_v27 }
 0x197   : > { %v4248_v9 = vpop.eup %3350  ;;  %v893_v22 = vadd.f32 1.0, %v3349_v61  ;;  %v861_v57 = vmul.f32 1.442695, %v798_v15  ;;  %v1524_v39 = vmul.f32 1.442695, %v1461_v20  ;;  %v1744_v40 = vmul.f32 %v4203_v16, %v4182_v28 }
 0x198   : > { %v3353_v0 = vpop.eup %3352  ;;  %3362 = vpow2.f32 %v2194_v4  ;;  %v1100_v52 = vpack.c.bf16 %v1082_v29, %v1081_v53  ;;  %v1745_v23 = vmul.f32 %v3345_v18, %v1649_v44  ;;  %v2018_v41 = vadd.f32 %v2017_v54, %v4214_v7 }
 0x199   : > { %v4253_v34 = vpop.eup %3354  ;;  %v2438_v35 = vmul.f32 %v3347_v38, %v2342_v33  ;;  %v2439_v42 = vmul.f32 %v3353_v0, %v2343_v58  ;;  %3364 = vpow2.f32 %v861_v57  ;;  %v2020_v37 = vadd.f32 %v2019_v21, %v1882_v62  ;;  %v1885_v49 = vpop.f32.mrf.mxu2 }
 0x19a   : > { %v3357_v50 = vpop.eup %3356  ;;  %v2715_v60 = vadd.f32 -1.0, %v4197_v14  ;;  %3366 = vpow2.f32 %v1524_v39  ;;  %1919 = vmatmul.bf16.gmra.mxu2 %v1100_v52  ;;  %v1763_v28 = vpack.c.bf16 %v1745_v23, %v1744_v40  ;;  %v2086_v16 = vmul.f32 %v3992_v32, %v2018_v41  ;;  %v2022_v54 = vpop.f32.mrf.mxu3 }
 0x19b   : > { %v3359_v2 = vpop.eup %3358  ;;  %v2995_v63 = vpack.c.bf16 %v2439_v42, %v2438_v35  ;;  %v2716_v5 = vadd.f32 -1.0, %v924_v59  ;;  %3368 = vrcp.f32 %v1683_v46  ;;  %v2248_v7 = vadd.f32 1.0, %v3357_v50 }
 0x19c   : > { %v3361_v3 = vpop.eup %3360  ;;  %v4257_v47 = vmul.f32 %v893_v22, %v893_v22  ;;  %v1556_v36 = vadd.f32 1.0, %v3359_v2  ;;  %2056 = vmatmul.bf16.gmra.mxu3 %v1763_v28  ;;  %v4260_v13 = vadd.f32 %v3997_v43, %v2086_v16  ;;  %v2087_v14 = vmul.f32 %v3992_v32, %v2020_v37 }
 0x19d   : > { %v2827_v24 = vadd.f32 -1.0, %v4226_v1  ;;  %3059 = vst [vmem:[%s4092_s29 + $0x18] sm:$0xff] %v2995_v63   ;;  %v2828_v45 = vadd.f32 -1.0, %v1587_v17  ;;  %v2280_v18 = vmul.f32 %v2248_v7, %v2248_v7  ;;  %v987_v62 = vmul.f32 %v2715_v60, %v4147_v48  ;;  %v4283_v60 = vld [vmem:[%s4389_s10] ss:$0 sm:$0xff] }
 0x19e   : > { %v3363_v27 = vpop.eup %3362  ;;  %v2154_v59 = vmin.f32 %v4260_v13, 20.0  ;;  %v4267_v12 = vadd.f32 %v3997_v43, %v2087_v14  ;;  %v4270_v44 = vmul.f32 %v1556_v36, %v1556_v36  ;;  %v988_v32 = vmul.f32 %v2716_v5, %v4169_v30  ;;  %v4292_v7 = vld [vmem:[%s4390_s11] ss:$0 sm:$0xff] }
 0x19f   : > { %v3365_v56 = vpop.eup %3364  ;;  %v2376_v51 = vadd.f32 1.0, %v2280_v18  ;;  %v2249_v21 = vadd.f32 1.0, %v3363_v27  ;;  %v1021_v1 = vadd.f32 1.0, %v4257_v47  ;;  %v1650_v38 = vmul.f32 %v2827_v24, %v4159_v55 }
 0x1a0   : > { %v3367_v33 = vpop.eup %3366  ;;  %v894_v17 = vadd.f32 1.0, %v3365_v56  ;;  %v2196_v11 = vmul.f32 1.442695, %v2154_v59  ;;  %v1651_v43 = vmul.f32 %v2828_v45, %v4190_v31  ;;  %v2155_v61 = vmin.f32 %v4267_v12, 20.0 }
 0x1a1   : > { %v3369_v53 = vpop.eup %3368  ;;  %v2281_v58 = vmul.f32 %v2249_v21, %v2249_v21  ;;  %v1557_v15 = vadd.f32 1.0, %v3367_v33  ;;  %v1887_v20 = vpop.f32.mrf.mxu2  ;;  %3370 = vrcp.f32 %v2376_v51  ;;  %v1084_v46 = vmul.f32 %v3361_v3, %v988_v32 }
 0x1a2   : > { %v926_v48 = vmul.f32 %v894_v17, %v894_v17  ;;  %v1684_v4 = vadd.f32 1.0, %v4270_v44  ;;  %3372 = vpow2.f32 %v2196_v11  ;;  %v2024_v22 = vpop.f32.mrf.mxu3  ;;  %v2198_v57 = vmul.f32 1.442695, %v2155_v61 }
 0x1a3   : > { %v2377_v30 = vadd.f32 1.0, %v2281_v58  ;;  %v1589_v29 = vmul.f32 %v1557_v15, %v1557_v15  ;;  %3374 = vrcp.f32 %v1021_v1  ;;  %v1083_v55 = vmul.f32 %v4248_v9, %v987_v62 }
 0x1a4   : > { %v1747_v39 = vmul.f32 %v3369_v53, %v1651_v43  ;;  %v2903_v31 = vadd.f32 -1.0, %v2280_v18  ;;  %v1022_v40 = vadd.f32 1.0, %v926_v48  ;;  %v1746_v0 = vmul.f32 %v4253_v34, %v1650_v38 }
 0x1a5   : > { %3376 = vrcp.f32 %v2377_v30  ;;  %v2904_v52 = vadd.f32 -1.0, %v2281_v58  ;;  %v1101_v23 = vpack.c.bf16 %v1084_v46, %v1083_v55  ;;  %v2023_v41 = vadd.f32 %v2022_v54, %v1885_v49 }
 0x1a6   : > { %v2025_v35 = vadd.f32 %v2024_v22, %v1887_v20  ;;  %3378 = vrcp.f32 %v1684_v4  ;;  %v1685_v42 = vadd.f32 1.0, %v1589_v29  ;;  %v1764_v50 = vpack.c.bf16 %v1747_v39, %v1746_v0 }
 0x1a7   : > { %v3371_v37 = vpop.eup %3370  ;;  %3380 = vpow2.f32 %v2198_v57  ;;  %v2088_v9 = vmul.f32 %v4283_v60, %v2023_v41  ;;  %v2344_v34 = vmul.f32 %v2903_v31, %v4221_v19  ;;  %v2345_v63 = vmul.f32 %v2904_v52, %v4233_v8 }
 0x1a8   : > { %v2089_v28 = vmul.f32 %v4283_v60, %v2025_v35  ;;  %v3373_v16 = vpop.eup %3372  ;;  %3382 = vrcp.f32 %v1022_v40  ;;  %v2718_v14 = vadd.f32 -1.0, %v926_v48  ;;  %v2717_v56 = vadd.f32 -1.0, %v4257_v47 }
 0x1a9   : > { %v1890_v49 = vpop.f32.mrf.mxu2  ;;  %v3375_v2 = vpop.eup %3374  ;;  %v2250_v5 = vadd.f32 1.0, %v3373_v16  ;;  %v4295_v54 = vadd.f32 %v4292_v7, %v2088_v9  ;;  %v2440_v19 = vmul.f32 %v3371_v37, %v2344_v34  ;;  %3384 = vrcp.f32 %v1685_v42 }
 0x1aa   : > { %1924 = vmatmul.bf16.gmra.mxu2 %v1101_v23  ;;  %v4298_v3 = vadd.f32 %v4292_v7, %v2089_v28  ;;  %v2027_v24 = vpop.f32.mrf.mxu3  ;;  %v2830_v33 = vadd.f32 -1.0, %v1589_v29  ;;  %v2829_v17 = vadd.f32 -1.0, %v4270_v44  ;;  %v990_v43 = vmul.f32 %v2718_v14, %v4236_v25 }
 0x1ab   : > { %v3377_v36 = vpop.eup %3376  ;;  %v2282_v8 = vmul.f32 %v2250_v5, %v2250_v5  ;;  %v2156_v18 = vmin.f32 %v4295_v54, 20.0  ;;  %v2028_v62 = vadd.f32 %v2027_v24, %v1890_v49  ;;  %v989_v20 = vmul.f32 %v2717_v56, %v4212_v6 }
 0x1ac   : > { %v2441_v45 = vmul.f32 %v3377_v36, %v2345_v63  ;;  %2061 = vmatmul.bf16.gmra.mxu3 %v1764_v50  ;;  %v2157_v27 = vmin.f32 %v4298_v3, 20.0  ;;  %v3379_v59 = vpop.eup %3378  ;;  %v1653_v61 = vmul.f32 %v2830_v33, %v4239_v10  ;;  %v1652_v4 = vmul.f32 %v2829_v17, %v4218_v26 }
 0x1ad   : > { %v3381_v51 = vpop.eup %3380  ;;  %v2200_v32 = vmul.f32 1.442695, %v2156_v18  ;;  %v2378_v11 = vadd.f32 1.0, %v2282_v8  ;;  %v2090_v58 = vmul.f32 %v4283_v60, %v2028_v62  ;;  %v1085_v29 = vmul.f32 %v3375_v2, %v989_v20 }
 0x1ae   : > { %v3000_v21 = vpack.c.bf16 %v2441_v45, %v2440_v19  ;;  %v3383_v1 = vpop.eup %3382  ;;  %v2251_v53 = vadd.f32 1.0, %v3381_v51  ;;  %v2202_v38 = vmul.f32 1.442695, %v2157_v27  ;;  %v2905_v55 = vadd.f32 -1.0, %v2282_v8 }
 0x1af   : > { %v3385_v15 = vpop.eup %3384  ;;  %3386 = vpow2.f32 %v2200_v32  ;;  %v1086_v46 = vmul.f32 %v3383_v1, %v990_v43  ;;  %v4310_v44 = vadd.f32 %v4292_v7, %v2090_v58  ;;  %v1748_v39 = vmul.f32 %v3379_v59, %v1652_v4 }
 0x1b0   : > { %3060 = vst [vmem:[%s4092_s29 + $0x20] sm:$0xff] %v3000_v21   ;;  %v2283_v47 = vmul.f32 %v2251_v53, %v2251_v53  ;;  %3388 = vpow2.f32 %v2202_v38  ;;  %v1749_v22 = vmul.f32 %v3385_v15, %v1653_v61  ;;  %v2346_v9 = vmul.f32 %v2905_v55, %v4260_v13 }
 0x1b1   : > { %v1892_v48 = vpop.f32.mrf.mxu2  ;;  %3390 = vrcp.f32 %v2378_v11  ;;  %v2158_v57 = vmin.f32 %v4310_v44, 20.0  ;;  %v1102_v10 = vpack.c.bf16 %v1086_v46, %v1085_v29 }
 0x1b2   : > { %v2379_v30 = vadd.f32 1.0, %v2283_v47  ;;  %v2029_v25 = vpop.f32.mrf.mxu3  ;;  %v2906_v31 = vadd.f32 -1.0, %v2283_v47  ;;  %v1765_v26 = vpack.c.bf16 %v1749_v22, %v1748_v39 }
 0x1b3   : > { %v2030_v6 = vadd.f32 %v2029_v25, %v1892_v48  ;;  %v2204_v40 = vmul.f32 1.442695, %v2158_v57 }
 0x1b4   : > { %3392 = vrcp.f32 %v2379_v30  ;;  %v2347_v28 = vmul.f32 %v2906_v31, %v4267_v12 }
 0x1b5   : > { %v2091_v0 = vmul.f32 %v4283_v60, %v2030_v6  ;;  %v3387_v52 = vpop.eup %3386  ;;  %3394 = vpow2.f32 %v2204_v40 }
 0x1b6   : > { %v3389_v23 = vpop.eup %3388  ;;  %v2252_v41 = vadd.f32 1.0, %v3387_v52 }
 0x1b7   : > { %v4316_v35 = vadd.f32 %v4292_v7, %v2091_v0  ;;  %v3391_v42 = vpop.eup %3390  ;;  %v2253_v37 = vadd.f32 1.0, %v3389_v23 }
 0x1b8   : > { %v2284_v16 = vmul.f32 %v2252_v41, %v2252_v41  ;;  %v2442_v5 = vmul.f32 %v3391_v42, %v2346_v9 }
 0x1b9   : > { %v1895_v50 = vpop.f32.mrf.mxu2  ;;  %v2159_v34 = vmin.f32 %v4316_v35, 20.0  ;;  %v2285_v2 = vmul.f32 %v2253_v37, %v2253_v37 }
 0x1ba   : > { %1929 = vmatmul.bf16.gmra.mxu2 %v1102_v10  ;;  %v3393_v49 = vpop.eup %3392  ;;  %v2032_v63 = vpop.f32.mrf.mxu3  ;;  %v2380_v19 = vadd.f32 1.0, %v2284_v16  ;;  %v2907_v27 = vadd.f32 -1.0, %v2284_v16 }
 0x1bb   : > { %v2443_v36 = vmul.f32 %v3393_v49, %v2347_v28  ;;  %v2206_v14 = vmul.f32 1.442695, %v2159_v34  ;;  %v2381_v24 = vadd.f32 1.0, %v2285_v2  ;;  %v2033_v45 = vadd.f32 %v2032_v63, %v1895_v50  ;;  %v3395_v8 = vpop.eup %3394 }
 0x1bc   : > { %2066 = vmatmul.bf16.gmra.mxu3 %v1765_v26  ;;  %3396 = vrcp.f32 %v2380_v19  ;;  %v2254_v13 = vadd.f32 1.0, %v3395_v8  ;;  %v2908_v59 = vadd.f32 -1.0, %v2285_v2  ;;  %v2348_v1 = vmul.f32 %v2907_v27, %v4295_v54 }
 0x1bd   : > { %v3005_v18 = vpack.c.bf16 %v2443_v36, %v2442_v5  ;;  %3398 = vrcp.f32 %v2381_v24  ;;  %v2092_v12 = vmul.f32 %v4283_v60, %v2033_v45 }
 0x1be   : > { %3400 = vpow2.f32 %v2206_v14  ;;  %v2286_v51 = vmul.f32 %v2254_v13, %v2254_v13  ;;  %v2349_v17 = vmul.f32 %v2908_v59, %v4298_v3 }
 0x1bf   : > { %3061 = vst [vmem:[%s4092_s29 + $0x28] sm:$0xff] %v3005_v18   ;;  %v4324_v56 = vadd.f32 %v4292_v7, %v2092_v12 }
 0x1c0   : > { %v2382_v47 = vadd.f32 1.0, %v2286_v51  ;;  %v2909_v22 = vadd.f32 -1.0, %v2286_v51 }
 0x1c1   : > { %v1897_v62 = vpop.f32.mrf.mxu2  ;;  %v2160_v21 = vmin.f32 %v4324_v56, 20.0 }
 0x1c2   : > { %v2034_v33 = vpop.f32.mrf.mxu3  ;;  %v3397_v32 = vpop.eup %3396  ;;  %v2350_v0 = vmul.f32 %v2909_v22, %v4310_v44 }
 0x1c3   : > { %v2035_v11 = vadd.f32 %v2034_v33, %v1897_v62  ;;  %v3399_v53 = vpop.eup %3398  ;;  %v2208_v38 = vmul.f32 1.442695, %v2160_v21  ;;  %v2444_v58 = vmul.f32 %v3397_v32, %v2348_v1 }
 0x1c4   : > { %v3401_v43 = vpop.eup %3400  ;;  %v2445_v15 = vmul.f32 %v3399_v53, %v2349_v17 }
 0x1c5   : > { %v2093_v20 = vmul.f32 %v4283_v60, %v2035_v11  ;;  %v2255_v48 = vadd.f32 1.0, %v3401_v43  ;;  %3402 = vpow2.f32 %v2208_v38 }
 0x1c6   : > { %v3010_v61 = vpack.c.bf16 %v2445_v15, %v2444_v58  ;;  %3404 = vrcp.f32 %v2382_v47 }
 0x1c7   : > { %v2129_v46 = vadd.f32 %v4292_v7, %v2093_v20  ;;  %v2287_v4 = vmul.f32 %v2255_v48, %v2255_v48 }
 0x1c8   : > { %3062 = vst [vmem:[%s4092_s29 + $0x30] sm:$0xff] %v3010_v61  }
 0x1c9   : > { %v1900_v30 = vpop.f32.mrf.mxu2  ;;  %v2161_v54 = vmin.f32 %v2129_v46, 20.0  ;;  %v2383_v3 = vadd.f32 1.0, %v2287_v4  ;;  %v2910_v6 = vadd.f32 -1.0, %v2287_v4 }
 0x1ca   : > { %v2037_v57 = vpop.f32.mrf.mxu3 }
 0x1cb   : > { %v2210_v25 = vmul.f32 1.442695, %v2161_v54  ;;  %v3403_v29 = vpop.eup %3402  ;;  %3406 = vrcp.f32 %v2383_v3  ;;  %v2038_v39 = vadd.f32 %v2037_v57, %v1900_v30  ;;  %v2351_v52 = vmul.f32 %v2910_v6, %v4316_v35 }
 0x1cc   : > { %v2256_v55 = vadd.f32 1.0, %v3403_v29  ;;  %v3405_v10 = vpop.eup %3404 }
 0x1cd   : > { %3408 = vpow2.f32 %v2210_v25  ;;  %v2094_v31 = vmul.f32 %v4283_v60, %v2038_v39  ;;  %v2446_v37 = vmul.f32 %v3405_v10, %v2350_v0 }
 0x1ce   : > { %v2288_v40 = vmul.f32 %v2256_v55, %v2256_v55 }
 0x1cf   : > { %v2130_v23 = vadd.f32 %v4292_v7, %v2094_v31 }
 0x1d0   : > { %v2384_v28 = vadd.f32 1.0, %v2288_v40  ;;  %v2911_v19 = vadd.f32 -1.0, %v2288_v40 }
 0x1d1   : > { %v3407_v41 = vpop.eup %3406  ;;  %v1902_v26 = vpop.f32.mrf.mxu2  ;;  %v2162_v9 = vmin.f32 %v2130_v23, 20.0 }
 0x1d2   : > { %v2447_v50 = vmul.f32 %v3407_v41, %v2351_v52  ;;  %v2039_v34 = vpop.f32.mrf.mxu3  ;;  %v2352_v12 = vmul.f32 %v2911_v19, %v4324_v56 }
 0x1d3   : > { %v3409_v42 = vpop.eup %3408  ;;  %v2212_v2 = vmul.f32 1.442695, %v2162_v9  ;;  %v2040_v63 = vadd.f32 %v2039_v34, %v1902_v26 }
 0x1d4   : > { %v2257_v16 = vadd.f32 1.0, %v3409_v42  ;;  %v3015_v49 = vpack.c.bf16 %v2447_v50, %v2446_v37 }
 0x1d5   : > { %3410 = vpow2.f32 %v2212_v2  ;;  %v2095_v44 = vmul.f32 %v4283_v60, %v2040_v63 }
 0x1d6   : > { %v2289_v5 = vmul.f32 %v2257_v16, %v2257_v16  ;;  %3063 = vst [vmem:[%s4092_s29 + $0x38] sm:$0xff] %v3015_v49   ;;  %3412 = vrcp.f32 %v2384_v28 }
 0x1d7   : > { %v2131_v36 = vadd.f32 %v4292_v7, %v2095_v44 }
 0x1d8   : > { %v2385_v35 = vadd.f32 1.0, %v2289_v5  ;;  %v2912_v14 = vadd.f32 -1.0, %v2289_v5 }
 0x1d9   : > { %v2163_v24 = vmin.f32 %v2131_v36, 20.0 }
 0x1da   : > { %3414 = vrcp.f32 %v2385_v35  ;;  %v2353_v27 = vmul.f32 %v2912_v14, %v2129_v46 }
 0x1db   : > { %v3411_v45 = vpop.eup %3410  ;;  %v2214_v8 = vmul.f32 1.442695, %v2163_v24 }
 0x1dc   : > { %v3413_v18 = vpop.eup %3412  ;;  %v2258_v13 = vadd.f32 1.0, %v3411_v45 }
 0x1dd   : > { %3416 = vpow2.f32 %v2214_v8  ;;  %v2448_v62 = vmul.f32 %v3413_v18, %v2352_v12 }
 0x1de   : > { %v2290_v21 = vmul.f32 %v2258_v13, %v2258_v13 }
 0x1e0   : > { %v3415_v59 = vpop.eup %3414  ;;  %v2386_v11 = vadd.f32 1.0, %v2290_v21  ;;  %v2913_v48 = vadd.f32 -1.0, %v2290_v21 }
 0x1e1   : > { %v2449_v51 = vmul.f32 %v3415_v59, %v2353_v27 }
 0x1e2   : > { %3418 = vrcp.f32 %v2386_v11  ;;  %v2354_v25 = vmul.f32 %v2913_v48, %v2130_v23 }
 0x1e3   : > { %v3020_v33 = vpack.c.bf16 %v2449_v51, %v2448_v62  ;;  %v3417_v1 = vpop.eup %3416 }
 0x1e4   : > { %v1905_v32 = vpop.f32.mrf.mxu2  ;;  %v2259_v53 = vadd.f32 1.0, %v3417_v1 }
 0x1e5   : > { %3064 = vst [vmem:[%s4092_s29 + $0x40] sm:$0xff] %v3020_v33  }
 0x1e6   : > { %v2042_v17 = vpop.f32.mrf.mxu3  ;;  %v2291_v43 = vmul.f32 %v2259_v53, %v2259_v53 }
 0x1e7   : > { %v2043_v38 = vadd.f32 %v2042_v17, %v1905_v32 }
 0x1e8   : > { %v2387_v15 = vadd.f32 1.0, %v2291_v43  ;;  %v2914_v61 = vadd.f32 -1.0, %v2291_v43  ;;  %v3419_v54 = vpop.eup %3418 }
 0x1e9   : > { %v2096_v58 = vmul.f32 %v4283_v60, %v2043_v38  ;;  %v2450_v6 = vmul.f32 %v3419_v54, %v2354_v25 }
 0x1ea   : > { %3420 = vrcp.f32 %v2387_v15  ;;  %v2355_v29 = vmul.f32 %v2914_v61, %v2131_v36 }
 0x1eb   : > { %v2132_v56 = vadd.f32 %v4292_v7, %v2096_v58 }
 0x1ec   : > { %v1907_v20 = vpop.f32.mrf.mxu2 }
 0x1ed   : > { %v2164_v47 = vmin.f32 %v2132_v56, 20.0 }
 0x1ee   : > { %v2044_v46 = vpop.f32.mrf.mxu3 }
 0x1ef   : > { %v2216_v4 = vmul.f32 1.442695, %v2164_v47  ;;  %v2045_v30 = vadd.f32 %v2044_v46, %v1907_v20 }
 0x1f0   : > { %v3421_v22 = vpop.eup %3420 }
 0x1f1   : > { %3422 = vpow2.f32 %v2216_v4  ;;  %v2097_v3 = vmul.f32 %v4283_v60, %v2045_v30  ;;  %v2451_v55 = vmul.f32 %v3421_v22, %v2355_v29 }
 0x1f3   : > { %v2133_v57 = vadd.f32 %v4292_v7, %v2097_v3  ;;  %v3025_v31 = vpack.c.bf16 %v2451_v55, %v2450_v6 }
 0x1f5   : > { %v2165_v39 = vmin.f32 %v2133_v57, 20.0  ;;  %3065 = vst [vmem:[%s4092_s29 + $0x48] sm:$0xff] %v3025_v31  }
 0x1f6   : > { %v1910_v10 = vpop.f32.mrf.mxu2 }
 0x1f7   : > { %v3423_v40 = vpop.eup %3422  ;;  %v2218_v0 = vmul.f32 1.442695, %v2165_v39  ;;  %v2047_v52 = vpop.f32.mrf.mxu3 }
 0x1f8   : > { %v2260_v41 = vadd.f32 1.0, %v3423_v40  ;;  %v2048_v26 = vadd.f32 %v2047_v52, %v1910_v10 }
 0x1f9   : > { %3424 = vpow2.f32 %v2218_v0 }
 0x1fa   : > { %v2098_v42 = vmul.f32 %v4283_v60, %v2048_v26  ;;  %v2292_v37 = vmul.f32 %v2260_v41, %v2260_v41 }
 0x1fc   : > { %v2134_v23 = vadd.f32 %v4292_v7, %v2098_v42  ;;  %v2388_v34 = vadd.f32 1.0, %v2292_v37  ;;  %v2915_v14 = vadd.f32 -1.0, %v2292_v37 }
 0x1fe   : > { %v2166_v50 = vmin.f32 %v2134_v23, 20.0  ;;  %v1912_v9 = vpop.f32.mrf.mxu2  ;;  %v2356_v27 = vmul.f32 %v2915_v14, %v2132_v56 }
 0x1ff   : > { %v3425_v28 = vpop.eup %3424  ;;  %v2049_v16 = vpop.f32.mrf.mxu3 }
 0x200   : > { %v2261_v49 = vadd.f32 1.0, %v3425_v28  ;;  %v2220_v2 = vmul.f32 1.442695, %v2166_v50  ;;  %v2050_v63 = vadd.f32 %v2049_v16, %v1912_v9 }
 0x202   : > { %v2293_v5 = vmul.f32 %v2261_v49, %v2261_v49  ;;  %3426 = vpow2.f32 %v2220_v2  ;;  %v2099_v44 = vmul.f32 %v4283_v60, %v2050_v63 }
 0x203   : > { %3428 = vrcp.f32 %v2388_v34 }
 0x204   : > { %v2389_v35 = vadd.f32 1.0, %v2293_v5  ;;  %v2135_v36 = vadd.f32 %v4292_v7, %v2099_v44  ;;  %v2916_v24 = vadd.f32 -1.0, %v2293_v5 }
 0x206   : > { %3430 = vrcp.f32 %v2389_v35  ;;  %v2167_v19 = vmin.f32 %v2135_v36, 20.0  ;;  %v2357_v59 = vmul.f32 %v2916_v24, %v2133_v57 }
 0x208   : > { %v3427_v45 = vpop.eup %3426  ;;  %v2222_v8 = vmul.f32 1.442695, %v2167_v19 }
 0x209   : > { %v2262_v18 = vadd.f32 1.0, %v3427_v45  ;;  %v3429_v13 = vpop.eup %3428 }
 0x20a   : > { %3432 = vpow2.f32 %v2222_v8  ;;  %v1915_v12 = vpop.f32.mrf.mxu2  ;;  %v2452_v33 = vmul.f32 %v3429_v13, %v2356_v27 }
 0x20b   : > { %v2052_v62 = vpop.f32.mrf.mxu3  ;;  %v2294_v1 = vmul.f32 %v2262_v18, %v2262_v18 }
 0x20c   : > { %v3431_v51 = vpop.eup %3430  ;;  %v2053_v21 = vadd.f32 %v2052_v62, %v1915_v12 }
 0x20d   : > { %v2453_v32 = vmul.f32 %v3431_v51, %v2357_v59  ;;  %v2390_v43 = vadd.f32 1.0, %v2294_v1  ;;  %v2917_v30 = vadd.f32 -1.0, %v2294_v1 }
 0x20e   : > { %v2100_v17 = vmul.f32 %v4283_v60, %v2053_v21 }
 0x20f   : > { %v3030_v11 = vpack.c.bf16 %v2453_v32, %v2452_v33  ;;  %3434 = vrcp.f32 %v2390_v43  ;;  %v2358_v57 = vmul.f32 %v2917_v30, %v2134_v23 }
 0x210   : > { %v3433_v53 = vpop.eup %3432  ;;  %v2136_v38 = vadd.f32 %v4292_v7, %v2100_v17 }
 0x211   : > { %3066 = vst [vmem:[%s4092_s29 + $0x50] sm:$0xff] %v3030_v11   ;;  %v2263_v58 = vadd.f32 1.0, %v3433_v53 }
 0x212   : > { %v2168_v15 = vmin.f32 %v2136_v38, 20.0  ;;  %v1917_v20 = vpop.f32.mrf.mxu2 }
 0x213   : > { %v2295_v47 = vmul.f32 %v2263_v58, %v2263_v58  ;;  %v2054_v56 = vpop.f32.mrf.mxu3 }
 0x214   : > { %v2224_v48 = vmul.f32 1.442695, %v2168_v15  ;;  %v2055_v61 = vadd.f32 %v2054_v56, %v1917_v20 }
 0x215   : > { %v2391_v46 = vadd.f32 1.0, %v2295_v47  ;;  %v2918_v54 = vadd.f32 -1.0, %v2295_v47  ;;  %v3435_v29 = vpop.eup %3434 }
 0x216   : > { %3436 = vpow2.f32 %v2224_v48  ;;  %v2101_v4 = vmul.f32 %v4283_v60, %v2055_v61  ;;  %v2454_v40 = vmul.f32 %v3435_v29, %v2358_v57 }
 0x217   : > { %3438 = vrcp.f32 %v2391_v46  ;;  %v2359_v6 = vmul.f32 %v2918_v54, %v2135_v36 }
 0x218   : > { %v2137_v3 = vadd.f32 %v4292_v7, %v2101_v4 }
 0x21a   : > { %v2169_v25 = vmin.f32 %v2137_v3, 20.0 }
 0x21c   : > { %v3437_v22 = vpop.eup %3436  ;;  %v2226_v55 = vmul.f32 1.442695, %v2169_v25 }
 0x21d   : > { %v3439_v39 = vpop.eup %3438  ;;  %v2264_v31 = vadd.f32 1.0, %v3437_v22  ;;  %v1920_v10 = vpop.f32.mrf.mxu2 }
 0x21e   : > { %v2455_v0 = vmul.f32 %v3439_v39, %v2359_v6  ;;  %3440 = vpow2.f32 %v2226_v55 }
 0x21f   : > { %v2057_v52 = vpop.f32.mrf.mxu3  ;;  %v2296_v42 = vmul.f32 %v2264_v31, %v2264_v31 }
 0x220   : > { %v3035_v41 = vpack.c.bf16 %v2455_v0, %v2454_v40  ;;  %v2058_v26 = vadd.f32 %v2057_v52, %v1920_v10 }
 0x221   : > { %v2392_v23 = vadd.f32 1.0, %v2296_v42  ;;  %v2919_v36 = vadd.f32 -1.0, %v2296_v42 }
 0x222   : > { %3067 = vst [vmem:[%s4092_s29 + $0x58] sm:$0xff] %v3035_v41   ;;  %v2102_v37 = vmul.f32 %v4283_v60, %v2058_v26 }
 0x223   : > { %3442 = vrcp.f32 %v2392_v23  ;;  %v2360_v12 = vmul.f32 %v2919_v36, %v2136_v38 }
 0x224   : > { %v3441_v50 = vpop.eup %3440  ;;  %v4358_v9 = vadd.f32 %v4292_v7, %v2102_v37 }
 0x225   : > { %v2265_v28 = vadd.f32 1.0, %v3441_v50  ;;  %v1922_v16 = vpop.f32.mrf.mxu2 }
 0x226   : > { %v2170_v34 = vmin.f32 %v4358_v9, 20.0 }
 0x227   : > { %v2297_v49 = vmul.f32 %v2265_v28, %v2265_v28  ;;  %v2059_v2 = vpop.f32.mrf.mxu3 }
 0x228   : > { %v2228_v63 = vmul.f32 1.442695, %v2170_v34  ;;  %v2060_v5 = vadd.f32 %v2059_v2, %v1922_v16 }
 0x229   : > { %v2393_v44 = vadd.f32 1.0, %v2297_v49  ;;  %v2920_v19 = vadd.f32 -1.0, %v2297_v49  ;;  %v3443_v8 = vpop.eup %3442 }
 0x22a   : > { %3444 = vpow2.f32 %v2228_v63  ;;  %v2103_v35 = vmul.f32 %v4283_v60, %v2060_v5  ;;  %v2456_v33 = vmul.f32 %v3443_v8, %v2360_v12 }
 0x22b   : > { %3446 = vrcp.f32 %v2393_v44  ;;  %v2361_v27 = vmul.f32 %v2920_v19, %v2137_v3 }
 0x22c   : > { %v2139_v14 = vadd.f32 %v4292_v7, %v2103_v35 }
 0x22d   : > { %v1925_v24 = vpop.f32.mrf.mxu2 }
 0x22e   : > { %v2171_v45 = vmin.f32 %v2139_v14, 20.0 }
 0x22f   : > { %v2062_v18 = vpop.f32.mrf.mxu3 }
 0x230   : > { %v3445_v13 = vpop.eup %3444  ;;  %v2230_v59 = vmul.f32 1.442695, %v2171_v45  ;;  %v2063_v62 = vadd.f32 %v2062_v18, %v1925_v24 }
 0x231   : > { %v3447_v51 = vpop.eup %3446  ;;  %v2266_v21 = vadd.f32 1.0, %v3445_v13 }
 0x232   : > { %v2457_v32 = vmul.f32 %v3447_v51, %v2361_v27  ;;  %3448 = vpow2.f32 %v2230_v59  ;;  %v2104_v1 = vmul.f32 %v4283_v60, %v2063_v62 }
 0x233   : > { %v2298_v53 = vmul.f32 %v2266_v21, %v2266_v21 }
 0x234   : > { %v3040_v17 = vpack.c.bf16 %v2457_v32, %v2456_v33  ;;  %v2140_v11 = vadd.f32 %v4292_v7, %v2104_v1 }
 0x235   : > { %v1927_v43 = vpop.f32.mrf.mxu2  ;;  %v2394_v56 = vadd.f32 1.0, %v2298_v53  ;;  %v2921_v22 = vadd.f32 -1.0, %v2298_v53 }
 0x236   : > { %3068 = vst [vmem:[%s4092_s29 + $0x60] sm:$0xff] %v3040_v17   ;;  %v2172_v58 = vmin.f32 %v2140_v11, 20.0 }
 0x237   : > { %v2064_v15 = vpop.f32.mrf.mxu3  ;;  %v2362_v40 = vmul.f32 %v2921_v22, %v4358_v9 }
 0x238   : > { %v3449_v20 = vpop.eup %3448  ;;  %v2232_v38 = vmul.f32 1.442695, %v2172_v58  ;;  %v2065_v47 = vadd.f32 %v2064_v15, %v1927_v43 }
 0x239   : > { %v2267_v48 = vadd.f32 1.0, %v3449_v20 }
 0x23a   : > { %3450 = vpow2.f32 %v2232_v38  ;;  %v2105_v61 = vmul.f32 %v4283_v60, %v2065_v47 }
 0x23b   : > { %v2299_v46 = vmul.f32 %v2267_v48, %v2267_v48  ;;  %3452 = vrcp.f32 %v2394_v56 }
 0x23c   : > { %v2141_v4 = vadd.f32 %v4292_v7, %v2105_v61 }
 0x23d   : > { %v2395_v30 = vadd.f32 1.0, %v2299_v46  ;;  %v1930_v54 = vpop.f32.mrf.mxu2  ;;  %v2922_v57 = vadd.f32 -1.0, %v2299_v46 }
 0x23e   : > { %v2173_v3 = vmin.f32 %v2141_v4, 20.0 }
 0x23f   : > { %3454 = vrcp.f32 %v2395_v30  ;;  %v2067_v25 = vpop.f32.mrf.mxu3  ;;  %v2363_v0 = vmul.f32 %v2922_v57, %v2139_v14 }
 0x240   : > { %v3451_v29 = vpop.eup %3450  ;;  %v2234_v6 = vmul.f32 1.442695, %v2173_v3  ;;  %v2068_v55 = vadd.f32 %v2067_v25, %v1930_v54 }
 0x241   : > { %v2268_v39 = vadd.f32 1.0, %v3451_v29  ;;  %v3453_v10 = vpop.eup %3452 }
 0x242   : > { %3456 = vpow2.f32 %v2234_v6  ;;  %v2106_v31 = vmul.f32 %v4283_v60, %v2068_v55  ;;  %v2458_v37 = vmul.f32 %v3453_v10, %v2362_v40 }
 0x243   : > { %v2300_v26 = vmul.f32 %v2268_v39, %v2268_v39 }
 0x244   : > { %v2142_v52 = vadd.f32 %v4292_v7, %v2106_v31 }
 0x245   : > { %v3455_v41 = vpop.eup %3454  ;;  %v1932_v42 = vpop.f32.mrf.mxu2  ;;  %v2396_v63 = vadd.f32 1.0, %v2300_v26  ;;  %v2923_v24 = vadd.f32 -1.0, %v2300_v26 }
 0x246   : > { %v2459_v50 = vmul.f32 %v3455_v41, %v2363_v0  ;;  %v2174_v23 = vmin.f32 %v2142_v52, 20.0 }
 0x247   : > { %v2069_v28 = vpop.f32.mrf.mxu3  ;;  %v2364_v12 = vmul.f32 %v2923_v24, %v2140_v11 }
 0x248   : > { %v3457_v16 = vpop.eup %3456  ;;  %v3045_v34 = vpack.c.bf16 %v2459_v50, %v2458_v37  ;;  %v2236_v49 = vmul.f32 1.442695, %v2174_v23  ;;  %v2070_v2 = vadd.f32 %v2069_v28, %v1932_v42 }
 0x249   : > { %v2269_v5 = vadd.f32 1.0, %v3457_v16 }
 0x24a   : > { %3069 = vst [vmem:[%s4092_s29 + $0x68] sm:$0xff] %v3045_v34   ;;  %3458 = vpow2.f32 %v2236_v49  ;;  %v2107_v9 = vmul.f32 %v4283_v60, %v2070_v2 }
 0x24b   : > { %v2301_v44 = vmul.f32 %v2269_v5, %v2269_v5  ;;  %3460 = vrcp.f32 %v2396_v63 }
 0x24c   : > { %v2143_v35 = vadd.f32 %v4292_v7, %v2107_v9 }
 0x24d   : > { %v2397_v36 = vadd.f32 1.0, %v2301_v44  ;;  %v2924_v45 = vadd.f32 -1.0, %v2301_v44 }
 0x24e   : > { %v2175_v19 = vmin.f32 %v2143_v35, 20.0 }
 0x24f   : > { %3462 = vrcp.f32 %v2397_v36  ;;  %v2365_v27 = vmul.f32 %v2924_v45, %v2141_v4 }
 0x250   : > { %v3459_v14 = vpop.eup %3458  ;;  %v2238_v8 = vmul.f32 1.442695, %v2175_v19 }
 0x251   : > { %v2270_v18 = vadd.f32 1.0, %v3459_v14  ;;  %v3461_v13 = vpop.eup %3460 }
 0x252   : > { %3464 = vpow2.f32 %v2238_v8  ;;  %v2460_v60 = vmul.f32 %v3461_v13, %v2364_v12 }
 0x253   : > { %v2302_v62 = vmul.f32 %v2270_v18, %v2270_v18 }
 0x255   : > { %v3463_v59 = vpop.eup %3462  ;;  %v2398_v33 = vadd.f32 1.0, %v2302_v62  ;;  %v2925_v53 = vadd.f32 -1.0, %v2302_v62 }
 0x256   : > { %v2461_v51 = vmul.f32 %v3463_v59, %v2365_v27 }
 0x257   : > { %3466 = vrcp.f32 %v2398_v33  ;;  %v2366_v15 = vmul.f32 %v2925_v53, %v2142_v52 }
 0x258   : > { %v3465_v21 = vpop.eup %3464  ;;  %v3050_v7 = vpack.c.bf16 %v2461_v51, %v2460_v60 }
 0x259   : > { %v2271_v32 = vadd.f32 1.0, %v3465_v21 }
 0x25a   : > { %3070 = vst [vmem:[%s4092_s29 + $0x70] sm:$0xff] %v3050_v7  }
 0x25b   : > { %v2303_v1 = vmul.f32 %v2271_v32, %v2271_v32 }
 0x25d   : > { %v2399_v17 = vadd.f32 1.0, %v2303_v1  ;;  %v2926_v43 = vadd.f32 -1.0, %v2303_v1  ;;  %v3467_v58 = vpop.eup %3466 }
 0x25e   : > { %v2462_v38 = vmul.f32 %v3467_v58, %v2366_v15 }
 0x25f   : > { %3468 = vrcp.f32 %v2399_v17  ;;  %v2367_v11 = vmul.f32 %v2926_v43, %v2143_v35 }
 0x265   : > { %v3469_v20 = vpop.eup %3468 }
 0x266   : > { %v2463_v47 = vmul.f32 %v3469_v20, %v2367_v11 }
 0x268   : > { %v3055_v56 = vpack.c.bf16 %v2463_v47, %v2462_v38 }
 0x26a   : > { %3071 = vst [vmem:[%s4092_s29 + $0x78] sm:$0xff] %v3055_v56  }
 0x26b PF: > { %s22_s21 = sadd.s32 1, %s3486_s21  }
 0x26c   : > { %p19_p4 = scmp.ge.s32.totalorder %s22_s21, 4  }
 0x26e   :  { %21 = sbr.rel (!%p19_p4) target bundleno = 1 (0x1), region = 101 }

// kernel: _lambda_.5
= control target key start
LH: loop header
LB: loop body
LE: loop exit
PB: predicated region body
PF: predicated region fallthrough
CT: control target
= control target key end

     0   :  { %s4484_s17 = smov 0   ;;  %s4486_s18 = smov 0   ;;  %s5267_s0 = inlined_call_operand.vmem [shape: bf16[2,16,16,128], index: 0, kind: input, shape index: {}, may-alias: {0,1,2}]   ;;  %s5268_s1 = inlined_call_operand.vmem [shape: bf16[2,16,16,128], index: 1, kind: input, shape index: {}, may-alias: {0,1,2}]   ;;  %s5269_s2 = inlined_call_operand.vmem [shape: bf16[2,16,16,128], index: 2, kind: input, shape index: {}, may-alias: {0,1,2}]   ;;  %s5270_s3 = inlined_call_operand.vmem [shape: bf16[128,128], index: 3, kind: input, shape index: {}]   ;;  %s5271_s4 = inlined_call_operand.vmem [shape: f32[1,128], index: 4, kind: input, shape index: {}]   ;;  %s5272_s5 = inlined_call_operand.vmem [shape: f32[1,128], index: 5, kind: input, shape index: {}]   ;;  %s5273_s6 = inlined_call_operand.vmem [shape: bf16[3,384,128], index: 6, kind: input, shape index: {}]   ;;  %s5274_s7 = inlined_call_operand.vmem [shape: f32[1,128], index: 7, kind: input, shape index: {}]   ;;  %s5275_s8 = inlined_call_operand.vmem [shape: f32[1,128], index: 8, kind: input, shape index: {}]   ;;  %s5276_s9 = inlined_call_operand.vmem [shape: f32[1,128], index: 9, kind: input, shape index: {}]   ;;  %s5277_s10 = inlined_call_operand.vmem [shape: f32[1,128], index: 10, kind: input, shape index: {}]   ;;  %s5278_s11 = inlined_call_operand.vmem [shape: bf16[2,16,16,128], index: 11, kind: output, shape index: {}]  }
   0x1   :  { %s4488_s19 = smov 0   ;;  %s4490_s20 = smov 0  }
   0x2   :  { %s4492_s21 = smov 0  }
   0x3 LB: > { %s30_s9 = sadd.s32 1, %s4414_s19  ;;  %s33_s10 = sadd.s32 1, %s4418_s20  ;;  %s4422_s21 = sphi %s4492_s21, %s21_s21   ;;  %s4418_s20 = sphi %s4490_s20, %s5284_s20   ;;  %s4414_s19 = sphi %s4488_s19, %s5283_s19   ;;  %s4410_s18 = sphi %s4486_s18, %s5282_s18   ;;  %s4406_s17 = sphi %s4484_s17, %s5281_s17  }
   0x4   : > { %p31_p0 = scmp.ge.s32.totalorder %s30_s9, 2  ;;  %p3159_p1 = scmp.ge.s32.totalorder %s4422_s21, 1 }
   0x5   : > { %p423_p2 = scmp.lt.s32.totalorder %s4422_s21, 5 }
   0x6   : > { %s5286_s9 = smov (%p31_p0, %s30_s9), 0  ;;  %s5288_s10 = smov (!%p31_p0, %s33_s10), %s4418_s20 }
   0x7   : > { %p424_p3 = pnand %p3159_p1, %p423_p2  ;;  %p35_p4 = scmp.ge.s32.totalorder %s5288_s10, 2 }
   0x8   : > { %s4528_s28 = sshll.u32 (!%p424_p3), %s4406_s17, 3  ;;  %p500_p5 = scmp.lt.s32.totalorder (!%p424_p3), %s4410_s18, 1 }
   0x9   : > { %s5290_s10 = smov (%p35_p4, %s5288_s10), 0  ;;  %427 = sbr.rel (%p424_p3) target bundleno = 776 (0x308), region = 64 }
   0xa   : > { %p502_p6 = scmp.lt.s32.totalorder (!%p424_p3), %s4528_s28, 15  ;;  %s3165_s14 = sadd.s32 (!%p424_p3), 4294967295, %s4528_s28 }
   0xb   : > { %p512_p7 = scmp.gt.s32.totalorder (!%p424_p3), %s3165_s14, 0  ;;  %p3166_p8 = scmp.lt.s32.totalorder (!%p424_p3), %s3165_s14, 15 }
   0xc   : > { %p1113_p10 = scmp.gt.s32.totalorder (!%p424_p3), %s4406_s17, 0  ;;  %p1187_p11 = scmp.lt.s32.totalorder (!%p424_p3), %s4406_s17, 1 }
   0xe   : > { %v3976_v0 = vld [vmem:[%s5270_s3 + $0x38] sm:$0xff]  ;;  %v3975_v1 = vld [vmem:[%s5270_s3 + $0x30] sm:$0xff]  ;;  %v3974_v2 = vld [vmem:[%s5270_s3 + $0x28] sm:$0xff]  ;;  %s5292_s18 = smov (!%p500_p5, %s4410_s18), 1  ;;  %s5294_s14 = smov (!%p512_p7, %s3165_s14), 0  ;;  %vm948_vm0 = vcmask 1040384  }
   0xf   : > { %685 = vmatpush.bf16.msra.mxu0 %v3976_v0  ;;  %4178 = vmatpush.bf16.msra.mxu1 %v3976_v0  ;;  %v3973_v3 = vld [vmem:[%s5270_s3 + $0x20] sm:$0xff]  ;;  %s503_s12 = scalar_select %p502_p6, %s4528_s28, 15  ;;  %v3972_v4 = vld [vmem:[%s5270_s3 + $0x18] sm:$0xff]  ;;  %v3971_v5 = vld [vmem:[%s5270_s3 + $0x10] sm:$0xff]  ;;  %vm997_vm1 = vcmask 1046528  }
  0x10   : > { %1196 = vmatpush.bf16.msra.mxu2 %v3976_v0  ;;  %s4540_s16 = sshll.u32 %s5292_s18, 5  ;;  %v3970_v6 = vld [vmem:[%s5270_s3 + $0x8] sm:$0xff]  ;;  %v3969_v7 = vld [vmem:[%s5270_s3] sm:$0xff]  ;;  %s5296_s14 = smov (!%p3166_p8, %s5294_s14), 15  ;;  %v4066_v17 = vld [vmem:[%s5273_s6 + $0xf8] sm:$0xff] }
  0x11   : > { %s3161_s15 = sshll.u32 %s503_s12, 1  ;;  %s3171_s22 = sshll.u32 %s5296_s14, 1  ;;  %v4074_v18 = vld [vmem:[%s5273_s6 + $0x138] sm:$0xff]  ;;  %4186 = vmatpush.bf16.msra.mxu3 %v4066_v17  ;;  %v4065_v19 = vld [vmem:[%s5273_s6 + $0xf0] sm:$0xff]  ;;  %v4595_v21 = vld [vmem:[%s5271_s4] ss:$0 sm:$0xff] }
  0x12   : > { %s4546_s24 = sadd.s32 %s4540_s16, %s3161_s15  ;;  %s528_s15 = sadd.s32 8, %s4528_s28  ;;  %v4073_v20 = vld [vmem:[%s5273_s6 + $0x130] sm:$0xff]  ;;  %v4600_v22 = vld [vmem:[%s5272_s5] ss:$0 sm:$0xff]  ;;  %v4064_v25 = vld [vmem:[%s5273_s6 + $0xe8] sm:$0xff] }
  0x13   : > { %686 = vmatpush.bf16.msra.mxu0 %v3975_v1  ;;  %4179 = vmatpush.bf16.msra.mxu1 %v3975_v1  ;;  %s5279_s18 = sshll.u32 %s4546_s24, 2  ;;  %p529_p9 = scmp.lt.s32.totalorder %s528_s15, 15  ;;  %v4072_v26 = vld [vmem:[%s5273_s6 + $0x128] sm:$0xff]  ;;  %v4063_v33 = vld [vmem:[%s5273_s6 + $0xe0] sm:$0xff]  ;;  %v4062_v42 = vld [vmem:[%s5273_s6 + $0xd8] sm:$0xff] }
  0x14   : > { %1197 = vmatpush.bf16.msra.mxu2 %v3975_v1  ;;  %s4560_s13 = scalar_lea.vmem %s5267_s0, %s5279_s18  ;;  %s520_s23 = sadd.s32 %s3171_s22, %s4540_s16  ;;  %v4071_v34 = vld [vmem:[%s5273_s6 + $0x120] sm:$0xff]  ;;  %v4070_v43 = vld [vmem:[%s5273_s6 + $0x118] sm:$0xff]  ;;  %v4061_v48 = vld [vmem:[%s5273_s6 + $0xd0] sm:$0xff] }
  0x15   : > { %v3977_v8 = vld [vmem:[%s4560_s13] sm:$0xff]  ;;  %v3982_v9 = vld [vmem:[%s4560_s13 + $0x28] sm:$0xff]  ;;  %v3983_v11 = vld [vmem:[%s4560_s13 + $0x30] sm:$0xff]  ;;  %s5298_s15 = smov (!%p529_p9, %s528_s15), 15  ;;  %s3173_s27 = sshll.u32 %s520_s23, 2  ;;  %4187 = vmatpush.bf16.msra.mxu3 %v4065_v19 }
  0x16   : > { %v3978_v10 = vld [vmem:[%s4560_s13 + $0x8] sm:$0xff]  ;;  %v3979_v12 = vld [vmem:[%s4560_s13 + $0x10] sm:$0xff]  ;;  %v3984_v13 = vld [vmem:[%s4560_s13 + $0x38] sm:$0xff]  ;;  %s5300_s15 = smov (!%p529_p9, %s5298_s15), 15  ;;  %s522_s12 = scalar_lea.vmem %s5268_s1, %s3173_s27 }
  0x17   : > { %687 = vmatpush.bf16.msra.mxu0 %v3974_v2  ;;  %4180 = vmatpush.bf16.msra.mxu1 %v3974_v2  ;;  %s4571_s25 = sshll.u32 %s5300_s15, 1  ;;  %v3980_v14 = vld [vmem:[%s4560_s13 + $0x18] sm:$0xff]  ;;  %v3985_v15 = vld [vmem:[%s522_s12] sm:$0xff]  ;;  %v4069_v49 = vld [vmem:[%s5273_s6 + $0x110] sm:$0xff] }
  0x18   : > { %1198 = vmatpush.bf16.msra.mxu2 %v3974_v2  ;;  %s537_s26 = sadd.s32 %s4571_s25, %s4540_s16  ;;  %v3981_v16 = vld [vmem:[%s4560_s13 + $0x20] sm:$0xff]  ;;  %v4060_v60 = vld [vmem:[%s5273_s6 + $0xc8] sm:$0xff] }
  0x19   : > { %4188 = vmatpush.bf16.msra.mxu3 %v4064_v25  ;;  %s3180_s23 = sshll.u32 %s537_s26, 2  ;;  %v4068_v61 = vld [vmem:[%s5273_s6 + $0x108] sm:$0xff] }
  0x1a   : > { %s539_s28 = scalar_lea.vmem %s5269_s2, %s3180_s23 }
  0x1b   : > { %688 = vmatpush.bf16.msra.mxu0 %v3973_v3  ;;  %4181 = vmatpush.bf16.msra.mxu1 %v3973_v3  ;;  %v3986_v40 = vld [vmem:[%s539_s28] sm:$0xff]  ;;  %s4858_s23 = scalar_select %p1113_p10, 1, 0 }
  0x1c   : > { %1199 = vmatpush.bf16.msra.mxu2 %v3973_v3  ;;  %s4942_s27 = scalar_select %p1187_p11, 1, 0 }
  0x1d   : > { %4189 = vmatpush.bf16.msra.mxu3 %v4063_v33  ;;  %s1115_s13 = scvt.s32.f32 %s4858_s23 }
  0x1e   : > { %s1189_s30 = scvt.s32.f32 %s4942_s27 }
  0x1f   : > { %689 = vmatpush.bf16.msra.mxu0 %v3972_v4  ;;  %4182 = vmatpush.bf16.msra.mxu1 %v3972_v4 }
  0x20   : > { %1200 = vmatpush.bf16.msra.mxu2 %v3972_v4 }
  0x21   : > { %4190 = vmatpush.bf16.msra.mxu3 %v4062_v42 }
  0x23   : > { %690 = vmatpush.bf16.msra.mxu0 %v3971_v5  ;;  %4183 = vmatpush.bf16.msra.mxu1 %v3971_v5 }
  0x24   : > { %1201 = vmatpush.bf16.msra.mxu2 %v3971_v5 }
  0x25   : > { %4191 = vmatpush.bf16.msra.mxu3 %v4061_v48 }
  0x27   : > { %691 = vmatpush.bf16.msra.mxu0 %v3970_v6  ;;  %4184 = vmatpush.bf16.msra.mxu1 %v3970_v6 }
  0x28   : > { %1202 = vmatpush.bf16.msra.mxu2 %v3970_v6 }
  0x29   : > { %4192 = vmatpush.bf16.msra.mxu3 %v4060_v60 }
  0x2b   : > { %692 = vmatpush.bf16.msra.mxu0 %v3969_v7  ;;  %4185 = vmatpush.bf16.msra.mxu1 %v3969_v7 }
  0x2c   : > { %1203 = vmatpush.bf16.msra.mxu2 %v3969_v7 }
  0x2e   : > { %693 = vmatmul.bf16.vlgmr.msra.gmra.mxu0 %v3977_v8  ;;  %718 = vmatmul.bf16.vlgmr.msra.gmra.mxu1 %v3982_v9 }
  0x2f   : > { %1122 = vmatpush.bf16.msrb.mxu1 %v3976_v0  ;;  %1204 = vmatmul.bf16.vlgmr.msra.gmra.mxu2 %v3986_v40 }
  0x30   : > { %1693 = vmatpush.bf16.msrb.mxu2 %v4066_v17 }
  0x33   : > { %1123 = vmatpush.bf16.msrb.mxu1 %v3975_v1 }
  0x34   : > { %1694 = vmatpush.bf16.msrb.mxu2 %v4065_v19 }
  0x37   : > { %1124 = vmatpush.bf16.msrb.mxu1 %v3974_v2 }
  0x38   : > { %1695 = vmatpush.bf16.msrb.mxu2 %v4064_v25 }
  0x3b   : > { %1125 = vmatpush.bf16.msrb.mxu1 %v3973_v3 }
  0x3c   : > { %1696 = vmatpush.bf16.msrb.mxu2 %v4063_v33 }
  0x3e   : > { %698 = vmatmul.bf16.gmra.mxu0 %v3978_v10  ;;  %723 = vmatmul.bf16.gmra.mxu1 %v3983_v11 }
  0x3f   : > { %1126 = vmatpush.bf16.msrb.mxu1 %v3972_v4 }
  0x40   : > { %1697 = vmatpush.bf16.msrb.mxu2 %v4062_v42 }
  0x43   : > { %1127 = vmatpush.bf16.msrb.mxu1 %v3971_v5 }
  0x44   : > { %1698 = vmatpush.bf16.msrb.mxu2 %v4061_v48 }
  0x47   : > { %1128 = vmatpush.bf16.msrb.mxu1 %v3970_v6 }
  0x48   : > { %1699 = vmatpush.bf16.msrb.mxu2 %v4060_v60 }
  0x4b   : > { %1129 = vmatpush.bf16.msrb.mxu1 %v3969_v7 }
  0x4e   : > { %703 = vmatmul.bf16.gmra.mxu0 %v3979_v12  ;;  %728 = vmatmul.bf16.gmra.mxu1 %v3984_v13 }
  0x4f   : > { %1742 = vmatpush.bf16.msra.mxu1 %v4074_v18 }
  0x53   : > { %1743 = vmatpush.bf16.msra.mxu1 %v4073_v20 }
  0x57   : > { %1744 = vmatpush.bf16.msra.mxu1 %v4072_v26 }
  0x5b   : > { %1745 = vmatpush.bf16.msra.mxu1 %v4071_v34 }
  0x5e   : > { %708 = vmatmul.bf16.gmra.mxu0 %v3980_v14  ;;  %1130 = vmatmul.bf16.vlgmr.msrb.gmra.mxu1 %v3985_v15  ;;  %v4059_v15 = vld [vmem:[%s5273_s6 + $0xc0] sm:$0xff] }
  0x5f   : > { %1746 = vmatpush.bf16.msra.mxu1 %v4070_v43  ;;  %1700 = vmatpush.bf16.msrb.mxu2 %v4059_v15 }
  0x60   : > { %4193 = vmatpush.bf16.msra.mxu3 %v4059_v15 }
  0x63   : > { %1747 = vmatpush.bf16.msra.mxu1 %v4069_v49 }
  0x67   : > { %1748 = vmatpush.bf16.msra.mxu1 %v4068_v61 }
  0x6e   : > { %713 = vmatmul.bf16.gmra.mxu0 %v3981_v16  ;;  %v4067_v16 = vld [vmem:[%s5273_s6 + $0x100] sm:$0xff] }
  0x6f   : > { %1749 = vmatpush.bf16.msra.mxu1 %v4067_v16 }
  0xab   : > { %v694_v23 = vpop.f32.mrf.mxu0  ;;  %v719_v24 = vpop.f32.mrf.mxu1 }
  0xac   : > { %v737_v27 = vmul.f32 %v4595_v21, %v694_v23  ;;  %v747_v29 = vmul.f32 %v4595_v21, %v719_v24 }
  0xae   : > { %v4610_v28 = vadd.f32 %v4600_v22, %v737_v27  ;;  %v4618_v31 = vadd.f32 %v4600_v22, %v747_v29 }
  0xb0   : > { %v772_v30 = vmin.f32 %v4610_v28, 20.0  ;;  %v782_v35 = vmin.f32 %v4618_v31, 20.0 }
  0xb2   : > { %v788_v32 = vmul.f32 1.442695, %v772_v30  ;;  %v808_v39 = vmul.f32 1.442695, %v782_v35 }
  0xb3   : > { %v696_v36 = vpop.f32.mrf.mxu0  ;;  %v721_v37 = vpop.f32.mrf.mxu1 }
  0xb4   : > { %4238 = vpow2.f32 %v788_v32  ;;  %v738_v38 = vmul.f32 %v4595_v21, %v696_v36  ;;  %v748_v45 = vmul.f32 %v4595_v21, %v721_v37 }
  0xb5   : > { %4240 = vpow2.f32 %v808_v39 }
  0xb6   : > { %v4632_v41 = vadd.f32 %v4600_v22, %v738_v38  ;;  %v4649_v51 = vadd.f32 %v4600_v22, %v748_v45 }
  0xb8   : > { %v773_v44 = vmin.f32 %v4632_v41, 20.0  ;;  %v783_v57 = vmin.f32 %v4649_v51, 20.0 }
  0xba   : > { %v4239_v46 = vpop.eup %4238  ;;  %v790_v47 = vmul.f32 1.442695, %v773_v44  ;;  %v810_v63 = vmul.f32 1.442695, %v783_v57 }
  0xbb   : > { %v820_v50 = vadd.f32 1.0, %v4239_v46  ;;  %v699_v52 = vpop.f32.mrf.mxu0  ;;  %v724_v53 = vpop.f32.mrf.mxu1 }
  0xbc   : > { %4242 = vpow2.f32 %v790_v47  ;;  %v739_v54 = vmul.f32 %v4595_v21, %v699_v52  ;;  %v4241_v55 = vpop.eup %4240  ;;  %v749_v2 = vmul.f32 %v4595_v21, %v724_v53 }
  0xbd   : > { %v836_v56 = vmul.f32 %v820_v50, %v820_v50  ;;  %v830_v58 = vadd.f32 1.0, %v4241_v55 }
  0xbe   : > { %v4654_v59 = vadd.f32 %v4600_v22, %v739_v54  ;;  %v4665_v9 = vadd.f32 %v4600_v22, %v749_v2 }
  0xbf   : > { %v884_v62 = vadd.f32 1.0, %v836_v56  ;;  %v846_v0 = vmul.f32 %v830_v58, %v830_v58  ;;  %v3249_v4 = vadd.f32 -1.0, %v836_v56 }
  0xc0   : > { %v774_v1 = vmin.f32 %v4654_v59, 20.0  ;;  %v784_v14 = vmin.f32 %v4665_v9, 20.0 }
  0xc1   : > { %4244 = vrcp.f32 %v884_v62  ;;  %v894_v5 = vadd.f32 1.0, %v846_v0  ;;  %v3259_v7 = vadd.f32 -1.0, %v846_v0  ;;  %v868_v17 = vmul.f32 %v3249_v4, %v4610_v28 }
  0xc2   : > { %v4243_v3 = vpop.eup %4242  ;;  %4246 = vpow2.f32 %v810_v63  ;;  %v792_v6 = vmul.f32 1.442695, %v774_v1  ;;  %v812_v24 = vmul.f32 1.442695, %v784_v14 }
  0xc3   : > { %v821_v8 = vadd.f32 1.0, %v4243_v3  ;;  %v701_v10 = vpop.f32.mrf.mxu0  ;;  %v726_v11 = vpop.f32.mrf.mxu1  ;;  %4248 = vrcp.f32 %v894_v5  ;;  %v878_v20 = vmul.f32 %v3259_v7, %v4618_v31 }
  0xc4   : > { %v740_v12 = vmul.f32 %v4595_v21, %v701_v10  ;;  %4250 = vpow2.f32 %v792_v6  ;;  %v750_v36 = vmul.f32 %v4595_v21, %v726_v11 }
  0xc5   : > { %v837_v13 = vmul.f32 %v821_v8, %v821_v8 }
  0xc6   : > { %v4677_v18 = vadd.f32 %v4600_v22, %v740_v12  ;;  %v4689_v49 = vadd.f32 %v4600_v22, %v750_v36 }
  0xc7   : > { %v4245_v19 = vpop.eup %4244  ;;  %v885_v23 = vadd.f32 1.0, %v837_v13  ;;  %v3250_v29 = vadd.f32 -1.0, %v837_v13 }
  0xc8   : > { %v4247_v25 = vpop.eup %4246  ;;  %v916_v26 = vmul.f32 %v4245_v19, %v868_v17  ;;  %v775_v27 = vmin.f32 %v4677_v18, 20.0  ;;  %v785_v60 = vmin.f32 %v4689_v49, 20.0 }
  0xc9   : > { %4252 = vrcp.f32 %v885_v23  ;;  %v831_v30 = vadd.f32 1.0, %v4247_v25  ;;  %v4249_v28 = vpop.eup %4248  ;;  %v869_v45 = vmul.f32 %v3250_v29, %v4632_v41 }
  0xca   : > { %v949_v32 = vrot.slane %v916_v26, 7  ;;  %4254 = vpow2.f32 %v812_v24  ;;  %v794_v33 = vmul.f32 1.442695, %v775_v27  ;;  %v4251_v34 = vpop.eup %4250  ;;  %v4681_v35 = vmul.f32 %v4249_v28, %v878_v20 }
  0xcb   : > { %v847_v31 = vmul.f32 %v831_v30, %v831_v30  ;;  %v704_v37 = vpop.f32.mrf.mxu0  ;;  %v729_v38 = vpop.f32.mrf.mxu1  ;;  %v822_v40 = vadd.f32 1.0, %v4251_v34  ;;  %v998_v55 = vrot.slane %v916_v26, 1  ;;  %v814_v5 = vmul.f32 1.442695, %v785_v60 }
  0xcc   : > { %v989_v39 = vsel %vm948_vm0, 0.0, %v949_v32  ;;  %4256 = vpow2.f32 %v794_v33  ;;  %v741_v42 = vmul.f32 %v4595_v21, %v704_v37  ;;  %v964_v44 = vrot.slane %v4681_v35, 7 }
  0xcd   : > { %v1046_v43 = vpack.c.bf16 %v916_v26, %v989_v39  ;;  %v3260_v46 = vadd.f32 -1.0, %v847_v31  ;;  %v895_v47 = vadd.f32 1.0, %v847_v31  ;;  %v838_v48 = vmul.f32 %v822_v40, %v822_v40 }
  0xce   : > { %v4692_v50 = vadd.f32 %v4600_v22, %v741_v42  ;;  %v994_v53 = vsel %vm948_vm0, 0.0, %v964_v44  ;;  %v751_v20 = vmul.f32 %v4595_v21, %v729_v38  ;;  %v1013_v23 = vrot.slane %v4681_v35, 1 }
  0xcf   : > { %v4253_v52 = vpop.eup %4252  ;;  %1079 = vst [vmem:[#allocation2 + $0x18] sm:$0xff] %v1046_v43  ;;  %v1066_v41 = vpack.c.bf16 %v4681_v35, %v994_v53  ;;  %4258 = vrcp.f32 %v895_v47  ;;  %v886_v57 = vadd.f32 1.0, %v838_v48  ;;  %v879_v1 = vmul.f32 %v3260_v46, %v4649_v51 }
  0xd0   : > { %v4255_v54 = vpop.eup %4254  ;;  %v917_v56 = vmul.f32 %v4253_v52, %v869_v45  ;;  %v776_v61 = vmin.f32 %v4692_v50, 20.0  ;;  %v3251_v2 = vadd.f32 -1.0, %v838_v48  ;;  %v4709_v29 = vadd.f32 %v4600_v22, %v751_v20 }
  0xd1   : > { %v832_v58 = vadd.f32 1.0, %v4255_v54  ;;  %1099 = vst [vmem:[#allocation2 + $0x90] sm:$0xff] %v1066_v41  ;;  %4260 = vrcp.f32 %v886_v57 }
  0xd2   : > { %v4257_v62 = vpop.eup %4256  ;;  %v950_v63 = vrot.slane %v917_v56, 7  ;;  %v999_v0 = vrot.slane %v917_v56, 1  ;;  %v796_v11 = vmul.f32 1.442695, %v776_v61  ;;  %4262 = vpow2.f32 %v814_v5  ;;  %v4082_v5 = vld [vmem:[%s5273_s6 + $0x178] sm:$0xff] }
  0xd3   : > { %v848_v3 = vmul.f32 %v832_v58, %v832_v58  ;;  %v823_v4 = vadd.f32 1.0, %v4257_v62  ;;  %v706_v6 = vpop.f32.mrf.mxu0  ;;  %v731_v16 = vpop.f32.mrf.mxu1  ;;  %v870_v26 = vmul.f32 %v3251_v2, %v4654_v59  ;;  %v786_v37 = vmin.f32 %v4709_v29, 20.0  ;;  %1791 = vmatpush.bf16.msra.mxu2 %v4082_v5 }
  0xd4   : > { %v951_v7 = vsel %vm948_vm0, %v949_v32, %v950_v63  ;;  %v1000_v8 = vsel %vm997_vm1, %v998_v55, %v999_v0  ;;  %v1038_v10 = vsel %vm997_vm1, %v999_v0, 0.0  ;;  %4264 = vpow2.f32 %v796_v11 }
  0xd5   : > { %v1047_v12 = vpack.c.bf16 %v1000_v8, %v1000_v8  ;;  %v1048_v13 = vpack.c.bf16 %v917_v56, %v951_v7  ;;  %v1049_v14 = vpack.c.bf16 %v1038_v10, %v1038_v10  ;;  %v3261_v15 = vadd.f32 -1.0, %v848_v3  ;;  %v4259_v17 = vpop.eup %4258 }
  0xd6   : > { %v896_v51 = vadd.f32 1.0, %v848_v3  ;;  %v839_v19 = vmul.f32 %v823_v4, %v823_v4  ;;  %v927_v24 = vmul.f32 %v4259_v17, %v879_v1  ;;  %v742_v25 = vmul.f32 %v4595_v21, %v706_v6 }
  0xd7   : > { %1080 = vst [vmem:[#allocation2 + $0x20] sm:$0xf] %v1047_v12  ;;  %v4261_v30 = vpop.eup %4260  ;;  %v880_v36 = vmul.f32 %v3261_v15, %v4665_v9  ;;  %v816_v54 = vmul.f32 1.442695, %v786_v37  ;;  %v752_v56 = vmul.f32 %v4595_v21, %v731_v16  ;;  %v4018_v15 = vld [vmem:[%s5273_s6 + $0x38] sm:$0xff] }
  0xd8   : > { %1081 = vst [vmem:[#allocation2 + $0x24] sm:$0xff] %v1048_v13  ;;  %4266 = vrcp.f32 %v896_v51  ;;  %v887_v27 = vadd.f32 1.0, %v839_v19  ;;  %v965_v28 = vrot.slane %v927_v24, 7  ;;  %v1014_v32 = vrot.slane %v927_v24, 1  ;;  %v4263_v43 = vpop.eup %4262  ;;  %2112 = vmatpush.bf16.msrb.mxu0 %v4018_v15 }
  0xd9   : > { %1082 = vst [vmem:[#allocation2 + $0x2c] sm:$0xf] %v1049_v14  ;;  %v3252_v33 = vadd.f32 -1.0, %v839_v19  ;;  %v4712_v34 = vadd.f32 %v4600_v22, %v742_v25  ;;  %v918_v31 = vmul.f32 %v4261_v30, %v870_v26  ;;  %v833_v53 = vadd.f32 1.0, %v4263_v43  ;;  %v4081_v30 = vld [vmem:[%s5273_s6 + $0x170] sm:$0xff] }
  0xda   : > { %4268 = vrcp.f32 %v887_v27  ;;  %v966_v59 = vsel %vm948_vm0, %v964_v44, %v965_v28  ;;  %v1015_v38 = vsel %vm997_vm1, %v1013_v23, %v1014_v32  ;;  %v1043_v39 = vsel %vm997_vm1, %v1014_v32, 0.0  ;;  %v4265_v9 = vpop.eup %4264  ;;  %1792 = vmatpush.bf16.msra.mxu2 %v4081_v30 }
  0xdb   : > { %v777_v40 = vmin.f32 %v4712_v34, 20.0  ;;  %v709_v42 = vpop.f32.mrf.mxu0  ;;  %v1067_v45 = vpack.c.bf16 %v1015_v38, %v1015_v38  ;;  %v1068_v46 = vpack.c.bf16 %v927_v24, %v966_v59  ;;  %v1069_v47 = vpack.c.bf16 %v1043_v39, %v1043_v39  ;;  %v1131_v62 = vpop.f32.mrf.mxu1  ;;  %v4035_v39 = vld [vmem:[#allocation2 + $0x1c] sm:$0xf] }
  0xdc   : > { %v952_v48 = vrot.slane %v918_v31, 7  ;;  %v871_v52 = vmul.f32 %v3252_v33, %v4677_v18  ;;  %v824_v41 = vadd.f32 1.0, %v4265_v9  ;;  %v743_v57 = vmul.f32 %v4595_v21, %v709_v42 }
  0xdd   : > { %v798_v35 = vmul.f32 1.442695, %v777_v40  ;;  %1100 = vst [vmem:[#allocation2 + $0x98] sm:$0xf] %v1067_v45  ;;  %v849_v61 = vmul.f32 %v833_v53, %v833_v53  ;;  %4270 = vpow2.f32 %v816_v54  ;;  %v4729_v0 = vadd.f32 %v4600_v22, %v752_v56  ;;  %v4017_v40 = vld [vmem:[%s5273_s6 + $0x30] sm:$0xff]  ;;  %v4080_v53 = vld [vmem:[%s5273_s6 + $0x168] sm:$0xff] }
  0xde   : > { %v4267_v55 = vpop.eup %4266  ;;  %v990_v44 = vsel %vm948_vm0, 0.0, %v952_v48  ;;  %1101 = vst [vmem:[#allocation2 + $0x9c] sm:$0xff] %v1068_v46  ;;  %v840_v63 = vmul.f32 %v824_v41, %v824_v41  ;;  %v1001_v1 = vrot.slane %v918_v31, 1  ;;  %v4737_v10 = vadd.f32 %v4600_v22, %v743_v57  ;;  %2113 = vmatpush.bf16.msrb.mxu0 %v4017_v40  ;;  %1793 = vmatpush.bf16.msra.mxu2 %v4080_v53 }
  0xdf   : > { %v1050_v58 = vpack.c.bf16 %v918_v31, %v990_v44  ;;  %v4726_v60 = vmul.f32 %v4267_v55, %v880_v36  ;;  %1102 = vst [vmem:[#allocation2 + $0xa4] sm:$0xf] %v1069_v47  ;;  %4272 = vpow2.f32 %v798_v35  ;;  %v3262_v4 = vadd.f32 -1.0, %v849_v61  ;;  %v4036_v26 = vld [vmem:[#allocation2 + $0x20] sm:$0xf0] }
  0xe0   : > { %v4269_v18 = vpop.eup %4268  ;;  %v897_v6 = vadd.f32 1.0, %v849_v61  ;;  %v888_v7 = vadd.f32 1.0, %v840_v63  ;;  %v787_v8 = vmin.f32 %v4729_v0, 20.0  ;;  %v3253_v14 = vadd.f32 -1.0, %v840_v63  ;;  %v3329_v27 = vld [vmem:[#allocation2 + $0x24] sm:$0xf0] }
  0xe1   : > { %1083 = vst [vmem:[#allocation2 + $0x30] sm:$0xff] %v1050_v58  ;;  %v967_v2 = vrot.slane %v4726_v60, 7  ;;  %v919_v3 = vmul.f32 %v4269_v18, %v871_v52  ;;  %v881_v17 = vmul.f32 %v3262_v4, %v4689_v49  ;;  %v3327_v36 = vld [vmem:[#allocation2 + $0x18] sm:$0xf]  ;;  %v778_v59 = vmin.f32 %v4737_v10, 20.0 }
  0xe2   : > { %4274 = vrcp.f32 %v897_v6  ;;  %v818_v51 = vmul.f32 1.442695, %v787_v8  ;;  %v1136_v38 = vmul.f32 %v4595_v21, %v1131_v62  ;;  %v3328_v43 = vor.u32 %v4036_v26, %v3327_v36  ;;  %v4016_v62 = vld [vmem:[%s5273_s6 + $0x28] sm:$0xff]  ;;  %v4079_v6 = vld [vmem:[%s5273_s6 + $0x160] sm:$0xff]  ;;  %v4078_v26 = vld [vmem:[%s5273_s6 + $0x158] sm:$0xff] }
  0xe3   : > { %v995_v11 = vsel %vm948_vm0, 0.0, %v967_v2  ;;  %v953_v12 = vrot.slane %v919_v3, 7  ;;  %v1002_v13 = vrot.slane %v919_v3, 1  ;;  %v711_v19 = vpop.f32.mrf.mxu0  ;;  %v4271_v20 = vpop.eup %4270  ;;  %4276 = vrcp.f32 %v888_v7  ;;  %2114 = vmatpush.bf16.msrb.mxu0 %v4016_v62  ;;  %1794 = vmatpush.bf16.msra.mxu2 %v4079_v6 }
  0xe4   : > { %v1070_v16 = vpack.c.bf16 %v4726_v60, %v995_v11  ;;  %v834_v31 = vadd.f32 1.0, %v4271_v20  ;;  %4278 = vpow2.f32 %v818_v51  ;;  %v3332_v45 = vor.u32 %v4035_v39, %v3329_v27  ;;  %v1133_v52 = vpop.f32.mrf.mxu1  ;;  %1701 = vmatmul.bf16.vlgmr.msrb.gmra.mxu2 %v3328_v43  ;;  %v4015_v51 = vld [vmem:[%s5273_s6 + $0x20] sm:$0xff] }
  0xe5   : > { %v954_v23 = vsel %vm948_vm0, %v952_v48, %v953_v12  ;;  %v1003_v24 = vsel %vm997_vm1, %v1001_v1, %v1002_v13  ;;  %v1039_v25 = vsel %vm997_vm1, %v1002_v13, 0.0  ;;  %v4273_v28 = vpop.eup %4272  ;;  %v744_v46 = vmul.f32 %v4595_v21, %v711_v19 }
  0xe6   : > { %1103 = vst [vmem:[#allocation2 + $0xa8] sm:$0xff] %v1070_v16  ;;  %v1051_v49 = vpack.c.bf16 %v1003_v24, %v1003_v24  ;;  %v1052_v32 = vpack.c.bf16 %v919_v3, %v954_v23  ;;  %v1053_v33 = vpack.c.bf16 %v1039_v25, %v1039_v25  ;;  %v825_v37 = vadd.f32 1.0, %v4273_v28  ;;  %1750 = vmatmul.bf16.vlgmr.msra.gmra.mxu1 %v3332_v45 }
  0xe7   : > { %v850_v42 = vmul.f32 %v834_v31, %v834_v31  ;;  %v800_v48 = vmul.f32 1.442695, %v778_v59  ;;  %v4760_v9 = vadd.f32 %v4600_v22, %v1136_v38  ;;  %v1016_v35 = vrot.slane %v4726_v60, 1  ;;  %2115 = vmatpush.bf16.msrb.mxu0 %v4015_v51  ;;  %1795 = vmatpush.bf16.msra.mxu2 %v4078_v26  ;;  %v4012_v51 = vld [vmem:[%s5273_s6 + $0x8] sm:$0xff] }
  0xe8   : > { %1084 = vst [vmem:[#allocation2 + $0x38] sm:$0xf] %v1051_v49  ;;  %v841_v47 = vmul.f32 %v825_v37, %v825_v37  ;;  %v4275_v54 = vpop.eup %4274  ;;  %v872_v55 = vmul.f32 %v3253_v14, %v4692_v50  ;;  %v4768_v61 = vadd.f32 %v4600_v22, %v744_v46  ;;  %v1137_v63 = vmul.f32 %v4595_v21, %v1133_v52  ;;  %v3339_v38 = vld [vmem:[#allocation2 + $0x30] sm:$0xf] }
  0xe9   : > { %1085 = vst [vmem:[#allocation2 + $0x3c] sm:$0xff] %v1052_v32  ;;  %v3263_v44 = vadd.f32 -1.0, %v850_v42  ;;  %v898_v41 = vadd.f32 1.0, %v850_v42  ;;  %v4277_v56 = vpop.eup %4276  ;;  %v929_v57 = vmul.f32 %v4275_v54, %v881_v17  ;;  %4280 = vpow2.f32 %v800_v48  ;;  %v4077_v52 = vld [vmem:[%s5273_s6 + $0x150] sm:$0xff] }
  0xea   : > { %1086 = vst [vmem:[#allocation2 + $0x44] sm:$0xf] %v1053_v33  ;;  %v889_v58 = vadd.f32 1.0, %v841_v47  ;;  %v4773_v18 = vmul.f32 %v4277_v56, %v872_v55  ;;  %v1140_v50 = vmin.f32 %v4760_v9, 20.0  ;;  %v4279_v1 = vpop.eup %4278  ;;  %v3254_v5 = vadd.f32 -1.0, %v841_v47 }
  0xeb   : > { %4282 = vrcp.f32 %v898_v41  ;;  %v968_v3 = vrot.slane %v929_v57, 7  ;;  %v1017_v4 = vrot.slane %v929_v57, 1  ;;  %v882_v8 = vmul.f32 %v3263_v44, %v4709_v29  ;;  %v714_v13 = vpop.f32.mrf.mxu0  ;;  %v4038_v44 = vld [vmem:[#allocation2 + $0x34] sm:$0xf]  ;;  %1796 = vmatpush.bf16.msra.mxu2 %v4077_v52 }
  0xec   : > { %4284 = vrcp.f32 %v889_v58  ;;  %v955_v7 = vrot.slane %v4773_v18, 7  ;;  %v835_v11 = vadd.f32 1.0, %v4279_v1  ;;  %v1142_v12 = vmul.f32 1.442695, %v1140_v50  ;;  %v4013_v50 = vld [vmem:[%s5273_s6 + $0x10] sm:$0xff] }
  0xed   : > { %v969_v14 = vsel %vm948_vm0, %v967_v2, %v968_v3  ;;  %v1018_v15 = vsel %vm997_vm1, %v1016_v35, %v1017_v4  ;;  %v1044_v16 = vsel %vm997_vm1, %v1017_v4, 0.0  ;;  %v779_v17 = vmin.f32 %v4768_v61, 20.0 }
  0xee   : > { %v1071_v19 = vpack.c.bf16 %v1018_v15, %v1018_v15  ;;  %v1072_v29 = vpack.c.bf16 %v929_v57, %v969_v14  ;;  %v1073_v20 = vpack.c.bf16 %v1044_v16, %v1044_v16  ;;  %v991_v60 = vsel %vm948_vm0, 0.0, %v955_v7 }
  0xef   : > { %v4281_v23 = vpop.eup %4280  ;;  %v1054_v2 = vpack.c.bf16 %v4773_v18, %v991_v60  ;;  %v851_v24 = vmul.f32 %v835_v11, %v835_v11  ;;  %4286 = vpow2.f32 %v1142_v12  ;;  %v802_v25 = vmul.f32 1.442695, %v779_v17  ;;  %v4076_v12 = vld [vmem:[%s5273_s6 + $0x148] sm:$0xff] }
  0xf0   : > { %1104 = vst [vmem:[#allocation2 + $0xb0] sm:$0xf] %v1071_v19  ;;  %v873_v30 = vmul.f32 %v3254_v5, %v4712_v34  ;;  %v826_v28 = vadd.f32 1.0, %v4281_v23  ;;  %v4800_v49 = vadd.f32 %v4600_v22, %v1137_v63  ;;  %v745_v32 = vmul.f32 %v4595_v21, %v714_v13  ;;  %v4039_v33 = vld [vmem:[#allocation2 + $0x38] sm:$0xf0]  ;;  %1797 = vmatpush.bf16.msra.mxu2 %v4076_v12 }
  0xf1   : > { %v4283_v27 = vpop.eup %4282  ;;  %1105 = vst [vmem:[#allocation2 + $0xb4] sm:$0xff] %v1072_v29  ;;  %v3264_v37 = vadd.f32 -1.0, %v851_v24  ;;  %v899_v59 = vadd.f32 1.0, %v851_v24  ;;  %4288 = vpow2.f32 %v802_v25  ;;  %v4014_v34 = vld [vmem:[%s5273_s6 + $0x18] sm:$0xff]  ;;  %v3341_v45 = vld [vmem:[#allocation2 + $0x3c] sm:$0xf0]  ;;  %v3340_v48 = vor.u32 %v4039_v33, %v3339_v38 }
  0xf2   : > { %v4285_v31 = vpop.eup %4284  ;;  %v4803_v36 = vmul.f32 %v4283_v27, %v882_v8  ;;  %1106 = vst [vmem:[#allocation2 + $0xbc] sm:$0xf] %v1073_v20  ;;  %v842_v40 = vmul.f32 %v826_v28, %v826_v28  ;;  %v1141_v42 = vmin.f32 %v4800_v49, 20.0  ;;  %v4810_v43 = vadd.f32 %v4600_v22, %v745_v32  ;;  %2116 = vmatpush.bf16.msrb.mxu0 %v4014_v34 }
  0xf3   : > { %v921_v39 = vmul.f32 %v4285_v31, %v873_v30  ;;  %v1004_v46 = vrot.slane %v4773_v18, 1  ;;  %1087 = vst [vmem:[#allocation2 + $0x48] sm:$0xff] %v1054_v2  ;;  %4290 = vrcp.f32 %v899_v59  ;;  %v883_v35 = vmul.f32 %v3264_v37, %v4729_v0  ;;  %v716_v4 = vpop.f32.mrf.mxu0  ;;  %v4011_v30 = vld [vmem:[%s5273_s6] sm:$0xff] }
  0xf4   : > { %v970_v47 = vrot.slane %v4803_v36, 7  ;;  %v890_v55 = vadd.f32 1.0, %v842_v40  ;;  %v1144_v57 = vmul.f32 1.442695, %v1141_v42  ;;  %v780_v58 = vmin.f32 %v4810_v43, 20.0  ;;  %1706 = vmatmul.bf16.gmra.mxu2 %v3340_v48 }
  0xf5   : > { %v956_v53 = vrot.slane %v921_v39, 7  ;;  %v1005_v54 = vrot.slane %v921_v39, 1  ;;  %v4287_v41 = vpop.eup %4286  ;;  %v3344_v62 = vor.u32 %v4038_v44, %v3341_v45  ;;  %v1019_v15 = vrot.slane %v4803_v36, 1 }
  0xf6   : > { %v996_v56 = vsel %vm948_vm0, 0.0, %v970_v47  ;;  %2117 = vmatpush.bf16.msrb.mxu0 %v4013_v50  ;;  %4292 = vrcp.f32 %v890_v55  ;;  %v1146_v18 = vadd.f32 1.0, %v4287_v41  ;;  %v3255_v16 = vadd.f32 -1.0, %v842_v40 }
  0xf7   : > { %v1074_v63 = vpack.c.bf16 %v4803_v36, %v996_v56  ;;  %v957_v0 = vsel %vm948_vm0, %v955_v7, %v956_v53  ;;  %v1006_v1 = vsel %vm997_vm1, %v1004_v46, %v1005_v54  ;;  %v1040_v3 = vsel %vm997_vm1, %v1005_v54, 0.0  ;;  %v4289_v5 = vpop.eup %4288  ;;  %1755 = vmatmul.bf16.gmra.mxu1 %v3344_v62  ;;  %v4025_v56 = vld [vmem:[%s5273_s6 + $0x70] sm:$0xff] }
  0xf8   : > { %v1055_v6 = vpack.c.bf16 %v1006_v1, %v1006_v1  ;;  %v1056_v8 = vpack.c.bf16 %v921_v39, %v957_v0  ;;  %v1057_v11 = vpack.c.bf16 %v1040_v3, %v1040_v3  ;;  %v827_v13 = vadd.f32 1.0, %v4289_v5 }
  0xf9   : > { %1107 = vst [vmem:[#allocation2 + $0xc0] sm:$0xff] %v1074_v63  ;;  %v804_v7 = vmul.f32 1.442695, %v780_v58  ;;  %v4291_v14 = vpop.eup %4290  ;;  %4294 = vpow2.f32 %v1144_v57  ;;  %v746_v17 = vmul.f32 %v4595_v21, %v716_v4  ;;  %v1148_v29 = vmul.f32 %v1146_v18, %v1146_v18  ;;  %v4075_v21 = vld [vmem:[%s5273_s6 + $0x140] sm:$0xff] }
  0xfa   : > { %1088 = vst [vmem:[#allocation2 + $0x50] sm:$0xf] %v1055_v6  ;;  %v931_v19 = vmul.f32 %v4291_v14, %v883_v35  ;;  %v843_v20 = vmul.f32 %v827_v13, %v827_v13  ;;  %2118 = vmatpush.bf16.msrb.mxu0 %v4012_v51  ;;  %v874_v25 = vmul.f32 %v3255_v16, %v4737_v10  ;;  %v3351_v46 = vld [vmem:[#allocation2 + $0x48] sm:$0xf]  ;;  %v4041_v41 = vld [vmem:[#allocation2 + $0x4c] sm:$0xf]  ;;  %v1160_v1 = vstv %s1115_s13 }
  0xfb   : > { %1089 = vst [vmem:[#allocation2 + $0x54] sm:$0xff] %v1056_v8  ;;  %4296 = vpow2.f32 %v804_v7  ;;  %v4841_v60 = vadd.f32 %v4600_v22, %v746_v17  ;;  %v1154_v24 = vadd.f32 1.0, %v1148_v29  ;;  %1798 = vmatpush.bf16.msra.mxu2 %v4075_v21  ;;  %v3269_v10 = vadd.f32 -1.0, %v1148_v29 }
  0xfc   : > { %1090 = vst [vmem:[#allocation2 + $0x5c] sm:$0xf] %v1057_v11  ;;  %v971_v23 = vrot.slane %v931_v19, 7  ;;  %v1020_v2 = vrot.slane %v931_v19, 1  ;;  %v891_v26 = vadd.f32 1.0, %v843_v20  ;;  %v4293_v22 = vpop.eup %4292  ;;  %v3256_v48 = vadd.f32 -1.0, %v843_v20 }
  0xfd   : > { %v781_v27 = vmin.f32 %v4841_v60, 20.0  ;;  %v922_v34 = vmul.f32 %v4293_v22, %v874_v25  ;;  %4298 = vrcp.f32 %v1154_v24  ;;  %v1152_v55 = vmul.f32 %v3269_v10, %v4760_v9 }
  0xfe   : > { %v972_v28 = vsel %vm948_vm0, %v970_v47, %v971_v23  ;;  %v1021_v32 = vsel %vm997_vm1, %v1019_v15, %v1020_v2  ;;  %v1045_v33 = vsel %vm997_vm1, %v1020_v2, 0.0  ;;  %2119 = vmatpush.bf16.msrb.mxu0 %v4011_v30  ;;  %4300 = vrcp.f32 %v891_v26  ;;  %v4026_v47 = vld [vmem:[%s5273_s6 + $0x78] sm:$0xff] }
  0xff   : > { %v4295_v31 = vpop.eup %4294  ;;  %v1075_v37 = vpack.c.bf16 %v1021_v32, %v1021_v32  ;;  %v1076_v59 = vpack.c.bf16 %v931_v19, %v972_v28  ;;  %v1077_v38 = vpack.c.bf16 %v1045_v33, %v1045_v33  ;;  %v806_v40 = vmul.f32 1.442695, %v781_v27  ;;  %2161 = vmatpush.bf16.msrb.mxu3 %v4026_v47 }
 0x100   : > { %v1147_v36 = vadd.f32 1.0, %v4295_v31  ;;  %v958_v42 = vrot.slane %v922_v34, 7  ;;  %v875_v3 = vmul.f32 %v3256_v48, %v4768_v61  ;;  %v1007_v13 = vrot.slane %v922_v34, 1 }
 0x101   : > { %v4297_v39 = vpop.eup %4296  ;;  %1108 = vst [vmem:[#allocation2 + $0xc8] sm:$0xf] %v1075_v37  ;;  %4302 = vpow2.f32 %v806_v40  ;;  %v4024_v37 = vld [vmem:[%s5273_s6 + $0x68] sm:$0xff] }
 0x102   : > { %v828_v45 = vadd.f32 1.0, %v4297_v39  ;;  %1109 = vst [vmem:[#allocation2 + $0xcc] sm:$0xff] %v1076_v59  ;;  %v1149_v52 = vmul.f32 %v1147_v36, %v1147_v36  ;;  %v4042_v53 = vld [vmem:[#allocation2 + $0x50] sm:$0xf0]  ;;  %v3353_v54 = vld [vmem:[#allocation2 + $0x54] sm:$0xf0] }
 0x103   : > { %1110 = vst [vmem:[#allocation2 + $0xd4] sm:$0xf] %v1077_v38  ;;  %v992_v35 = vsel %vm948_vm0, 0.0, %v958_v42  ;;  %v3352_v62 = vor.u32 %v4042_v53, %v3351_v46  ;;  %v3356_v50 = vor.u32 %v4041_v41, %v3353_v54  ;;  %v4299_v0 = vpop.eup %4298  ;;  %2162 = vmatpush.bf16.msrb.mxu3 %v4025_v56  ;;  %v3335_v38 = vld [vmem:[#allocation2 + $0x20] sm:$0xf] }
 0x104   : > { %v844_v44 = vmul.f32 %v828_v45, %v828_v45  ;;  %v1058_v57 = vpack.c.bf16 %v922_v34, %v992_v35  ;;  %v1155_v58 = vadd.f32 1.0, %v1149_v52  ;;  %v3270_v4 = vadd.f32 -1.0, %v1149_v52  ;;  %v4301_v9 = vpop.eup %4300  ;;  %v4037_v34 = vld [vmem:[#allocation2 + $0x28] sm:$0xf0] }
 0x105   : > { %v1158_v5 = vmul.f32 %v4299_v0, %v1152_v55  ;;  %v923_v8 = vmul.f32 %v4301_v9, %v875_v3  ;;  %1711 = vmatmul.bf16.gmra.mxu2 %v3352_v62  ;;  %v3336_v52 = vor.u32 %v4037_v34, %v3335_v38 }
 0x106   : > { %v892_v63 = vadd.f32 1.0, %v844_v44  ;;  %1091 = vst [vmem:[#allocation2 + $0x60] sm:$0xff] %v1058_v57  ;;  %4304 = vrcp.f32 %v1155_v58  ;;  %v3257_v11 = vadd.f32 -1.0, %v844_v44  ;;  %v1153_v15 = vmul.f32 %v3270_v4, %v4800_v49 }
 0x107   : > { %v4303_v6 = vpop.eup %4302  ;;  %1760 = vmatmul.bf16.gmra.mxu1 %v3356_v50  ;;  %v1161_v12 = vmul.f32 %v1160_v1, %v1158_v5  ;;  %v959_v7 = vrot.slane %v923_v8, 7  ;;  %v1008_v14 = vrot.slane %v923_v8, 1  ;;  %2163 = vmatpush.bf16.msrb.mxu3 %v4024_v37 }
 0x108   : > { %4306 = vrcp.f32 %v892_v63  ;;  %v829_v18 = vadd.f32 1.0, %v4303_v6  ;;  %v876_v20 = vmul.f32 %v3257_v11, %v4810_v43  ;;  %v3347_v11 = vld [vmem:[#allocation2 + $0x38] sm:$0xf] }
 0x109   : > { %v1165_v16 = vrot.slane %v1161_v12, 7  ;;  %v960_v51 = vsel %vm948_vm0, %v958_v42, %v959_v7  ;;  %v1009_v19 = vsel %vm997_vm1, %v1007_v13, %v1008_v14  ;;  %v1041_v29 = vsel %vm997_vm1, %v1008_v14, 0.0  ;;  %v4023_v42 = vld [vmem:[%s5273_s6 + $0x60] sm:$0xff] }
 0x10a   : > { %v845_v61 = vmul.f32 %v829_v18, %v829_v18  ;;  %v1059_v2 = vpack.c.bf16 %v1009_v19, %v1009_v19  ;;  %v1060_v24 = vpack.c.bf16 %v923_v8, %v960_v51  ;;  %v1061_v26 = vpack.c.bf16 %v1041_v29, %v1041_v29  ;;  %v4022_v8 = vld [vmem:[%s5273_s6 + $0x58] sm:$0xff]  ;;  %v3991_v51 = vld [vmem:[#allocation2 + $0x20] sm:$0xf0] }
 0x10b   : > { %v1170_v23 = vsel %vm948_vm0, 0.0, %v1165_v16  ;;  %v1171_v22 = vrot.slane %v1161_v12, 1  ;;  %2164 = vmatpush.bf16.msrb.mxu3 %v4023_v42  ;;  %v3531_v19 = vld [vmem:[#allocation2 + $0x18] sm:$0xf]  ;;  %v4383_v42 = vld [vmem:[%s5272_s5] ss:$0 sm:$0xff] }
 0x10c   : > { %v4305_v17 = vpop.eup %4304  ;;  %v1177_v25 = vpack.c.bf16 %v1161_v12, %v1170_v23  ;;  %1092 = vst [vmem:[#allocation2 + $0x68] sm:$0xf] %v1059_v2  ;;  %v893_v30 = vadd.f32 1.0, %v845_v61  ;;  %v3258_v33 = vadd.f32 -1.0, %v845_v61  ;;  %v4040_v12 = vld [vmem:[#allocation2 + $0x40] sm:$0xf0]  ;;  %v3532_v29 = vor.u32 %v3991_v51, %v3531_v19 }
 0x10d   : > { %v1159_v27 = vmul.f32 %v4305_v17, %v1153_v15  ;;  %1093 = vst [vmem:[#allocation2 + $0x6c] sm:$0xff] %v1060_v24  ;;  %v3363_v54 = vld [vmem:[#allocation2 + $0x60] sm:$0xf]  ;;  %v4044_v35 = vld [vmem:[#allocation2 + $0x64] sm:$0xf]  ;;  %v3348_v13 = vor.u32 %v4040_v12, %v3347_v11  ;;  %v4034_v17 = vld [vmem:[%s5273_s6 + $0xb8] sm:$0xff] }
 0x10e   : > { %v4307_v21 = vpop.eup %4306  ;;  %1181 = vst [vmem:[#allocation2] sm:$0xff] %v1177_v25  ;;  %4308 = vrcp.f32 %v893_v30  ;;  %v877_v48 = vmul.f32 %v3258_v33, %v4841_v60  ;;  %2210 = vmatpush.bf16.msrb.mxu1 %v4034_v17  ;;  %v3359_v23 = vld [vmem:[#allocation2 + $0x50] sm:$0xf]  ;;  %v4043_v2 = vld [vmem:[#allocation2 + $0x58] sm:$0xf0]  ;;  %v4032_v24 = vld [vmem:[%s5273_s6 + $0xa8] sm:$0xff] }
 0x10f   : > { %v924_v49 = vmul.f32 %v4307_v21, %v876_v20  ;;  %v1162_v28 = vmul.f32 %v1160_v1, %v1159_v27  ;;  %1094 = vst [vmem:[#allocation2 + $0x74] sm:$0xf] %v1061_v26  ;;  %2165 = vmatpush.bf16.msrb.mxu3 %v4022_v8  ;;  %v4021_v20 = vld [vmem:[%s5273_s6 + $0x50] sm:$0xff]  ;;  %v4020_v26 = vld [vmem:[%s5273_s6 + $0x48] sm:$0xff]  ;;  %v4051_v27 = vld [vmem:[#allocation2 + $0x98] sm:$0xf0] }
 0x110   : > { %v4033_v21 = vld [vmem:[%s5273_s6 + $0xb0] sm:$0xff]  ;;  %v3389_v30 = vld [vmem:[#allocation2 + $0x9c] sm:$0xf0]  ;;  %v4122_v12 = vld [vmem:[%s5273_s6 + $0x1f8] sm:$0xff] }
 0x111   : > { %v961_v32 = vrot.slane %v924_v49, 7  ;;  %v1166_v43 = vrot.slane %v1162_v28, 7  ;;  %v1172_v10 = vrot.slane %v1162_v28, 1  ;;  %v1010_v58 = vrot.slane %v924_v49, 1  ;;  %v3387_v25 = vld [vmem:[#allocation2 + $0x90] sm:$0xf]  ;;  %2662 = vmatpush.bf16.msra.mxu0 %v4122_v12 }
 0x112   : > { %2211 = vmatpush.bf16.msrb.mxu1 %v4033_v21 }
 0x113   : > { %v993_v31 = vsel %vm948_vm0, 0.0, %v961_v32  ;;  %v1167_v39 = vsel %vm948_vm0, %v1165_v16, %v1166_v43  ;;  %v1173_v36 = vsel %vm997_vm1, %v1171_v22, %v1172_v10  ;;  %v1176_v40 = vsel %vm997_vm1, %v1172_v10, 0.0  ;;  %2166 = vmatpush.bf16.msrb.mxu3 %v4021_v20  ;;  %v4030_v43 = vld [vmem:[%s5273_s6 + $0x98] sm:$0xff]  ;;  %v3371_v38 = vld [vmem:[#allocation2 + $0x68] sm:$0xf] }
 0x114   : > { %v1062_v59 = vpack.c.bf16 %v924_v49, %v993_v31  ;;  %v1178_v45 = vpack.c.bf16 %v1173_v36, %v1173_v36  ;;  %v1179_v46 = vpack.c.bf16 %v1162_v28, %v1167_v39  ;;  %v1180_v47 = vpack.c.bf16 %v1176_v40, %v1176_v40  ;;  %v4309_v53 = vpop.eup %4308  ;;  %v4045_v44 = vld [vmem:[#allocation2 + $0x68] sm:$0xf0]  ;;  %v3365_v41 = vld [vmem:[#allocation2 + $0x6c] sm:$0xf0]  ;;  %v4050_v49 = vld [vmem:[#allocation2 + $0x94] sm:$0xf] }
 0x115   : > { %v925_v55 = vmul.f32 %v4309_v53, %v877_v48  ;;  %1799 = vmatmul.bf16.vlgmr.msra.gmra.mxu2 %v3336_v52  ;;  %v3364_v56 = vor.u32 %v4045_v44, %v3363_v54  ;;  %v3368_v57 = vor.u32 %v4044_v35, %v3365_v41  ;;  %v3519_v9 = vld [vmem:[#allocation2] sm:$0xf]  ;;  %v3360_v22 = vor.u32 %v4043_v2, %v3359_v23  ;;  %v3994_v10 = vld [vmem:[#allocation2 + $0x38] sm:$0xf0]  ;;  %v3543_v31 = vld [vmem:[#allocation2 + $0x30] sm:$0xf] }
 0x116   : > { %1095 = vst [vmem:[#allocation2 + $0x78] sm:$0xff] %v1062_v59  ;;  %2212 = vmatpush.bf16.msrb.mxu1 %v4032_v24  ;;  %v4031_v28 = vld [vmem:[%s5273_s6 + $0xa0] sm:$0xff]  ;;  %v3392_v33 = vor.u32 %v4050_v49, %v3389_v30  ;;  %v3544_v37 = vor.u32 %v3994_v10, %v3543_v31  ;;  %v1205_v59 = vpop.f32.mrf.mxu2  ;;  %v4046_v34 = vld [vmem:[#allocation2 + $0x70] sm:$0xf0]  ;;  %v3399_v40 = vld [vmem:[#allocation2 + $0xa8] sm:$0xf] }
 0x117   : > { %1182 = vst [vmem:[#allocation2 + $0x8] sm:$0xf] %v1178_v45  ;;  %v962_v62 = vrot.slane %v925_v55, 7  ;;  %v1011_v50 = vrot.slane %v925_v55, 1  ;;  %1716 = vmatmul.bf16.vlgmr.msra.gmra.mxu3 %v3364_v56  ;;  %1765 = vmatmul.bf16.gmra.mxu1 %v3368_v57  ;;  %v4382_v39 = vld [vmem:[%s5271_s4] ss:$0 sm:$0xff]  ;;  %v3372_v52 = vor.u32 %v4046_v34, %v3371_v38 }
 0x118   : > { %1183 = vst [vmem:[#allocation2 + $0xc] sm:$0xff] %v1179_v46  ;;  %2167 = vmatpush.bf16.msrb.mxu3 %v4020_v26  ;;  %v1210_v36 = vmul.f32 %v4382_v39, %v1205_v59  ;;  %v4054_v46 = vld [vmem:[#allocation2 + $0xb0] sm:$0xf0]  ;;  %v3401_v48 = vld [vmem:[#allocation2 + $0xb4] sm:$0xf0]  ;;  %v4019_v35 = vld [vmem:[%s5273_s6 + $0x40] sm:$0xff] }
 0x119   : > { %1184 = vst [vmem:[#allocation2 + $0x14] sm:$0xf] %v1180_v47  ;;  %v963_v60 = vsel %vm948_vm0, %v961_v32, %v962_v62  ;;  %v1012_v63 = vsel %vm997_vm1, %v1010_v58, %v1011_v50  ;;  %v1042_v0 = vsel %vm997_vm1, %v1011_v50, 0.0  ;;  %v3388_v32 = vor.u32 %v4051_v27, %v3387_v25  ;;  %v4053_v47 = vld [vmem:[#allocation2 + $0xac] sm:$0xf]  ;;  %v4029_v54 = vld [vmem:[%s5273_s6 + $0x90] sm:$0xff] }
 0x11a   : > { %v1063_v1 = vpack.c.bf16 %v1012_v63, %v1012_v63  ;;  %v1064_v3 = vpack.c.bf16 %v925_v55, %v963_v60  ;;  %v1065_v4 = vpack.c.bf16 %v1042_v0, %v1042_v0  ;;  %2213 = vmatpush.bf16.msrb.mxu1 %v4031_v28  ;;  %v1212_v45 = vadd.f32 %v4383_v42, %v1210_v36  ;;  %v4028_v56 = vld [vmem:[%s5273_s6 + $0x88] sm:$0xff]  ;;  %v3997_v62 = vld [vmem:[#allocation2 + $0x50] sm:$0xf0]  ;;  %v3567_v30 = vld [vmem:[#allocation2 + $0x60] sm:$0xf] }
 0x11b   : > { %v3400_v55 = vor.u32 %v4054_v46, %v3399_v40  ;;  %v3404_v44 = vor.u32 %v4053_v47, %v3401_v48  ;;  %v3555_v60 = vld [vmem:[#allocation2 + $0x48] sm:$0xf]  ;;  %v4129_v2 = vld [vmem:[%s5273_s6 + $0x230] sm:$0xff]  ;;  %v4000_v25 = vld [vmem:[#allocation2 + $0x68] sm:$0xf0]  ;;  %v1234_v27 = vstv %s1189_s30  ;;  %s5280_s30 = sshll.u32 %s4546_s24, 2 }
 0x11c   : > { %1096 = vst [vmem:[#allocation2 + $0x80] sm:$0xf] %v1063_v1  ;;  %v1214_v53 = vmin.f32 %v1212_v45, 20.0  ;;  %2168 = vmatpush.bf16.msrb.mxu3 %v4019_v35  ;;  %v3556_v0 = vor.u32 %v3997_v62, %v3555_v60  ;;  %v4112_v10 = vld [vmem:[%s5273_s6 + $0x1a8] sm:$0xff]  ;;  %v3395_v59 = vld [vmem:[#allocation2 + $0x98] sm:$0xf]  ;;  %s5175_s28 = scalar_lea.vmem %s5278_s11, %s5280_s30 }
 0x11d   : > { %1097 = vst [vmem:[#allocation2 + $0x84] sm:$0xff] %v1064_v3  ;;  %v3375_v18 = vld [vmem:[#allocation2 + $0x78] sm:$0xf]  ;;  %v4047_v14 = vld [vmem:[#allocation2 + $0x7c] sm:$0xf]  ;;  %v4120_v34 = vld [vmem:[%s5273_s6 + $0x1e8] sm:$0xff] }
 0x11e   : > { %1098 = vst [vmem:[#allocation2 + $0x8c] sm:$0xf] %v1065_v4  ;;  %2214 = vmatpush.bf16.msrb.mxu1 %v4030_v43  ;;  %v1216_v41 = vmul.f32 1.442695, %v1214_v53  ;;  %v1207_v57 = vpop.f32.mrf.mxu2  ;;  %v4121_v43 = vld [vmem:[%s5273_s6 + $0x1f0] sm:$0xff]  ;;  %v4119_v35 = vld [vmem:[%s5273_s6 + $0x1e0] sm:$0xff] }
 0x11f   : > { %v3988_v5 = vld [vmem:[#allocation2 + $0x8] sm:$0xf0]  ;;  %v1211_v58 = vmul.f32 %v4382_v39, %v1207_v57  ;;  %v4052_v38 = vld [vmem:[#allocation2 + $0xa0] sm:$0xf0]  ;;  %2663 = vmatpush.bf16.msra.mxu0 %v4121_v43  ;;  %v3521_v48 = vld [vmem:[#allocation2 + $0xc] sm:$0xf0] }
 0x120   : > { %v3520_v6 = vor.u32 %v3988_v5, %v3519_v9  ;;  %4310 = vpow2.f32 %v1216_v41  ;;  %v4027_v9 = vld [vmem:[%s5273_s6 + $0x80] sm:$0xff]  ;;  %v4114_v5 = vld [vmem:[%s5273_s6 + $0x1b8] sm:$0xff]  ;;  %v3396_v47 = vor.u32 %v4052_v38, %v3395_v59  ;;  %v3989_v53 = vld [vmem:[#allocation2 + $0x10] sm:$0xf0] }
 0x121   : > { %v1213_v50 = vadd.f32 %v4383_v42, %v1211_v58  ;;  %2613 = vmatpush.bf16.msrb.mxu2 %v4114_v5  ;;  %v3987_v40 = vld [vmem:[#allocation2 + $0x4] sm:$0xf]  ;;  %v4110_v60 = vld [vmem:[%s5273_s6 + $0x198] sm:$0xff] }
 0x122   : > { %2120 = vmatmul.bf16.vlgmr.msrb.gmra.mxu0 %v3520_v6  ;;  %2215 = vmatpush.bf16.msrb.mxu1 %v4029_v54  ;;  %v4130_v6 = vld [vmem:[%s5273_s6 + $0x238] sm:$0xff]  ;;  %v4111_v42 = vld [vmem:[%s5273_s6 + $0x1a0] sm:$0xff]  ;;  %v3524_v41 = vor.u32 %v3987_v40, %v3521_v48 }
 0x123   : > { %v1215_v63 = vmin.f32 %v1213_v50, 20.0  ;;  %v3383_v8 = vld [vmem:[#allocation2 + $0x80] sm:$0xf]  ;;  %2711 = vmatpush.bf16.msra.mxu3 %v4130_v6  ;;  %2664 = vmatpush.bf16.msra.mxu0 %v4120_v34  ;;  %v3995_v40 = vld [vmem:[#allocation2 + $0x40] sm:$0xf0] }
 0x124   : > { %v4048_v7 = vld [vmem:[#allocation2 + $0x80] sm:$0xf0]  ;;  %v3377_v15 = vld [vmem:[#allocation2 + $0x84] sm:$0xf0] }
 0x125   : > { %v3376_v16 = vor.u32 %v4048_v7, %v3375_v18  ;;  %v3380_v61 = vor.u32 %v4047_v14, %v3377_v15  ;;  %1804 = vmatmul.bf16.gmra.mxu2 %v3348_v13  ;;  %v1218_v3 = vmul.f32 1.442695, %v1215_v63  ;;  %v4049_v11 = vld [vmem:[#allocation2 + $0x88] sm:$0xf0]  ;;  %v3411_v13 = vld [vmem:[#allocation2 + $0xc0] sm:$0xf] }
 0x126   : > { %2216 = vmatpush.bf16.msrb.mxu1 %v4028_v56  ;;  %v4311_v1 = vpop.eup %4310  ;;  %v4057_v7 = vld [vmem:[#allocation2 + $0xc8] sm:$0xf0]  ;;  %v4113_v14 = vld [vmem:[%s5273_s6 + $0x1b0] sm:$0xff]  ;;  %v4056_v15 = vld [vmem:[#allocation2 + $0xc4] sm:$0xf] }
 0x127   : > { %1721 = vmatmul.bf16.gmra.mxu3 %v3376_v16  ;;  %1770 = vmatmul.bf16.gmra.mxu1 %v3380_v61  ;;  %v1220_v4 = vadd.f32 1.0, %v4311_v1  ;;  %4312 = vpow2.f32 %v1218_v3  ;;  %v3413_v16 = vld [vmem:[#allocation2 + $0xcc] sm:$0xf0]  ;;  %v3384_v61 = vor.u32 %v4049_v11, %v3383_v8  ;;  %v3579_v11 = vld [vmem:[#allocation2 + $0x78] sm:$0xf] }
 0x128   : > { %v3416_v20 = vor.u32 %v4056_v15, %v3413_v16  ;;  %2614 = vmatpush.bf16.msrb.mxu2 %v4113_v14  ;;  %2712 = vmatpush.bf16.msra.mxu3 %v4129_v2  ;;  %v3407_v14 = vld [vmem:[#allocation2 + $0xb0] sm:$0xf]  ;;  %v4055_v15 = vld [vmem:[#allocation2 + $0xb8] sm:$0xf0]  ;;  %v4116_v2 = vld [vmem:[%s5273_s6 + $0x1c8] sm:$0xff] }
 0x129   : > { %v1222_v18 = vmul.f32 %v1220_v4, %v1220_v4  ;;  %2665 = vmatpush.bf16.msra.mxu0 %v4119_v35  ;;  %v4003_v4 = vld [vmem:[#allocation2 + $0x80] sm:$0xf0]  ;;  %v4126_v35 = vld [vmem:[%s5273_s6 + $0x218] sm:$0xff] }
 0x12a   : > { %2217 = vmatpush.bf16.msrb.mxu1 %v4027_v9  ;;  %v3580_v12 = vor.u32 %v4003_v4, %v3579_v11 }
 0x12b   : > { %v1228_v17 = vadd.f32 1.0, %v1222_v18  ;;  %v3275_v51 = vadd.f32 -1.0, %v1222_v18  ;;  %v4118_v18 = vld [vmem:[%s5273_s6 + $0x1d8] sm:$0xff] }
 0x12c   : > { %2615 = vmatpush.bf16.msrb.mxu2 %v4112_v10 }
 0x12d   : > { %4314 = vrcp.f32 %v1228_v17  ;;  %v4313_v19 = vpop.eup %4312  ;;  %v1226_v23 = vmul.f32 %v3275_v51, %v1212_v45  ;;  %2666 = vmatpush.bf16.msra.mxu0 %v4118_v18  ;;  %v4108_v51 = vld [vmem:[%s5273_s6 + $0x188] sm:$0xff] }
 0x12e   : > { %v1221_v21 = vadd.f32 1.0, %v4313_v19  ;;  %v3408_v19 = vor.u32 %v4055_v15, %v3407_v14 }
 0x130   : > { %v1223_v24 = vmul.f32 %v1221_v21, %v1221_v21  ;;  %2616 = vmatpush.bf16.msrb.mxu2 %v4111_v42  ;;  %v3992_v21 = vld [vmem:[#allocation2 + $0x28] sm:$0xf0]  ;;  %v3993_v42 = vld [vmem:[#allocation2 + $0x34] sm:$0xf] }
 0x132   : > { %2125 = vmatmul.bf16.gmra.mxu0 %v3532_v29  ;;  %v3412_v29 = vor.u32 %v4057_v7, %v3411_v13  ;;  %v1229_v49 = vadd.f32 1.0, %v1223_v24  ;;  %v3276_v28 = vadd.f32 -1.0, %v1223_v24  ;;  %v4109_v13 = vld [vmem:[%s5273_s6 + $0x190] sm:$0xff] }
 0x133   : > { %v4315_v26 = vpop.eup %4314 }
 0x134   : > { %4316 = vrcp.f32 %v1229_v49  ;;  %2617 = vmatpush.bf16.msrb.mxu2 %v4110_v60 }
 0x135   : > { %1809 = vmatmul.bf16.gmra.mxu2 %v3360_v22  ;;  %v1232_v22 = vmul.f32 %v4315_v26, %v1226_v23  ;;  %v3990_v23 = vld [vmem:[#allocation2 + $0x1c] sm:$0xf]  ;;  %v4107_v26 = vld [vmem:[%s5273_s6 + $0x180] sm:$0xff] }
 0x137   : > { %1726 = vmatmul.bf16.gmra.mxu3 %v3388_v32  ;;  %1775 = vmatmul.bf16.gmra.mxu1 %v3392_v33  ;;  %v3568_v32 = vor.u32 %v4000_v25, %v3567_v30  ;;  %v1235_v33 = vmul.f32 %v1234_v27, %v1232_v22  ;;  %v3591_v30 = vld [vmem:[#allocation2 + $0x90] sm:$0xf]  ;;  %v4006_v22 = vld [vmem:[#allocation2 + $0x98] sm:$0xf0] }
 0x138   : > { %2618 = vmatpush.bf16.msrb.mxu2 %v4109_v13  ;;  %v3592_v43 = vor.u32 %v4006_v22, %v3591_v30  ;;  %v4125_v13 = vld [vmem:[%s5273_s6 + $0x210] sm:$0xff] }
 0x139   : > { %v1239_v31 = vrot.slane %v1235_v33, 7 }
 0x13a   : > { %v4317_v45 = vpop.eup %4316 }
 0x13b   : > { %v1244_v39 = vsel %vm948_vm0, 0.0, %v1239_v31 }
 0x13c   : > { %v1251_v46 = vpack.c.bf16 %v1235_v33, %v1244_v39  ;;  %2619 = vmatpush.bf16.msrb.mxu2 %v4108_v51  ;;  %v3545_v39 = vld [vmem:[#allocation2 + $0x3c] sm:$0xf0]  ;;  %v3771_v51 = vld [vmem:[#allocation2 + $0x48] sm:$0xf] }
 0x13e   : > { %1256 = vst [vmem:[#allocation2 + $0xd8] sm:$0xff] %v1251_v46 }
 0x140   : > { %2620 = vmatpush.bf16.msrb.mxu2 %v4107_v26  ;;  %v3999_v26 = vld [vmem:[#allocation2 + $0x64] sm:$0xf] }
 0x142   : > { %2130 = vmatmul.bf16.gmra.mxu0 %v3544_v37  ;;  %v1227_v37 = vmul.f32 %v3276_v28, %v1213_v50  ;;  %v4128_v50 = vld [vmem:[%s5273_s6 + $0x228] sm:$0xff] }
 0x143   : > { %2713 = vmatpush.bf16.msra.mxu3 %v4128_v50  ;;  %v3998_v50 = vld [vmem:[#allocation2 + $0x58] sm:$0xf0] }
 0x144   : > { %v1233_v54 = vmul.f32 %v4317_v45, %v1227_v37  ;;  %v4058_v37 = vld [vmem:[#allocation2 + $0xd0] sm:$0xf0]  ;;  %v3548_v45 = vor.u32 %v3993_v42, %v3545_v39  ;;  %v3783_v42 = vld [vmem:[#allocation2 + $0x60] sm:$0xf] }
 0x145   : > { %1814 = vmatmul.bf16.gmra.mxu2 %v3372_v52  ;;  %v3527_v52 = vld [vmem:[#allocation2 + $0x8] sm:$0xf] }
 0x146   : > { %v3528_v56 = vor.u32 %v3989_v53, %v3527_v52  ;;  %v3603_v52 = vld [vmem:[#allocation2 + $0xa8] sm:$0xf]  ;;  %v4009_v53 = vld [vmem:[#allocation2 + $0xb0] sm:$0xf0] }
 0x147   : > { %1731 = vmatmul.bf16.gmra.mxu3 %v3400_v55  ;;  %1780 = vmatmul.bf16.gmra.mxu1 %v3404_v44  ;;  %v1245_v55 = vrot.slane %v1235_v33, 1  ;;  %v1236_v44 = vmul.f32 %v1234_v27, %v1233_v54  ;;  %v4127_v33 = vld [vmem:[%s5273_s6 + $0x220] sm:$0xff] }
 0x148   : > { %2714 = vmatpush.bf16.msra.mxu3 %v4127_v33 }
 0x149   : > { %v1240_v57 = vrot.slane %v1236_v44, 7  ;;  %v1246_v58 = vrot.slane %v1236_v44, 1 }
 0x14b   : > { %v1247_v1 = vsel %vm997_vm1, %v1245_v55, %v1246_v58  ;;  %v1250_v3 = vsel %vm997_vm1, %v1246_v58, 0.0  ;;  %v3604_v55 = vor.u32 %v4009_v53, %v3603_v52  ;;  %v3557_v58 = vld [vmem:[#allocation2 + $0x54] sm:$0xf0]  ;;  %v4004_v52 = vld [vmem:[#allocation2 + $0x88] sm:$0xf0] }
 0x14c   : > { %v1252_v5 = vpack.c.bf16 %v1247_v1, %v1247_v1  ;;  %v1254_v8 = vpack.c.bf16 %v1250_v3, %v1250_v3  ;;  %2715 = vmatpush.bf16.msra.mxu3 %v4126_v35  ;;  %v3996_v1 = vld [vmem:[#allocation2 + $0x4c] sm:$0xf] }
 0x14d   : > { %v3560_v3 = vor.u32 %v3996_v1, %v3557_v58  ;;  %v4089_v1 = vld [vmem:[#allocation2 + $0x64] sm:$0xf] }
 0x14e   : > { %1257 = vst [vmem:[#allocation2 + $0xe0] sm:$0xf] %v1252_v5 }
 0x14f   : > { %1259 = vst [vmem:[#allocation2 + $0xec] sm:$0xf] %v1254_v8 }
 0x150   : > { %2716 = vmatpush.bf16.msra.mxu3 %v4125_v13  ;;  %v3795_v13 = vld [vmem:[#allocation2 + $0x78] sm:$0xf] }
 0x152   : > { %2135 = vmatmul.bf16.gmra.mxu0 %v3556_v0  ;;  %v1241_v0 = vsel %vm948_vm0, %v1239_v31, %v1240_v57  ;;  %v3419_v31 = vld [vmem:[#allocation2 + $0xc8] sm:$0xf]  ;;  %v3759_v57 = vld [vmem:[#allocation2 + $0x30] sm:$0xf] }
 0x153   : > { %v1253_v6 = vpack.c.bf16 %v1236_v44, %v1241_v0  ;;  %v3420_v34 = vor.u32 %v4058_v37, %v3419_v31  ;;  %v4124_v37 = vld [vmem:[%s5273_s6 + $0x208] sm:$0xff] }
 0x154   : > { %2717 = vmatpush.bf16.msra.mxu3 %v4124_v37  ;;  %v4096_v37 = vld [vmem:[#allocation2 + $0x98] sm:$0xf0] }
 0x155   : > { %1819 = vmatmul.bf16.gmra.mxu2 %v3384_v61  ;;  %1258 = vst [vmem:[#allocation2 + $0xe4] sm:$0xff] %v1253_v6  ;;  %v4117_v61 = vld [vmem:[%s5273_s6 + $0x1d0] sm:$0xff]  ;;  %v3761_v6 = vld [vmem:[#allocation2 + $0x3c] sm:$0xf0] }
 0x156   : > { %2667 = vmatpush.bf16.msra.mxu0 %v4117_v61 }
 0x157   : > { %1736 = vmatmul.bf16.gmra.mxu3 %v3412_v29  ;;  %1785 = vmatmul.bf16.gmra.mxu1 %v3416_v20  ;;  %v3533_v29 = vld [vmem:[#allocation2 + $0x24] sm:$0xf0]  ;;  %v3539_v20 = vld [vmem:[#allocation2 + $0x20] sm:$0xf] }
 0x158   : > { %v3536_v24 = vor.u32 %v3990_v23, %v3533_v29  ;;  %v3540_v25 = vor.u32 %v3992_v21, %v3539_v20  ;;  %v3569_v29 = vld [vmem:[#allocation2 + $0x6c] sm:$0xf0]  ;;  %v3575_v20 = vld [vmem:[#allocation2 + $0x68] sm:$0xf]  ;;  %v4001_v21 = vld [vmem:[#allocation2 + $0x70] sm:$0xf0] }
 0x159   : > { %v3572_v30 = vor.u32 %v3999_v26, %v3569_v29  ;;  %v3576_v22 = vor.u32 %v4001_v21, %v3575_v20 }
 0x15a   : > { %2668 = vmatpush.bf16.msra.mxu0 %v4116_v2 }
 0x162   : > { %2140 = vmatmul.bf16.gmra.mxu0 %v3568_v32  ;;  %v4115_v32 = vld [vmem:[%s5273_s6 + $0x1c0] sm:$0xff] }
 0x163   : > { %v1751_v36 = vpop.f32.mrf.mxu1  ;;  %2669 = vmatpush.bf16.msra.mxu0 %v4115_v32  ;;  %v3773_v32 = vld [vmem:[#allocation2 + $0x54] sm:$0xf0] }
 0x165   : > { %1824 = vmatmul.bf16.gmra.mxu2 %v3396_v47 }
 0x167   : > { %2169 = vmatmul.bf16.vlgmr.msrb.gmra.mxu3 %v3524_v41  ;;  %2218 = vmatmul.bf16.vlgmr.msrb.gmra.mxu1 %v3528_v56  ;;  %v1702_v62 = vpop.f32.mrf.mxu2  ;;  %v4084_v41 = vld [vmem:[#allocation2 + $0x38] sm:$0xf0] }
 0x168   : > { %v4973_v63 = vadd.f32 %v1751_v36, %v1702_v62  ;;  %v3551_v36 = vld [vmem:[#allocation2 + $0x38] sm:$0xf]  ;;  %v3563_v62 = vld [vmem:[#allocation2 + $0x50] sm:$0xf]  ;;  %v3760_v60 = vor.u32 %v4084_v41, %v3759_v57 }
 0x169   : > { %v3552_v46 = vor.u32 %v3995_v40, %v3551_v36  ;;  %v3564_v4 = vor.u32 %v3998_v50, %v3563_v62  ;;  %v4090_v40 = vld [vmem:[#allocation2 + $0x68] sm:$0xf0]  ;;  %v3785_v50 = vld [vmem:[#allocation2 + $0x6c] sm:$0xf0] }
 0x16a   : > { %v3784_v53 = vor.u32 %v4090_v40, %v3783_v42  ;;  %v3605_v40 = vld [vmem:[#allocation2 + $0xb4] sm:$0xf0] }
 0x16b   : > { %v1753_v9 = vpop.f32.mrf.mxu1 }
 0x16f   : > { %v1704_v7 = vpop.f32.mrf.mxu2 }
 0x170   : > { %v4984_v16 = vadd.f32 %v1753_v9, %v1704_v7 }
 0x172   : > { %2145 = vmatmul.bf16.gmra.mxu0 %v3580_v12  ;;  %v4083_v12 = vld [vmem:[#allocation2 + $0x34] sm:$0xf] }
 0x173   : > { %v3764_v7 = vor.u32 %v4083_v12, %v3761_v6  ;;  %v4005_v12 = vld [vmem:[#allocation2 + $0x94] sm:$0xf] }
 0x174   : > { %v1756_v17 = vpop.f32.mrf.mxu1 }
 0x175   : > { %1829 = vmatmul.bf16.gmra.mxu2 %v3408_v19 }
 0x177   : > { %2174 = vmatmul.bf16.gmra.mxu3 %v3536_v24  ;;  %2223 = vmatmul.bf16.gmra.mxu1 %v3540_v25  ;;  %v1707_v27 = vpop.f32.mrf.mxu2 }
 0x178   : > { %v4998_v49 = vadd.f32 %v1756_v17, %v1707_v27  ;;  %v4087_v17 = vld [vmem:[#allocation2 + $0x50] sm:$0xf0] }
 0x179   : > { %v3772_v23 = vor.u32 %v4087_v17, %v3771_v51  ;;  %v4007_v17 = vld [vmem:[#allocation2 + $0xa0] sm:$0xf0] }
 0x17c   : > { %v1758_v28 = vpop.f32.mrf.mxu1 }
 0x17f   : > { %v1709_v10 = vpop.f32.mrf.mxu2 }
 0x180   : > { %v5006_v59 = vadd.f32 %v1758_v28, %v1709_v10  ;;  %v4086_v10 = vld [vmem:[#allocation2 + $0x4c] sm:$0xf] }
 0x182   : > { %2150 = vmatmul.bf16.gmra.mxu0 %v3592_v43 }
 0x184   : > { %v1761_v38 = vpop.f32.mrf.mxu1 }
 0x185   : > { %1834 = vmatmul.bf16.gmra.mxu2 %v3420_v34 }
 0x187   : > { %2179 = vmatmul.bf16.gmra.mxu3 %v3548_v45  ;;  %2228 = vmatmul.bf16.gmra.mxu1 %v3552_v46  ;;  %v3581_v46 = vld [vmem:[#allocation2 + $0x84] sm:$0xf0] }
 0x188   : > { %v1712_v47 = vpop.f32.mrf.mxu2 }
 0x189   : > { %v5008_v48 = vadd.f32 %v1761_v38, %v1712_v47  ;;  %v3776_v38 = vor.u32 %v4086_v10, %v3773_v32  ;;  %v3587_v47 = vld [vmem:[#allocation2 + $0x80] sm:$0xf]  ;;  %v3807_v10 = vld [vmem:[#allocation2 + $0x90] sm:$0xf] }
 0x18a   : > { %v3588_v58 = vor.u32 %v4004_v52, %v3587_v47  ;;  %v3808_v42 = vor.u32 %v4096_v37, %v3807_v10 }
 0x18c   : > { %v1763_v54 = vpop.f32.mrf.mxu1 }
 0x190   : > { %v1714_v44 = vpop.f32.mrf.mxu2 }
 0x191   : > { %v5013_v56 = vadd.f32 %v1763_v54, %v1714_v44  ;;  %v4002_v44 = vld [vmem:[#allocation2 + $0x7c] sm:$0xf] }
 0x192   : > { %2155 = vmatmul.bf16.gmra.mxu0 %v3604_v55  ;;  %v3584_v57 = vor.u32 %v4002_v44, %v3581_v46  ;;  %v4095_v44 = vld [vmem:[#allocation2 + $0x94] sm:$0xf] }
 0x194   : > { %v1766_v0 = vpop.f32.mrf.mxu1 }
 0x195   : > { %2621 = vmatmul.bf16.vlgmr.msrb.gmra.mxu2 %v3760_v60 }
 0x197   : > { %2184 = vmatmul.bf16.gmra.mxu3 %v3560_v3  ;;  %2233 = vmatmul.bf16.gmra.mxu1 %v3564_v4  ;;  %v4123_v4 = vld [vmem:[%s5273_s6 + $0x200] sm:$0xff] }
 0x198   : > { %v1800_v9 = vpop.f32.mrf.mxu2  ;;  %2718 = vmatpush.bf16.msra.mxu3 %v4123_v4  ;;  %v4099_v4 = vld [vmem:[#allocation2 + $0xb0] sm:$0xf0] }
 0x199   : > { %v1801_v5 = vadd.f32 %v1800_v9, %v4973_v63  ;;  %v3788_v9 = vor.u32 %v4089_v1, %v3785_v50  ;;  %v3819_v1 = vld [vmem:[#allocation2 + $0xa8] sm:$0xf] }
 0x19a   : > { %v1717_v8 = vpop.f32.mrf.mxu3 }
 0x19b   : > { %v5016_v18 = vadd.f32 %v1766_v0, %v1717_v8 }
 0x19c   : > { %v1768_v14 = vpop.f32.mrf.mxu1 }
 0x19f   : > { %v2121_v11 = vpop.f32.mrf.mxu0 }
 0x1a0   : > { %v5021_v15 = vadd.f32 %v2121_v11, %v1801_v5  ;;  %v1802_v61 = vpop.f32.mrf.mxu2  ;;  %v4093_v11 = vld [vmem:[#allocation2 + $0x80] sm:$0xf0] }
 0x1a1   : > { %v1803_v63 = vadd.f32 %v1802_v61, %v4984_v16  ;;  %v3599_v61 = vld [vmem:[#allocation2 + $0x98] sm:$0xf] }
 0x1a2   : > { %2670 = vmatmul.bf16.vlgmr.msra.gmra.mxu0 %v3764_v7  ;;  %v1719_v19 = vpop.f32.mrf.mxu3 }
 0x1a3   : > { %v5024_v24 = vadd.f32 %v1768_v14, %v1719_v19  ;;  %v3593_v14 = vld [vmem:[#allocation2 + $0x9c] sm:$0xf0] }
 0x1a4   : > { %v1771_v25 = vpop.f32.mrf.mxu1  ;;  %v3596_v21 = vor.u32 %v4005_v12, %v3593_v14 }
 0x1a5   : > { %2626 = vmatmul.bf16.gmra.mxu2 %v3772_v23  ;;  %v3600_v23 = vor.u32 %v4007_v17, %v3599_v61 }
 0x1a7   : > { %v2123_v2 = vpop.f32.mrf.mxu0  ;;  %2189 = vmatmul.bf16.gmra.mxu3 %v3572_v30  ;;  %2238 = vmatmul.bf16.gmra.mxu1 %v3576_v22  ;;  %v4092_v22 = vld [vmem:[#allocation2 + $0x7c] sm:$0xf] }
 0x1a8   : > { %v5026_v27 = vadd.f32 %v2123_v2, %v1803_v63  ;;  %v1805_v28 = vpop.f32.mrf.mxu2  ;;  %v3796_v63 = vor.u32 %v4093_v11, %v3795_v13  ;;  %v3820_v11 = vor.u32 %v4099_v4, %v3819_v1  ;;  %v4104_v1 = vld [vmem:[#allocation2 + $0xdc] sm:$0xf]  ;;  %v3845_v4 = vld [vmem:[#allocation2 + $0xe4] sm:$0xf0] }
 0x1a9   : > { %v1806_v16 = vadd.f32 %v1805_v28, %v4998_v49 }
 0x1aa   : > { %v1722_v33 = vpop.f32.mrf.mxu3 }
 0x1ab   : > { %v5029_v31 = vadd.f32 %v1771_v25, %v1722_v33  ;;  %v3797_v25 = vld [vmem:[#allocation2 + $0x84] sm:$0xf0] }
 0x1ac   : > { %v1773_v34 = vpop.f32.mrf.mxu1 }
 0x1af   : > { %v2126_v43 = vpop.f32.mrf.mxu0 }
 0x1b0   : > { %v5034_v39 = vadd.f32 %v2126_v43, %v1806_v16  ;;  %v1807_v36 = vpop.f32.mrf.mxu2  ;;  %v3800_v16 = vor.u32 %v4092_v22, %v3797_v25  ;;  %v3831_v25 = vld [vmem:[#allocation2 + $0xc0] sm:$0xf] }
 0x1b1   : > { %v1808_v49 = vadd.f32 %v1807_v36, %v5006_v59 }
 0x1b2   : > { %2675 = vmatmul.bf16.gmra.mxu0 %v3776_v38  ;;  %v1724_v45 = vpop.f32.mrf.mxu3 }
 0x1b3   : > { %v5037_v35 = vadd.f32 %v1773_v34, %v1724_v45  ;;  %v4008_v34 = vld [vmem:[#allocation2 + $0xac] sm:$0xf] }
 0x1b4   : > { %v1776_v55 = vpop.f32.mrf.mxu1  ;;  %v3608_v52 = vor.u32 %v4008_v34, %v3605_v40  ;;  %v3833_v40 = vld [vmem:[#allocation2 + $0xcc] sm:$0xf0] }
 0x1b5   : > { %2631 = vmatmul.bf16.gmra.mxu2 %v3784_v53 }
 0x1b7   : > { %v2128_v54 = vpop.f32.mrf.mxu0  ;;  %2194 = vmatmul.bf16.gmra.mxu3 %v3584_v57  ;;  %2243 = vmatmul.bf16.gmra.mxu1 %v3588_v58  ;;  %v3809_v57 = vld [vmem:[#allocation2 + $0x9c] sm:$0xf0] }
 0x1b8   : > { %v5039_v41 = vadd.f32 %v2128_v54, %v1808_v49  ;;  %v1810_v62 = vpop.f32.mrf.mxu2  ;;  %v4010_v49 = vld [vmem:[#allocation2 + $0xb8] sm:$0xf0]  ;;  %v3812_v50 = vor.u32 %v4095_v44, %v3809_v57  ;;  %v3791_v44 = vld [vmem:[#allocation2 + $0x68] sm:$0xf] }
 0x1b9   : > { %v1811_v59 = vadd.f32 %v1810_v62, %v5008_v48 }
 0x1ba   : > { %v1727_v60 = vpop.f32.mrf.mxu3 }
 0x1bb   : > { %v5042_v3 = vadd.f32 %v1776_v55, %v1727_v60 }
 0x1bc   : > { %v1778_v5 = vpop.f32.mrf.mxu1 }
 0x1bf   : > { %v2131_v0 = vpop.f32.mrf.mxu0 }
 0x1c0   : > { %v5047_v6 = vadd.f32 %v2131_v0, %v1811_v59  ;;  %v1812_v8 = vpop.f32.mrf.mxu2 }
 0x1c1   : > { %v1813_v48 = vadd.f32 %v1812_v8, %v5013_v56 }
 0x1c2   : > { %2680 = vmatmul.bf16.gmra.mxu0 %v3788_v9  ;;  %v1729_v7 = vpop.f32.mrf.mxu3 }
 0x1c3   : > { %v5050_v19 = vadd.f32 %v1778_v5, %v1729_v7 }
 0x1c4   : > { %v1781_v29 = vpop.f32.mrf.mxu1 }
 0x1c5   : > { %2636 = vmatmul.bf16.gmra.mxu2 %v3796_v63  ;;  %v4098_v63 = vld [vmem:[#allocation2 + $0xac] sm:$0xf] }
 0x1c7   : > { %v2133_v51 = vpop.f32.mrf.mxu0  ;;  %2199 = vmatmul.bf16.gmra.mxu3 %v3596_v21  ;;  %2248 = vmatmul.bf16.gmra.mxu1 %v3600_v23 }
 0x1c8   : > { %v5052_v20 = vadd.f32 %v2133_v51, %v1813_v48  ;;  %v1815_v2 = vpop.f32.mrf.mxu2  ;;  %v3767_v48 = vld [vmem:[#allocation2 + $0x38] sm:$0xf] }
 0x1c9   : > { %v1816_v56 = vadd.f32 %v1815_v2, %v5016_v18  ;;  %v3611_v18 = vld [vmem:[#allocation2 + $0xb0] sm:$0xf]  ;;  %v3821_v51 = vld [vmem:[#allocation2 + $0xb4] sm:$0xf0] }
 0x1ca   : > { %v1732_v26 = vpop.f32.mrf.mxu3  ;;  %v3612_v53 = vor.u32 %v4010_v49, %v3611_v18  ;;  %v3824_v23 = vor.u32 %v4098_v63, %v3821_v51 }
 0x1cb   : > { %v5055_v28 = vadd.f32 %v1781_v29, %v1732_v26  ;;  %v4102_v26 = vld [vmem:[#allocation2 + $0xc8] sm:$0xf0] }
 0x1cc   : > { %v1783_v33 = vpop.f32.mrf.mxu1 }
 0x1cf   : > { %v2136_v30 = vpop.f32.mrf.mxu0 }
 0x1d0   : > { %v5057_v32 = vadd.f32 %v2136_v30, %v1816_v56  ;;  %v1817_v43 = vpop.f32.mrf.mxu2 }
 0x1d1   : > { %v1818_v38 = vadd.f32 %v1817_v43, %v5024_v24 }
 0x1d2   : > { %2685 = vmatmul.bf16.gmra.mxu0 %v3800_v16  ;;  %v1734_v36 = vpop.f32.mrf.mxu3  ;;  %v3832_v16 = vor.u32 %v4102_v26, %v3831_v25 }
 0x1d3   : > { %v5060_v46 = vadd.f32 %v1783_v33, %v1734_v36  ;;  %v3779_v33 = vld [vmem:[#allocation2 + $0x50] sm:$0xf]  ;;  %v4101_v36 = vld [vmem:[#allocation2 + $0xc4] sm:$0xf] }
 0x1d4   : > { %v1786_v55 = vpop.f32.mrf.mxu1 }
 0x1d5   : > { %2641 = vmatmul.bf16.gmra.mxu2 %v3808_v42  ;;  %v3836_v42 = vor.u32 %v4101_v36, %v3833_v40 }
 0x1d7   : > { %v2138_v45 = vpop.f32.mrf.mxu0  ;;  %2204 = vmatmul.bf16.gmra.mxu3 %v3608_v52  ;;  %2253 = vmatmul.bf16.gmra.mxu1 %v3612_v53  ;;  %v3843_v52 = vld [vmem:[#allocation2 + $0xd8] sm:$0xf]  ;;  %v4105_v53 = vld [vmem:[#allocation2 + $0xe0] sm:$0xf0] }
 0x1d8   : > { %v5062_v47 = vadd.f32 %v2138_v45, %v1818_v38  ;;  %v1820_v54 = vpop.f32.mrf.mxu2 }
 0x1d9   : > { %v1821_v24 = vadd.f32 %v1820_v54, %v5029_v31  ;;  %v4085_v31 = vld [vmem:[#allocation2 + $0x40] sm:$0xf0] }
 0x1da   : > { %v1737_v58 = vpop.f32.mrf.mxu3  ;;  %v3768_v14 = vor.u32 %v4085_v31, %v3767_v48 }
 0x1db   : > { %v5065_v59 = vadd.f32 %v1786_v55, %v1737_v58 }
 0x1dc   : > { %v1788_v5 = vpop.f32.mrf.mxu1 }
 0x1df   : > { %v2141_v62 = vpop.f32.mrf.mxu0 }
 0x1e0   : > { %v5067_v60 = vadd.f32 %v2141_v62, %v1821_v24  ;;  %v1822_v0 = vpop.f32.mrf.mxu2  ;;  %v3844_v24 = vor.u32 %v4105_v53, %v3843_v52 }
 0x1e1   : > { %v1823_v9 = vadd.f32 %v1822_v0, %v5037_v35 }
 0x1e2   : > { %2690 = vmatmul.bf16.gmra.mxu0 %v3812_v50  ;;  %v1739_v8 = vpop.f32.mrf.mxu3 }
 0x1e3   : > { %v5070_v13 = vadd.f32 %v1788_v5, %v1739_v8  ;;  %v3848_v8 = vor.u32 %v4104_v1, %v3845_v4 }
 0x1e5   : > { %2646 = vmatmul.bf16.gmra.mxu2 %v3820_v11 }
 0x1e7   : > { %v2143_v12 = vpop.f32.mrf.mxu0  ;;  %2719 = vmatmul.bf16.vlgmr.msra.gmra.mxu3 %v3768_v14  ;;  %v4094_v14 = vld [vmem:[#allocation2 + $0x88] sm:$0xf0] }
 0x1e8   : > { %v5072_v7 = vadd.f32 %v2143_v12, %v1823_v9  ;;  %v1825_v61 = vpop.f32.mrf.mxu2  ;;  %v3803_v12 = vld [vmem:[#allocation2 + $0x80] sm:$0xf] }
 0x1e9   : > { %v1826_v17 = vadd.f32 %v1825_v61, %v5042_v3  ;;  %v4088_v3 = vld [vmem:[#allocation2 + $0x58] sm:$0xf0]  ;;  %v3804_v63 = vor.u32 %v4094_v14, %v3803_v12 }
 0x1ea   : > { %v2170_v29 = vpop.f32.mrf.mxu3  ;;  %v3780_v37 = vor.u32 %v4088_v3, %v3779_v33 }
 0x1eb   : > { %v5076_v21 = vadd.f32 %v2170_v29, %v5021_v15 }
 0x1ef   : > { %v2146_v35 = vpop.f32.mrf.mxu0 }
 0x1f0   : > { %v5078_v2 = vadd.f32 %v2146_v35, %v1826_v17  ;;  %v1827_v56 = vpop.f32.mrf.mxu2  ;;  %v3815_v35 = vld [vmem:[#allocation2 + $0x98] sm:$0xf] }
 0x1f1   : > { %v1828_v30 = vadd.f32 %v1827_v56, %v5050_v19 }
 0x1f2   : > { %2695 = vmatmul.bf16.gmra.mxu0 %v3824_v23  ;;  %v2172_v22 = vpop.f32.mrf.mxu3  ;;  %v4097_v23 = vld [vmem:[#allocation2 + $0xa0] sm:$0xf0] }
 0x1f3   : > { %v5082_v10 = vadd.f32 %v2172_v22, %v5026_v27  ;;  %v4100_v22 = vld [vmem:[#allocation2 + $0xb8] sm:$0xf0] }
 0x1f5   : > { %2651 = vmatmul.bf16.gmra.mxu2 %v3832_v16 }
 0x1f7   : > { %v2148_v43 = vpop.f32.mrf.mxu0  ;;  %2724 = vmatmul.bf16.gmra.mxu3 %v3780_v37  ;;  %v4103_v37 = vld [vmem:[#allocation2 + $0xd0] sm:$0xf0] }
 0x1f8   : > { %v5084_v15 = vadd.f32 %v2148_v43, %v1828_v30  ;;  %v1830_v38 = vpop.f32.mrf.mxu2  ;;  %v3827_v30 = vld [vmem:[#allocation2 + $0xb0] sm:$0xf]  ;;  %v3839_v43 = vld [vmem:[#allocation2 + $0xc8] sm:$0xf] }
 0x1f9   : > { %v1831_v34 = vadd.f32 %v1830_v38, %v5055_v28  ;;  %v4091_v28 = vld [vmem:[#allocation2 + $0x70] sm:$0xf0] }
 0x1fa   : > { %v2175_v18 = vpop.f32.mrf.mxu3  ;;  %v3792_v62 = vor.u32 %v4091_v28, %v3791_v44 }
 0x1fb   : > { %v5088_v49 = vadd.f32 %v2175_v18, %v5034_v39  ;;  %v2219_v18 = vpop.f32.mrf.mxu1 }
 0x1ff   : > { %v2151_v19 = vpop.f32.mrf.mxu0 }
 0x200   : > { %v5090_v45 = vadd.f32 %v2151_v19, %v1831_v34  ;;  %v1832_v27 = vpop.f32.mrf.mxu2 }
 0x201   : > { %v1833_v54 = vadd.f32 %v1832_v27, %v5060_v46  ;;  %v3851_v27 = vld [vmem:[#allocation2 + $0xe0] sm:$0xf] }
 0x202   : > { %2700 = vmatmul.bf16.gmra.mxu0 %v3836_v42  ;;  %v2177_v55 = vpop.f32.mrf.mxu3 }
 0x203   : > { %v5094_v58 = vadd.f32 %v2177_v55, %v5039_v41 }
 0x205   : > { %2656 = vmatmul.bf16.gmra.mxu2 %v3844_v24 }
 0x207   : > { %v2153_v57 = vpop.f32.mrf.mxu0  ;;  %2729 = vmatmul.bf16.gmra.mxu3 %v3792_v62 }
 0x208   : > { %v2154_v39 = vadd.f32 %v2153_v57, %v1833_v54  ;;  %v1835_v50 = vpop.f32.mrf.mxu2  ;;  %v2221_v54 = vpop.f32.mrf.mxu1 }
 0x209   : > { %v1836_v0 = vadd.f32 %v1835_v50, %v5065_v59 }
 0x20a   : > { %v2180_v9 = vpop.f32.mrf.mxu3 }
 0x20b   : > { %v5098_v46 = vadd.f32 %v2180_v9, %v5047_v6 }
 0x20f   : > { %v2156_v5 = vpop.f32.mrf.mxu0 }
 0x210   : > { %v2157_v11 = vadd.f32 %v2156_v5, %v1836_v0  ;;  %v1837_v48 = vpop.f32.mrf.mxu2  ;;  %v2224_v57 = vpop.f32.mrf.mxu1 }
 0x211   : > { %v1838_v41 = vadd.f32 %v1837_v48, %v5070_v13  ;;  %v3816_v13 = vor.u32 %v4097_v23, %v3815_v35  ;;  %v5140_v48 = vld [vmem:[%s5275_s8] ss:$0 sm:$0xff] }
 0x212   : > { %2705 = vmatmul.bf16.gmra.mxu0 %v3848_v8  ;;  %v2182_v31 = vpop.f32.mrf.mxu3  ;;  %v5135_v8 = vld [vmem:[%s5274_s7] ss:$0 sm:$0xff] }
 0x213   : > { %v5102_v17 = vadd.f32 %v2182_v31, %v5052_v20 }
 0x217   : > { %v2158_v61 = vpop.f32.mrf.mxu0  ;;  %2734 = vmatmul.bf16.gmra.mxu3 %v3804_v63 }
 0x218   : > { %v2159_v59 = vadd.f32 %v2158_v61, %v1838_v41  ;;  %v2622_v34 = vpop.f32.mrf.mxu2  ;;  %v2226_v1 = vpop.f32.mrf.mxu1 }
 0x21a   : > { %v2185_v51 = vpop.f32.mrf.mxu3 }
 0x21b   : > { %v5105_v6 = vadd.f32 %v2185_v51, %v5057_v32  ;;  %v3828_v32 = vor.u32 %v4100_v22, %v3827_v30 }
 0x21f   : > { %v2671_v36 = vpop.f32.mrf.mxu0 }
 0x220   : > { %v2624_v19 = vpop.f32.mrf.mxu2  ;;  %v2672_v4 = vadd.f32 %v2671_v36, %v2622_v34  ;;  %v2229_v63 = vpop.f32.mrf.mxu1 }
 0x222   : > { %v2187_v29 = vpop.f32.mrf.mxu3 }
 0x223   : > { %v5108_v56 = vadd.f32 %v2187_v29, %v5062_v47 }
 0x227   : > { %2739 = vmatmul.bf16.gmra.mxu3 %v3816_v13  ;;  %v2673_v53 = vpop.f32.mrf.mxu0 }
 0x228   : > { %v2627_v44 = vpop.f32.mrf.mxu2  ;;  %v2674_v12 = vadd.f32 %v2673_v53, %v2624_v19 }
 0x22a   : > { %v2190_v25 = vpop.f32.mrf.mxu3 }
 0x22b   : > { %v5111_v26 = vadd.f32 %v2190_v25, %v5067_v60  ;;  %v3840_v60 = vor.u32 %v4103_v37, %v3839_v43  ;;  %v2231_v37 = vpop.f32.mrf.mxu1 }
 0x22f   : > { %v2676_v28 = vpop.f32.mrf.mxu0 }
 0x230   : > { %v2677_v25 = vadd.f32 %v2676_v28, %v2627_v44 }
 0x232   : > { %v2192_v20 = vpop.f32.mrf.mxu3 }
 0x233   : > { %v5114_v16 = vadd.f32 %v2192_v20, %v5072_v7 }
 0x237   : > { %2744 = vmatmul.bf16.gmra.mxu3 %v3828_v32  ;;  %v2678_v0 = vpop.f32.mrf.mxu0  ;;  %v2225_v32 = vadd.f32 %v2224_v57, %v5088_v49 }
 0x23a   : > { %v2195_v33 = vpop.f32.mrf.mxu3 }
 0x23b   : > { %v5117_v3 = vadd.f32 %v2195_v33, %v5078_v2  ;;  %v4106_v2 = vld [vmem:[#allocation2 + $0xe8] sm:$0xf0] }
 0x23c   : > { %v3852_v55 = vor.u32 %v4106_v2, %v3851_v27  ;;  %v2227_v2 = vadd.f32 %v2226_v1, %v5094_v58 }
 0x242   : > { %v2197_v47 = vpop.f32.mrf.mxu3 }
 0x243   : > { %v5120_v38 = vadd.f32 %v2197_v47, %v5084_v15 }
 0x247   : > { %2749 = vmatmul.bf16.gmra.mxu3 %v3840_v60 }
 0x24a   : > { %v2200_v40 = vpop.f32.mrf.mxu3 }
 0x24b   : > { %v5123_v7 = vadd.f32 %v2200_v40, %v5090_v45  ;;  %v2629_v45 = vpop.f32.mrf.mxu2 }
 0x252   : > { %v2202_v42 = vpop.f32.mrf.mxu3 }
 0x253   : > { %v5125_v52 = vadd.f32 %v2202_v42, %v2154_v39  ;;  %v2220_v39 = vadd.f32 %v2219_v18, %v5076_v21  ;;  %v2632_v31 = vpop.f32.mrf.mxu2  ;;  %v2681_v21 = vpop.f32.mrf.mxu0  ;;  %v2679_v18 = vadd.f32 %v2678_v0, %v2629_v45 }
 0x257   : > { %2754 = vmatmul.bf16.gmra.mxu3 %v3852_v55 }
 0x25a   : > { %v2205_v15 = vpop.f32.mrf.mxu3 }
 0x25b   : > { %v5127_v24 = vadd.f32 %v2205_v15, %v2157_v11  ;;  %v2634_v30 = vpop.f32.mrf.mxu2  ;;  %v2683_v43 = vpop.f32.mrf.mxu0 }
 0x262   : > { %v2207_v62 = vpop.f32.mrf.mxu3 }
 0x263   : > { %v5129_v50 = vadd.f32 %v2207_v62, %v2159_v59  ;;  %v2222_v59 = vadd.f32 %v2221_v54, %v5082_v10  ;;  %v2637_v54 = vpop.f32.mrf.mxu2  ;;  %v2686_v28 = vpop.f32.mrf.mxu0 }
 0x26a   : > { %v2720_v9 = vpop.f32.mrf.mxu3 }
 0x26b   : > { %v2721_v5 = vadd.f32 %v2720_v9, %v2672_v4  ;;  %v2234_v4 = vpop.f32.mrf.mxu1  ;;  %v2682_v9 = vadd.f32 %v2681_v21, %v2632_v31 }
 0x26d   : > { %v2760_v11 = vadd.f32 %v2721_v5, %v2220_v39  ;;  %v2230_v5 = vadd.f32 %v2229_v63, %v5098_v46 }
 0x26f   : > { %v2780_v41 = vmul.f32 %v5135_v8, %v2760_v11 }
 0x271   : > { %v5144_v14 = vadd.f32 %v5140_v48, %v2780_v41 }
 0x272   : > { %v2722_v61 = vpop.f32.mrf.mxu3 }
 0x273   : > { %v2816_v51 = vmin.f32 %v5144_v14, 20.0  ;;  %v2723_v29 = vadd.f32 %v2722_v61, %v2674_v12 }
 0x275   : > { %v2832_v35 = vmul.f32 1.442695, %v2816_v51  ;;  %v2761_v23 = vadd.f32 %v2723_v29, %v2222_v59 }
 0x277   : > { %4318 = vpow2.f32 %v2832_v35  ;;  %v2781_v13 = vmul.f32 %v5135_v8, %v2761_v23  ;;  %v2639_v35 = vpop.f32.mrf.mxu2 }
 0x279   : > { %v2801_v20 = vadd.f32 %v5140_v48, %v2781_v13  ;;  %v2688_v13 = vpop.f32.mrf.mxu0 }
 0x27a   : > { %v2725_v22 = vpop.f32.mrf.mxu3 }
 0x27b   : > { %v2817_v33 = vmin.f32 %v2801_v20, 20.0  ;;  %v2726_v47 = vadd.f32 %v2725_v22, %v2677_v25  ;;  %v2236_v25 = vpop.f32.mrf.mxu1  ;;  %v2684_v22 = vadd.f32 %v2683_v43, %v2634_v30 }
 0x27d   : > { %v4319_v10 = vpop.eup %4318  ;;  %v2834_v60 = vmul.f32 1.442695, %v2817_v33  ;;  %v2762_v34 = vadd.f32 %v2726_v47, %v2225_v32  ;;  %v2232_v47 = vadd.f32 %v2231_v37, %v5102_v17 }
 0x27e   : > { %v2864_v36 = vadd.f32 1.0, %v4319_v10 }
 0x27f   : > { %4320 = vpow2.f32 %v2834_v60  ;;  %v2782_v40 = vmul.f32 %v5135_v8, %v2762_v34 }
 0x280   : > { %v2880_v42 = vmul.f32 %v2864_v36, %v2864_v36 }
 0x281   : > { %v5153_v19 = vadd.f32 %v5140_v48, %v2782_v40 }
 0x282   : > { %v2727_v27 = vpop.f32.mrf.mxu3  ;;  %v2928_v57 = vadd.f32 1.0, %v2880_v42  ;;  %v3949_v61 = vadd.f32 -1.0, %v2880_v42 }
 0x283   : > { %v2818_v49 = vmin.f32 %v5153_v19, 20.0  ;;  %v2728_v53 = vadd.f32 %v2727_v27, %v2679_v18  ;;  %v2642_v27 = vpop.f32.mrf.mxu2 }
 0x284   : > { %v2912_v46 = vmul.f32 %v3949_v61, %v5144_v14 }
 0x285   : > { %v4321_v55 = vpop.eup %4320  ;;  %v2836_v15 = vmul.f32 1.442695, %v2818_v49  ;;  %v2763_v44 = vadd.f32 %v2728_v53, %v2227_v2  ;;  %v2687_v49 = vadd.f32 %v2686_v28, %v2637_v54 }
 0x286   : > { %v2865_v62 = vadd.f32 1.0, %v4321_v55  ;;  %v2691_v55 = vpop.f32.mrf.mxu0 }
 0x287   : > { %4322 = vpow2.f32 %v2836_v15  ;;  %v2783_v45 = vmul.f32 %v5135_v8, %v2763_v44 }
 0x288   : > { %v2881_v0 = vmul.f32 %v2865_v62, %v2865_v62  ;;  %4324 = vrcp.f32 %v2928_v57  ;;  %v2235_v57 = vadd.f32 %v2234_v4, %v5105_v6  ;;  %v2239_v62 = vpop.f32.mrf.mxu1 }
 0x289   : > { %v5159_v39 = vadd.f32 %v5140_v48, %v2783_v45 }
 0x28a   : > { %v2929_v58 = vadd.f32 1.0, %v2881_v0  ;;  %v2730_v1 = vpop.f32.mrf.mxu3  ;;  %v3950_v59 = vadd.f32 -1.0, %v2881_v0 }
 0x28b   : > { %v2819_v11 = vmin.f32 %v5159_v39, 20.0  ;;  %v2731_v41 = vadd.f32 %v2730_v1, %v2682_v9 }
 0x28c   : > { %4326 = vrcp.f32 %v2929_v58  ;;  %v2913_v63 = vmul.f32 %v3950_v59, %v2801_v20 }
 0x28d   : > { %v4323_v12 = vpop.eup %4322  ;;  %v2838_v51 = vmul.f32 1.442695, %v2819_v11  ;;  %v2764_v29 = vadd.f32 %v2731_v41, %v2230_v5 }
 0x28e   : > { %v2866_v23 = vadd.f32 1.0, %v4323_v12  ;;  %v4325_v21 = vpop.eup %4324  ;;  %v2689_v12 = vadd.f32 %v2688_v13, %v2639_v35  ;;  %v2693_v35 = vpop.f32.mrf.mxu0 }
 0x28f   : > { %4328 = vpow2.f32 %v2838_v51  ;;  %v2784_v31 = vmul.f32 %v5135_v8, %v2764_v29  ;;  %v2960_v34 = vmul.f32 %v4325_v21, %v2912_v46  ;;  %v2237_v51 = vadd.f32 %v2236_v25, %v5108_v56  ;;  %v2644_v29 = vpop.f32.mrf.mxu2 }
 0x290   : > { %v2882_v10 = vmul.f32 %v2866_v23, %v2866_v23 }
 0x291   : > { %v5166_v32 = vadd.f32 %v5140_v48, %v2784_v31 }
 0x292   : > { %v4327_v33 = vpop.eup %4326  ;;  %v2732_v60 = vpop.f32.mrf.mxu3  ;;  %v2930_v42 = vadd.f32 1.0, %v2882_v10  ;;  %v3951_v58 = vadd.f32 -1.0, %v2882_v10 }
 0x293   : > { %v2961_v36 = vmul.f32 %v4327_v33, %v2913_v63  ;;  %v2820_v40 = vmin.f32 %v5166_v32, 20.0  ;;  %v2733_v18 = vadd.f32 %v2732_v60, %v2684_v22 }
 0x294   : > { %v2914_v61 = vmul.f32 %v3951_v58, %v5153_v19  ;;  %v2241_v19 = vpop.f32.mrf.mxu1 }
 0x295   : > { %v4329_v14 = vpop.eup %4328  ;;  %v4134_v20 = vpack.c.bf16 %v2961_v36, %v2960_v34  ;;  %v2840_v30 = vmul.f32 1.442695, %v2820_v40  ;;  %v2765_v43 = vadd.f32 %v2733_v18, %v2232_v47  ;;  %v2692_v34 = vadd.f32 %v2691_v55, %v2642_v27 }
 0x296   : > { %v2867_v17 = vadd.f32 1.0, %v4329_v14  ;;  %v2240_v14 = vadd.f32 %v2239_v62, %v5111_v26  ;;  %v2242_v58 = vadd.f32 %v2241_v19, %v5114_v16 }
 0x297   : > { %4135 = vst [vmem:[%s5175_s28] sm:$0xff] %v4134_v20   ;;  %4330 = vpow2.f32 %v2840_v30  ;;  %v2785_v37 = vmul.f32 %v5135_v8, %v2765_v43  ;;  %v2647_v43 = vpop.f32.mrf.mxu2 }
 0x298   : > { %v2883_v2 = vmul.f32 %v2867_v17, %v2867_v17  ;;  %4332 = vrcp.f32 %v2930_v42 }
 0x299   : > { %v5180_v53 = vadd.f32 %v5140_v48, %v2785_v37 }
 0x29a   : > { %v2931_v15 = vadd.f32 1.0, %v2883_v2  ;;  %v2735_v44 = vpop.f32.mrf.mxu3  ;;  %v3952_v1 = vadd.f32 -1.0, %v2883_v2 }
 0x29b   : > { %v2821_v45 = vmin.f32 %v5180_v53, 20.0  ;;  %v2736_v0 = vadd.f32 %v2735_v44, %v2687_v49 }
 0x29c   : > { %4334 = vrcp.f32 %v2931_v15  ;;  %v2915_v6 = vmul.f32 %v3952_v1, %v5159_v39  ;;  %v2696_v15 = vpop.f32.mrf.mxu0  ;;  %v2244_v55 = vpop.f32.mrf.mxu1 }
 0x29d   : > { %v4331_v9 = vpop.eup %4330  ;;  %v2842_v5 = vmul.f32 1.442695, %v2821_v45  ;;  %v2766_v11 = vadd.f32 %v2736_v0, %v2235_v57  ;;  %v2694_v45 = vadd.f32 %v2693_v35, %v2644_v29  ;;  %v2245_v35 = vadd.f32 %v2244_v55, %v5117_v3 }
 0x29e   : > { %v2868_v54 = vadd.f32 1.0, %v4331_v9  ;;  %v4333_v41 = vpop.eup %4332 }
 0x29f   : > { %4336 = vpow2.f32 %v2842_v5  ;;  %v2786_v28 = vmul.f32 %v5135_v8, %v2766_v11  ;;  %v2962_v21 = vmul.f32 %v4333_v41, %v2914_v61 }
 0x2a0   : > { %v2884_v23 = vmul.f32 %v2868_v54, %v2868_v54 }
 0x2a1   : > { %v5188_v4 = vadd.f32 %v5140_v48, %v2786_v28 }
 0x2a2   : > { %v4335_v59 = vpop.eup %4334  ;;  %v2737_v31 = vpop.f32.mrf.mxu3  ;;  %v2932_v10 = vadd.f32 1.0, %v2884_v23  ;;  %v3953_v17 = vadd.f32 -1.0, %v2884_v23 }
 0x2a3   : > { %v2963_v22 = vmul.f32 %v4335_v59, %v2915_v6  ;;  %v2822_v46 = vmin.f32 %v5188_v4, 20.0  ;;  %v2738_v63 = vadd.f32 %v2737_v31, %v2689_v12  ;;  %v2649_v59 = vpop.f32.mrf.mxu2 }
 0x2a4   : > { %v2916_v26 = vmul.f32 %v3953_v17, %v5166_v32  ;;  %v2698_v23 = vpop.f32.mrf.mxu0  ;;  %v2246_v31 = vpop.f32.mrf.mxu1 }
 0x2a5   : > { %v4337_v13 = vpop.eup %4336  ;;  %v4139_v33 = vpack.c.bf16 %v2963_v22, %v2962_v21  ;;  %v2844_v39 = vmul.f32 1.442695, %v2822_v46  ;;  %v2767_v47 = vadd.f32 %v2738_v63, %v2237_v51  ;;  %v2697_v21 = vadd.f32 %v2696_v15, %v2647_v43 }
 0x2a6   : > { %v2869_v60 = vadd.f32 1.0, %v4337_v13  ;;  %v2247_v43 = vadd.f32 %v2246_v31, %v5120_v38 }
 0x2a7   : > { %4171 = vst [vmem:[%s5175_s28 + $0x8] sm:$0xff] %v4139_v33   ;;  %4338 = vpow2.f32 %v2844_v39  ;;  %v2787_v56 = vmul.f32 %v5135_v8, %v2767_v47 }
 0x2a8   : > { %v2885_v25 = vmul.f32 %v2869_v60, %v2869_v60  ;;  %4340 = vrcp.f32 %v2932_v10 }
 0x2a9   : > { %v5195_v36 = vadd.f32 %v5140_v48, %v2787_v56 }
 0x2aa   : > { %v2933_v40 = vadd.f32 1.0, %v2885_v25  ;;  %v2740_v18 = vpop.f32.mrf.mxu3  ;;  %v3954_v37 = vadd.f32 -1.0, %v2885_v25 }
 0x2ab   : > { %v2823_v20 = vmin.f32 %v5195_v36, 20.0  ;;  %v2741_v30 = vadd.f32 %v2740_v18, %v2692_v34  ;;  %v2699_v18 = vadd.f32 %v2698_v23, %v2649_v59 }
 0x2ac   : > { %4342 = vrcp.f32 %v2933_v40  ;;  %v2917_v62 = vmul.f32 %v3954_v37, %v5180_v53  ;;  %v2652_v40 = vpop.f32.mrf.mxu2 }
 0x2ad   : > { %v4339_v42 = vpop.eup %4338  ;;  %v2846_v2 = vmul.f32 1.442695, %v2823_v20  ;;  %v2768_v49 = vadd.f32 %v2741_v30, %v2240_v14 }
 0x2ae   : > { %v2870_v27 = vadd.f32 1.0, %v4339_v42  ;;  %v4341_v57 = vpop.eup %4340  ;;  %v2701_v42 = vpop.f32.mrf.mxu0 }
 0x2af   : > { %4344 = vpow2.f32 %v2846_v2  ;;  %v2788_v44 = vmul.f32 %v5135_v8, %v2768_v49  ;;  %v2964_v11 = vmul.f32 %v4341_v57, %v2916_v26  ;;  %v2249_v2 = vpop.f32.mrf.mxu1 }
 0x2b0   : > { %v2886_v1 = vmul.f32 %v2870_v27, %v2870_v27 }
 0x2b1   : > { %v5203_v0 = vadd.f32 %v5140_v48, %v2788_v44 }
 0x2b2   : > { %v4343_v9 = vpop.eup %4342  ;;  %v2742_v5 = vpop.f32.mrf.mxu3  ;;  %v2934_v53 = vadd.f32 1.0, %v2886_v1  ;;  %v3955_v39 = vadd.f32 -1.0, %v2886_v1 }
 0x2b3   : > { %v2965_v54 = vmul.f32 %v4343_v9, %v2917_v62  ;;  %v2824_v28 = vmin.f32 %v5203_v0, 20.0  ;;  %v2743_v41 = vadd.f32 %v2742_v5, %v2694_v45  ;;  %v2702_v9 = vadd.f32 %v2701_v42, %v2652_v40 }
 0x2b4   : > { %v2918_v14 = vmul.f32 %v3955_v39, %v5188_v4  ;;  %v2654_v1 = vpop.f32.mrf.mxu2 }
 0x2b5   : > { %v4345_v12 = vpop.eup %4344  ;;  %v4144_v61 = vpack.c.bf16 %v2965_v54, %v2964_v11  ;;  %v2848_v6 = vmul.f32 1.442695, %v2824_v28  ;;  %v2769_v32 = vadd.f32 %v2743_v41, %v2242_v58  ;;  %v2250_v54 = vadd.f32 %v2249_v2, %v5123_v7 }
 0x2b6   : > { %v2871_v51 = vadd.f32 1.0, %v4345_v12  ;;  %v2703_v12 = vpop.f32.mrf.mxu0 }
 0x2b7   : > { %4172 = vst [vmem:[%s5175_s28 + $0x10] sm:$0xff] %v4144_v61   ;;  %4346 = vpow2.f32 %v2848_v6  ;;  %v2789_v29 = vmul.f32 %v5135_v8, %v2769_v32  ;;  %v2251_v6 = vpop.f32.mrf.mxu1  ;;  %v2704_v31 = vadd.f32 %v2703_v12, %v2654_v1 }
 0x2b8   : > { %v2887_v16 = vmul.f32 %v2871_v51, %v2871_v51  ;;  %4348 = vrcp.f32 %v2934_v53 }
 0x2b9   : > { %v5210_v22 = vadd.f32 %v5140_v48, %v2789_v29 }
 0x2ba   : > { %v2935_v46 = vadd.f32 1.0, %v2887_v16  ;;  %v2745_v63 = vpop.f32.mrf.mxu3  ;;  %v3956_v47 = vadd.f32 -1.0, %v2887_v16 }
 0x2bb   : > { %v2825_v13 = vmin.f32 %v5210_v22, 20.0  ;;  %v2746_v19 = vadd.f32 %v2745_v63, %v2697_v21 }
 0x2bc   : > { %4350 = vrcp.f32 %v2935_v46  ;;  %v2919_v3 = vmul.f32 %v3956_v47, %v5195_v36 }
 0x2bd   : > { %v4347_v33 = vpop.eup %4346  ;;  %v2850_v10 = vmul.f32 1.442695, %v2825_v13  ;;  %v2770_v60 = vadd.f32 %v2746_v19, %v2245_v35  ;;  %v2252_v35 = vadd.f32 %v2251_v6, %v5125_v52 }
 0x2be   : > { %v2872_v56 = vadd.f32 1.0, %v4347_v33  ;;  %v4349_v34 = vpop.eup %4348 }
 0x2bf   : > { %4352 = vpow2.f32 %v2850_v10  ;;  %v2790_v25 = vmul.f32 %v5135_v8, %v2770_v60  ;;  %v2966_v49 = vmul.f32 %v4349_v34, %v2918_v14  ;;  %v2657_v60 = vpop.f32.mrf.mxu2  ;;  %v2254_v14 = vpop.f32.mrf.mxu1 }
 0x2c0   : > { %v2888_v17 = vmul.f32 %v2872_v56, %v2872_v56 }
 0x2c1   : > { %v5218_v20 = vadd.f32 %v5140_v48, %v2790_v25 }
 0x2c2   : > { %v4351_v30 = vpop.eup %4350  ;;  %v2747_v37 = vpop.f32.mrf.mxu3  ;;  %v2936_v45 = vadd.f32 1.0, %v2888_v17  ;;  %v3957_v32 = vadd.f32 -1.0, %v2888_v17 }
 0x2c3   : > { %v2967_v15 = vmul.f32 %v4351_v30, %v2919_v3  ;;  %v2826_v27 = vmin.f32 %v5218_v20, 20.0  ;;  %v2748_v55 = vadd.f32 %v2747_v37, %v2699_v18  ;;  %v2255_v37 = vadd.f32 %v2254_v14, %v5127_v24 }
 0x2c4   : > { %v2920_v21 = vmul.f32 %v3957_v32, %v5203_v0 }
 0x2c5   : > { %v4353_v44 = vpop.eup %4352  ;;  %v4149_v4 = vpack.c.bf16 %v2967_v15, %v2966_v49  ;;  %v2852_v57 = vmul.f32 1.442695, %v2826_v27  ;;  %v2771_v36 = vadd.f32 %v2748_v55, %v2247_v43 }
 0x2c6   : > { %v2873_v26 = vadd.f32 1.0, %v4353_v44 }
 0x2c7   : > { %4173 = vst [vmem:[%s5175_s28 + $0x18] sm:$0xff] %v4149_v4   ;;  %4354 = vpow2.f32 %v2852_v57  ;;  %v2791_v62 = vmul.f32 %v5135_v8, %v2771_v36  ;;  %v2659_v57 = vpop.f32.mrf.mxu2 }
 0x2c8   : > { %v2889_v38 = vmul.f32 %v2873_v26, %v2873_v26  ;;  %4356 = vrcp.f32 %v2936_v45 }
 0x2c9   : > { %v5225_v58 = vadd.f32 %v5140_v48, %v2791_v62 }
 0x2ca   : > { %v2937_v5 = vadd.f32 1.0, %v2889_v38  ;;  %v2750_v11 = vpop.f32.mrf.mxu3  ;;  %v3958_v59 = vadd.f32 -1.0, %v2889_v38  ;;  %v2256_v38 = vpop.f32.mrf.mxu1 }
 0x2cb   : > { %v2827_v28 = vmin.f32 %v5225_v58, 20.0  ;;  %v2751_v41 = vadd.f32 %v2750_v11, %v2702_v9 }
 0x2cc   : > { %4358 = vrcp.f32 %v2937_v5  ;;  %v2921_v7 = vmul.f32 %v3958_v59, %v5210_v22  ;;  %v2706_v22 = vpop.f32.mrf.mxu0 }
 0x2cd   : > { %v4355_v61 = vpop.eup %4354  ;;  %v2854_v53 = vmul.f32 1.442695, %v2827_v28  ;;  %v2772_v51 = vadd.f32 %v2751_v41, %v2250_v54  ;;  %v2707_v30 = vadd.f32 %v2706_v22, %v2657_v60  ;;  %v2257_v54 = vadd.f32 %v2256_v38, %v5129_v50 }
 0x2ce   : > { %v2874_v29 = vadd.f32 1.0, %v4355_v61  ;;  %v4357_v16 = vpop.eup %4356 }
 0x2cf   : > { %4360 = vpow2.f32 %v2854_v53  ;;  %v2792_v23 = vmul.f32 %v5135_v8, %v2772_v51  ;;  %v2968_v33 = vmul.f32 %v4357_v16, %v2920_v21 }
 0x2d0   : > { %v2890_v13 = vmul.f32 %v2874_v29, %v2874_v29 }
 0x2d1   : > { %v5233_v46 = vadd.f32 %v5140_v48, %v2792_v23 }
 0x2d2   : > { %v4359_v63 = vpop.eup %4358  ;;  %v2752_v19 = vpop.f32.mrf.mxu3  ;;  %v2938_v40 = vadd.f32 1.0, %v2890_v13  ;;  %v3959_v27 = vadd.f32 -1.0, %v2890_v13 }
 0x2d3   : > { %v2969_v39 = vmul.f32 %v4359_v63, %v2921_v7  ;;  %v2828_v47 = vmin.f32 %v5233_v46, 20.0  ;;  %v2753_v10 = vadd.f32 %v2752_v19, %v2704_v31 }
 0x2d4   : > { %v2708_v62 = vpop.f32.mrf.mxu0  ;;  %v2922_v1 = vmul.f32 %v3959_v27, %v5218_v20 }
 0x2d5   : > { %v4361_v56 = vpop.eup %4360  ;;  %v4154_v25 = vpack.c.bf16 %v2969_v39, %v2968_v33  ;;  %v2856_v0 = vmul.f32 1.442695, %v2828_v47  ;;  %v2773_v34 = vadd.f32 %v2753_v10, %v2252_v35  ;;  %v2709_v9 = vadd.f32 %v2708_v62, %v2659_v57 }
 0x2d6   : > { %v2875_v18 = vadd.f32 1.0, %v4361_v56 }
 0x2d7   : > { %4174 = vst [vmem:[%s5175_s28 + $0x20] sm:$0xff] %v4154_v25   ;;  %4362 = vpow2.f32 %v2856_v0  ;;  %v2793_v52 = vmul.f32 %v5135_v8, %v2773_v34 }
 0x2d8   : > { %v2891_v3 = vmul.f32 %v2875_v18, %v2875_v18  ;;  %4364 = vrcp.f32 %v2938_v40 }
 0x2d9   : > { %v2813_v43 = vadd.f32 %v5140_v48, %v2793_v52 }
 0x2da   : > { %v2939_v42 = vadd.f32 1.0, %v2891_v3  ;;  %v2755_v17 = vpop.f32.mrf.mxu3  ;;  %v3960_v55 = vadd.f32 -1.0, %v2891_v3 }
 0x2db   : > { %v2829_v2 = vmin.f32 %v2813_v43, 20.0  ;;  %v2756_v49 = vadd.f32 %v2755_v17, %v2707_v30 }
 0x2dc   : > { %4366 = vrcp.f32 %v2939_v42  ;;  %v2923_v24 = vmul.f32 %v3960_v55, %v5225_v58 }
 0x2dd   : > { %v4363_v15 = vpop.eup %4362  ;;  %v2858_v44 = vmul.f32 1.442695, %v2829_v2  ;;  %v2774_v4 = vadd.f32 %v2756_v49, %v2255_v37 }
 0x2de   : > { %v2876_v36 = vadd.f32 1.0, %v4363_v15  ;;  %v4365_v26 = vpop.eup %4364 }
 0x2df   : > { %4368 = vpow2.f32 %v2858_v44  ;;  %v2794_v45 = vmul.f32 %v5135_v8, %v2774_v4  ;;  %v2970_v12 = vmul.f32 %v4365_v26, %v2922_v1 }
 0x2e0   : > { %v2892_v28 = vmul.f32 %v2876_v36, %v2876_v36 }
 0x2e1   : > { %v2814_v5 = vadd.f32 %v5140_v48, %v2794_v45 }
 0x2e2   : > { %v4367_v11 = vpop.eup %4366  ;;  %v2757_v41 = vpop.f32.mrf.mxu3  ;;  %v2940_v23 = vadd.f32 1.0, %v2892_v28  ;;  %v3961_v63 = vadd.f32 -1.0, %v2892_v28 }
 0x2e3   : > { %v2971_v61 = vmul.f32 %v4367_v11, %v2923_v24  ;;  %v2830_v6 = vmin.f32 %v2814_v5, 20.0  ;;  %v2758_v32 = vadd.f32 %v2757_v41, %v2709_v9 }
 0x2e4   : > { %v2924_v39 = vmul.f32 %v3961_v63, %v5233_v46 }
 0x2e5   : > { %v4369_v59 = vpop.eup %4368  ;;  %v4159_v53 = vpack.c.bf16 %v2971_v61, %v2970_v12  ;;  %v2860_v51 = vmul.f32 1.442695, %v2830_v6  ;;  %v2775_v29 = vadd.f32 %v2758_v32, %v2257_v54 }
 0x2e6   : > { %v2877_v20 = vadd.f32 1.0, %v4369_v59 }
 0x2e7   : > { %4175 = vst [vmem:[%s5175_s28 + $0x28] sm:$0xff] %v4159_v53   ;;  %4370 = vpow2.f32 %v2860_v51  ;;  %v2795_v58 = vmul.f32 %v5135_v8, %v2775_v29 }
 0x2e8   : > { %v2893_v16 = vmul.f32 %v2877_v20, %v2877_v20  ;;  %4372 = vrcp.f32 %v2940_v23 }
 0x2e9   : > { %v2815_v31 = vadd.f32 %v5140_v48, %v2795_v58 }
 0x2ea   : > { %v2941_v50 = vadd.f32 1.0, %v2893_v16  ;;  %v3962_v35 = vadd.f32 -1.0, %v2893_v16 }
 0x2eb   : > { %v2831_v21 = vmin.f32 %v2815_v31, 20.0 }
 0x2ec   : > { %4374 = vrcp.f32 %v2941_v50  ;;  %v2925_v47 = vmul.f32 %v3962_v35, %v2813_v43 }
 0x2ed   : > { %v4371_v7 = vpop.eup %4370  ;;  %v2862_v13 = vmul.f32 1.442695, %v2831_v21 }
 0x2ee   : > { %v2878_v19 = vadd.f32 1.0, %v4371_v7  ;;  %v4373_v33 = vpop.eup %4372 }
 0x2ef   : > { %4376 = vpow2.f32 %v2862_v13  ;;  %v2972_v60 = vmul.f32 %v4373_v33, %v2924_v39 }
 0x2f0   : > { %v2894_v8 = vmul.f32 %v2878_v19, %v2878_v19 }
 0x2f2   : > { %v4375_v10 = vpop.eup %4374  ;;  %v2942_v0 = vadd.f32 1.0, %v2894_v8  ;;  %v3963_v18 = vadd.f32 -1.0, %v2894_v8 }
 0x2f3   : > { %v2973_v56 = vmul.f32 %v4375_v10, %v2925_v47 }
 0x2f4   : > { %4378 = vrcp.f32 %v2942_v0  ;;  %v2926_v3 = vmul.f32 %v3963_v18, %v2814_v5 }
 0x2f5   : > { %v4377_v48 = vpop.eup %4376  ;;  %v4164_v25 = vpack.c.bf16 %v2973_v56, %v2972_v60 }
 0x2f6   : > { %v2879_v34 = vadd.f32 1.0, %v4377_v48 }
 0x2f7   : > { %4176 = vst [vmem:[%s5175_s28 + $0x30] sm:$0xff] %v4164_v25  }
 0x2f8   : > { %v2895_v22 = vmul.f32 %v2879_v34, %v2879_v34 }
 0x2fa   : > { %v2943_v40 = vadd.f32 1.0, %v2895_v22  ;;  %v3964_v14 = vadd.f32 -1.0, %v2895_v22  ;;  %v4379_v52 = vpop.eup %4378 }
 0x2fb   : > { %v2974_v43 = vmul.f32 %v4379_v52, %v2926_v3 }
 0x2fc   : > { %4380 = vrcp.f32 %v2943_v40  ;;  %v2927_v46 = vmul.f32 %v3964_v14, %v2815_v31 }
 0x302   : > { %v4381_v30 = vpop.eup %4380 }
 0x303   : > { %v2975_v42 = vmul.f32 %v4381_v30, %v2927_v46 }
 0x305   : > { %v4169_v17 = vpack.c.bf16 %v2975_v42, %v2974_v43 }
 0x307   : > { %4177 = vst [vmem:[%s5175_s28 + $0x38] sm:$0xff] %v4169_v17  }
 0x308 PF: > { %s21_s21 = sadd.s32 1, %s4422_s21   ;;  %s5281_s17 = smov %s4414_s19 }
 0x309   : > { %p18_p12 = scmp.ge.s32.totalorder %s21_s21, 6   ;;  %s5282_s18 = smov %s4418_s20 }
 0x30a   : > { %s5283_s19 = smov %s5286_s9  ;;  %s5284_s20 = smov %s5290_s10 }
 0x30b   :  { %20 = sbr.rel (!%p18_p12) target bundleno = 3 (0x3), region = 105 }

// kernel: _lambda_.6
= control target key start
LH: loop header
LB: loop body
LE: loop exit
PB: predicated region body
PF: predicated region fallthrough
CT: control target
= control target key end

     0   :  { %s4766_s17 = smov 0   ;;  %s4768_s18 = smov 0   ;;  %s5672_s0 = inlined_call_operand.vmem [shape: bf16[2,16,16,128], index: 0, kind: input, shape index: {}, may-alias: {0,1,2}]   ;;  %s5673_s1 = inlined_call_operand.vmem [shape: bf16[2,16,16,128], index: 1, kind: input, shape index: {}, may-alias: {0,1,2}]   ;;  %s5674_s2 = inlined_call_operand.vmem [shape: bf16[2,16,16,128], index: 2, kind: input, shape index: {}, may-alias: {0,1,2}]   ;;  %s5675_s3 = inlined_call_operand.vmem [shape: bf16[128,128], index: 3, kind: input, shape index: {}]   ;;  %s5676_s4 = inlined_call_operand.vmem [shape: f32[1,128], index: 4, kind: input, shape index: {}]   ;;  %s5677_s5 = inlined_call_operand.vmem [shape: f32[1,128], index: 5, kind: input, shape index: {}]   ;;  %s5678_s6 = inlined_call_operand.vmem [shape: bf16[3,384,128], index: 6, kind: input, shape index: {}]   ;;  %s5679_s7 = inlined_call_operand.vmem [shape: f32[1,128], index: 7, kind: input, shape index: {}]   ;;  %s5680_s8 = inlined_call_operand.vmem [shape: f32[1,128], index: 8, kind: input, shape index: {}]   ;;  %s5681_s9 = inlined_call_operand.vmem [shape: f32[1,128], index: 9, kind: input, shape index: {}]   ;;  %s5682_s10 = inlined_call_operand.vmem [shape: f32[1,128], index: 10, kind: input, shape index: {}]   ;;  %s5683_s11 = inlined_call_operand.vmem [shape: bf16[2,16,16,128], index: 11, kind: output, shape index: {}]  }
   0x1   :  { %5685 = sst [smem:[#allocation3_spill]] %s5672_s0  ;;  %s4770_s19 = smov 0  }
   0x2   :  { %5686 = sst [smem:[#allocation4_spill]] %s5675_s3  ;;  %s4772_s20 = smov 0  }
   0x3   :  { %s4774_s21 = smov 0  }
   0x4 LB: > { %s30_s22 = sadd.s32 1, %s4696_s19  ;;  %s33_s23 = sadd.s32 1, %s4700_s20  ;;  %s4704_s21 = sphi %s4774_s21, %s21_s21   ;;  %s4700_s20 = sphi %s4772_s20, %s5693_s20   ;;  %s4696_s19 = sphi %s4770_s19, %s5692_s19   ;;  %s4692_s18 = sphi %s4768_s18, %s5691_s18   ;;  %s4688_s17 = sphi %s4766_s17, %s5690_s17  }
   0x5   : > { %p31_p0 = scmp.ge.s32.totalorder %s30_s22, 2  ;;  %p3359_p1 = scmp.ge.s32.totalorder %s4704_s21, 1 }
   0x6   : > { %p423_p2 = scmp.lt.s32.totalorder %s4704_s21, 5 }
   0x7   : > { %s5695_s22 = smov (%p31_p0, %s30_s22), 0  ;;  %s5697_s23 = smov (!%p31_p0, %s33_s23), %s4700_s20 }
   0x8   : > { %p424_p3 = pnand %p3359_p1, %p423_p2  ;;  %p35_p4 = scmp.ge.s32.totalorder %s5697_s23, 2 }
   0x9   : > { %s5687_s3 = sld [smem:[#allocation4_spill]] (!%p424_p3)  ;;  %s4810_s30 = sshll.u32 (!%p424_p3), %s4688_s17, 3 }
   0xa   : > { %s5699_s23 = smov (%p35_p4, %s5697_s23), 0  ;;  %427 = sbr.rel (%p424_p3) target bundleno = 808 (0x328), region = 64 }
   0xb   : > { %p500_p5 = scmp.lt.s32.totalorder (!%p424_p3), %s4692_s18, 1  ;;  %p502_p6 = scmp.lt.s32.totalorder (!%p424_p3), %s4810_s30, 15 }
   0xc   : > { %s5688_s0 = sld [smem:[#allocation3_spill]] (!%p424_p3)  ;;  %s3365_s26 = sadd.s32 (!%p424_p3), 4294967295, %s4810_s30 }
   0xd   : > { %p512_p7 = scmp.gt.s32.totalorder (!%p424_p3), %s3365_s26, 0  ;;  %p3366_p8 = scmp.lt.s32.totalorder (!%p424_p3), %s3365_s26, 15 }
   0xe   : > { %s528_s27 = sadd.s32 (!%p424_p3), 8, %s4810_s30  ;;  %p1113_p10 = scmp.gt.s32.totalorder (!%p424_p3), %s4688_s17, 0 }
   0xf   : > { %v4192_v0 = vld [vmem:[%s5687_s3 + $0x38] sm:$0xff]  ;;  %v4191_v1 = vld [vmem:[%s5687_s3 + $0x30] sm:$0xff]  ;;  %v4190_v2 = vld [vmem:[%s5687_s3 + $0x28] sm:$0xff]  ;;  %s5701_s18 = smov (!%p500_p5, %s4692_s18), 1  ;;  %s5703_s26 = smov (!%p512_p7, %s3365_s26), 0  ;;  %vm948_vm0 = vcmask 1040384  }
  0x10   : > { %685 = vmatpush.bf16.msra.mxu0 %v4192_v0  ;;  %4394 = vmatpush.bf16.msra.mxu1 %v4192_v0  ;;  %v4189_v3 = vld [vmem:[%s5687_s3 + $0x20] sm:$0xff]  ;;  %s503_s14 = scalar_select %p502_p6, %s4810_s30, 15  ;;  %v4188_v4 = vld [vmem:[%s5687_s3 + $0x18] sm:$0xff]  ;;  %v4187_v5 = vld [vmem:[%s5687_s3 + $0x10] sm:$0xff]  ;;  %vm997_vm1 = vcmask 1046528  }
  0x11   : > { %1196 = vmatpush.bf16.msra.mxu2 %v4192_v0  ;;  %s4822_s25 = sshll.u32 %s5701_s18, 5  ;;  %v4186_v6 = vld [vmem:[%s5687_s3 + $0x8] sm:$0xff]  ;;  %v4185_v7 = vld [vmem:[%s5687_s3] sm:$0xff]  ;;  %s5705_s26 = smov (!%p3366_p8, %s5703_s26), 15  ;;  %v4282_v17 = vld [vmem:[%s5678_s6 + $0xf8] sm:$0xff] }
  0x12   : > { %s3361_s24 = sshll.u32 %s503_s14, 1  ;;  %p529_p9 = scmp.lt.s32.totalorder %s528_s27, 15  ;;  %v4290_v18 = vld [vmem:[%s5678_s6 + $0x138] sm:$0xff]  ;;  %4402 = vmatpush.bf16.msra.mxu3 %v4282_v17  ;;  %v4281_v19 = vld [vmem:[%s5678_s6 + $0xf0] sm:$0xff]  ;;  %v4877_v21 = vld [vmem:[%s5676_s4] ss:$0 sm:$0xff] }
  0x13   : > { %s4828_s28 = sadd.s32 %s4822_s25, %s3361_s24  ;;  %s3371_s29 = sshll.u32 %s5705_s26, 1  ;;  %v4289_v20 = vld [vmem:[%s5678_s6 + $0x130] sm:$0xff]  ;;  %v4882_v22 = vld [vmem:[%s5677_s5] ss:$0 sm:$0xff]  ;;  %v4280_v25 = vld [vmem:[%s5678_s6 + $0xe8] sm:$0xff] }
  0x14   : > { %686 = vmatpush.bf16.msra.mxu0 %v4191_v1  ;;  %4395 = vmatpush.bf16.msra.mxu1 %v4191_v1  ;;  %s5684_s18 = sshll.u32 %s4828_s28, 2  ;;  %s5707_s27 = smov (!%p529_p9, %s528_s27), 15  ;;  %v4288_v26 = vld [vmem:[%s5678_s6 + $0x128] sm:$0xff]  ;;  %v4279_v33 = vld [vmem:[%s5678_s6 + $0xe0] sm:$0xff]  ;;  %v4278_v42 = vld [vmem:[%s5678_s6 + $0xd8] sm:$0xff] }
  0x15   : > { %1197 = vmatpush.bf16.msra.mxu2 %v4191_v1  ;;  %s4842_s24 = scalar_lea.vmem %s5688_s0, %s5684_s18  ;;  %s5709_s27 = smov (!%p529_p9, %s5707_s27), 15  ;;  %v4287_v34 = vld [vmem:[%s5678_s6 + $0x120] sm:$0xff]  ;;  %v4286_v43 = vld [vmem:[%s5678_s6 + $0x118] sm:$0xff]  ;;  %v4277_v48 = vld [vmem:[%s5678_s6 + $0xd0] sm:$0xff] }
  0x16   : > { %v4193_v8 = vld [vmem:[%s4842_s24] sm:$0xff]  ;;  %v4198_v9 = vld [vmem:[%s4842_s24 + $0x28] sm:$0xff]  ;;  %v4199_v11 = vld [vmem:[%s4842_s24 + $0x30] sm:$0xff]  ;;  %s520_s12 = sadd.s32 %s3371_s29, %s4822_s25  ;;  %s4853_s13 = sshll.u32 %s5709_s27, 1  ;;  %4403 = vmatpush.bf16.msra.mxu3 %v4281_v19 }
  0x17   : > { %v4194_v10 = vld [vmem:[%s4842_s24 + $0x8] sm:$0xff]  ;;  %v4195_v12 = vld [vmem:[%s4842_s24 + $0x10] sm:$0xff]  ;;  %v4200_v13 = vld [vmem:[%s4842_s24 + $0x38] sm:$0xff]  ;;  %s537_s14 = sadd.s32 %s4853_s13, %s4822_s25  ;;  %s3373_s15 = sshll.u32 %s520_s12, 2 }
  0x18   : > { %687 = vmatpush.bf16.msra.mxu0 %v4190_v2  ;;  %4396 = vmatpush.bf16.msra.mxu1 %v4190_v2  ;;  %s522_s0 = scalar_lea.vmem %s5673_s1, %s3373_s15  ;;  %v4196_v14 = vld [vmem:[%s4842_s24 + $0x18] sm:$0xff]  ;;  %v4197_v16 = vld [vmem:[%s4842_s24 + $0x20] sm:$0xff]  ;;  %s3380_s18 = sshll.u32 %s537_s14, 2  ;;  %v4285_v49 = vld [vmem:[%s5678_s6 + $0x110] sm:$0xff] }
  0x19   : > { %1198 = vmatpush.bf16.msra.mxu2 %v4190_v2  ;;  %v4201_v15 = vld [vmem:[%s522_s0] sm:$0xff]  ;;  %s539_s30 = scalar_lea.vmem %s5674_s2, %s3380_s18  ;;  %v4276_v60 = vld [vmem:[%s5678_s6 + $0xc8] sm:$0xff]  ;;  %p1187_p11 = scmp.lt.s32.totalorder %s4688_s17, 1 }
  0x1a   : > { %4404 = vmatpush.bf16.msra.mxu3 %v4280_v25  ;;  %v4202_v40 = vld [vmem:[%s539_s30] sm:$0xff]  ;;  %v4284_v61 = vld [vmem:[%s5678_s6 + $0x108] sm:$0xff]  ;;  %s5140_s18 = scalar_select %p1113_p10, 1, 0 }
  0x1b   : > { %s5224_s0 = scalar_select %p1187_p11, 1, 0 }
  0x1c   : > { %688 = vmatpush.bf16.msra.mxu0 %v4189_v3  ;;  %4397 = vmatpush.bf16.msra.mxu1 %v4189_v3  ;;  %s1115_s24 = scvt.s32.f32 %s5140_s18  ;;  %s5689_s25 = sshll.u32 %s4828_s28, 2 }
  0x1d   : > { %1199 = vmatpush.bf16.msra.mxu2 %v4189_v3  ;;  %s1189_s15 = scvt.s32.f32 %s5224_s0  ;;  %s5535_s26 = scalar_lea.vmem %s5683_s11, %s5689_s25 }
  0x1e   : > { %4405 = vmatpush.bf16.msra.mxu3 %v4279_v33 }
  0x20   : > { %689 = vmatpush.bf16.msra.mxu0 %v4188_v4  ;;  %4398 = vmatpush.bf16.msra.mxu1 %v4188_v4 }
  0x21   : > { %1200 = vmatpush.bf16.msra.mxu2 %v4188_v4 }
  0x22   : > { %4406 = vmatpush.bf16.msra.mxu3 %v4278_v42 }
  0x24   : > { %690 = vmatpush.bf16.msra.mxu0 %v4187_v5  ;;  %4399 = vmatpush.bf16.msra.mxu1 %v4187_v5 }
  0x25   : > { %1201 = vmatpush.bf16.msra.mxu2 %v4187_v5 }
  0x26   : > { %4407 = vmatpush.bf16.msra.mxu3 %v4277_v48 }
  0x28   : > { %691 = vmatpush.bf16.msra.mxu0 %v4186_v6  ;;  %4400 = vmatpush.bf16.msra.mxu1 %v4186_v6 }
  0x29   : > { %1202 = vmatpush.bf16.msra.mxu2 %v4186_v6 }
  0x2a   : > { %4408 = vmatpush.bf16.msra.mxu3 %v4276_v60 }
  0x2c   : > { %692 = vmatpush.bf16.msra.mxu0 %v4185_v7  ;;  %4401 = vmatpush.bf16.msra.mxu1 %v4185_v7 }
  0x2d   : > { %1203 = vmatpush.bf16.msra.mxu2 %v4185_v7 }
  0x2f   : > { %693 = vmatmul.bf16.vlgmr.msra.gmra.mxu0 %v4193_v8  ;;  %718 = vmatmul.bf16.vlgmr.msra.gmra.mxu1 %v4198_v9 }
  0x30   : > { %1122 = vmatpush.bf16.msrb.mxu1 %v4192_v0  ;;  %1204 = vmatmul.bf16.vlgmr.msra.gmra.mxu2 %v4202_v40 }
  0x31   : > { %1693 = vmatpush.bf16.msrb.mxu2 %v4282_v17 }
  0x34   : > { %1123 = vmatpush.bf16.msrb.mxu1 %v4191_v1 }
  0x35   : > { %1694 = vmatpush.bf16.msrb.mxu2 %v4281_v19 }
  0x38   : > { %1124 = vmatpush.bf16.msrb.mxu1 %v4190_v2 }
  0x39   : > { %1695 = vmatpush.bf16.msrb.mxu2 %v4280_v25 }
  0x3c   : > { %1125 = vmatpush.bf16.msrb.mxu1 %v4189_v3 }
  0x3d   : > { %1696 = vmatpush.bf16.msrb.mxu2 %v4279_v33 }
  0x3f   : > { %698 = vmatmul.bf16.gmra.mxu0 %v4194_v10  ;;  %723 = vmatmul.bf16.gmra.mxu1 %v4199_v11 }
  0x40   : > { %1126 = vmatpush.bf16.msrb.mxu1 %v4188_v4 }
  0x41   : > { %1697 = vmatpush.bf16.msrb.mxu2 %v4278_v42 }
  0x44   : > { %1127 = vmatpush.bf16.msrb.mxu1 %v4187_v5 }
  0x45   : > { %1698 = vmatpush.bf16.msrb.mxu2 %v4277_v48 }
  0x48   : > { %1128 = vmatpush.bf16.msrb.mxu1 %v4186_v6 }
  0x49   : > { %1699 = vmatpush.bf16.msrb.mxu2 %v4276_v60 }
  0x4c   : > { %1129 = vmatpush.bf16.msrb.mxu1 %v4185_v7 }
  0x4f   : > { %703 = vmatmul.bf16.gmra.mxu0 %v4195_v12  ;;  %728 = vmatmul.bf16.gmra.mxu1 %v4200_v13 }
  0x50   : > { %1742 = vmatpush.bf16.msra.mxu1 %v4290_v18 }
  0x54   : > { %1743 = vmatpush.bf16.msra.mxu1 %v4289_v20 }
  0x58   : > { %1744 = vmatpush.bf16.msra.mxu1 %v4288_v26 }
  0x5c   : > { %1745 = vmatpush.bf16.msra.mxu1 %v4287_v34 }
  0x5f   : > { %708 = vmatmul.bf16.gmra.mxu0 %v4196_v14  ;;  %1130 = vmatmul.bf16.vlgmr.msrb.gmra.mxu1 %v4201_v15  ;;  %v4275_v15 = vld [vmem:[%s5678_s6 + $0xc0] sm:$0xff] }
  0x60   : > { %1746 = vmatpush.bf16.msra.mxu1 %v4286_v43  ;;  %1700 = vmatpush.bf16.msrb.mxu2 %v4275_v15 }
  0x61   : > { %4409 = vmatpush.bf16.msra.mxu3 %v4275_v15 }
  0x64   : > { %1747 = vmatpush.bf16.msra.mxu1 %v4285_v49 }
  0x68   : > { %1748 = vmatpush.bf16.msra.mxu1 %v4284_v61 }
  0x6f   : > { %713 = vmatmul.bf16.gmra.mxu0 %v4197_v16  ;;  %v4283_v16 = vld [vmem:[%s5678_s6 + $0x100] sm:$0xff] }
  0x70   : > { %1749 = vmatpush.bf16.msra.mxu1 %v4283_v16 }
  0xac   : > { %v694_v23 = vpop.f32.mrf.mxu0  ;;  %v719_v24 = vpop.f32.mrf.mxu1 }
  0xad   : > { %v737_v27 = vmul.f32 %v4877_v21, %v694_v23  ;;  %v747_v29 = vmul.f32 %v4877_v21, %v719_v24 }
  0xaf   : > { %v4892_v28 = vadd.f32 %v4882_v22, %v737_v27  ;;  %v4900_v31 = vadd.f32 %v4882_v22, %v747_v29 }
  0xb1   : > { %v772_v30 = vmin.f32 %v4892_v28, 20.0  ;;  %v782_v35 = vmin.f32 %v4900_v31, 20.0 }
  0xb3   : > { %v788_v32 = vmul.f32 1.442695, %v772_v30  ;;  %v808_v39 = vmul.f32 1.442695, %v782_v35 }
  0xb4   : > { %v696_v36 = vpop.f32.mrf.mxu0  ;;  %v721_v37 = vpop.f32.mrf.mxu1 }
  0xb5   : > { %4456 = vpow2.f32 %v788_v32  ;;  %v738_v38 = vmul.f32 %v4877_v21, %v696_v36  ;;  %v748_v45 = vmul.f32 %v4877_v21, %v721_v37 }
  0xb6   : > { %4458 = vpow2.f32 %v808_v39 }
  0xb7   : > { %v4914_v41 = vadd.f32 %v4882_v22, %v738_v38  ;;  %v4931_v51 = vadd.f32 %v4882_v22, %v748_v45 }
  0xb9   : > { %v773_v44 = vmin.f32 %v4914_v41, 20.0  ;;  %v783_v57 = vmin.f32 %v4931_v51, 20.0 }
  0xbb   : > { %v4457_v46 = vpop.eup %4456  ;;  %v790_v47 = vmul.f32 1.442695, %v773_v44  ;;  %v810_v63 = vmul.f32 1.442695, %v783_v57 }
  0xbc   : > { %v820_v50 = vadd.f32 1.0, %v4457_v46  ;;  %v699_v52 = vpop.f32.mrf.mxu0  ;;  %v724_v53 = vpop.f32.mrf.mxu1 }
  0xbd   : > { %4460 = vpow2.f32 %v790_v47  ;;  %v739_v54 = vmul.f32 %v4877_v21, %v699_v52  ;;  %v4459_v55 = vpop.eup %4458  ;;  %v749_v2 = vmul.f32 %v4877_v21, %v724_v53 }
  0xbe   : > { %v836_v56 = vmul.f32 %v820_v50, %v820_v50  ;;  %v830_v58 = vadd.f32 1.0, %v4459_v55 }
  0xbf   : > { %v4936_v59 = vadd.f32 %v4882_v22, %v739_v54  ;;  %v4947_v9 = vadd.f32 %v4882_v22, %v749_v2 }
  0xc0   : > { %v884_v62 = vadd.f32 1.0, %v836_v56  ;;  %v846_v0 = vmul.f32 %v830_v58, %v830_v58  ;;  %v3449_v4 = vadd.f32 -1.0, %v836_v56 }
  0xc1   : > { %v774_v1 = vmin.f32 %v4936_v59, 20.0  ;;  %v784_v14 = vmin.f32 %v4947_v9, 20.0 }
  0xc2   : > { %4462 = vrcp.f32 %v884_v62  ;;  %v894_v5 = vadd.f32 1.0, %v846_v0  ;;  %v3459_v7 = vadd.f32 -1.0, %v846_v0  ;;  %v868_v17 = vmul.f32 %v3449_v4, %v4892_v28 }
  0xc3   : > { %v4461_v3 = vpop.eup %4460  ;;  %4464 = vpow2.f32 %v810_v63  ;;  %v792_v6 = vmul.f32 1.442695, %v774_v1  ;;  %v812_v24 = vmul.f32 1.442695, %v784_v14 }
  0xc4   : > { %v821_v8 = vadd.f32 1.0, %v4461_v3  ;;  %v701_v10 = vpop.f32.mrf.mxu0  ;;  %v726_v11 = vpop.f32.mrf.mxu1  ;;  %4466 = vrcp.f32 %v894_v5  ;;  %v878_v20 = vmul.f32 %v3459_v7, %v4900_v31 }
  0xc5   : > { %v740_v12 = vmul.f32 %v4877_v21, %v701_v10  ;;  %4468 = vpow2.f32 %v792_v6  ;;  %v750_v36 = vmul.f32 %v4877_v21, %v726_v11 }
  0xc6   : > { %v837_v13 = vmul.f32 %v821_v8, %v821_v8 }
  0xc7   : > { %v4959_v18 = vadd.f32 %v4882_v22, %v740_v12  ;;  %v4971_v49 = vadd.f32 %v4882_v22, %v750_v36 }
  0xc8   : > { %v4463_v19 = vpop.eup %4462  ;;  %v885_v23 = vadd.f32 1.0, %v837_v13  ;;  %v3450_v29 = vadd.f32 -1.0, %v837_v13 }
  0xc9   : > { %v4465_v25 = vpop.eup %4464  ;;  %v916_v26 = vmul.f32 %v4463_v19, %v868_v17  ;;  %v775_v27 = vmin.f32 %v4959_v18, 20.0  ;;  %v785_v60 = vmin.f32 %v4971_v49, 20.0 }
  0xca   : > { %4470 = vrcp.f32 %v885_v23  ;;  %v831_v30 = vadd.f32 1.0, %v4465_v25  ;;  %v4467_v28 = vpop.eup %4466  ;;  %v869_v45 = vmul.f32 %v3450_v29, %v4914_v41 }
  0xcb   : > { %v949_v32 = vrot.slane %v916_v26, 7  ;;  %4472 = vpow2.f32 %v812_v24  ;;  %v794_v33 = vmul.f32 1.442695, %v775_v27  ;;  %v4469_v34 = vpop.eup %4468  ;;  %v4963_v35 = vmul.f32 %v4467_v28, %v878_v20 }
  0xcc   : > { %v847_v31 = vmul.f32 %v831_v30, %v831_v30  ;;  %v704_v37 = vpop.f32.mrf.mxu0  ;;  %v729_v38 = vpop.f32.mrf.mxu1  ;;  %v822_v40 = vadd.f32 1.0, %v4469_v34  ;;  %v998_v55 = vrot.slane %v916_v26, 1  ;;  %v814_v5 = vmul.f32 1.442695, %v785_v60 }
  0xcd   : > { %v989_v39 = vsel %vm948_vm0, 0.0, %v949_v32  ;;  %4474 = vpow2.f32 %v794_v33  ;;  %v741_v42 = vmul.f32 %v4877_v21, %v704_v37  ;;  %v964_v44 = vrot.slane %v4963_v35, 7 }
  0xce   : > { %v1046_v43 = vpack.c.bf16 %v916_v26, %v989_v39  ;;  %v3460_v46 = vadd.f32 -1.0, %v847_v31  ;;  %v895_v47 = vadd.f32 1.0, %v847_v31  ;;  %v838_v48 = vmul.f32 %v822_v40, %v822_v40 }
  0xcf   : > { %v4974_v50 = vadd.f32 %v4882_v22, %v741_v42  ;;  %v994_v53 = vsel %vm948_vm0, 0.0, %v964_v44  ;;  %v751_v20 = vmul.f32 %v4877_v21, %v729_v38  ;;  %v1013_v23 = vrot.slane %v4963_v35, 1 }
  0xd0   : > { %v4471_v52 = vpop.eup %4470  ;;  %1079 = vst [vmem:[#allocation2 + $0x18] sm:$0xff] %v1046_v43  ;;  %v1066_v41 = vpack.c.bf16 %v4963_v35, %v994_v53  ;;  %4476 = vrcp.f32 %v895_v47  ;;  %v886_v57 = vadd.f32 1.0, %v838_v48  ;;  %v879_v1 = vmul.f32 %v3460_v46, %v4931_v51 }
  0xd1   : > { %v4473_v54 = vpop.eup %4472  ;;  %v917_v56 = vmul.f32 %v4471_v52, %v869_v45  ;;  %v776_v61 = vmin.f32 %v4974_v50, 20.0  ;;  %v3451_v2 = vadd.f32 -1.0, %v838_v48  ;;  %v4991_v29 = vadd.f32 %v4882_v22, %v751_v20 }
  0xd2   : > { %v832_v58 = vadd.f32 1.0, %v4473_v54  ;;  %1099 = vst [vmem:[#allocation2 + $0x90] sm:$0xff] %v1066_v41  ;;  %4478 = vrcp.f32 %v886_v57 }
  0xd3   : > { %v4475_v62 = vpop.eup %4474  ;;  %v950_v63 = vrot.slane %v917_v56, 7  ;;  %v999_v0 = vrot.slane %v917_v56, 1  ;;  %v796_v11 = vmul.f32 1.442695, %v776_v61  ;;  %4480 = vpow2.f32 %v814_v5  ;;  %v4298_v5 = vld [vmem:[%s5678_s6 + $0x178] sm:$0xff] }
  0xd4   : > { %v848_v3 = vmul.f32 %v832_v58, %v832_v58  ;;  %v823_v4 = vadd.f32 1.0, %v4475_v62  ;;  %v706_v6 = vpop.f32.mrf.mxu0  ;;  %v731_v16 = vpop.f32.mrf.mxu1  ;;  %v870_v26 = vmul.f32 %v3451_v2, %v4936_v59  ;;  %v786_v37 = vmin.f32 %v4991_v29, 20.0  ;;  %1791 = vmatpush.bf16.msra.mxu2 %v4298_v5 }
  0xd5   : > { %v951_v7 = vsel %vm948_vm0, %v949_v32, %v950_v63  ;;  %v1000_v8 = vsel %vm997_vm1, %v998_v55, %v999_v0  ;;  %v1038_v10 = vsel %vm997_vm1, %v999_v0, 0.0  ;;  %4482 = vpow2.f32 %v796_v11 }
  0xd6   : > { %v1047_v12 = vpack.c.bf16 %v1000_v8, %v1000_v8  ;;  %v1048_v13 = vpack.c.bf16 %v917_v56, %v951_v7  ;;  %v1049_v14 = vpack.c.bf16 %v1038_v10, %v1038_v10  ;;  %v3461_v15 = vadd.f32 -1.0, %v848_v3  ;;  %v4477_v17 = vpop.eup %4476 }
  0xd7   : > { %v896_v51 = vadd.f32 1.0, %v848_v3  ;;  %v839_v19 = vmul.f32 %v823_v4, %v823_v4  ;;  %v927_v24 = vmul.f32 %v4477_v17, %v879_v1  ;;  %v742_v25 = vmul.f32 %v4877_v21, %v706_v6 }
  0xd8   : > { %1080 = vst [vmem:[#allocation2 + $0x20] sm:$0xf] %v1047_v12  ;;  %v4479_v30 = vpop.eup %4478  ;;  %v880_v36 = vmul.f32 %v3461_v15, %v4947_v9  ;;  %v816_v54 = vmul.f32 1.442695, %v786_v37  ;;  %v752_v56 = vmul.f32 %v4877_v21, %v731_v16  ;;  %v4234_v15 = vld [vmem:[%s5678_s6 + $0x38] sm:$0xff] }
  0xd9   : > { %1081 = vst [vmem:[#allocation2 + $0x24] sm:$0xff] %v1048_v13  ;;  %4484 = vrcp.f32 %v896_v51  ;;  %v887_v27 = vadd.f32 1.0, %v839_v19  ;;  %v965_v28 = vrot.slane %v927_v24, 7  ;;  %v1014_v32 = vrot.slane %v927_v24, 1  ;;  %v4481_v43 = vpop.eup %4480  ;;  %2112 = vmatpush.bf16.msrb.mxu0 %v4234_v15 }
  0xda   : > { %1082 = vst [vmem:[#allocation2 + $0x2c] sm:$0xf] %v1049_v14  ;;  %v3452_v33 = vadd.f32 -1.0, %v839_v19  ;;  %v4994_v34 = vadd.f32 %v4882_v22, %v742_v25  ;;  %v918_v31 = vmul.f32 %v4479_v30, %v870_v26  ;;  %v833_v53 = vadd.f32 1.0, %v4481_v43  ;;  %v4297_v30 = vld [vmem:[%s5678_s6 + $0x170] sm:$0xff] }
  0xdb   : > { %4486 = vrcp.f32 %v887_v27  ;;  %v966_v59 = vsel %vm948_vm0, %v964_v44, %v965_v28  ;;  %v1015_v38 = vsel %vm997_vm1, %v1013_v23, %v1014_v32  ;;  %v1043_v39 = vsel %vm997_vm1, %v1014_v32, 0.0  ;;  %v4483_v9 = vpop.eup %4482  ;;  %1792 = vmatpush.bf16.msra.mxu2 %v4297_v30 }
  0xdc   : > { %v777_v40 = vmin.f32 %v4994_v34, 20.0  ;;  %v709_v42 = vpop.f32.mrf.mxu0  ;;  %v1067_v45 = vpack.c.bf16 %v1015_v38, %v1015_v38  ;;  %v1068_v46 = vpack.c.bf16 %v927_v24, %v966_v59  ;;  %v1069_v47 = vpack.c.bf16 %v1043_v39, %v1043_v39  ;;  %v1131_v62 = vpop.f32.mrf.mxu1  ;;  %v4251_v39 = vld [vmem:[#allocation2 + $0x1c] sm:$0xf] }
  0xdd   : > { %v952_v48 = vrot.slane %v918_v31, 7  ;;  %v871_v52 = vmul.f32 %v3452_v33, %v4959_v18  ;;  %v824_v41 = vadd.f32 1.0, %v4483_v9  ;;  %v743_v57 = vmul.f32 %v4877_v21, %v709_v42 }
  0xde   : > { %v798_v35 = vmul.f32 1.442695, %v777_v40  ;;  %1100 = vst [vmem:[#allocation2 + $0x98] sm:$0xf] %v1067_v45  ;;  %v849_v61 = vmul.f32 %v833_v53, %v833_v53  ;;  %4488 = vpow2.f32 %v816_v54  ;;  %v5011_v0 = vadd.f32 %v4882_v22, %v752_v56  ;;  %v4233_v40 = vld [vmem:[%s5678_s6 + $0x30] sm:$0xff]  ;;  %v4296_v53 = vld [vmem:[%s5678_s6 + $0x168] sm:$0xff] }
  0xdf   : > { %v4485_v55 = vpop.eup %4484  ;;  %v990_v44 = vsel %vm948_vm0, 0.0, %v952_v48  ;;  %1101 = vst [vmem:[#allocation2 + $0x9c] sm:$0xff] %v1068_v46  ;;  %v840_v63 = vmul.f32 %v824_v41, %v824_v41  ;;  %v1001_v1 = vrot.slane %v918_v31, 1  ;;  %v5019_v10 = vadd.f32 %v4882_v22, %v743_v57  ;;  %2113 = vmatpush.bf16.msrb.mxu0 %v4233_v40  ;;  %1793 = vmatpush.bf16.msra.mxu2 %v4296_v53 }
  0xe0   : > { %v1050_v58 = vpack.c.bf16 %v918_v31, %v990_v44  ;;  %v5008_v60 = vmul.f32 %v4485_v55, %v880_v36  ;;  %1102 = vst [vmem:[#allocation2 + $0xa4] sm:$0xf] %v1069_v47  ;;  %4490 = vpow2.f32 %v798_v35  ;;  %v3462_v4 = vadd.f32 -1.0, %v849_v61  ;;  %v4252_v26 = vld [vmem:[#allocation2 + $0x20] sm:$0xf0] }
  0xe1   : > { %v4487_v18 = vpop.eup %4486  ;;  %v897_v6 = vadd.f32 1.0, %v849_v61  ;;  %v888_v7 = vadd.f32 1.0, %v840_v63  ;;  %v787_v8 = vmin.f32 %v5011_v0, 20.0  ;;  %v3453_v14 = vadd.f32 -1.0, %v840_v63  ;;  %v3529_v27 = vld [vmem:[#allocation2 + $0x24] sm:$0xf0] }
  0xe2   : > { %1083 = vst [vmem:[#allocation2 + $0x30] sm:$0xff] %v1050_v58  ;;  %v967_v2 = vrot.slane %v5008_v60, 7  ;;  %v919_v3 = vmul.f32 %v4487_v18, %v871_v52  ;;  %v881_v17 = vmul.f32 %v3462_v4, %v4971_v49  ;;  %v3527_v36 = vld [vmem:[#allocation2 + $0x18] sm:$0xf]  ;;  %v778_v59 = vmin.f32 %v5019_v10, 20.0 }
  0xe3   : > { %4492 = vrcp.f32 %v897_v6  ;;  %v818_v51 = vmul.f32 1.442695, %v787_v8  ;;  %v1136_v38 = vmul.f32 %v4877_v21, %v1131_v62  ;;  %v3528_v43 = vor.u32 %v4252_v26, %v3527_v36  ;;  %v4232_v62 = vld [vmem:[%s5678_s6 + $0x28] sm:$0xff]  ;;  %v4295_v6 = vld [vmem:[%s5678_s6 + $0x160] sm:$0xff]  ;;  %v4294_v26 = vld [vmem:[%s5678_s6 + $0x158] sm:$0xff] }
  0xe4   : > { %v995_v11 = vsel %vm948_vm0, 0.0, %v967_v2  ;;  %v953_v12 = vrot.slane %v919_v3, 7  ;;  %v1002_v13 = vrot.slane %v919_v3, 1  ;;  %v711_v19 = vpop.f32.mrf.mxu0  ;;  %v4489_v20 = vpop.eup %4488  ;;  %4494 = vrcp.f32 %v888_v7  ;;  %2114 = vmatpush.bf16.msrb.mxu0 %v4232_v62  ;;  %1794 = vmatpush.bf16.msra.mxu2 %v4295_v6 }
  0xe5   : > { %v1070_v16 = vpack.c.bf16 %v5008_v60, %v995_v11  ;;  %v834_v31 = vadd.f32 1.0, %v4489_v20  ;;  %4496 = vpow2.f32 %v818_v51  ;;  %v3532_v45 = vor.u32 %v4251_v39, %v3529_v27  ;;  %v1133_v52 = vpop.f32.mrf.mxu1  ;;  %1701 = vmatmul.bf16.vlgmr.msrb.gmra.mxu2 %v3528_v43  ;;  %v4231_v51 = vld [vmem:[%s5678_s6 + $0x20] sm:$0xff] }
  0xe6   : > { %v954_v23 = vsel %vm948_vm0, %v952_v48, %v953_v12  ;;  %v1003_v24 = vsel %vm997_vm1, %v1001_v1, %v1002_v13  ;;  %v1039_v25 = vsel %vm997_vm1, %v1002_v13, 0.0  ;;  %v4491_v28 = vpop.eup %4490  ;;  %v744_v46 = vmul.f32 %v4877_v21, %v711_v19 }
  0xe7   : > { %1103 = vst [vmem:[#allocation2 + $0xa8] sm:$0xff] %v1070_v16  ;;  %v1051_v49 = vpack.c.bf16 %v1003_v24, %v1003_v24  ;;  %v1052_v32 = vpack.c.bf16 %v919_v3, %v954_v23  ;;  %v1053_v33 = vpack.c.bf16 %v1039_v25, %v1039_v25  ;;  %v825_v37 = vadd.f32 1.0, %v4491_v28  ;;  %1750 = vmatmul.bf16.vlgmr.msra.gmra.mxu1 %v3532_v45 }
  0xe8   : > { %v850_v42 = vmul.f32 %v834_v31, %v834_v31  ;;  %v800_v48 = vmul.f32 1.442695, %v778_v59  ;;  %v5042_v9 = vadd.f32 %v4882_v22, %v1136_v38  ;;  %v1016_v35 = vrot.slane %v5008_v60, 1  ;;  %2115 = vmatpush.bf16.msrb.mxu0 %v4231_v51  ;;  %1795 = vmatpush.bf16.msra.mxu2 %v4294_v26  ;;  %v4228_v51 = vld [vmem:[%s5678_s6 + $0x8] sm:$0xff] }
  0xe9   : > { %1084 = vst [vmem:[#allocation2 + $0x38] sm:$0xf] %v1051_v49  ;;  %v841_v47 = vmul.f32 %v825_v37, %v825_v37  ;;  %v4493_v54 = vpop.eup %4492  ;;  %v872_v55 = vmul.f32 %v3453_v14, %v4974_v50  ;;  %v5050_v61 = vadd.f32 %v4882_v22, %v744_v46  ;;  %v1137_v63 = vmul.f32 %v4877_v21, %v1133_v52  ;;  %v3539_v38 = vld [vmem:[#allocation2 + $0x30] sm:$0xf] }
  0xea   : > { %1085 = vst [vmem:[#allocation2 + $0x3c] sm:$0xff] %v1052_v32  ;;  %v3463_v44 = vadd.f32 -1.0, %v850_v42  ;;  %v898_v41 = vadd.f32 1.0, %v850_v42  ;;  %v4495_v56 = vpop.eup %4494  ;;  %v929_v57 = vmul.f32 %v4493_v54, %v881_v17  ;;  %4498 = vpow2.f32 %v800_v48  ;;  %v4293_v52 = vld [vmem:[%s5678_s6 + $0x150] sm:$0xff] }
  0xeb   : > { %1086 = vst [vmem:[#allocation2 + $0x44] sm:$0xf] %v1053_v33  ;;  %v889_v58 = vadd.f32 1.0, %v841_v47  ;;  %v5055_v18 = vmul.f32 %v4495_v56, %v872_v55  ;;  %v1140_v50 = vmin.f32 %v5042_v9, 20.0  ;;  %v4497_v1 = vpop.eup %4496  ;;  %v3454_v5 = vadd.f32 -1.0, %v841_v47 }
  0xec   : > { %4500 = vrcp.f32 %v898_v41  ;;  %v968_v3 = vrot.slane %v929_v57, 7  ;;  %v1017_v4 = vrot.slane %v929_v57, 1  ;;  %v882_v8 = vmul.f32 %v3463_v44, %v4991_v29  ;;  %v714_v13 = vpop.f32.mrf.mxu0  ;;  %v4254_v44 = vld [vmem:[#allocation2 + $0x34] sm:$0xf]  ;;  %1796 = vmatpush.bf16.msra.mxu2 %v4293_v52 }
  0xed   : > { %4502 = vrcp.f32 %v889_v58  ;;  %v955_v7 = vrot.slane %v5055_v18, 7  ;;  %v835_v11 = vadd.f32 1.0, %v4497_v1  ;;  %v1142_v12 = vmul.f32 1.442695, %v1140_v50  ;;  %v4229_v50 = vld [vmem:[%s5678_s6 + $0x10] sm:$0xff] }
  0xee   : > { %v969_v14 = vsel %vm948_vm0, %v967_v2, %v968_v3  ;;  %v1018_v15 = vsel %vm997_vm1, %v1016_v35, %v1017_v4  ;;  %v1044_v16 = vsel %vm997_vm1, %v1017_v4, 0.0  ;;  %v779_v17 = vmin.f32 %v5050_v61, 20.0 }
  0xef   : > { %v1071_v19 = vpack.c.bf16 %v1018_v15, %v1018_v15  ;;  %v1072_v29 = vpack.c.bf16 %v929_v57, %v969_v14  ;;  %v1073_v20 = vpack.c.bf16 %v1044_v16, %v1044_v16  ;;  %v991_v60 = vsel %vm948_vm0, 0.0, %v955_v7 }
  0xf0   : > { %v4499_v23 = vpop.eup %4498  ;;  %v1054_v2 = vpack.c.bf16 %v5055_v18, %v991_v60  ;;  %v851_v24 = vmul.f32 %v835_v11, %v835_v11  ;;  %4504 = vpow2.f32 %v1142_v12  ;;  %v802_v25 = vmul.f32 1.442695, %v779_v17  ;;  %v4292_v12 = vld [vmem:[%s5678_s6 + $0x148] sm:$0xff] }
  0xf1   : > { %1104 = vst [vmem:[#allocation2 + $0xb0] sm:$0xf] %v1071_v19  ;;  %v873_v30 = vmul.f32 %v3454_v5, %v4994_v34  ;;  %v826_v28 = vadd.f32 1.0, %v4499_v23  ;;  %v5082_v49 = vadd.f32 %v4882_v22, %v1137_v63  ;;  %v745_v32 = vmul.f32 %v4877_v21, %v714_v13  ;;  %v4255_v33 = vld [vmem:[#allocation2 + $0x38] sm:$0xf0]  ;;  %1797 = vmatpush.bf16.msra.mxu2 %v4292_v12 }
  0xf2   : > { %v4501_v27 = vpop.eup %4500  ;;  %1105 = vst [vmem:[#allocation2 + $0xb4] sm:$0xff] %v1072_v29  ;;  %v3464_v37 = vadd.f32 -1.0, %v851_v24  ;;  %v899_v59 = vadd.f32 1.0, %v851_v24  ;;  %4506 = vpow2.f32 %v802_v25  ;;  %v4230_v34 = vld [vmem:[%s5678_s6 + $0x18] sm:$0xff]  ;;  %v3541_v45 = vld [vmem:[#allocation2 + $0x3c] sm:$0xf0]  ;;  %v3540_v48 = vor.u32 %v4255_v33, %v3539_v38 }
  0xf3   : > { %v4503_v31 = vpop.eup %4502  ;;  %v5085_v36 = vmul.f32 %v4501_v27, %v882_v8  ;;  %1106 = vst [vmem:[#allocation2 + $0xbc] sm:$0xf] %v1073_v20  ;;  %v842_v40 = vmul.f32 %v826_v28, %v826_v28  ;;  %v1141_v42 = vmin.f32 %v5082_v49, 20.0  ;;  %v5092_v43 = vadd.f32 %v4882_v22, %v745_v32  ;;  %2116 = vmatpush.bf16.msrb.mxu0 %v4230_v34 }
  0xf4   : > { %v921_v39 = vmul.f32 %v4503_v31, %v873_v30  ;;  %v1004_v46 = vrot.slane %v5055_v18, 1  ;;  %1087 = vst [vmem:[#allocation2 + $0x48] sm:$0xff] %v1054_v2  ;;  %4508 = vrcp.f32 %v899_v59  ;;  %v883_v35 = vmul.f32 %v3464_v37, %v5011_v0  ;;  %v716_v4 = vpop.f32.mrf.mxu0  ;;  %v4227_v30 = vld [vmem:[%s5678_s6] sm:$0xff] }
  0xf5   : > { %v970_v47 = vrot.slane %v5085_v36, 7  ;;  %v890_v55 = vadd.f32 1.0, %v842_v40  ;;  %v1144_v57 = vmul.f32 1.442695, %v1141_v42  ;;  %v780_v58 = vmin.f32 %v5092_v43, 20.0  ;;  %1706 = vmatmul.bf16.gmra.mxu2 %v3540_v48 }
  0xf6   : > { %v956_v53 = vrot.slane %v921_v39, 7  ;;  %v1005_v54 = vrot.slane %v921_v39, 1  ;;  %v4505_v41 = vpop.eup %4504  ;;  %v3544_v62 = vor.u32 %v4254_v44, %v3541_v45  ;;  %v1019_v15 = vrot.slane %v5085_v36, 1 }
  0xf7   : > { %v996_v56 = vsel %vm948_vm0, 0.0, %v970_v47  ;;  %2117 = vmatpush.bf16.msrb.mxu0 %v4229_v50  ;;  %4510 = vrcp.f32 %v890_v55  ;;  %v1146_v18 = vadd.f32 1.0, %v4505_v41  ;;  %v3455_v16 = vadd.f32 -1.0, %v842_v40 }
  0xf8   : > { %v1074_v63 = vpack.c.bf16 %v5085_v36, %v996_v56  ;;  %v957_v0 = vsel %vm948_vm0, %v955_v7, %v956_v53  ;;  %v1006_v1 = vsel %vm997_vm1, %v1004_v46, %v1005_v54  ;;  %v1040_v3 = vsel %vm997_vm1, %v1005_v54, 0.0  ;;  %v4507_v5 = vpop.eup %4506  ;;  %1755 = vmatmul.bf16.gmra.mxu1 %v3544_v62  ;;  %v4241_v56 = vld [vmem:[%s5678_s6 + $0x70] sm:$0xff] }
  0xf9   : > { %v1055_v6 = vpack.c.bf16 %v1006_v1, %v1006_v1  ;;  %v1056_v8 = vpack.c.bf16 %v921_v39, %v957_v0  ;;  %v1057_v11 = vpack.c.bf16 %v1040_v3, %v1040_v3  ;;  %v827_v13 = vadd.f32 1.0, %v4507_v5 }
  0xfa   : > { %1107 = vst [vmem:[#allocation2 + $0xc0] sm:$0xff] %v1074_v63  ;;  %v804_v7 = vmul.f32 1.442695, %v780_v58  ;;  %v4509_v14 = vpop.eup %4508  ;;  %4512 = vpow2.f32 %v1144_v57  ;;  %v746_v17 = vmul.f32 %v4877_v21, %v716_v4  ;;  %v1148_v29 = vmul.f32 %v1146_v18, %v1146_v18  ;;  %v4291_v21 = vld [vmem:[%s5678_s6 + $0x140] sm:$0xff] }
  0xfb   : > { %1088 = vst [vmem:[#allocation2 + $0x50] sm:$0xf] %v1055_v6  ;;  %v931_v19 = vmul.f32 %v4509_v14, %v883_v35  ;;  %v843_v20 = vmul.f32 %v827_v13, %v827_v13  ;;  %2118 = vmatpush.bf16.msrb.mxu0 %v4228_v51  ;;  %v874_v25 = vmul.f32 %v3455_v16, %v5019_v10  ;;  %v3551_v46 = vld [vmem:[#allocation2 + $0x48] sm:$0xf]  ;;  %v4257_v41 = vld [vmem:[#allocation2 + $0x4c] sm:$0xf]  ;;  %v1160_v1 = vstv %s1115_s24 }
  0xfc   : > { %1089 = vst [vmem:[#allocation2 + $0x54] sm:$0xff] %v1056_v8  ;;  %4514 = vpow2.f32 %v804_v7  ;;  %v5123_v60 = vadd.f32 %v4882_v22, %v746_v17  ;;  %v1154_v24 = vadd.f32 1.0, %v1148_v29  ;;  %1798 = vmatpush.bf16.msra.mxu2 %v4291_v21  ;;  %v3469_v10 = vadd.f32 -1.0, %v1148_v29 }
  0xfd   : > { %1090 = vst [vmem:[#allocation2 + $0x5c] sm:$0xf] %v1057_v11  ;;  %v971_v23 = vrot.slane %v931_v19, 7  ;;  %v1020_v2 = vrot.slane %v931_v19, 1  ;;  %v891_v26 = vadd.f32 1.0, %v843_v20  ;;  %v4511_v22 = vpop.eup %4510  ;;  %v3456_v48 = vadd.f32 -1.0, %v843_v20 }
  0xfe   : > { %v781_v27 = vmin.f32 %v5123_v60, 20.0  ;;  %v922_v34 = vmul.f32 %v4511_v22, %v874_v25  ;;  %4516 = vrcp.f32 %v1154_v24  ;;  %v1152_v55 = vmul.f32 %v3469_v10, %v5042_v9 }
  0xff   : > { %v972_v28 = vsel %vm948_vm0, %v970_v47, %v971_v23  ;;  %v1021_v32 = vsel %vm997_vm1, %v1019_v15, %v1020_v2  ;;  %v1045_v33 = vsel %vm997_vm1, %v1020_v2, 0.0  ;;  %2119 = vmatpush.bf16.msrb.mxu0 %v4227_v30  ;;  %4518 = vrcp.f32 %v891_v26  ;;  %v4242_v47 = vld [vmem:[%s5678_s6 + $0x78] sm:$0xff] }
 0x100   : > { %v4513_v31 = vpop.eup %4512  ;;  %v1075_v37 = vpack.c.bf16 %v1021_v32, %v1021_v32  ;;  %v1076_v59 = vpack.c.bf16 %v931_v19, %v972_v28  ;;  %v1077_v38 = vpack.c.bf16 %v1045_v33, %v1045_v33  ;;  %v806_v40 = vmul.f32 1.442695, %v781_v27  ;;  %2161 = vmatpush.bf16.msrb.mxu3 %v4242_v47 }
 0x101   : > { %v1147_v36 = vadd.f32 1.0, %v4513_v31  ;;  %v958_v42 = vrot.slane %v922_v34, 7  ;;  %v875_v3 = vmul.f32 %v3456_v48, %v5050_v61  ;;  %v1007_v13 = vrot.slane %v922_v34, 1 }
 0x102   : > { %v4515_v39 = vpop.eup %4514  ;;  %1108 = vst [vmem:[#allocation2 + $0xc8] sm:$0xf] %v1075_v37  ;;  %4520 = vpow2.f32 %v806_v40  ;;  %v4240_v37 = vld [vmem:[%s5678_s6 + $0x68] sm:$0xff] }
 0x103   : > { %v828_v45 = vadd.f32 1.0, %v4515_v39  ;;  %1109 = vst [vmem:[#allocation2 + $0xcc] sm:$0xff] %v1076_v59  ;;  %v1149_v52 = vmul.f32 %v1147_v36, %v1147_v36  ;;  %v4258_v53 = vld [vmem:[#allocation2 + $0x50] sm:$0xf0]  ;;  %v3553_v54 = vld [vmem:[#allocation2 + $0x54] sm:$0xf0] }
 0x104   : > { %1110 = vst [vmem:[#allocation2 + $0xd4] sm:$0xf] %v1077_v38  ;;  %v992_v35 = vsel %vm948_vm0, 0.0, %v958_v42  ;;  %v3552_v62 = vor.u32 %v4258_v53, %v3551_v46  ;;  %v3556_v50 = vor.u32 %v4257_v41, %v3553_v54  ;;  %v4517_v0 = vpop.eup %4516  ;;  %2162 = vmatpush.bf16.msrb.mxu3 %v4241_v56  ;;  %v3535_v38 = vld [vmem:[#allocation2 + $0x20] sm:$0xf] }
 0x105   : > { %v844_v44 = vmul.f32 %v828_v45, %v828_v45  ;;  %v1058_v57 = vpack.c.bf16 %v922_v34, %v992_v35  ;;  %v1155_v58 = vadd.f32 1.0, %v1149_v52  ;;  %v3470_v4 = vadd.f32 -1.0, %v1149_v52  ;;  %v4519_v9 = vpop.eup %4518  ;;  %v4253_v34 = vld [vmem:[#allocation2 + $0x28] sm:$0xf0] }
 0x106   : > { %v1158_v5 = vmul.f32 %v4517_v0, %v1152_v55  ;;  %v923_v8 = vmul.f32 %v4519_v9, %v875_v3  ;;  %1711 = vmatmul.bf16.gmra.mxu2 %v3552_v62  ;;  %v3536_v52 = vor.u32 %v4253_v34, %v3535_v38 }
 0x107   : > { %v892_v63 = vadd.f32 1.0, %v844_v44  ;;  %1091 = vst [vmem:[#allocation2 + $0x60] sm:$0xff] %v1058_v57  ;;  %4522 = vrcp.f32 %v1155_v58  ;;  %v3457_v11 = vadd.f32 -1.0, %v844_v44  ;;  %v1153_v15 = vmul.f32 %v3470_v4, %v5082_v49 }
 0x108   : > { %v4521_v6 = vpop.eup %4520  ;;  %1760 = vmatmul.bf16.gmra.mxu1 %v3556_v50  ;;  %v1161_v12 = vmul.f32 %v1160_v1, %v1158_v5  ;;  %v959_v7 = vrot.slane %v923_v8, 7  ;;  %v1008_v14 = vrot.slane %v923_v8, 1  ;;  %2163 = vmatpush.bf16.msrb.mxu3 %v4240_v37 }
 0x109   : > { %4524 = vrcp.f32 %v892_v63  ;;  %v829_v18 = vadd.f32 1.0, %v4521_v6  ;;  %v876_v20 = vmul.f32 %v3457_v11, %v5092_v43  ;;  %v3547_v11 = vld [vmem:[#allocation2 + $0x38] sm:$0xf] }
 0x10a   : > { %v1165_v16 = vrot.slane %v1161_v12, 7  ;;  %v960_v51 = vsel %vm948_vm0, %v958_v42, %v959_v7  ;;  %v1009_v19 = vsel %vm997_vm1, %v1007_v13, %v1008_v14  ;;  %v1041_v29 = vsel %vm997_vm1, %v1008_v14, 0.0  ;;  %v4239_v42 = vld [vmem:[%s5678_s6 + $0x60] sm:$0xff] }
 0x10b   : > { %v845_v61 = vmul.f32 %v829_v18, %v829_v18  ;;  %v1059_v2 = vpack.c.bf16 %v1009_v19, %v1009_v19  ;;  %v1060_v24 = vpack.c.bf16 %v923_v8, %v960_v51  ;;  %v1061_v26 = vpack.c.bf16 %v1041_v29, %v1041_v29  ;;  %v4238_v8 = vld [vmem:[%s5678_s6 + $0x58] sm:$0xff]  ;;  %v4207_v51 = vld [vmem:[#allocation2 + $0x20] sm:$0xf0] }
 0x10c   : > { %v1170_v23 = vsel %vm948_vm0, 0.0, %v1165_v16  ;;  %v1171_v22 = vrot.slane %v1161_v12, 1  ;;  %2164 = vmatpush.bf16.msrb.mxu3 %v4239_v42  ;;  %v3731_v19 = vld [vmem:[#allocation2 + $0x18] sm:$0xf]  ;;  %v4665_v42 = vld [vmem:[%s5677_s5] ss:$0 sm:$0xff] }
 0x10d   : > { %v4523_v17 = vpop.eup %4522  ;;  %v1177_v25 = vpack.c.bf16 %v1161_v12, %v1170_v23  ;;  %1092 = vst [vmem:[#allocation2 + $0x68] sm:$0xf] %v1059_v2  ;;  %v893_v30 = vadd.f32 1.0, %v845_v61  ;;  %v3458_v33 = vadd.f32 -1.0, %v845_v61  ;;  %v4256_v12 = vld [vmem:[#allocation2 + $0x40] sm:$0xf0]  ;;  %v3732_v29 = vor.u32 %v4207_v51, %v3731_v19 }
 0x10e   : > { %v1159_v27 = vmul.f32 %v4523_v17, %v1153_v15  ;;  %1093 = vst [vmem:[#allocation2 + $0x6c] sm:$0xff] %v1060_v24  ;;  %v3563_v54 = vld [vmem:[#allocation2 + $0x60] sm:$0xf]  ;;  %v4260_v35 = vld [vmem:[#allocation2 + $0x64] sm:$0xf]  ;;  %v3548_v13 = vor.u32 %v4256_v12, %v3547_v11  ;;  %v4250_v17 = vld [vmem:[%s5678_s6 + $0xb8] sm:$0xff] }
 0x10f   : > { %v4525_v21 = vpop.eup %4524  ;;  %1181 = vst [vmem:[#allocation2] sm:$0xff] %v1177_v25  ;;  %4526 = vrcp.f32 %v893_v30  ;;  %v877_v48 = vmul.f32 %v3458_v33, %v5123_v60  ;;  %2210 = vmatpush.bf16.msrb.mxu1 %v4250_v17  ;;  %v3559_v23 = vld [vmem:[#allocation2 + $0x50] sm:$0xf]  ;;  %v4259_v2 = vld [vmem:[#allocation2 + $0x58] sm:$0xf0]  ;;  %v4248_v24 = vld [vmem:[%s5678_s6 + $0xa8] sm:$0xff] }
 0x110   : > { %v924_v49 = vmul.f32 %v4525_v21, %v876_v20  ;;  %v1162_v28 = vmul.f32 %v1160_v1, %v1159_v27  ;;  %1094 = vst [vmem:[#allocation2 + $0x74] sm:$0xf] %v1061_v26  ;;  %2165 = vmatpush.bf16.msrb.mxu3 %v4238_v8  ;;  %v4237_v20 = vld [vmem:[%s5678_s6 + $0x50] sm:$0xff]  ;;  %v4236_v26 = vld [vmem:[%s5678_s6 + $0x48] sm:$0xff]  ;;  %v4267_v27 = vld [vmem:[#allocation2 + $0x98] sm:$0xf0] }
 0x111   : > { %v4249_v21 = vld [vmem:[%s5678_s6 + $0xb0] sm:$0xff]  ;;  %v3589_v30 = vld [vmem:[#allocation2 + $0x9c] sm:$0xf0]  ;;  %v4338_v12 = vld [vmem:[%s5678_s6 + $0x1f8] sm:$0xff] }
 0x112   : > { %v961_v32 = vrot.slane %v924_v49, 7  ;;  %v1166_v43 = vrot.slane %v1162_v28, 7  ;;  %v1172_v10 = vrot.slane %v1162_v28, 1  ;;  %v1010_v58 = vrot.slane %v924_v49, 1  ;;  %v3587_v25 = vld [vmem:[#allocation2 + $0x90] sm:$0xf]  ;;  %2662 = vmatpush.bf16.msra.mxu0 %v4338_v12 }
 0x113   : > { %2211 = vmatpush.bf16.msrb.mxu1 %v4249_v21 }
 0x114   : > { %v993_v31 = vsel %vm948_vm0, 0.0, %v961_v32  ;;  %v1167_v39 = vsel %vm948_vm0, %v1165_v16, %v1166_v43  ;;  %v1173_v36 = vsel %vm997_vm1, %v1171_v22, %v1172_v10  ;;  %v1176_v40 = vsel %vm997_vm1, %v1172_v10, 0.0  ;;  %2166 = vmatpush.bf16.msrb.mxu3 %v4237_v20  ;;  %v4246_v43 = vld [vmem:[%s5678_s6 + $0x98] sm:$0xff]  ;;  %v3571_v38 = vld [vmem:[#allocation2 + $0x68] sm:$0xf] }
 0x115   : > { %v1062_v59 = vpack.c.bf16 %v924_v49, %v993_v31  ;;  %v1178_v45 = vpack.c.bf16 %v1173_v36, %v1173_v36  ;;  %v1179_v46 = vpack.c.bf16 %v1162_v28, %v1167_v39  ;;  %v1180_v47 = vpack.c.bf16 %v1176_v40, %v1176_v40  ;;  %v4527_v53 = vpop.eup %4526  ;;  %v4261_v44 = vld [vmem:[#allocation2 + $0x68] sm:$0xf0]  ;;  %v3565_v41 = vld [vmem:[#allocation2 + $0x6c] sm:$0xf0]  ;;  %v4266_v49 = vld [vmem:[#allocation2 + $0x94] sm:$0xf] }
 0x116   : > { %v925_v55 = vmul.f32 %v4527_v53, %v877_v48  ;;  %1799 = vmatmul.bf16.vlgmr.msra.gmra.mxu2 %v3536_v52  ;;  %v3564_v56 = vor.u32 %v4261_v44, %v3563_v54  ;;  %v3568_v57 = vor.u32 %v4260_v35, %v3565_v41  ;;  %v3719_v9 = vld [vmem:[#allocation2] sm:$0xf]  ;;  %v3560_v22 = vor.u32 %v4259_v2, %v3559_v23  ;;  %v4210_v10 = vld [vmem:[#allocation2 + $0x38] sm:$0xf0]  ;;  %v3743_v31 = vld [vmem:[#allocation2 + $0x30] sm:$0xf] }
 0x117   : > { %1095 = vst [vmem:[#allocation2 + $0x78] sm:$0xff] %v1062_v59  ;;  %2212 = vmatpush.bf16.msrb.mxu1 %v4248_v24  ;;  %v4247_v28 = vld [vmem:[%s5678_s6 + $0xa0] sm:$0xff]  ;;  %v3592_v33 = vor.u32 %v4266_v49, %v3589_v30  ;;  %v3744_v37 = vor.u32 %v4210_v10, %v3743_v31  ;;  %v1205_v59 = vpop.f32.mrf.mxu2  ;;  %v4262_v34 = vld [vmem:[#allocation2 + $0x70] sm:$0xf0]  ;;  %v3599_v40 = vld [vmem:[#allocation2 + $0xa8] sm:$0xf] }
 0x118   : > { %1182 = vst [vmem:[#allocation2 + $0x8] sm:$0xf] %v1178_v45  ;;  %v962_v62 = vrot.slane %v925_v55, 7  ;;  %v1011_v50 = vrot.slane %v925_v55, 1  ;;  %1716 = vmatmul.bf16.vlgmr.msra.gmra.mxu3 %v3564_v56  ;;  %1765 = vmatmul.bf16.gmra.mxu1 %v3568_v57  ;;  %v4664_v39 = vld [vmem:[%s5676_s4] ss:$0 sm:$0xff]  ;;  %v3572_v52 = vor.u32 %v4262_v34, %v3571_v38 }
 0x119   : > { %1183 = vst [vmem:[#allocation2 + $0xc] sm:$0xff] %v1179_v46  ;;  %2167 = vmatpush.bf16.msrb.mxu3 %v4236_v26  ;;  %v1210_v36 = vmul.f32 %v4664_v39, %v1205_v59  ;;  %v4270_v46 = vld [vmem:[#allocation2 + $0xb0] sm:$0xf0]  ;;  %v3601_v48 = vld [vmem:[#allocation2 + $0xb4] sm:$0xf0]  ;;  %v4235_v35 = vld [vmem:[%s5678_s6 + $0x40] sm:$0xff] }
 0x11a   : > { %1184 = vst [vmem:[#allocation2 + $0x14] sm:$0xf] %v1180_v47  ;;  %v963_v60 = vsel %vm948_vm0, %v961_v32, %v962_v62  ;;  %v1012_v63 = vsel %vm997_vm1, %v1010_v58, %v1011_v50  ;;  %v1042_v0 = vsel %vm997_vm1, %v1011_v50, 0.0  ;;  %v3588_v32 = vor.u32 %v4267_v27, %v3587_v25  ;;  %v4269_v47 = vld [vmem:[#allocation2 + $0xac] sm:$0xf]  ;;  %v4245_v54 = vld [vmem:[%s5678_s6 + $0x90] sm:$0xff] }
 0x11b   : > { %v1063_v1 = vpack.c.bf16 %v1012_v63, %v1012_v63  ;;  %v1064_v3 = vpack.c.bf16 %v925_v55, %v963_v60  ;;  %v1065_v4 = vpack.c.bf16 %v1042_v0, %v1042_v0  ;;  %2213 = vmatpush.bf16.msrb.mxu1 %v4247_v28  ;;  %v1212_v45 = vadd.f32 %v4665_v42, %v1210_v36  ;;  %v4244_v56 = vld [vmem:[%s5678_s6 + $0x88] sm:$0xff]  ;;  %v4213_v62 = vld [vmem:[#allocation2 + $0x50] sm:$0xf0]  ;;  %v3767_v30 = vld [vmem:[#allocation2 + $0x60] sm:$0xf] }
 0x11c   : > { %v3600_v55 = vor.u32 %v4270_v46, %v3599_v40  ;;  %v3604_v44 = vor.u32 %v4269_v47, %v3601_v48  ;;  %v3755_v60 = vld [vmem:[#allocation2 + $0x48] sm:$0xf]  ;;  %v4345_v2 = vld [vmem:[%s5678_s6 + $0x230] sm:$0xff]  ;;  %v4216_v25 = vld [vmem:[#allocation2 + $0x68] sm:$0xf0]  ;;  %v1234_v27 = vstv %s1189_s15 }
 0x11d   : > { %1096 = vst [vmem:[#allocation2 + $0x80] sm:$0xf] %v1063_v1  ;;  %v1214_v53 = vmin.f32 %v1212_v45, 20.0  ;;  %2168 = vmatpush.bf16.msrb.mxu3 %v4235_v35  ;;  %v3756_v0 = vor.u32 %v4213_v62, %v3755_v60  ;;  %v4328_v10 = vld [vmem:[%s5678_s6 + $0x1a8] sm:$0xff]  ;;  %v3595_v59 = vld [vmem:[#allocation2 + $0x98] sm:$0xf] }
 0x11e   : > { %1097 = vst [vmem:[#allocation2 + $0x84] sm:$0xff] %v1064_v3  ;;  %v3575_v18 = vld [vmem:[#allocation2 + $0x78] sm:$0xf]  ;;  %v4263_v14 = vld [vmem:[#allocation2 + $0x7c] sm:$0xf]  ;;  %v4336_v34 = vld [vmem:[%s5678_s6 + $0x1e8] sm:$0xff] }
 0x11f   : > { %1098 = vst [vmem:[#allocation2 + $0x8c] sm:$0xf] %v1065_v4  ;;  %2214 = vmatpush.bf16.msrb.mxu1 %v4246_v43  ;;  %v1216_v41 = vmul.f32 1.442695, %v1214_v53  ;;  %v1207_v57 = vpop.f32.mrf.mxu2  ;;  %v4337_v43 = vld [vmem:[%s5678_s6 + $0x1f0] sm:$0xff]  ;;  %v4335_v35 = vld [vmem:[%s5678_s6 + $0x1e0] sm:$0xff] }
 0x120   : > { %v4204_v5 = vld [vmem:[#allocation2 + $0x8] sm:$0xf0]  ;;  %v1211_v58 = vmul.f32 %v4664_v39, %v1207_v57  ;;  %v4268_v38 = vld [vmem:[#allocation2 + $0xa0] sm:$0xf0]  ;;  %2663 = vmatpush.bf16.msra.mxu0 %v4337_v43  ;;  %v3721_v48 = vld [vmem:[#allocation2 + $0xc] sm:$0xf0] }
 0x121   : > { %v3720_v6 = vor.u32 %v4204_v5, %v3719_v9  ;;  %4528 = vpow2.f32 %v1216_v41  ;;  %v4243_v9 = vld [vmem:[%s5678_s6 + $0x80] sm:$0xff]  ;;  %v4330_v5 = vld [vmem:[%s5678_s6 + $0x1b8] sm:$0xff]  ;;  %v3596_v47 = vor.u32 %v4268_v38, %v3595_v59  ;;  %v4205_v53 = vld [vmem:[#allocation2 + $0x10] sm:$0xf0] }
 0x122   : > { %v1213_v50 = vadd.f32 %v4665_v42, %v1211_v58  ;;  %2613 = vmatpush.bf16.msrb.mxu2 %v4330_v5  ;;  %v4203_v40 = vld [vmem:[#allocation2 + $0x4] sm:$0xf]  ;;  %v4326_v60 = vld [vmem:[%s5678_s6 + $0x198] sm:$0xff] }
 0x123   : > { %2120 = vmatmul.bf16.vlgmr.msrb.gmra.mxu0 %v3720_v6  ;;  %2215 = vmatpush.bf16.msrb.mxu1 %v4245_v54  ;;  %v4346_v6 = vld [vmem:[%s5678_s6 + $0x238] sm:$0xff]  ;;  %v4327_v42 = vld [vmem:[%s5678_s6 + $0x1a0] sm:$0xff]  ;;  %v3724_v41 = vor.u32 %v4203_v40, %v3721_v48 }
 0x124   : > { %v1215_v63 = vmin.f32 %v1213_v50, 20.0  ;;  %v3583_v8 = vld [vmem:[#allocation2 + $0x80] sm:$0xf]  ;;  %2711 = vmatpush.bf16.msra.mxu3 %v4346_v6  ;;  %2664 = vmatpush.bf16.msra.mxu0 %v4336_v34  ;;  %v4211_v40 = vld [vmem:[#allocation2 + $0x40] sm:$0xf0] }
 0x125   : > { %v4264_v7 = vld [vmem:[#allocation2 + $0x80] sm:$0xf0]  ;;  %v3577_v15 = vld [vmem:[#allocation2 + $0x84] sm:$0xf0] }
 0x126   : > { %v3576_v16 = vor.u32 %v4264_v7, %v3575_v18  ;;  %v3580_v61 = vor.u32 %v4263_v14, %v3577_v15  ;;  %1804 = vmatmul.bf16.gmra.mxu2 %v3548_v13  ;;  %v1218_v3 = vmul.f32 1.442695, %v1215_v63  ;;  %v4265_v11 = vld [vmem:[#allocation2 + $0x88] sm:$0xf0]  ;;  %v3611_v13 = vld [vmem:[#allocation2 + $0xc0] sm:$0xf] }
 0x127   : > { %2216 = vmatpush.bf16.msrb.mxu1 %v4244_v56  ;;  %v4529_v1 = vpop.eup %4528  ;;  %v4273_v7 = vld [vmem:[#allocation2 + $0xc8] sm:$0xf0]  ;;  %v4329_v14 = vld [vmem:[%s5678_s6 + $0x1b0] sm:$0xff]  ;;  %v4272_v15 = vld [vmem:[#allocation2 + $0xc4] sm:$0xf] }
 0x128   : > { %1721 = vmatmul.bf16.gmra.mxu3 %v3576_v16  ;;  %1770 = vmatmul.bf16.gmra.mxu1 %v3580_v61  ;;  %v1220_v4 = vadd.f32 1.0, %v4529_v1  ;;  %4530 = vpow2.f32 %v1218_v3  ;;  %v3613_v16 = vld [vmem:[#allocation2 + $0xcc] sm:$0xf0]  ;;  %v3584_v61 = vor.u32 %v4265_v11, %v3583_v8  ;;  %v3779_v11 = vld [vmem:[#allocation2 + $0x78] sm:$0xf] }
 0x129   : > { %v3616_v20 = vor.u32 %v4272_v15, %v3613_v16  ;;  %2614 = vmatpush.bf16.msrb.mxu2 %v4329_v14  ;;  %2712 = vmatpush.bf16.msra.mxu3 %v4345_v2  ;;  %v3607_v14 = vld [vmem:[#allocation2 + $0xb0] sm:$0xf]  ;;  %v4271_v15 = vld [vmem:[#allocation2 + $0xb8] sm:$0xf0]  ;;  %v4332_v2 = vld [vmem:[%s5678_s6 + $0x1c8] sm:$0xff] }
 0x12a   : > { %v1222_v18 = vmul.f32 %v1220_v4, %v1220_v4  ;;  %2665 = vmatpush.bf16.msra.mxu0 %v4335_v35  ;;  %v4219_v4 = vld [vmem:[#allocation2 + $0x80] sm:$0xf0]  ;;  %v4342_v35 = vld [vmem:[%s5678_s6 + $0x218] sm:$0xff] }
 0x12b   : > { %2217 = vmatpush.bf16.msrb.mxu1 %v4243_v9  ;;  %v3780_v12 = vor.u32 %v4219_v4, %v3779_v11 }
 0x12c   : > { %v1228_v17 = vadd.f32 1.0, %v1222_v18  ;;  %v3475_v51 = vadd.f32 -1.0, %v1222_v18  ;;  %v4334_v18 = vld [vmem:[%s5678_s6 + $0x1d8] sm:$0xff] }
 0x12d   : > { %2615 = vmatpush.bf16.msrb.mxu2 %v4328_v10 }
 0x12e   : > { %4532 = vrcp.f32 %v1228_v17  ;;  %v4531_v19 = vpop.eup %4530  ;;  %v1226_v23 = vmul.f32 %v3475_v51, %v1212_v45  ;;  %2666 = vmatpush.bf16.msra.mxu0 %v4334_v18  ;;  %v4324_v51 = vld [vmem:[%s5678_s6 + $0x188] sm:$0xff] }
 0x12f   : > { %v1221_v21 = vadd.f32 1.0, %v4531_v19  ;;  %v3608_v19 = vor.u32 %v4271_v15, %v3607_v14 }
 0x131   : > { %v1223_v24 = vmul.f32 %v1221_v21, %v1221_v21  ;;  %2616 = vmatpush.bf16.msrb.mxu2 %v4327_v42  ;;  %v4208_v21 = vld [vmem:[#allocation2 + $0x28] sm:$0xf0]  ;;  %v4209_v42 = vld [vmem:[#allocation2 + $0x34] sm:$0xf] }
 0x133   : > { %2125 = vmatmul.bf16.gmra.mxu0 %v3732_v29  ;;  %v3612_v29 = vor.u32 %v4273_v7, %v3611_v13  ;;  %v1229_v49 = vadd.f32 1.0, %v1223_v24  ;;  %v3476_v28 = vadd.f32 -1.0, %v1223_v24  ;;  %v4325_v13 = vld [vmem:[%s5678_s6 + $0x190] sm:$0xff] }
 0x134   : > { %v4533_v26 = vpop.eup %4532 }
 0x135   : > { %4534 = vrcp.f32 %v1229_v49  ;;  %2617 = vmatpush.bf16.msrb.mxu2 %v4326_v60 }
 0x136   : > { %1809 = vmatmul.bf16.gmra.mxu2 %v3560_v22  ;;  %v1232_v22 = vmul.f32 %v4533_v26, %v1226_v23  ;;  %v4206_v23 = vld [vmem:[#allocation2 + $0x1c] sm:$0xf]  ;;  %v4323_v26 = vld [vmem:[%s5678_s6 + $0x180] sm:$0xff] }
 0x138   : > { %1726 = vmatmul.bf16.gmra.mxu3 %v3588_v32  ;;  %1775 = vmatmul.bf16.gmra.mxu1 %v3592_v33  ;;  %v3768_v32 = vor.u32 %v4216_v25, %v3767_v30  ;;  %v1235_v33 = vmul.f32 %v1234_v27, %v1232_v22  ;;  %v3791_v30 = vld [vmem:[#allocation2 + $0x90] sm:$0xf]  ;;  %v4222_v22 = vld [vmem:[#allocation2 + $0x98] sm:$0xf0] }
 0x139   : > { %2618 = vmatpush.bf16.msrb.mxu2 %v4325_v13  ;;  %v3792_v43 = vor.u32 %v4222_v22, %v3791_v30  ;;  %v4341_v13 = vld [vmem:[%s5678_s6 + $0x210] sm:$0xff] }
 0x13a   : > { %v1239_v31 = vrot.slane %v1235_v33, 7 }
 0x13b   : > { %v4535_v45 = vpop.eup %4534 }
 0x13c   : > { %v1244_v39 = vsel %vm948_vm0, 0.0, %v1239_v31 }
 0x13d   : > { %v1251_v46 = vpack.c.bf16 %v1235_v33, %v1244_v39  ;;  %2619 = vmatpush.bf16.msrb.mxu2 %v4324_v51  ;;  %v3745_v39 = vld [vmem:[#allocation2 + $0x3c] sm:$0xf0]  ;;  %v3971_v51 = vld [vmem:[#allocation2 + $0x48] sm:$0xf] }
 0x13f   : > { %1256 = vst [vmem:[#allocation2 + $0xd8] sm:$0xff] %v1251_v46 }
 0x141   : > { %2620 = vmatpush.bf16.msrb.mxu2 %v4323_v26  ;;  %v4215_v26 = vld [vmem:[#allocation2 + $0x64] sm:$0xf] }
 0x143   : > { %2130 = vmatmul.bf16.gmra.mxu0 %v3744_v37  ;;  %v1227_v37 = vmul.f32 %v3476_v28, %v1213_v50  ;;  %v4344_v50 = vld [vmem:[%s5678_s6 + $0x228] sm:$0xff] }
 0x144   : > { %2713 = vmatpush.bf16.msra.mxu3 %v4344_v50  ;;  %v4214_v50 = vld [vmem:[#allocation2 + $0x58] sm:$0xf0] }
 0x145   : > { %v1233_v54 = vmul.f32 %v4535_v45, %v1227_v37  ;;  %v4274_v37 = vld [vmem:[#allocation2 + $0xd0] sm:$0xf0]  ;;  %v3748_v45 = vor.u32 %v4209_v42, %v3745_v39  ;;  %v3983_v42 = vld [vmem:[#allocation2 + $0x60] sm:$0xf] }
 0x146   : > { %1814 = vmatmul.bf16.gmra.mxu2 %v3572_v52  ;;  %v3727_v52 = vld [vmem:[#allocation2 + $0x8] sm:$0xf] }
 0x147   : > { %v3728_v56 = vor.u32 %v4205_v53, %v3727_v52  ;;  %v3803_v52 = vld [vmem:[#allocation2 + $0xa8] sm:$0xf]  ;;  %v4225_v53 = vld [vmem:[#allocation2 + $0xb0] sm:$0xf0] }
 0x148   : > { %1731 = vmatmul.bf16.gmra.mxu3 %v3600_v55  ;;  %1780 = vmatmul.bf16.gmra.mxu1 %v3604_v44  ;;  %v1245_v55 = vrot.slane %v1235_v33, 1  ;;  %v1236_v44 = vmul.f32 %v1234_v27, %v1233_v54  ;;  %v4343_v33 = vld [vmem:[%s5678_s6 + $0x220] sm:$0xff] }
 0x149   : > { %2714 = vmatpush.bf16.msra.mxu3 %v4343_v33 }
 0x14a   : > { %v1240_v57 = vrot.slane %v1236_v44, 7  ;;  %v1246_v58 = vrot.slane %v1236_v44, 1 }
 0x14c   : > { %v1247_v1 = vsel %vm997_vm1, %v1245_v55, %v1246_v58  ;;  %v1250_v3 = vsel %vm997_vm1, %v1246_v58, 0.0  ;;  %v3804_v55 = vor.u32 %v4225_v53, %v3803_v52  ;;  %v3757_v58 = vld [vmem:[#allocation2 + $0x54] sm:$0xf0]  ;;  %v4220_v52 = vld [vmem:[#allocation2 + $0x88] sm:$0xf0] }
 0x14d   : > { %v1252_v5 = vpack.c.bf16 %v1247_v1, %v1247_v1  ;;  %v1254_v8 = vpack.c.bf16 %v1250_v3, %v1250_v3  ;;  %2715 = vmatpush.bf16.msra.mxu3 %v4342_v35  ;;  %v4212_v1 = vld [vmem:[#allocation2 + $0x4c] sm:$0xf] }
 0x14e   : > { %v3760_v3 = vor.u32 %v4212_v1, %v3757_v58  ;;  %v4305_v1 = vld [vmem:[#allocation2 + $0x64] sm:$0xf] }
 0x14f   : > { %1257 = vst [vmem:[#allocation2 + $0xe0] sm:$0xf] %v1252_v5 }
 0x150   : > { %1259 = vst [vmem:[#allocation2 + $0xec] sm:$0xf] %v1254_v8 }
 0x151   : > { %2716 = vmatpush.bf16.msra.mxu3 %v4341_v13  ;;  %v3995_v13 = vld [vmem:[#allocation2 + $0x78] sm:$0xf] }
 0x153   : > { %2135 = vmatmul.bf16.gmra.mxu0 %v3756_v0  ;;  %v1241_v0 = vsel %vm948_vm0, %v1239_v31, %v1240_v57  ;;  %v3619_v31 = vld [vmem:[#allocation2 + $0xc8] sm:$0xf]  ;;  %v3959_v57 = vld [vmem:[#allocation2 + $0x30] sm:$0xf] }
 0x154   : > { %v1253_v6 = vpack.c.bf16 %v1236_v44, %v1241_v0  ;;  %v3620_v34 = vor.u32 %v4274_v37, %v3619_v31  ;;  %v4340_v37 = vld [vmem:[%s5678_s6 + $0x208] sm:$0xff] }
 0x155   : > { %2717 = vmatpush.bf16.msra.mxu3 %v4340_v37  ;;  %v4312_v37 = vld [vmem:[#allocation2 + $0x98] sm:$0xf0] }
 0x156   : > { %1819 = vmatmul.bf16.gmra.mxu2 %v3584_v61  ;;  %1258 = vst [vmem:[#allocation2 + $0xe4] sm:$0xff] %v1253_v6  ;;  %v4333_v61 = vld [vmem:[%s5678_s6 + $0x1d0] sm:$0xff]  ;;  %v3961_v6 = vld [vmem:[#allocation2 + $0x3c] sm:$0xf0] }
 0x157   : > { %2667 = vmatpush.bf16.msra.mxu0 %v4333_v61 }
 0x158   : > { %1736 = vmatmul.bf16.gmra.mxu3 %v3612_v29  ;;  %1785 = vmatmul.bf16.gmra.mxu1 %v3616_v20  ;;  %v3733_v29 = vld [vmem:[#allocation2 + $0x24] sm:$0xf0]  ;;  %v3739_v20 = vld [vmem:[#allocation2 + $0x20] sm:$0xf] }
 0x159   : > { %v3736_v24 = vor.u32 %v4206_v23, %v3733_v29  ;;  %v3740_v25 = vor.u32 %v4208_v21, %v3739_v20  ;;  %v3769_v29 = vld [vmem:[#allocation2 + $0x6c] sm:$0xf0]  ;;  %v3775_v20 = vld [vmem:[#allocation2 + $0x68] sm:$0xf]  ;;  %v4217_v21 = vld [vmem:[#allocation2 + $0x70] sm:$0xf0] }
 0x15a   : > { %v3772_v30 = vor.u32 %v4215_v26, %v3769_v29  ;;  %v3776_v22 = vor.u32 %v4217_v21, %v3775_v20 }
 0x15b   : > { %2668 = vmatpush.bf16.msra.mxu0 %v4332_v2 }
 0x163   : > { %2140 = vmatmul.bf16.gmra.mxu0 %v3768_v32  ;;  %v4331_v32 = vld [vmem:[%s5678_s6 + $0x1c0] sm:$0xff] }
 0x164   : > { %v1751_v36 = vpop.f32.mrf.mxu1  ;;  %2669 = vmatpush.bf16.msra.mxu0 %v4331_v32  ;;  %v3973_v32 = vld [vmem:[#allocation2 + $0x54] sm:$0xf0] }
 0x166   : > { %1824 = vmatmul.bf16.gmra.mxu2 %v3596_v47 }
 0x168   : > { %2169 = vmatmul.bf16.vlgmr.msrb.gmra.mxu3 %v3724_v41  ;;  %2218 = vmatmul.bf16.vlgmr.msrb.gmra.mxu1 %v3728_v56  ;;  %v1702_v62 = vpop.f32.mrf.mxu2  ;;  %v4300_v41 = vld [vmem:[#allocation2 + $0x38] sm:$0xf0] }
 0x169   : > { %v5255_v63 = vadd.f32 %v1751_v36, %v1702_v62  ;;  %v3751_v36 = vld [vmem:[#allocation2 + $0x38] sm:$0xf]  ;;  %v3763_v62 = vld [vmem:[#allocation2 + $0x50] sm:$0xf]  ;;  %v3960_v60 = vor.u32 %v4300_v41, %v3959_v57 }
 0x16a   : > { %v3752_v46 = vor.u32 %v4211_v40, %v3751_v36  ;;  %v3764_v4 = vor.u32 %v4214_v50, %v3763_v62  ;;  %v4306_v40 = vld [vmem:[#allocation2 + $0x68] sm:$0xf0]  ;;  %v3985_v50 = vld [vmem:[#allocation2 + $0x6c] sm:$0xf0] }
 0x16b   : > { %v3984_v53 = vor.u32 %v4306_v40, %v3983_v42  ;;  %v3805_v40 = vld [vmem:[#allocation2 + $0xb4] sm:$0xf0] }
 0x16c   : > { %v1753_v9 = vpop.f32.mrf.mxu1 }
 0x170   : > { %v1704_v7 = vpop.f32.mrf.mxu2 }
 0x171   : > { %v5266_v16 = vadd.f32 %v1753_v9, %v1704_v7 }
 0x173   : > { %2145 = vmatmul.bf16.gmra.mxu0 %v3780_v12  ;;  %v4299_v12 = vld [vmem:[#allocation2 + $0x34] sm:$0xf] }
 0x174   : > { %v3964_v7 = vor.u32 %v4299_v12, %v3961_v6  ;;  %v4221_v12 = vld [vmem:[#allocation2 + $0x94] sm:$0xf] }
 0x175   : > { %v1756_v17 = vpop.f32.mrf.mxu1 }
 0x176   : > { %1829 = vmatmul.bf16.gmra.mxu2 %v3608_v19 }
 0x178   : > { %2174 = vmatmul.bf16.gmra.mxu3 %v3736_v24  ;;  %2223 = vmatmul.bf16.gmra.mxu1 %v3740_v25  ;;  %v1707_v27 = vpop.f32.mrf.mxu2 }
 0x179   : > { %v5280_v49 = vadd.f32 %v1756_v17, %v1707_v27  ;;  %v4303_v17 = vld [vmem:[#allocation2 + $0x50] sm:$0xf0] }
 0x17a   : > { %v3972_v23 = vor.u32 %v4303_v17, %v3971_v51  ;;  %v4223_v17 = vld [vmem:[#allocation2 + $0xa0] sm:$0xf0] }
 0x17d   : > { %v1758_v28 = vpop.f32.mrf.mxu1 }
 0x180   : > { %v1709_v10 = vpop.f32.mrf.mxu2 }
 0x181   : > { %v5288_v59 = vadd.f32 %v1758_v28, %v1709_v10  ;;  %v4302_v10 = vld [vmem:[#allocation2 + $0x4c] sm:$0xf] }
 0x183   : > { %2150 = vmatmul.bf16.gmra.mxu0 %v3792_v43 }
 0x185   : > { %v1761_v38 = vpop.f32.mrf.mxu1 }
 0x186   : > { %1834 = vmatmul.bf16.gmra.mxu2 %v3620_v34 }
 0x188   : > { %2179 = vmatmul.bf16.gmra.mxu3 %v3748_v45  ;;  %2228 = vmatmul.bf16.gmra.mxu1 %v3752_v46  ;;  %v3781_v46 = vld [vmem:[#allocation2 + $0x84] sm:$0xf0] }
 0x189   : > { %v1712_v47 = vpop.f32.mrf.mxu2 }
 0x18a   : > { %v5290_v48 = vadd.f32 %v1761_v38, %v1712_v47  ;;  %v3976_v38 = vor.u32 %v4302_v10, %v3973_v32  ;;  %v3787_v47 = vld [vmem:[#allocation2 + $0x80] sm:$0xf]  ;;  %v4007_v10 = vld [vmem:[#allocation2 + $0x90] sm:$0xf] }
 0x18b   : > { %v3788_v58 = vor.u32 %v4220_v52, %v3787_v47  ;;  %v4008_v42 = vor.u32 %v4312_v37, %v4007_v10 }
 0x18d   : > { %v1763_v54 = vpop.f32.mrf.mxu1 }
 0x191   : > { %v1714_v44 = vpop.f32.mrf.mxu2 }
 0x192   : > { %v5295_v56 = vadd.f32 %v1763_v54, %v1714_v44  ;;  %v4218_v44 = vld [vmem:[#allocation2 + $0x7c] sm:$0xf] }
 0x193   : > { %2155 = vmatmul.bf16.gmra.mxu0 %v3804_v55  ;;  %v3784_v57 = vor.u32 %v4218_v44, %v3781_v46  ;;  %v4311_v44 = vld [vmem:[#allocation2 + $0x94] sm:$0xf] }
 0x195   : > { %v1766_v0 = vpop.f32.mrf.mxu1 }
 0x196   : > { %2621 = vmatmul.bf16.vlgmr.msrb.gmra.mxu2 %v3960_v60 }
 0x198   : > { %2184 = vmatmul.bf16.gmra.mxu3 %v3760_v3  ;;  %2233 = vmatmul.bf16.gmra.mxu1 %v3764_v4  ;;  %v4339_v4 = vld [vmem:[%s5678_s6 + $0x200] sm:$0xff] }
 0x199   : > { %v1800_v9 = vpop.f32.mrf.mxu2  ;;  %2718 = vmatpush.bf16.msra.mxu3 %v4339_v4  ;;  %v4315_v4 = vld [vmem:[#allocation2 + $0xb0] sm:$0xf0] }
 0x19a   : > { %v1801_v5 = vadd.f32 %v1800_v9, %v5255_v63  ;;  %v3988_v9 = vor.u32 %v4305_v1, %v3985_v50  ;;  %v4019_v1 = vld [vmem:[#allocation2 + $0xa8] sm:$0xf] }
 0x19b   : > { %v1717_v8 = vpop.f32.mrf.mxu3 }
 0x19c   : > { %v5298_v18 = vadd.f32 %v1766_v0, %v1717_v8 }
 0x19d   : > { %v1768_v14 = vpop.f32.mrf.mxu1 }
 0x1a0   : > { %v2121_v11 = vpop.f32.mrf.mxu0 }
 0x1a1   : > { %v5303_v15 = vadd.f32 %v2121_v11, %v1801_v5  ;;  %v1802_v61 = vpop.f32.mrf.mxu2  ;;  %v4309_v11 = vld [vmem:[#allocation2 + $0x80] sm:$0xf0] }
 0x1a2   : > { %v1803_v63 = vadd.f32 %v1802_v61, %v5266_v16  ;;  %v3799_v61 = vld [vmem:[#allocation2 + $0x98] sm:$0xf] }
 0x1a3   : > { %2670 = vmatmul.bf16.vlgmr.msra.gmra.mxu0 %v3964_v7  ;;  %v1719_v19 = vpop.f32.mrf.mxu3 }
 0x1a4   : > { %v5306_v24 = vadd.f32 %v1768_v14, %v1719_v19  ;;  %v3793_v14 = vld [vmem:[#allocation2 + $0x9c] sm:$0xf0] }
 0x1a5   : > { %v1771_v25 = vpop.f32.mrf.mxu1  ;;  %v3796_v21 = vor.u32 %v4221_v12, %v3793_v14 }
 0x1a6   : > { %2626 = vmatmul.bf16.gmra.mxu2 %v3972_v23  ;;  %v3800_v23 = vor.u32 %v4223_v17, %v3799_v61 }
 0x1a8   : > { %v2123_v2 = vpop.f32.mrf.mxu0  ;;  %2189 = vmatmul.bf16.gmra.mxu3 %v3772_v30  ;;  %2238 = vmatmul.bf16.gmra.mxu1 %v3776_v22  ;;  %v4308_v22 = vld [vmem:[#allocation2 + $0x7c] sm:$0xf] }
 0x1a9   : > { %v5308_v27 = vadd.f32 %v2123_v2, %v1803_v63  ;;  %v1805_v28 = vpop.f32.mrf.mxu2  ;;  %v3996_v63 = vor.u32 %v4309_v11, %v3995_v13  ;;  %v4020_v11 = vor.u32 %v4315_v4, %v4019_v1  ;;  %v4320_v1 = vld [vmem:[#allocation2 + $0xdc] sm:$0xf]  ;;  %v4045_v4 = vld [vmem:[#allocation2 + $0xe4] sm:$0xf0] }
 0x1aa   : > { %v1806_v16 = vadd.f32 %v1805_v28, %v5280_v49 }
 0x1ab   : > { %v1722_v33 = vpop.f32.mrf.mxu3 }
 0x1ac   : > { %v5311_v31 = vadd.f32 %v1771_v25, %v1722_v33  ;;  %v3997_v25 = vld [vmem:[#allocation2 + $0x84] sm:$0xf0] }
 0x1ad   : > { %v1773_v34 = vpop.f32.mrf.mxu1 }
 0x1b0   : > { %v2126_v43 = vpop.f32.mrf.mxu0 }
 0x1b1   : > { %v5316_v39 = vadd.f32 %v2126_v43, %v1806_v16  ;;  %v1807_v36 = vpop.f32.mrf.mxu2  ;;  %v4000_v16 = vor.u32 %v4308_v22, %v3997_v25  ;;  %v4031_v25 = vld [vmem:[#allocation2 + $0xc0] sm:$0xf] }
 0x1b2   : > { %v1808_v49 = vadd.f32 %v1807_v36, %v5288_v59 }
 0x1b3   : > { %2675 = vmatmul.bf16.gmra.mxu0 %v3976_v38  ;;  %v1724_v45 = vpop.f32.mrf.mxu3 }
 0x1b4   : > { %v5319_v35 = vadd.f32 %v1773_v34, %v1724_v45  ;;  %v4224_v34 = vld [vmem:[#allocation2 + $0xac] sm:$0xf] }
 0x1b5   : > { %v1776_v55 = vpop.f32.mrf.mxu1  ;;  %v3808_v52 = vor.u32 %v4224_v34, %v3805_v40  ;;  %v4033_v40 = vld [vmem:[#allocation2 + $0xcc] sm:$0xf0] }
 0x1b6   : > { %2631 = vmatmul.bf16.gmra.mxu2 %v3984_v53 }
 0x1b8   : > { %v2128_v54 = vpop.f32.mrf.mxu0  ;;  %2194 = vmatmul.bf16.gmra.mxu3 %v3784_v57  ;;  %2243 = vmatmul.bf16.gmra.mxu1 %v3788_v58  ;;  %v4009_v57 = vld [vmem:[#allocation2 + $0x9c] sm:$0xf0] }
 0x1b9   : > { %v5321_v41 = vadd.f32 %v2128_v54, %v1808_v49  ;;  %v1810_v62 = vpop.f32.mrf.mxu2  ;;  %v4226_v49 = vld [vmem:[#allocation2 + $0xb8] sm:$0xf0]  ;;  %v4012_v50 = vor.u32 %v4311_v44, %v4009_v57  ;;  %v3991_v44 = vld [vmem:[#allocation2 + $0x68] sm:$0xf] }
 0x1ba   : > { %v1811_v59 = vadd.f32 %v1810_v62, %v5290_v48 }
 0x1bb   : > { %v1727_v60 = vpop.f32.mrf.mxu3 }
 0x1bc   : > { %v5324_v3 = vadd.f32 %v1776_v55, %v1727_v60 }
 0x1bd   : > { %v1778_v5 = vpop.f32.mrf.mxu1 }
 0x1c0   : > { %v2131_v0 = vpop.f32.mrf.mxu0 }
 0x1c1   : > { %v5329_v6 = vadd.f32 %v2131_v0, %v1811_v59  ;;  %v1812_v8 = vpop.f32.mrf.mxu2 }
 0x1c2   : > { %v1813_v48 = vadd.f32 %v1812_v8, %v5295_v56 }
 0x1c3   : > { %2680 = vmatmul.bf16.gmra.mxu0 %v3988_v9  ;;  %v1729_v7 = vpop.f32.mrf.mxu3 }
 0x1c4   : > { %v5332_v19 = vadd.f32 %v1778_v5, %v1729_v7 }
 0x1c5   : > { %v1781_v29 = vpop.f32.mrf.mxu1 }
 0x1c6   : > { %2636 = vmatmul.bf16.gmra.mxu2 %v3996_v63  ;;  %v4314_v63 = vld [vmem:[#allocation2 + $0xac] sm:$0xf] }
 0x1c8   : > { %v2133_v51 = vpop.f32.mrf.mxu0  ;;  %2199 = vmatmul.bf16.gmra.mxu3 %v3796_v21  ;;  %2248 = vmatmul.bf16.gmra.mxu1 %v3800_v23 }
 0x1c9   : > { %v5334_v20 = vadd.f32 %v2133_v51, %v1813_v48  ;;  %v1815_v2 = vpop.f32.mrf.mxu2  ;;  %v3967_v48 = vld [vmem:[#allocation2 + $0x38] sm:$0xf] }
 0x1ca   : > { %v1816_v56 = vadd.f32 %v1815_v2, %v5298_v18  ;;  %v3811_v18 = vld [vmem:[#allocation2 + $0xb0] sm:$0xf]  ;;  %v4021_v51 = vld [vmem:[#allocation2 + $0xb4] sm:$0xf0] }
 0x1cb   : > { %v1732_v26 = vpop.f32.mrf.mxu3  ;;  %v3812_v53 = vor.u32 %v4226_v49, %v3811_v18  ;;  %v4024_v23 = vor.u32 %v4314_v63, %v4021_v51 }
 0x1cc   : > { %v5337_v28 = vadd.f32 %v1781_v29, %v1732_v26  ;;  %v4318_v26 = vld [vmem:[#allocation2 + $0xc8] sm:$0xf0] }
 0x1cd   : > { %v1783_v33 = vpop.f32.mrf.mxu1 }
 0x1d0   : > { %v2136_v30 = vpop.f32.mrf.mxu0 }
 0x1d1   : > { %v5339_v32 = vadd.f32 %v2136_v30, %v1816_v56  ;;  %v1817_v43 = vpop.f32.mrf.mxu2 }
 0x1d2   : > { %v1818_v38 = vadd.f32 %v1817_v43, %v5306_v24 }
 0x1d3   : > { %2685 = vmatmul.bf16.gmra.mxu0 %v4000_v16  ;;  %v1734_v36 = vpop.f32.mrf.mxu3  ;;  %v4032_v16 = vor.u32 %v4318_v26, %v4031_v25 }
 0x1d4   : > { %v5342_v46 = vadd.f32 %v1783_v33, %v1734_v36  ;;  %v3979_v33 = vld [vmem:[#allocation2 + $0x50] sm:$0xf]  ;;  %v4317_v36 = vld [vmem:[#allocation2 + $0xc4] sm:$0xf] }
 0x1d5   : > { %v1786_v55 = vpop.f32.mrf.mxu1 }
 0x1d6   : > { %2641 = vmatmul.bf16.gmra.mxu2 %v4008_v42  ;;  %v4036_v42 = vor.u32 %v4317_v36, %v4033_v40 }
 0x1d8   : > { %v2138_v45 = vpop.f32.mrf.mxu0  ;;  %2204 = vmatmul.bf16.gmra.mxu3 %v3808_v52  ;;  %2253 = vmatmul.bf16.gmra.mxu1 %v3812_v53  ;;  %v4043_v52 = vld [vmem:[#allocation2 + $0xd8] sm:$0xf]  ;;  %v4321_v53 = vld [vmem:[#allocation2 + $0xe0] sm:$0xf0] }
 0x1d9   : > { %v5344_v47 = vadd.f32 %v2138_v45, %v1818_v38  ;;  %v1820_v54 = vpop.f32.mrf.mxu2 }
 0x1da   : > { %v1821_v24 = vadd.f32 %v1820_v54, %v5311_v31  ;;  %v4301_v31 = vld [vmem:[#allocation2 + $0x40] sm:$0xf0] }
 0x1db   : > { %v1737_v58 = vpop.f32.mrf.mxu3  ;;  %v3968_v14 = vor.u32 %v4301_v31, %v3967_v48 }
 0x1dc   : > { %v5347_v59 = vadd.f32 %v1786_v55, %v1737_v58 }
 0x1dd   : > { %v1788_v5 = vpop.f32.mrf.mxu1 }
 0x1e0   : > { %v2141_v62 = vpop.f32.mrf.mxu0 }
 0x1e1   : > { %v5349_v60 = vadd.f32 %v2141_v62, %v1821_v24  ;;  %v1822_v0 = vpop.f32.mrf.mxu2  ;;  %v4044_v24 = vor.u32 %v4321_v53, %v4043_v52 }
 0x1e2   : > { %v1823_v9 = vadd.f32 %v1822_v0, %v5319_v35 }
 0x1e3   : > { %2690 = vmatmul.bf16.gmra.mxu0 %v4012_v50  ;;  %v1739_v8 = vpop.f32.mrf.mxu3 }
 0x1e4   : > { %v5352_v13 = vadd.f32 %v1788_v5, %v1739_v8  ;;  %v4048_v8 = vor.u32 %v4320_v1, %v4045_v4 }
 0x1e6   : > { %2646 = vmatmul.bf16.gmra.mxu2 %v4020_v11 }
 0x1e8   : > { %v2143_v12 = vpop.f32.mrf.mxu0  ;;  %2719 = vmatmul.bf16.vlgmr.msra.gmra.mxu3 %v3968_v14  ;;  %v4310_v14 = vld [vmem:[#allocation2 + $0x88] sm:$0xf0] }
 0x1e9   : > { %v5354_v7 = vadd.f32 %v2143_v12, %v1823_v9  ;;  %v1825_v61 = vpop.f32.mrf.mxu2  ;;  %v4003_v12 = vld [vmem:[#allocation2 + $0x80] sm:$0xf] }
 0x1ea   : > { %v1826_v17 = vadd.f32 %v1825_v61, %v5324_v3  ;;  %v4304_v3 = vld [vmem:[#allocation2 + $0x58] sm:$0xf0]  ;;  %v4004_v63 = vor.u32 %v4310_v14, %v4003_v12 }
 0x1eb   : > { %v2170_v29 = vpop.f32.mrf.mxu3  ;;  %v3980_v37 = vor.u32 %v4304_v3, %v3979_v33 }
 0x1ec   : > { %v5358_v21 = vadd.f32 %v2170_v29, %v5303_v15 }
 0x1f0   : > { %v2146_v35 = vpop.f32.mrf.mxu0 }
 0x1f1   : > { %v5360_v2 = vadd.f32 %v2146_v35, %v1826_v17  ;;  %v1827_v56 = vpop.f32.mrf.mxu2  ;;  %v4015_v35 = vld [vmem:[#allocation2 + $0x98] sm:$0xf] }
 0x1f2   : > { %v1828_v30 = vadd.f32 %v1827_v56, %v5332_v19 }
 0x1f3   : > { %2695 = vmatmul.bf16.gmra.mxu0 %v4024_v23  ;;  %v2172_v22 = vpop.f32.mrf.mxu3  ;;  %v4313_v23 = vld [vmem:[#allocation2 + $0xa0] sm:$0xf0] }
 0x1f4   : > { %v5364_v10 = vadd.f32 %v2172_v22, %v5308_v27  ;;  %v4316_v22 = vld [vmem:[#allocation2 + $0xb8] sm:$0xf0] }
 0x1f6   : > { %2651 = vmatmul.bf16.gmra.mxu2 %v4032_v16 }
 0x1f8   : > { %v2148_v43 = vpop.f32.mrf.mxu0  ;;  %2724 = vmatmul.bf16.gmra.mxu3 %v3980_v37  ;;  %v4319_v37 = vld [vmem:[#allocation2 + $0xd0] sm:$0xf0] }
 0x1f9   : > { %v5366_v15 = vadd.f32 %v2148_v43, %v1828_v30  ;;  %v1830_v38 = vpop.f32.mrf.mxu2  ;;  %v4027_v30 = vld [vmem:[#allocation2 + $0xb0] sm:$0xf]  ;;  %v4039_v43 = vld [vmem:[#allocation2 + $0xc8] sm:$0xf] }
 0x1fa   : > { %v1831_v34 = vadd.f32 %v1830_v38, %v5337_v28  ;;  %v4307_v28 = vld [vmem:[#allocation2 + $0x70] sm:$0xf0] }
 0x1fb   : > { %v2175_v18 = vpop.f32.mrf.mxu3  ;;  %v3992_v62 = vor.u32 %v4307_v28, %v3991_v44 }
 0x1fc   : > { %v5370_v49 = vadd.f32 %v2175_v18, %v5316_v39  ;;  %v2219_v18 = vpop.f32.mrf.mxu1 }
 0x200   : > { %v2151_v19 = vpop.f32.mrf.mxu0 }
 0x201   : > { %v5372_v45 = vadd.f32 %v2151_v19, %v1831_v34  ;;  %v1832_v27 = vpop.f32.mrf.mxu2 }
 0x202   : > { %v1833_v54 = vadd.f32 %v1832_v27, %v5342_v46  ;;  %v4051_v27 = vld [vmem:[#allocation2 + $0xe0] sm:$0xf] }
 0x203   : > { %2700 = vmatmul.bf16.gmra.mxu0 %v4036_v42  ;;  %v2177_v55 = vpop.f32.mrf.mxu3 }
 0x204   : > { %v5376_v58 = vadd.f32 %v2177_v55, %v5321_v41 }
 0x206   : > { %2656 = vmatmul.bf16.gmra.mxu2 %v4044_v24 }
 0x208   : > { %v2153_v57 = vpop.f32.mrf.mxu0  ;;  %2729 = vmatmul.bf16.gmra.mxu3 %v3992_v62 }
 0x209   : > { %v2154_v39 = vadd.f32 %v2153_v57, %v1833_v54  ;;  %v1835_v50 = vpop.f32.mrf.mxu2  ;;  %v2221_v54 = vpop.f32.mrf.mxu1 }
 0x20a   : > { %v1836_v0 = vadd.f32 %v1835_v50, %v5347_v59 }
 0x20b   : > { %v2180_v9 = vpop.f32.mrf.mxu3 }
 0x20c   : > { %v5380_v46 = vadd.f32 %v2180_v9, %v5329_v6 }
 0x210   : > { %v2156_v5 = vpop.f32.mrf.mxu0 }
 0x211   : > { %v2157_v11 = vadd.f32 %v2156_v5, %v1836_v0  ;;  %v1837_v48 = vpop.f32.mrf.mxu2  ;;  %v2224_v57 = vpop.f32.mrf.mxu1 }
 0x212   : > { %v1838_v41 = vadd.f32 %v1837_v48, %v5352_v13  ;;  %v4016_v13 = vor.u32 %v4313_v23, %v4015_v35  ;;  %v5422_v48 = vld [vmem:[%s5680_s8] ss:$0 sm:$0xff] }
 0x213   : > { %2705 = vmatmul.bf16.gmra.mxu0 %v4048_v8  ;;  %v2182_v31 = vpop.f32.mrf.mxu3  ;;  %v5417_v8 = vld [vmem:[%s5679_s7] ss:$0 sm:$0xff] }
 0x214   : > { %v5384_v17 = vadd.f32 %v2182_v31, %v5334_v20 }
 0x218   : > { %v2158_v61 = vpop.f32.mrf.mxu0  ;;  %2734 = vmatmul.bf16.gmra.mxu3 %v4004_v63 }
 0x219   : > { %v2159_v59 = vadd.f32 %v2158_v61, %v1838_v41  ;;  %v2622_v34 = vpop.f32.mrf.mxu2  ;;  %v2226_v1 = vpop.f32.mrf.mxu1 }
 0x21b   : > { %v2185_v51 = vpop.f32.mrf.mxu3 }
 0x21c   : > { %v5387_v6 = vadd.f32 %v2185_v51, %v5339_v32  ;;  %v4028_v32 = vor.u32 %v4316_v22, %v4027_v30 }
 0x220   : > { %v2671_v36 = vpop.f32.mrf.mxu0 }
 0x221   : > { %v2624_v19 = vpop.f32.mrf.mxu2  ;;  %v2672_v4 = vadd.f32 %v2671_v36, %v2622_v34  ;;  %v2229_v63 = vpop.f32.mrf.mxu1 }
 0x223   : > { %v2187_v29 = vpop.f32.mrf.mxu3 }
 0x224   : > { %v5390_v56 = vadd.f32 %v2187_v29, %v5344_v47 }
 0x228   : > { %2739 = vmatmul.bf16.gmra.mxu3 %v4016_v13  ;;  %v2673_v52 = vpop.f32.mrf.mxu0 }
 0x229   : > { %v2627_v24 = vpop.f32.mrf.mxu2  ;;  %v2674_v12 = vadd.f32 %v2673_v52, %v2624_v19 }
 0x22b   : > { %v2190_v25 = vpop.f32.mrf.mxu3 }
 0x22c   : > { %v5393_v26 = vadd.f32 %v2190_v25, %v5349_v60  ;;  %v4040_v60 = vor.u32 %v4319_v37, %v4039_v43 }
 0x230   : > { %v2676_v28 = vpop.f32.mrf.mxu0 }
 0x231   : > { %v2677_v25 = vadd.f32 %v2676_v28, %v2627_v24 }
 0x233   : > { %v2192_v20 = vpop.f32.mrf.mxu3 }
 0x234   : > { %v5396_v16 = vadd.f32 %v2192_v20, %v5354_v7 }
 0x238   : > { %2744 = vmatmul.bf16.gmra.mxu3 %v4028_v32  ;;  %v2678_v0 = vpop.f32.mrf.mxu0  ;;  %v2225_v32 = vadd.f32 %v2224_v57, %v5370_v49  ;;  %v2227_v49 = vadd.f32 %v2226_v1, %v5376_v58  ;;  %v5442_v58 = vld [vmem:[%s5681_s9] ss:$0 sm:$0xff] }
 0x23b   : > { %v2195_v33 = vpop.f32.mrf.mxu3 }
 0x23c   : > { %v5399_v3 = vadd.f32 %v2195_v33, %v5360_v2  ;;  %v4322_v2 = vld [vmem:[#allocation2 + $0xe8] sm:$0xf0] }
 0x23d   : > { %v4052_v55 = vor.u32 %v4322_v2, %v4051_v27 }
 0x240   : > { %v2681_v14 = vpop.f32.mrf.mxu0 }
 0x243   : > { %v2197_v47 = vpop.f32.mrf.mxu3 }
 0x244   : > { %v5402_v38 = vadd.f32 %v2197_v47, %v5366_v15 }
 0x248   : > { %2749 = vmatmul.bf16.gmra.mxu3 %v4040_v60  ;;  %v2683_v33 = vpop.f32.mrf.mxu0 }
 0x24b   : > { %v2200_v40 = vpop.f32.mrf.mxu3 }
 0x24c   : > { %v5405_v7 = vadd.f32 %v2200_v40, %v5372_v45  ;;  %v2629_v45 = vpop.f32.mrf.mxu2 }
 0x24d   : > { %v2679_v19 = vadd.f32 %v2678_v0, %v2629_v45 }
 0x250   : > { %v2686_v24 = vpop.f32.mrf.mxu0 }
 0x253   : > { %v2202_v42 = vpop.f32.mrf.mxu3 }
 0x254   : > { %v5407_v53 = vadd.f32 %v2202_v42, %v2154_v39  ;;  %v2220_v39 = vadd.f32 %v2219_v18, %v5358_v21  ;;  %v2632_v41 = vpop.f32.mrf.mxu2 }
 0x258   : > { %2754 = vmatmul.bf16.gmra.mxu3 %v4052_v55 }
 0x25b   : > { %v2205_v15 = vpop.f32.mrf.mxu3 }
 0x25c   : > { %v5409_v44 = vadd.f32 %v2205_v15, %v2157_v11  ;;  %v2634_v20 = vpop.f32.mrf.mxu2 }
 0x263   : > { %v2207_v62 = vpop.f32.mrf.mxu3 }
 0x264   : > { %v5411_v50 = vadd.f32 %v2207_v62, %v2159_v59  ;;  %v2222_v59 = vadd.f32 %v2221_v54, %v5364_v10  ;;  %v2231_v10 = vpop.f32.mrf.mxu1  ;;  %v5435_v52 = vpop.f32.mrf.mxu2 }
 0x26b   : > { %v2720_v9 = vpop.f32.mrf.mxu3 }
 0x26c   : > { %v2721_v5 = vadd.f32 %v2720_v9, %v2672_v4  ;;  %v2234_v45 = vpop.f32.mrf.mxu1 }
 0x26e   : > { %v2760_v11 = vadd.f32 %v2721_v5, %v2220_v39  ;;  %v2682_v39 = vadd.f32 %v2681_v14, %v2632_v41 }
 0x270   : > { %v2780_v31 = vmul.f32 %v5417_v8, %v2760_v11 }
 0x272   : > { %v2800_v61 = vadd.f32 %v5422_v48, %v2780_v31 }
 0x273   : > { %v2722_v21 = vpop.f32.mrf.mxu3 }
 0x274   : > { %v2816_v51 = vmin.f32 %v2800_v61, 20.0  ;;  %v2723_v29 = vadd.f32 %v2722_v21, %v2674_v12  ;;  %v2230_v21 = vadd.f32 %v2229_v63, %v5380_v46  ;;  %v2688_v46 = vpop.f32.mrf.mxu0 }
 0x276   : > { %v2832_v35 = vmul.f32 1.442695, %v2816_v51  ;;  %v2761_v23 = vadd.f32 %v2723_v29, %v2222_v59  ;;  %v5451_v51 = vld [vmem:[%s5682_s10] ss:$0 sm:$0xff]  ;;  %v5454_v29 = vpop.f32.mrf.mxu2 }
 0x278   : > { %4536 = vpow2.f32 %v2832_v35  ;;  %v2781_v13 = vmul.f32 %v5417_v8, %v2761_v23 }
 0x27a   : > { %v2801_v30 = vadd.f32 %v5422_v48, %v2781_v13 }
 0x27b   : > { %v2725_v22 = vpop.f32.mrf.mxu3 }
 0x27c   : > { %v2817_v47 = vmin.f32 %v2801_v30, 20.0  ;;  %v2726_v43 = vadd.f32 %v2725_v22, %v2677_v25 }
 0x27e   : > { %v4537_v37 = vpop.eup %4536  ;;  %v2834_v60 = vmul.f32 1.442695, %v2817_v47  ;;  %v2762_v34 = vadd.f32 %v2726_v43, %v2225_v32  ;;  %v2236_v43 = vpop.f32.mrf.mxu1 }
 0x27f   : > { %v2864_v36 = vadd.f32 1.0, %v4537_v37  ;;  %v2684_v37 = vadd.f32 %v2683_v33, %v2634_v20 }
 0x280   : > { %4538 = vpow2.f32 %v2834_v60  ;;  %v2782_v40 = vmul.f32 %v5417_v8, %v2762_v34 }
 0x281   : > { %v2880_v18 = vmul.f32 %v2864_v36, %v2864_v36 }
 0x282   : > { %v5432_v42 = vadd.f32 %v5422_v48, %v2782_v40 }
 0x283   : > { %v2928_v27 = vadd.f32 1.0, %v2880_v18  ;;  %v2727_v2 = vpop.f32.mrf.mxu3  ;;  %v4149_v28 = vadd.f32 -1.0, %v2880_v18  ;;  %v2232_v18 = vadd.f32 %v2231_v10, %v5384_v17 }
 0x284   : > { %v2818_v54 = vmin.f32 %v5432_v42, 20.0  ;;  %v2728_v55 = vadd.f32 %v2727_v2, %v2679_v19 }
 0x285   : > { %4540 = vrcp.f32 %v2928_v27  ;;  %v2912_v5 = vmul.f32 %v4149_v28, %v2800_v61 }
 0x286   : > { %v4539_v15 = vpop.eup %4538  ;;  %v2836_v57 = vmul.f32 1.442695, %v2818_v54  ;;  %v2763_v62 = vadd.f32 %v2728_v55, %v2227_v49 }
 0x287   : > { %v2865_v4 = vadd.f32 1.0, %v4539_v15 }
 0x288   : > { %4542 = vpow2.f32 %v2836_v57  ;;  %v2783_v0 = vmul.f32 %v5417_v8, %v2763_v62  ;;  %v5468_v62 = vpop.f32.mrf.mxu2 }
 0x289   : > { %v2881_v9 = vmul.f32 %v2865_v4, %v2865_v4 }
 0x28a   : > { %v5445_v1 = vadd.f32 %v5422_v48, %v2783_v0  ;;  %v2687_v0 = vadd.f32 %v2686_v24, %v5435_v52 }
 0x28b   : > { %v4541_v11 = vpop.eup %4540  ;;  %v2929_v31 = vadd.f32 1.0, %v2881_v9  ;;  %v2730_v12 = vpop.f32.mrf.mxu3  ;;  %v4150_v23 = vadd.f32 -1.0, %v2881_v9 }
 0x28c   : > { %v2960_v59 = vmul.f32 %v4541_v11, %v2912_v5  ;;  %v2819_v41 = vmin.f32 %v5445_v1, 20.0  ;;  %v2731_v14 = vadd.f32 %v2730_v12, %v2682_v39  ;;  %v2691_v9 = vpop.f32.mrf.mxu0  ;;  %v2235_v12 = vadd.f32 %v2234_v45, %v5387_v6 }
 0x28d   : > { %4544 = vrcp.f32 %v2929_v31  ;;  %v2913_v34 = vmul.f32 %v4150_v23, %v2801_v30 }
 0x28e   : > { %v4543_v61 = vpop.eup %4542  ;;  %v2980_v35 = vmul.f32 %v5442_v58, %v2960_v59  ;;  %v2838_v13 = vmul.f32 1.442695, %v2819_v41  ;;  %v2764_v25 = vadd.f32 %v2731_v14, %v2230_v21  ;;  %v2239_v14 = vpop.f32.mrf.mxu1 }
 0x28f   : > { %v2866_v22 = vadd.f32 1.0, %v4543_v61 }
 0x290   : > { %v5458_v63 = vadd.f32 %v5451_v51, %v2980_v35  ;;  %4546 = vpow2.f32 %v2838_v13  ;;  %v2784_v32 = vmul.f32 %v5417_v8, %v2764_v25 }
 0x291   : > { %v2882_v47 = vmul.f32 %v2866_v22, %v2866_v22 }
 0x292   : > { %v3016_v60 = vmin.f32 %v5458_v63, 20.0  ;;  %v5463_v36 = vadd.f32 %v5422_v48, %v2784_v32 }
 0x293   : > { %v4545_v40 = vpop.eup %4544  ;;  %v2930_v19 = vadd.f32 1.0, %v2882_v47  ;;  %v2732_v27 = vpop.f32.mrf.mxu3  ;;  %v4151_v15 = vadd.f32 -1.0, %v2882_v47 }
 0x294   : > { %v3032_v2 = vmul.f32 1.442695, %v3016_v60  ;;  %v2961_v49 = vmul.f32 %v4545_v40, %v2913_v34  ;;  %v2820_v54 = vmin.f32 %v5463_v36, 20.0  ;;  %v2733_v55 = vadd.f32 %v2732_v27, %v2684_v37  ;;  %v5488_v40 = vpop.f32.mrf.mxu2 }
 0x295   : > { %4548 = vrcp.f32 %v2930_v19  ;;  %v2914_v5 = vmul.f32 %v4151_v15, %v5432_v42  ;;  %v2689_v34 = vadd.f32 %v2688_v46, %v5454_v29 }
 0x296   : > { %v4547_v28 = vpop.eup %4546  ;;  %4550 = vpow2.f32 %v3032_v2  ;;  %v2981_v20 = vmul.f32 %v5442_v58, %v2961_v49  ;;  %v2840_v30 = vmul.f32 1.442695, %v2820_v54  ;;  %v2765_v33 = vadd.f32 %v2733_v55, %v2232_v18 }
 0x297   : > { %v2867_v57 = vadd.f32 1.0, %v4547_v28  ;;  %v2237_v49 = vadd.f32 %v2236_v43, %v5390_v56 }
 0x298   : > { %v5471_v17 = vadd.f32 %v5451_v51, %v2981_v20  ;;  %4552 = vpow2.f32 %v2840_v30  ;;  %v2785_v10 = vmul.f32 %v5417_v8, %v2765_v33  ;;  %v5496_v20 = vpop.f32.mrf.mxu0 }
 0x299   : > { %v2883_v4 = vmul.f32 %v2867_v57, %v2867_v57 }
 0x29a   : > { %v3017_v39 = vmin.f32 %v5471_v17, 20.0  ;;  %v5478_v11 = vadd.f32 %v5422_v48, %v2785_v10 }
 0x29b   : > { %v4549_v31 = vpop.eup %4548  ;;  %v2931_v21 = vadd.f32 1.0, %v2883_v4  ;;  %v2735_v59 = vpop.f32.mrf.mxu3  ;;  %v4152_v13 = vadd.f32 -1.0, %v2883_v4 }
 0x29c   : > { %v4551_v41 = vpop.eup %4550  ;;  %v3034_v61 = vmul.f32 1.442695, %v3017_v39  ;;  %v2962_v35 = vmul.f32 %v4549_v31, %v2914_v5  ;;  %v2821_v23 = vmin.f32 %v5478_v11, 20.0  ;;  %v2736_v52 = vadd.f32 %v2735_v59, %v2687_v0  ;;  %v5499_v4 = vpop.f32.mrf.mxu1 }
 0x29d   : > { %v3064_v24 = vadd.f32 1.0, %v4551_v41  ;;  %4554 = vrcp.f32 %v2931_v21  ;;  %v2915_v19 = vmul.f32 %v4152_v13, %v5445_v1  ;;  %v2240_v21 = vadd.f32 %v2239_v14, %v5393_v26 }
 0x29e   : > { %v4553_v25 = vpop.eup %4552  ;;  %4556 = vpow2.f32 %v3034_v61  ;;  %v2982_v42 = vmul.f32 %v5442_v58, %v2962_v35  ;;  %v2842_v22 = vmul.f32 1.442695, %v2821_v23  ;;  %v2766_v32 = vadd.f32 %v2736_v52, %v2235_v12 }
 0x29f   : > { %v3080_v47 = vmul.f32 %v3064_v24, %v3064_v24  ;;  %v2868_v6 = vadd.f32 1.0, %v4553_v25  ;;  %v2692_v61 = vadd.f32 %v2691_v9, %v5468_v62 }
 0x2a0   : > { %v5484_v45 = vadd.f32 %v5451_v51, %v2982_v42  ;;  %4558 = vpow2.f32 %v2842_v22  ;;  %v2786_v37 = vmul.f32 %v5417_v8, %v2766_v32 }
 0x2a1   : > { %v2884_v60 = vmul.f32 %v2868_v6, %v2868_v6  ;;  %v3128_v54 = vadd.f32 1.0, %v3080_v47  ;;  %v4165_v13 = vadd.f32 -1.0, %v3080_v47  ;;  %v5513_v6 = vpop.f32.mrf.mxu2 }
 0x2a2   : > { %v3018_v18 = vmin.f32 %v5484_v45, 20.0  ;;  %v5493_v27 = vadd.f32 %v5422_v48, %v2786_v37 }
 0x2a3   : > { %v4555_v2 = vpop.eup %4554  ;;  %v2932_v55 = vadd.f32 1.0, %v2884_v60  ;;  %v2737_v15 = vpop.f32.mrf.mxu3  ;;  %v4153_v10 = vadd.f32 -1.0, %v2884_v60 }
 0x2a4   : > { %v4557_v28 = vpop.eup %4556  ;;  %v3036_v30 = vmul.f32 1.442695, %v3018_v18  ;;  %v2963_v29 = vmul.f32 %v4555_v2, %v2915_v19  ;;  %v2822_v46 = vmin.f32 %v5493_v27, 20.0  ;;  %v2738_v33 = vadd.f32 %v2737_v15, %v2689_v34  ;;  %v2696_v18 = vpop.f32.mrf.mxu0 }
 0x2a5   : > { %v3065_v57 = vadd.f32 1.0, %v4557_v28  ;;  %4560 = vrcp.f32 %v2932_v55  ;;  %v2916_v23 = vmul.f32 %v4153_v10, %v5463_v36  ;;  %v2244_v15 = vpop.f32.mrf.mxu1 }
 0x2a6   : > { %v4559_v1 = vpop.eup %4558  ;;  %4562 = vpow2.f32 %v3036_v30  ;;  %v2983_v56 = vmul.f32 %v5442_v58, %v2963_v29  ;;  %v2844_v43 = vmul.f32 1.442695, %v2822_v46  ;;  %v2767_v0 = vadd.f32 %v2738_v33, %v2237_v49 }
 0x2a7   : > { %4564 = vrcp.f32 %v3128_v54  ;;  %v3081_v39 = vmul.f32 %v3065_v57, %v3065_v57  ;;  %v2869_v5 = vadd.f32 1.0, %v4559_v1  ;;  %v3112_v49 = vmul.f32 %v4165_v13, %v5458_v63 }
 0x2a8   : > { %v5503_v31 = vadd.f32 %v5451_v51, %v2983_v56  ;;  %4566 = vpow2.f32 %v2844_v43  ;;  %v2787_v12 = vmul.f32 %v5417_v8, %v2767_v0 }
 0x2a9   : > { %v3129_v59 = vadd.f32 1.0, %v3081_v39  ;;  %v2885_v41 = vmul.f32 %v2869_v5, %v2869_v5  ;;  %v4166_v25 = vadd.f32 -1.0, %v3081_v39 }
 0x2aa   : > { %v3019_v35 = vmin.f32 %v5503_v31, 20.0  ;;  %v5511_v52 = vadd.f32 %v5422_v48, %v2787_v12 }
 0x2ab   : > { %v4561_v24 = vpop.eup %4560  ;;  %4568 = vrcp.f32 %v3129_v59  ;;  %v2933_v42 = vadd.f32 1.0, %v2885_v41  ;;  %v2740_v22 = vpop.f32.mrf.mxu3  ;;  %v4154_v36 = vadd.f32 -1.0, %v2885_v41  ;;  %v3113_v28 = vmul.f32 %v4166_v25, %v5471_v17 }
 0x2ac   : > { %v4563_v32 = vpop.eup %4562  ;;  %v3038_v26 = vmul.f32 1.442695, %v3019_v35  ;;  %v2964_v14 = vmul.f32 %v4561_v24, %v2916_v23  ;;  %v2823_v62 = vmin.f32 %v5511_v52, 20.0  ;;  %v2741_v9 = vadd.f32 %v2740_v22, %v2692_v61  ;;  %v2649_v23 = vpop.f32.mrf.mxu2 }
 0x2ad   : > { %v4565_v37 = vpop.eup %4564  ;;  %v3066_v60 = vadd.f32 1.0, %v4563_v32  ;;  %4570 = vrcp.f32 %v2933_v42  ;;  %v2917_v63 = vmul.f32 %v4154_v36, %v5478_v11  ;;  %v2694_v17 = vadd.f32 %v5496_v20, %v5488_v40 }
 0x2ae   : > { %v4567_v34 = vpop.eup %4566  ;;  %4572 = vpow2.f32 %v3038_v26  ;;  %v2984_v47 = vmul.f32 %v5442_v58, %v2964_v14  ;;  %v2846_v19 = vmul.f32 1.442695, %v2823_v62  ;;  %v2768_v2 = vadd.f32 %v2741_v9, %v2240_v21  ;;  %v2698_v26 = vpop.f32.mrf.mxu0 }
 0x2af   : > { %v3082_v54 = vmul.f32 %v3066_v60, %v3066_v60  ;;  %v2870_v55 = vadd.f32 1.0, %v4567_v34  ;;  %v3160_v33 = vmul.f32 %v4565_v37, %v3112_v49  ;;  %v2242_v61 = vadd.f32 %v5499_v4, %v5396_v16  ;;  %v2246_v37 = vpop.f32.mrf.mxu1 }
 0x2b0   : > { %v5520_v30 = vadd.f32 %v5451_v51, %v2984_v47  ;;  %4574 = vpow2.f32 %v2846_v19  ;;  %v2788_v29 = vmul.f32 %v5417_v8, %v2768_v2  ;;  %v2245_v9 = vadd.f32 %v2244_v15, %v5399_v3 }
 0x2b1   : > { %v4569_v46 = vpop.eup %4568  ;;  %v2886_v57 = vmul.f32 %v2870_v55, %v2870_v55  ;;  %v3130_v0 = vadd.f32 1.0, %v3082_v54  ;;  %v2697_v60 = vadd.f32 %v2696_v18, %v5513_v6  ;;  %v4167_v19 = vadd.f32 -1.0, %v3082_v54 }
 0x2b2   : > { %v3161_v10 = vmul.f32 %v4569_v46, %v3113_v28  ;;  %v3020_v1 = vmin.f32 %v5520_v30, 20.0  ;;  %v5526_v56 = vadd.f32 %v5422_v48, %v2788_v29 }
 0x2b3   : > { %v4571_v43 = vpop.eup %4570  ;;  %v2934_v39 = vadd.f32 1.0, %v2886_v57  ;;  %v2742_v5 = vpop.f32.mrf.mxu3  ;;  %v4155_v13 = vadd.f32 -1.0, %v2886_v57 }
 0x2b4   : > { %v4573_v12 = vpop.eup %4572  ;;  %v4350_v21 = vpack.c.bf16 %v3161_v10, %v3160_v33  ;;  %v3040_v11 = vmul.f32 1.442695, %v3020_v1  ;;  %v2965_v59 = vmul.f32 %v4571_v43, %v2917_v63  ;;  %v2824_v41 = vmin.f32 %v5526_v56, 20.0 }
 0x2b5   : > { %v3067_v40 = vadd.f32 1.0, %v4573_v12  ;;  %4576 = vrcp.f32 %v2934_v39  ;;  %v2743_v20 = vadd.f32 %v2742_v5, %v2694_v17  ;;  %v2918_v34 = vmul.f32 %v4155_v13, %v5493_v27  ;;  %v2652_v17 = vpop.f32.mrf.mxu2 }
 0x2b6   : > { %v4575_v35 = vpop.eup %4574  ;;  %4351 = vst [vmem:[%s5535_s26] sm:$0xff] %v4350_v21   ;;  %4578 = vpow2.f32 %v3040_v11  ;;  %v2985_v24 = vmul.f32 %v5442_v58, %v2965_v59  ;;  %v2848_v25 = vmul.f32 1.442695, %v2824_v41  ;;  %v3114_v1 = vmul.f32 %v4167_v19, %v5484_v45 }
 0x2b7   : > { %4580 = vrcp.f32 %v3130_v0  ;;  %v3083_v42 = vmul.f32 %v3067_v40, %v3067_v40  ;;  %v2871_v22 = vadd.f32 1.0, %v4575_v35  ;;  %v2769_v32 = vadd.f32 %v2743_v20, %v2242_v61  ;;  %v2701_v61 = vpop.f32.mrf.mxu0 }
 0x2b8   : > { %v5543_v14 = vadd.f32 %v5451_v51, %v2985_v24  ;;  %4582 = vpow2.f32 %v2848_v25  ;;  %v2699_v35 = vadd.f32 %v2698_v26, %v2649_v23 }
 0x2b9   : > { %v3131_v16 = vadd.f32 1.0, %v3083_v42  ;;  %v2887_v4 = vmul.f32 %v2871_v22, %v2871_v22  ;;  %v2789_v62 = vmul.f32 %v5417_v8, %v2769_v32  ;;  %v4168_v2 = vadd.f32 -1.0, %v3083_v42  ;;  %v2249_v22 = vpop.f32.mrf.mxu1 }
 0x2ba   : > { %v3021_v36 = vmin.f32 %v5543_v14, 20.0 }
 0x2bb   : > { %v4577_v47 = vpop.eup %4576  ;;  %4584 = vrcp.f32 %v3131_v16  ;;  %v2935_v49 = vadd.f32 1.0, %v2887_v4  ;;  %v2745_v55 = vpop.f32.mrf.mxu3  ;;  %v5551_v33 = vadd.f32 %v5422_v48, %v2789_v62  ;;  %v4156_v6 = vadd.f32 -1.0, %v2887_v4 }
 0x2bc   : > { %v4579_v28 = vpop.eup %4578  ;;  %v3042_v29 = vmul.f32 1.442695, %v3021_v36  ;;  %v2966_v46 = vmul.f32 %v4577_v47, %v2918_v34  ;;  %v2746_v3 = vadd.f32 %v2745_v55, %v2697_v60  ;;  %v3115_v0 = vmul.f32 %v4168_v2, %v5503_v31 }
 0x2bd   : > { %v4581_v15 = vpop.eup %4580  ;;  %v3068_v57 = vadd.f32 1.0, %v4579_v28  ;;  %4586 = vrcp.f32 %v2935_v49  ;;  %v2825_v54 = vmin.f32 %v5551_v33, 20.0  ;;  %v2919_v59 = vmul.f32 %v4156_v6, %v5511_v52 }
 0x2be   : > { %v4583_v18 = vpop.eup %4582  ;;  %4588 = vpow2.f32 %v3042_v29  ;;  %v2986_v27 = vmul.f32 %v5442_v58, %v2966_v46  ;;  %v2770_v10 = vadd.f32 %v2746_v3, %v2245_v9  ;;  %v3162_v11 = vmul.f32 %v4581_v15, %v3114_v1  ;;  %v2654_v29 = vpop.f32.mrf.mxu2 }
 0x2bf   : > { %v3084_v63 = vmul.f32 %v3068_v57, %v3068_v57  ;;  %v2872_v43 = vadd.f32 1.0, %v4583_v18  ;;  %v2850_v5 = vmul.f32 1.442695, %v2825_v54  ;;  %v2247_v62 = vadd.f32 %v2246_v37, %v5402_v38 }
 0x2c0   : > { %v5558_v39 = vadd.f32 %v5451_v51, %v2986_v27  ;;  %v2790_v12 = vmul.f32 %v5417_v8, %v2770_v10  ;;  %v2250_v37 = vadd.f32 %v2249_v22, %v5405_v7  ;;  %v2702_v28 = vadd.f32 %v2701_v61, %v2652_v17  ;;  %v2703_v10 = vpop.f32.mrf.mxu0 }
 0x2c1   : > { %v4585_v21 = vpop.eup %4584  ;;  %v2888_v41 = vmul.f32 %v2872_v43, %v2872_v43  ;;  %4590 = vpow2.f32 %v2850_v5  ;;  %v3132_v24 = vadd.f32 1.0, %v3084_v63  ;;  %v4169_v57 = vadd.f32 -1.0, %v3084_v63 }
 0x2c2   : > { %v3163_v40 = vmul.f32 %v4585_v21, %v3115_v0  ;;  %v3022_v45 = vmin.f32 %v5558_v39, 20.0  ;;  %v5564_v20 = vadd.f32 %v5422_v48, %v2790_v12 }
 0x2c3   : > { %v4587_v31 = vpop.eup %4586  ;;  %v2936_v13 = vadd.f32 1.0, %v2888_v41  ;;  %v2747_v25 = vpop.f32.mrf.mxu3  ;;  %v4157_v23 = vadd.f32 -1.0, %v2888_v41  ;;  %v3116_v41 = vmul.f32 %v4169_v57, %v5520_v30 }
 0x2c4   : > { %v4589_v42 = vpop.eup %4588  ;;  %v4355_v32 = vpack.c.bf16 %v3163_v40, %v3162_v11  ;;  %v3044_v16 = vmul.f32 1.442695, %v3022_v45  ;;  %v2967_v52 = vmul.f32 %v4587_v31, %v2919_v59  ;;  %v2826_v4 = vmin.f32 %v5564_v20, 20.0  ;;  %v2251_v11 = vpop.f32.mrf.mxu1 }
 0x2c5   : > { %v3069_v9 = vadd.f32 1.0, %v4589_v42  ;;  %4592 = vrcp.f32 %v2936_v13  ;;  %v2748_v60 = vadd.f32 %v2747_v25, %v2699_v35  ;;  %v2920_v3 = vmul.f32 %v4157_v23, %v5526_v56 }
 0x2c6   : > { %4387 = vst [vmem:[%s5535_s26 + $0x8] sm:$0xff] %v4355_v32   ;;  %4594 = vpow2.f32 %v3044_v16  ;;  %v2987_v36 = vmul.f32 %v5442_v58, %v2967_v52  ;;  %v2852_v26 = vmul.f32 1.442695, %v2826_v4  ;;  %v2704_v25 = vadd.f32 %v2703_v10, %v2654_v29 }
 0x2c7   : > { %4596 = vrcp.f32 %v3132_v24  ;;  %v3085_v34 = vmul.f32 %v3069_v9, %v3069_v9  ;;  %v2771_v47 = vadd.f32 %v2748_v60, %v2247_v62  ;;  %v4591_v19 = vpop.eup %4590 }
 0x2c8   : > { %v5571_v2 = vadd.f32 %v5451_v51, %v2987_v36  ;;  %4598 = vpow2.f32 %v2852_v26  ;;  %v2873_v55 = vadd.f32 1.0, %v4591_v19  ;;  %v2657_v36 = vpop.f32.mrf.mxu2 }
 0x2c9   : > { %v3133_v49 = vadd.f32 1.0, %v3085_v34  ;;  %v2791_v38 = vmul.f32 %v5417_v8, %v2771_v47  ;;  %v4170_v1 = vadd.f32 -1.0, %v3085_v34 }
 0x2ca   : > { %v3023_v46 = vmin.f32 %v5571_v2, 20.0  ;;  %v2889_v6 = vmul.f32 %v2873_v55, %v2873_v55 }
 0x2cb   : > { %v4593_v15 = vpop.eup %4592  ;;  %4600 = vrcp.f32 %v3133_v49  ;;  %v5578_v18 = vadd.f32 %v5422_v48, %v2791_v38  ;;  %v2750_v27 = vpop.f32.mrf.mxu3  ;;  %v3117_v45 = vmul.f32 %v4170_v1, %v5543_v14  ;;  %v2252_v14 = vadd.f32 %v2251_v11, %v5407_v53 }
 0x2cc   : > { %v4595_v54 = vpop.eup %4594  ;;  %v3046_v43 = vmul.f32 1.442695, %v3023_v46  ;;  %v2968_v0 = vmul.f32 %v4593_v15, %v2920_v3  ;;  %v2751_v7 = vadd.f32 %v2750_v27, %v2702_v28  ;;  %v2937_v12 = vadd.f32 1.0, %v2889_v6  ;;  %v2254_v3 = vpop.f32.mrf.mxu1 }
 0x2cd   : > { %v4597_v17 = vpop.eup %4596  ;;  %v3070_v5 = vadd.f32 1.0, %v4595_v54  ;;  %v2827_v21 = vmin.f32 %v5578_v18, 20.0  ;;  %v4158_v61 = vadd.f32 -1.0, %v2889_v6 }
 0x2ce   : > { %v4599_v56 = vpop.eup %4598  ;;  %4602 = vpow2.f32 %v3046_v43  ;;  %v2988_v63 = vmul.f32 %v5442_v58, %v2968_v0  ;;  %v2772_v59 = vadd.f32 %v2751_v7, %v2250_v37  ;;  %v3164_v42 = vmul.f32 %v4597_v17, %v3116_v41  ;;  %v2706_v37 = vpop.f32.mrf.mxu0 }
 0x2cf   : > { %4604 = vrcp.f32 %v2937_v12  ;;  %v2874_v40 = vadd.f32 1.0, %v4599_v56  ;;  %v2854_v35 = vmul.f32 1.442695, %v2827_v21  ;;  %v3086_v22 = vmul.f32 %v3070_v5, %v3070_v5 }
 0x2d0   : > { %v5585_v31 = vadd.f32 %v5451_v51, %v2988_v63  ;;  %v2792_v24 = vmul.f32 %v5417_v8, %v2772_v59  ;;  %v2921_v4 = vmul.f32 %v4158_v61, %v5551_v33  ;;  %v2707_v10 = vadd.f32 %v2706_v37, %v2657_v36 }
 0x2d1   : > { %v4601_v13 = vpop.eup %4600  ;;  %v2890_v32 = vmul.f32 %v2874_v40, %v2874_v40  ;;  %4606 = vpow2.f32 %v2854_v35  ;;  %v3134_v49 = vadd.f32 1.0, %v3086_v22  ;;  %v4171_v6 = vadd.f32 -1.0, %v3086_v22 }
 0x2d2   : > { %v3165_v16 = vmul.f32 %v4601_v13, %v3117_v45  ;;  %v3024_v52 = vmin.f32 %v5585_v31, 20.0  ;;  %v5590_v30 = vadd.f32 %v5422_v48, %v2792_v24  ;;  %v2255_v17 = vadd.f32 %v2254_v3, %v5409_v44  ;;  %v2659_v45 = vpop.f32.mrf.mxu2 }
 0x2d3   : > { %v2938_v62 = vadd.f32 1.0, %v2890_v32  ;;  %v2752_v9 = vpop.f32.mrf.mxu3  ;;  %v4159_v38 = vadd.f32 -1.0, %v2890_v32  ;;  %v3118_v61 = vmul.f32 %v4171_v6, %v5558_v39 }
 0x2d4   : > { %v4603_v60 = vpop.eup %4602  ;;  %v4360_v23 = vpack.c.bf16 %v3165_v16, %v3164_v42  ;;  %v3048_v26 = vmul.f32 1.442695, %v3024_v52  ;;  %v2828_v34 = vmin.f32 %v5590_v30, 20.0  ;;  %v2753_v47 = vadd.f32 %v2752_v9, %v2704_v25 }
 0x2d5   : > { %v4605_v19 = vpop.eup %4604  ;;  %v3071_v55 = vadd.f32 1.0, %v4603_v60  ;;  %4608 = vrcp.f32 %v2938_v62  ;;  %v2922_v43 = vmul.f32 %v4159_v38, %v5564_v20  ;;  %v2256_v60 = vpop.f32.mrf.mxu1 }
 0x2d6   : > { %4388 = vst [vmem:[%s5535_s26 + $0x10] sm:$0xff] %v4360_v23   ;;  %4610 = vpow2.f32 %v3048_v26  ;;  %v2969_v53 = vmul.f32 %v4605_v19, %v2921_v4  ;;  %v2856_v28 = vmul.f32 1.442695, %v2828_v34  ;;  %v2773_v33 = vadd.f32 %v2753_v47, %v2252_v14  ;;  %v2708_v16 = vpop.f32.mrf.mxu0 }
 0x2d7   : > { %v3087_v29 = vmul.f32 %v3071_v55, %v3071_v55  ;;  %v4607_v46 = vpop.eup %4606  ;;  %v2709_v62 = vadd.f32 %v2708_v16, %v2659_v45 }
 0x2d8   : > { %v2989_v15 = vmul.f32 %v5442_v58, %v2969_v53  ;;  %4612 = vpow2.f32 %v2856_v28  ;;  %v2793_v57 = vmul.f32 %v5417_v8, %v2773_v33  ;;  %v2875_v54 = vadd.f32 1.0, %v4607_v46 }
 0x2d9   : > { %4614 = vrcp.f32 %v3134_v49  ;;  %v3135_v27 = vadd.f32 1.0, %v3087_v29  ;;  %v4172_v5 = vadd.f32 -1.0, %v3087_v29 }
 0x2da   : > { %v5599_v1 = vadd.f32 %v5451_v51, %v2989_v15  ;;  %v5603_v0 = vadd.f32 %v5422_v48, %v2793_v57  ;;  %v2891_v12 = vmul.f32 %v2875_v54, %v2875_v54 }
 0x2db   : > { %v4609_v7 = vpop.eup %4608  ;;  %4616 = vrcp.f32 %v3135_v27  ;;  %v2755_v21 = vpop.f32.mrf.mxu3  ;;  %v3119_v52 = vmul.f32 %v4172_v5, %v5571_v2  ;;  %v2257_v2 = vadd.f32 %v2256_v60, %v5411_v50 }
 0x2dc   : > { %v4611_v56 = vpop.eup %4610  ;;  %v3025_v11 = vmin.f32 %v5599_v1, 20.0  ;;  %v2970_v63 = vmul.f32 %v4609_v7, %v2922_v43  ;;  %v2829_v59 = vmin.f32 %v5603_v0, 20.0  ;;  %v2756_v41 = vadd.f32 %v2755_v21, %v2707_v10 }
 0x2dd   : > { %v2939_v20 = vadd.f32 1.0, %v2891_v12  ;;  %v3072_v42 = vadd.f32 1.0, %v4611_v56  ;;  %v4160_v22 = vadd.f32 -1.0, %v2891_v12 }
 0x2de   : > { %v4613_v40 = vpop.eup %4612  ;;  %v3050_v35 = vmul.f32 1.442695, %v3025_v11  ;;  %v2990_v24 = vmul.f32 %v5442_v58, %v2970_v63  ;;  %v2858_v44 = vmul.f32 1.442695, %v2829_v59  ;;  %v2774_v13 = vadd.f32 %v2756_v41, %v2255_v17 }
 0x2df   : > { %v4615_v25 = vpop.eup %4614  ;;  %4618 = vrcp.f32 %v2939_v20  ;;  %v2876_v32 = vadd.f32 1.0, %v4613_v40  ;;  %v3088_v47 = vmul.f32 %v3072_v42, %v3072_v42  ;;  %v2923_v19 = vmul.f32 %v4160_v22, %v5578_v18 }
 0x2e0   : > { %4620 = vpow2.f32 %v3050_v35  ;;  %v5612_v14 = vadd.f32 %v5451_v51, %v2990_v24  ;;  %v2794_v39 = vmul.f32 %v5417_v8, %v2774_v13  ;;  %v3166_v36 = vmul.f32 %v4615_v25, %v3118_v61 }
 0x2e1   : > { %v4617_v4 = vpop.eup %4616  ;;  %v2892_v9 = vmul.f32 %v2876_v32, %v2876_v32  ;;  %4622 = vpow2.f32 %v2858_v44  ;;  %v3136_v6 = vadd.f32 1.0, %v3088_v47  ;;  %v4173_v61 = vadd.f32 -1.0, %v3088_v47 }
 0x2e2   : > { %v3167_v23 = vmul.f32 %v4617_v4, %v3119_v52  ;;  %v3026_v26 = vmin.f32 %v5612_v14, 20.0  ;;  %v5617_v34 = vadd.f32 %v5422_v48, %v2794_v39 }
 0x2e3   : > { %v2940_v49 = vadd.f32 1.0, %v2892_v9  ;;  %v2757_v55 = vpop.f32.mrf.mxu3  ;;  %v4161_v29 = vadd.f32 -1.0, %v2892_v9  ;;  %v3120_v22 = vmul.f32 %v4173_v61, %v5585_v31 }
 0x2e4   : > { %v4365_v38 = vpack.c.bf16 %v3167_v23, %v3166_v36  ;;  %v3052_v37 = vmul.f32 1.442695, %v3026_v26  ;;  %v2830_v53 = vmin.f32 %v5617_v34, 20.0  ;;  %v2758_v28 = vadd.f32 %v2757_v55, %v2709_v62 }
 0x2e5   : > { %v4619_v33 = vpop.eup %4618  ;;  %4624 = vrcp.f32 %v2940_v49  ;;  %v2924_v17 = vmul.f32 %v4161_v29, %v5590_v30 }
 0x2e6   : > { %v4621_v46 = vpop.eup %4620  ;;  %4389 = vst [vmem:[%s5535_s26 + $0x18] sm:$0xff] %v4365_v38   ;;  %4626 = vpow2.f32 %v3052_v37  ;;  %v2971_v3 = vmul.f32 %v4619_v33, %v2923_v19  ;;  %v2860_v15 = vmul.f32 1.442695, %v2830_v53  ;;  %v2775_v57 = vadd.f32 %v2758_v28, %v2257_v2 }
 0x2e7   : > { %v4623_v50 = vpop.eup %4622  ;;  %v3073_v27 = vadd.f32 1.0, %v4621_v46 }
 0x2e8   : > { %v2991_v18 = vmul.f32 %v5442_v58, %v2971_v3  ;;  %v2877_v54 = vadd.f32 1.0, %v4623_v50  ;;  %4628 = vpow2.f32 %v2860_v15  ;;  %v2795_v10 = vmul.f32 %v5417_v8, %v2775_v57 }
 0x2e9   : > { %v3089_v43 = vmul.f32 %v3073_v27, %v3073_v27  ;;  %4630 = vrcp.f32 %v3136_v6 }
 0x2ea   : > { %v5626_v7 = vadd.f32 %v5451_v51, %v2991_v18  ;;  %v2893_v5 = vmul.f32 %v2877_v54, %v2877_v54  ;;  %v5630_v12 = vadd.f32 %v5422_v48, %v2795_v10 }
 0x2eb   : > { %v4625_v21 = vpop.eup %4624  ;;  %v3137_v56 = vadd.f32 1.0, %v3089_v43  ;;  %v4174_v40 = vadd.f32 -1.0, %v3089_v43 }
 0x2ec   : > { %v4627_v11 = vpop.eup %4626  ;;  %v3027_v63 = vmin.f32 %v5626_v7, 20.0  ;;  %v2972_v59 = vmul.f32 %v4625_v21, %v2924_v17  ;;  %v2941_v41 = vadd.f32 1.0, %v2893_v5  ;;  %v2831_v8 = vmin.f32 %v5630_v12, 20.0 }
 0x2ed   : > { %4632 = vrcp.f32 %v3137_v56  ;;  %v3074_v48 = vadd.f32 1.0, %v4627_v11  ;;  %v4162_v35 = vadd.f32 -1.0, %v2893_v5  ;;  %v3121_v32 = vmul.f32 %v4174_v40, %v5599_v1 }
 0x2ee   : > { %v4629_v20 = vpop.eup %4628  ;;  %v3054_v45 = vmul.f32 1.442695, %v3027_v63  ;;  %v2992_v30 = vmul.f32 %v5442_v58, %v2972_v59  ;;  %4634 = vrcp.f32 %v2941_v41  ;;  %v2862_v44 = vmul.f32 1.442695, %v2831_v8 }
 0x2ef   : > { %v2878_v24 = vadd.f32 1.0, %v4629_v20  ;;  %v4631_v25 = vpop.eup %4630  ;;  %v3090_v39 = vmul.f32 %v3074_v48, %v3074_v48  ;;  %v2925_v4 = vmul.f32 %v4162_v35, %v5603_v0 }
 0x2f0   : > { %4636 = vpow2.f32 %v3054_v45  ;;  %v5636_v13 = vadd.f32 %v5451_v51, %v2992_v30  ;;  %v3168_v60 = vmul.f32 %v4631_v25, %v3120_v22 }
 0x2f1   : > { %v2894_v42 = vmul.f32 %v2878_v24, %v2878_v24  ;;  %4638 = vpow2.f32 %v2862_v44  ;;  %v3138_v1 = vadd.f32 1.0, %v3090_v39  ;;  %v4175_v50 = vadd.f32 -1.0, %v3090_v39 }
 0x2f2   : > { %v3028_v16 = vmin.f32 %v5636_v13, 20.0 }
 0x2f3   : > { %v4633_v52 = vpop.eup %4632  ;;  %v2942_v62 = vadd.f32 1.0, %v2894_v42  ;;  %v4163_v31 = vadd.f32 -1.0, %v2894_v42  ;;  %v3122_v17 = vmul.f32 %v4175_v50, %v5612_v14 }
 0x2f4   : > { %v4635_v9 = vpop.eup %4634  ;;  %v3169_v36 = vmul.f32 %v4633_v52, %v3121_v32  ;;  %v3056_v23 = vmul.f32 1.442695, %v3028_v16 }
 0x2f5   : > { %v2973_v26 = vmul.f32 %v4635_v9, %v2925_v4  ;;  %4640 = vrcp.f32 %v2942_v62  ;;  %v2926_v53 = vmul.f32 %v4163_v31, %v5617_v34 }
 0x2f6   : > { %v4637_v2 = vpop.eup %4636  ;;  %v4370_v47 = vpack.c.bf16 %v3169_v36, %v3168_v60  ;;  %4642 = vpow2.f32 %v3056_v23 }
 0x2f7   : > { %v4639_v19 = vpop.eup %4638  ;;  %v3075_v49 = vadd.f32 1.0, %v4637_v2  ;;  %v2993_v55 = vmul.f32 %v5442_v58, %v2973_v26  ;;  %4644 = vrcp.f32 %v3138_v1 }
 0x2f8   : > { %4390 = vst [vmem:[%s5535_s26 + $0x20] sm:$0xff] %v4370_v47   ;;  %v2879_v38 = vadd.f32 1.0, %v4639_v19 }
 0x2f9   : > { %v3091_v0 = vmul.f32 %v3075_v49, %v3075_v49  ;;  %v3013_v37 = vadd.f32 %v5451_v51, %v2993_v55 }
 0x2fa   : > { %v2895_v28 = vmul.f32 %v2879_v38, %v2879_v38 }
 0x2fb   : > { %v4641_v33 = vpop.eup %4640  ;;  %v3139_v29 = vadd.f32 1.0, %v3091_v0  ;;  %v3029_v46 = vmin.f32 %v3013_v37, 20.0  ;;  %v4176_v27 = vadd.f32 -1.0, %v3091_v0 }
 0x2fc   : > { %v4643_v3 = vpop.eup %4642  ;;  %v2974_v15 = vmul.f32 %v4641_v33, %v2926_v53  ;;  %v2943_v57 = vadd.f32 1.0, %v2895_v28  ;;  %v4164_v10 = vadd.f32 -1.0, %v2895_v28 }
 0x2fd   : > { %4646 = vrcp.f32 %v3139_v29  ;;  %v3058_v6 = vmul.f32 1.442695, %v3029_v46  ;;  %v3076_v18 = vadd.f32 1.0, %v4643_v3  ;;  %v4645_v43 = vpop.eup %4644  ;;  %v3123_v5 = vmul.f32 %v4176_v27, %v5626_v7 }
 0x2fe   : > { %v2994_v54 = vmul.f32 %v5442_v58, %v2974_v15  ;;  %4648 = vrcp.f32 %v2943_v57  ;;  %v2927_v63 = vmul.f32 %v4164_v10, %v5630_v12  ;;  %v3170_v41 = vmul.f32 %v4645_v43, %v3122_v17 }
 0x2ff   : > { %4650 = vpow2.f32 %v3058_v6  ;;  %v3092_v21 = vmul.f32 %v3076_v18, %v3076_v18 }
 0x300   : > { %v3014_v34 = vadd.f32 %v5451_v51, %v2994_v54 }
 0x301   : > { %v3140_v30 = vadd.f32 1.0, %v3092_v21  ;;  %v4177_v25 = vadd.f32 -1.0, %v3092_v21 }
 0x302   : > { %v3030_v56 = vmin.f32 %v3014_v34, 20.0 }
 0x303   : > { %v4647_v11 = vpop.eup %4646  ;;  %v3124_v52 = vmul.f32 %v4177_v25, %v5636_v13 }
 0x304   : > { %v4649_v59 = vpop.eup %4648  ;;  %v3171_v61 = vmul.f32 %v4647_v11, %v3123_v5  ;;  %v3060_v8 = vmul.f32 1.442695, %v3030_v56 }
 0x305   : > { %v4651_v20 = vpop.eup %4650  ;;  %v2975_v40 = vmul.f32 %v4649_v59, %v2927_v63 }
 0x306   : > { %v4375_v45 = vpack.c.bf16 %v3171_v61, %v3170_v41  ;;  %v3077_v48 = vadd.f32 1.0, %v4651_v20  ;;  %4652 = vpow2.f32 %v3060_v8 }
 0x307   : > { %v2995_v14 = vmul.f32 %v5442_v58, %v2975_v40  ;;  %4654 = vrcp.f32 %v3140_v30 }
 0x308   : > { %4391 = vst [vmem:[%s5535_s26 + $0x28] sm:$0xff] %v4375_v45   ;;  %v3093_v7 = vmul.f32 %v3077_v48, %v3077_v48 }
 0x309   : > { %v3015_v35 = vadd.f32 %v5451_v51, %v2995_v14 }
 0x30a   : > { %v3141_v24 = vadd.f32 1.0, %v3093_v7  ;;  %v4178_v42 = vadd.f32 -1.0, %v3093_v7 }
 0x30b   : > { %v3031_v44 = vmin.f32 %v3015_v35, 20.0 }
 0x30c   : > { %v4653_v12 = vpop.eup %4652  ;;  %4656 = vrcp.f32 %v3141_v24  ;;  %v3125_v39 = vmul.f32 %v4178_v42, %v3013_v37 }
 0x30d   : > { %v3062_v22 = vmul.f32 1.442695, %v3031_v44  ;;  %v3078_v32 = vadd.f32 1.0, %v4653_v12  ;;  %v4655_v16 = vpop.eup %4654 }
 0x30e   : > { %v3172_v62 = vmul.f32 %v4655_v16, %v3124_v52 }
 0x30f   : > { %4658 = vpow2.f32 %v3062_v22  ;;  %v3094_v4 = vmul.f32 %v3078_v32, %v3078_v32 }
 0x311   : > { %v3142_v36 = vadd.f32 1.0, %v3094_v4  ;;  %v4179_v47 = vadd.f32 -1.0, %v3094_v4 }
 0x312   : > { %v4657_v58 = vpop.eup %4656 }
 0x313   : > { %v3173_v9 = vmul.f32 %v4657_v58, %v3125_v39  ;;  %4660 = vrcp.f32 %v3142_v36  ;;  %v3126_v1 = vmul.f32 %v4179_v47, %v3014_v34 }
 0x315   : > { %v4659_v51 = vpop.eup %4658  ;;  %v4380_v60 = vpack.c.bf16 %v3173_v9, %v3172_v62 }
 0x316   : > { %v3079_v23 = vadd.f32 1.0, %v4659_v51 }
 0x317   : > { %4392 = vst [vmem:[%s5535_s26 + $0x30] sm:$0xff] %v4380_v60  }
 0x318   : > { %v3095_v26 = vmul.f32 %v3079_v23, %v3079_v23 }
 0x319   : > { %v4661_v19 = vpop.eup %4660 }
 0x31a   : > { %v3143_v2 = vadd.f32 1.0, %v3095_v26  ;;  %v4180_v31 = vadd.f32 -1.0, %v3095_v26  ;;  %v3174_v55 = vmul.f32 %v4661_v19, %v3126_v1 }
 0x31c   : > { %4662 = vrcp.f32 %v3143_v2  ;;  %v3127_v13 = vmul.f32 %v4180_v31, %v3015_v35 }
 0x322   : > { %v4663_v49 = vpop.eup %4662 }
 0x323   : > { %v3175_v38 = vmul.f32 %v4663_v49, %v3127_v13 }
 0x325   : > { %v4385_v0 = vpack.c.bf16 %v3175_v38, %v3174_v55 }
 0x327   : > { %4393 = vst [vmem:[%s5535_s26 + $0x38] sm:$0xff] %v4385_v0  }
 0x328 PF: > { %s21_s21 = sadd.s32 1, %s4704_s21   ;;  %s5690_s17 = smov %s4696_s19 }
 0x329   : > { %p18_p12 = scmp.ge.s32.totalorder %s21_s21, 6   ;;  %s5691_s18 = smov %s4700_s20 }
 0x32a   : > { %s5692_s19 = smov %s5695_s22  ;;  %s5693_s20 = smov %s5699_s23 }
 0x32b   :  { %20 = sbr.rel (!%p18_p12) target bundleno = 4 (0x4), region = 105 }

</bundles_post_ra>
